<compile_context>
chip_gen: v7x
topology: tpu7x:2x2x1
jax: 0.10.0
libtpu: 0.0.40
codegen_flags: <defaults>
</compile_context>

<pallas_src>
import functools

import numpy as np
import jax
import jax.numpy as jnp
from jax.experimental import pallas as pl
from jax.experimental.pallas import tpu as pltpu


# ----------------------------------------------------------------------------
# Fused decoder-block kernel (single invocation, everything VMEM-resident)
# ----------------------------------------------------------------------------
def _decoder_kernel(x_ref, w1_ref, b1_ref, g1_ref, be1_ref,
                    w2_ref, b2_ref, g2_ref, be2_ref,
                    wt_ref, bt_ref, m1_ref, m2_ref,
                    out_ref, xs_ref, y1s_ref,
                    *, W, R, PAD, n1, n2, eps):
    f32 = jnp.float32
    bf16 = jnp.bfloat16

    def conv3x3(src_ref, w_ref, b_ref):
        # 9-tap shifted-window matmuls over the tail-padded scratch: no im2col.
        cout = w_ref.shape[2]
        acc = jnp.zeros((R, cout), f32)
        for t in range(9):
            di, dj = t // 3, t % 3
            slab = src_ref[pl.ds(di * W + dj, R), :].astype(bf16)   # (R, cin) bf16
            acc = acc + jnp.dot(slab, w_ref[t], preferred_element_type=f32)
        return acc + b_ref[...]

    def bn_relu(y, m, g_ref, be_ref, count):
        # Training-mode batch statistics over the `count` valid rows (mask m),
        # two-pass (mean-subtract-first) variance for numerical robustness.
        mean = jnp.sum(y * m, axis=0, keepdims=True) * (1.0 / count)
        d = (y - mean) * m
        var = jnp.sum(d * d, axis=0, keepdims=True) * (1.0 / count)
        scale = g_ref[...] * jax.lax.rsqrt(var + eps)
        return jnp.maximum((y - mean) * scale + be_ref[...], 0.0)

    # Stage input into a tail-padded VMEM scratch so tap windows are plain slices.
    cin = x_ref.shape[1]
    xs_ref[pl.ds(0, R), :] = x_ref[...]
    xs_ref[pl.ds(R, PAD), :] = jnp.zeros((PAD, cin), f32)

    # conv1 -> BN1 -> ReLU (computed on the full HxW grid; stats masked to valid rows)
    y1 = bn_relu(conv3x3(xs_ref, w1_ref, b1_ref), m1_ref[...], g1_ref, be1_ref, n1)

    # Stage y1 (still on the full grid) for conv2's tap windows.
    cmid = y1.shape[1]
    y1s_ref[pl.ds(0, R), :] = y1
    y1s_ref[pl.ds(R, PAD), :] = jnp.zeros((PAD, cmid), f32)

    # conv2 -> BN2 -> ReLU
    y2 = bn_relu(conv3x3(y1s_ref, w2_ref, b2_ref), m2_ref[...], g2_ref, be2_ref, n2)

    # ConvTranspose2d(kernel=2, stride=2): one matmul producing the 4 sub-pixel taps
    # per position; the (non-overlapping) pixel shuffle is a reshape in the wrapper.
    out_ref[...] = (jnp.dot(y2.astype(bf16), wt_ref[...],
                            preferred_element_type=f32) + bt_ref[...])


def decoder_block_forward(params, x_nchw, eps=1e-5):
    N, Cin, H, W = x_nchw.shape
    Cmid = params["w1"].shape[0]
    Cout = params["wt"].shape[1]
    H1, W1 = H - 2, W - 2          # conv1 valid output spatial
    H2, W2 = H - 4, W - 4          # conv2 valid output spatial
    R = N * H * W
    PAD = -(-(2 * W + 2) // 8) * 8  # max tap shift, rounded up to a sublane multiple

    # NCHW -> NHWC -> flat (rows = (n, h, w), last axis = channels)
    x2d = jnp.transpose(x_nchw, (0, 2, 3, 1)).reshape(R, Cin).astype(jnp.float32)

    # Per-tap weight matrices (t = di*3 + dj), bf16 for the MXU.
    w1 = jnp.transpose(params["w1"], (2, 3, 1, 0)).reshape(9, Cin, Cmid).astype(jnp.bfloat16)
    w2 = jnp.transpose(params["w2"], (2, 3, 1, 0)).reshape(9, Cmid, Cmid).astype(jnp.bfloat16)
    wt = jnp.transpose(params["wt"], (0, 2, 3, 1)).reshape(Cmid, 4 * Cout).astype(jnp.bfloat16)

    b1 = params["b1"].reshape(1, Cmid).astype(jnp.float32)
    g1 = params["g1"].reshape(1, Cmid).astype(jnp.float32)
    be1 = params["be1"].reshape(1, Cmid).astype(jnp.float32)
    b2 = params["b2"].reshape(1, Cmid).astype(jnp.float32)
    g2 = params["g2"].reshape(1, Cmid).astype(jnp.float32)
    be2 = params["be2"].reshape(1, Cmid).astype(jnp.float32)
    bt = jnp.tile(params["bt"], 4).reshape(1, 4 * Cout).astype(jnp.float32)

    # Compile-time validity masks: the kernel evaluates conv outputs on the full
    # HxW grid; these pick the rows that are real "valid" conv outputs for BN stats.
    hh, ww = np.meshgrid(np.arange(H), np.arange(W), indexing="ij")
    m1 = np.tile(((hh < H1) & (ww < W1)).astype(np.float32).reshape(1, H * W), (N, 1))
    m2 = np.tile(((hh < H2) & (ww < W2)).astype(np.float32).reshape(1, H * W), (N, 1))
    m1 = jnp.asarray(m1.reshape(R, 1))
    m2 = jnp.asarray(m2.reshape(R, 1))

    kernel = functools.partial(
        _decoder_kernel, W=W, R=R, PAD=PAD,
        n1=float(N * H1 * W1), n2=float(N * H2 * W2), eps=eps)

    out2d = pl.pallas_call(
        kernel,
        out_shape=jax.ShapeDtypeStruct((R, 4 * Cout), jnp.float32),
        scratch_shapes=[
            pltpu.VMEM((R + PAD, Cin), jnp.float32),    # tail-padded x
            pltpu.VMEM((R + PAD, Cmid), jnp.float32),   # tail-padded y1
        ],
        compiler_params=pltpu.CompilerParams(vmem_limit_bytes=32 * 1024 * 1024),
    )(x2d, w1, b1, g1, be1, w2, b2, g2, be2, wt, bt, m1, m2)

    # Pixel shuffle of the stride-2 2x2 transposed conv, crop to the valid region,
    # and convert back to NCHW (tiny pure-layout XLA ops).
    out = out2d.reshape(N, H, W, 2, 2, Cout)[:, :H2, :W2]
    out = jnp.transpose(out, (0, 5, 1, 3, 2, 4)).reshape(N, Cout, 2 * H2, 2 * W2)
    return out


# ----------------------------------------------------------------------------
# Pure-JAX f32 reference (same math, no Pallas) for a sanity check
# ----------------------------------------------------------------------------
def _ref_forward(params, x_nchw, eps=1e-5):
    x = jnp.transpose(x_nchw, (0, 2, 3, 1)).astype(jnp.float32)

    def conv(x, w, b):
        N, H, W, Cin = x.shape
        Ho, Wo = H - 2, W - 2
        p = jnp.stack(
            [x[:, di:di + Ho, dj:dj + Wo, :] for di in range(3) for dj in range(3)],
            axis=3,
        ).reshape(N, Ho, Wo, 9 * Cin)
        wm = jnp.transpose(w, (2, 3, 1, 0)).reshape(9 * Cin, -1)
        return p @ wm + b

    def bn_relu(y, g, be):
        mean = jnp.mean(y, axis=(0, 1, 2))
        var = jnp.mean((y - mean) ** 2, axis=(0, 1, 2))
        return jnp.maximum((y - mean) / jnp.sqrt(var + eps) * g + be, 0.0)

    y = bn_relu(conv(x, params["w1"], params["b1"]), params["g1"], params["be1"])
    y = bn_relu(conv(y, params["w2"], params["b2"]), params["g2"], params["be2"])
    N, H, W, Cin = y.shape
    Cout = params["wt"].shape[1]
    wm = jnp.transpose(params["wt"], (0, 2, 3, 1)).reshape(Cin, 4 * Cout)
    o = y.reshape(N * H * W, Cin) @ wm + jnp.tile(params["bt"], 4)
    o = o.reshape(N, H, W, 2, 2, Cout)
    o = jnp.transpose(o, (0, 1, 3, 2, 4, 5)).reshape(N, 2 * H, 2 * W, Cout)
    return jnp.transpose(o, (0, 3, 1, 2))


# ----------------------------------------------------------------------------
# Deterministic parameter init (shapes per _DecoderBlock.__init__)
# ----------------------------------------------------------------------------
def init_params(key, in_channels, middle_channels, out_channels):
    ks = jax.random.split(key, 6)
    scale1 = 1.0 / (in_channels * 9) ** 0.5
    scale2 = 1.0 / (middle_channels * 9) ** 0.5
    scale3 = 1.0 / (middle_channels * 4) ** 0.5
    return {
        "w1": jax.random.uniform(ks[0], (middle_channels, in_channels, 3, 3),
                                 jnp.float32, -scale1, scale1),
        "b1": jax.random.uniform(ks[1], (middle_channels,), jnp.float32, -scale1, scale1),
        "g1": jnp.ones((middle_channels,), jnp.float32),
        "be1": jnp.zeros((middle_channels,), jnp.float32),
        "w2": jax.random.uniform(ks[2], (middle_channels, middle_channels, 3, 3),
                                 jnp.float32, -scale2, scale2),
        "b2": jax.random.uniform(ks[3], (middle_channels,), jnp.float32, -scale2, scale2),
        "g2": jnp.ones((middle_channels,), jnp.float32),
        "be2": jnp.zeros((middle_channels,), jnp.float32),
        # ConvTranspose2d weight layout: (in_channels, out_channels, kH, kW)
        "wt": jax.random.uniform(ks[4], (middle_channels, out_channels, 2, 2),
                                 jnp.float32, -scale3, scale3),
        "bt": jax.random.uniform(ks[5], (out_channels,), jnp.float32, -scale3, scale3),
    }


if __name__ == "__main__":
    in_channels, middle_channels, out_channels = 4, 8, 4
    key = jax.random.PRNGKey(0)
    kp, kx = jax.random.split(key)
    params = init_params(kp, in_channels, middle_channels, out_channels)

    x = jax.random.normal(kx, (2, in_channels, 16, 16), jnp.float32)  # NCHW

    fwd = jax.jit(functools.partial(decoder_block_forward, params))
    out = jax.block_until_ready(fwd(x))

    # expected output shape: (N, out_channels, 2*(16-4), 2*(16-4)) = (2, 4, 24, 24)
    assert out.shape == (2, out_channels, 24, 24), out.shape
    ref = _ref_forward(params, x)
    assert jnp.all(jnp.isfinite(out))
    # bf16 MXU inputs (f32 accumulation) vs. the f32 reference
    assert jnp.allclose(out, ref, rtol=2e-2, atol=2e-2), float(jnp.max(jnp.abs(out - ref)))

    print("KERNEL_OK")
</pallas_src>

<mosaic_0001>
module attributes {stable_mosaic.version = 11 : i64} {
  func.func @_decoder_kernel(%arg0: memref<512x4xf32, #tpu.memory_space<vmem>>, %arg1: memref<9x4x8xbf16, #tpu.memory_space<vmem>>, %arg2: memref<1x8xf32, #tpu.memory_space<vmem>>, %arg3: memref<1x8xf32, #tpu.memory_space<vmem>>, %arg4: memref<1x8xf32, #tpu.memory_space<vmem>>, %arg5: memref<9x8x8xbf16, #tpu.memory_space<vmem>>, %arg6: memref<1x8xf32, #tpu.memory_space<vmem>>, %arg7: memref<1x8xf32, #tpu.memory_space<vmem>>, %arg8: memref<1x8xf32, #tpu.memory_space<vmem>>, %arg9: memref<8x16xbf16, #tpu.memory_space<vmem>>, %arg10: memref<1x16xf32, #tpu.memory_space<vmem>>, %arg11: memref<512x1xf32, #tpu.memory_space<vmem>>, %arg12: memref<512x1xf32, #tpu.memory_space<vmem>>, %arg13: memref<512x16xf32, #tpu.memory_space<vmem>>, %arg14: memref<552x4xf32, #tpu.memory_space<vmem>>, %arg15: memref<552x8xf32, #tpu.memory_space<vmem>>) attributes {dimension_semantics = [], scalar_prefetch = 0 : i64, scratch_operands = 2 : i64, tpu.core_type = #tpu.core_type<tc>} {
    %c0 = arith.constant 0 : index
    %c0_0 = arith.constant 0 : index
    %0 = vector.load %arg0[%c0, %c0_0] : memref<512x4xf32, #tpu.memory_space<vmem>>, vector<512x4xf32>
    %c0_1 = arith.constant 0 : index
    %c0_2 = arith.constant 0 : index
    %1 = vector.load %arg14[%c0_1, %c0_2] : memref<552x4xf32, #tpu.memory_space<vmem>>, vector<512x4xf32>
    tpu.vector_store %arg14[%c0_1, %c0_2], %0 {strides = array<i32>} : memref<552x4xf32, #tpu.memory_space<vmem>>, vector<512x4xf32>,
    %cst = arith.constant 0.000000e+00 : f32
    %2 = vector.broadcast %cst : f32 to vector<40x4xf32>
    %c512 = arith.constant 512 : index
    %c0_3 = arith.constant 0 : index
    %3 = vector.load %arg14[%c512, %c0_3] : memref<552x4xf32, #tpu.memory_space<vmem>>, vector<40x4xf32>
    tpu.vector_store %arg14[%c512, %c0_3], %2 {strides = array<i32>} : memref<552x4xf32, #tpu.memory_space<vmem>>, vector<40x4xf32>,
    %cst_4 = arith.constant 0.000000e+00 : f32
    %4 = vector.broadcast %cst_4 : f32 to vector<512x8xf32>
    %c0_5 = arith.constant 0 : index
    %c0_6 = arith.constant 0 : index
    %5 = vector.load %arg14[%c0_5, %c0_6] : memref<552x4xf32, #tpu.memory_space<vmem>>, vector<512x4xf32>
    %6 = arith.truncf %5 : vector<512x4xf32> to vector<512x4xbf16>
    %c0_7 = arith.constant 0 : index
    %c0_8 = arith.constant 0 : index
    %c0_9 = arith.constant 0 : index
    %7 = vector.load %arg1[%c0_7, %c0_8, %c0_9] : memref<9x4x8xbf16, #tpu.memory_space<vmem>>, vector<1x4x8xbf16>
    %8 = vector.shape_cast %7 : vector<1x4x8xbf16> to vector<4x8xbf16>
    %cst_10 = arith.constant dense<0.000000e+00> : vector<512x8xf32>
    %9 = tpu.matmul %6, %8, %cst_10 {dimension_numbers = #tpu.dot_dimension_numbers<[1], [0], [0], [1], [0, 0, 1, 1], [], []>} : vector<512x4xbf16>, vector<4x8xbf16>, vector<512x8xf32> -> vector<512x8xf32>
    %10 = arith.addf %4, %9 : vector<512x8xf32>
    %c1 = arith.constant 1 : index
    %c0_11 = arith.constant 0 : index
    %11 = vector.load %arg14[%c1, %c0_11] : memref<552x4xf32, #tpu.memory_space<vmem>>, vector<512x4xf32>
    %12 = arith.truncf %11 : vector<512x4xf32> to vector<512x4xbf16>
    %c1_12 = arith.constant 1 : index
    %c0_13 = arith.constant 0 : index
    %c0_14 = arith.constant 0 : index
    %13 = vector.load %arg1[%c1_12, %c0_13, %c0_14] : memref<9x4x8xbf16, #tpu.memory_space<vmem>>, vector<1x4x8xbf16>
    %14 = vector.shape_cast %13 : vector<1x4x8xbf16> to vector<4x8xbf16>
    %cst_15 = arith.constant dense<0.000000e+00> : vector<512x8xf32>
    %15 = tpu.matmul %12, %14, %cst_15 {dimension_numbers = #tpu.dot_dimension_numbers<[1], [0], [0], [1], [0, 0, 1, 1], [], []>} : vector<512x4xbf16>, vector<4x8xbf16>, vector<512x8xf32> -> vector<512x8xf32>
    %16 = arith.addf %10, %15 : vector<512x8xf32>
    %c2 = arith.constant 2 : index
    %c0_16 = arith.constant 0 : index
    %17 = vector.load %arg14[%c2, %c0_16] : memref<552x4xf32, #tpu.memory_space<vmem>>, vector<512x4xf32>
    %18 = arith.truncf %17 : vector<512x4xf32> to vector<512x4xbf16>
    %c2_17 = arith.constant 2 : index
    %c0_18 = arith.constant 0 : index
    %c0_19 = arith.constant 0 : index
    %19 = vector.load %arg1[%c2_17, %c0_18, %c0_19] : memref<9x4x8xbf16, #tpu.memory_space<vmem>>, vector<1x4x8xbf16>
    %20 = vector.shape_cast %19 : vector<1x4x8xbf16> to vector<4x8xbf16>
    %cst_20 = arith.constant dense<0.000000e+00> : vector<512x8xf32>
    %21 = tpu.matmul %18, %20, %cst_20 {dimension_numbers = #tpu.dot_dimension_numbers<[1], [0], [0], [1], [0, 0, 1, 1], [], []>} : vector<512x4xbf16>, vector<4x8xbf16>, vector<512x8xf32> -> vector<512x8xf32>
    %22 = arith.addf %16, %21 : vector<512x8xf32>
    %c16 = arith.constant 16 : index
    %c0_21 = arith.constant 0 : index
    %23 = vector.load %arg14[%c16, %c0_21] : memref<552x4xf32, #tpu.memory_space<vmem>>, vector<512x4xf32>
    %24 = arith.truncf %23 : vector<512x4xf32> to vector<512x4xbf16>
    %c3 = arith.constant 3 : index
    %c0_22 = arith.constant 0 : index
    %c0_23 = arith.constant 0 : index
    %25 = vector.load %arg1[%c3, %c0_22, %c0_23] : memref<9x4x8xbf16, #tpu.memory_space<vmem>>, vector<1x4x8xbf16>
    %26 = vector.shape_cast %25 : vector<1x4x8xbf16> to vector<4x8xbf16>
    %cst_24 = arith.constant dense<0.000000e+00> : vector<512x8xf32>
    %27 = tpu.matmul %24, %26, %cst_24 {dimension_numbers = #tpu.dot_dimension_numbers<[1], [0], [0], [1], [0, 0, 1, 1], [], []>} : vector<512x4xbf16>, vector<4x8xbf16>, vector<512x8xf32> -> vector<512x8xf32>
    %28 = arith.addf %22, %27 : vector<512x8xf32>
    %c17 = arith.constant 17 : index
    %c0_25 = arith.constant 0 : index
    %29 = vector.load %arg14[%c17, %c0_25] : memref<552x4xf32, #tpu.memory_space<vmem>>, vector<512x4xf32>
    %30 = arith.truncf %29 : vector<512x4xf32> to vector<512x4xbf16>
    %c4 = arith.constant 4 : index
    %c0_26 = arith.constant 0 : index
    %c0_27 = arith.constant 0 : index
    %31 = vector.load %arg1[%c4, %c0_26, %c0_27] : memref<9x4x8xbf16, #tpu.memory_space<vmem>>, vector<1x4x8xbf16>
    %32 = vector.shape_cast %31 : vector<1x4x8xbf16> to vector<4x8xbf16>
    %cst_28 = arith.constant dense<0.000000e+00> : vector<512x8xf32>
    %33 = tpu.matmul %30, %32, %cst_28 {dimension_numbers = #tpu.dot_dimension_numbers<[1], [0], [0], [1], [0, 0, 1, 1], [], []>} : vector<512x4xbf16>, vector<4x8xbf16>, vector<512x8xf32> -> vector<512x8xf32>
    %34 = arith.addf %28, %33 : vector<512x8xf32>
    %c18 = arith.constant 18 : index
    %c0_29 = arith.constant 0 : index
    %35 = vector.load %arg14[%c18, %c0_29] : memref<552x4xf32, #tpu.memory_space<vmem>>, vector<512x4xf32>
    %36 = arith.truncf %35 : vector<512x4xf32> to vector<512x4xbf16>
    %c5 = arith.constant 5 : index
    %c0_30 = arith.constant 0 : index
    %c0_31 = arith.constant 0 : index
    %37 = vector.load %arg1[%c5, %c0_30, %c0_31] : memref<9x4x8xbf16, #tpu.memory_space<vmem>>, vector<1x4x8xbf16>
    %38 = vector.shape_cast %37 : vector<1x4x8xbf16> to vector<4x8xbf16>
    %cst_32 = arith.constant dense<0.000000e+00> : vector<512x8xf32>
    %39 = tpu.matmul %36, %38, %cst_32 {dimension_numbers = #tpu.dot_dimension_numbers<[1], [0], [0], [1], [0, 0, 1, 1], [], []>} : vector<512x4xbf16>, vector<4x8xbf16>, vector<512x8xf32> -> vector<512x8xf32>
    %40 = arith.addf %34, %39 : vector<512x8xf32>
    %c32 = arith.constant 32 : index
    %c0_33 = arith.constant 0 : index
    %41 = vector.load %arg14[%c32, %c0_33] : memref<552x4xf32, #tpu.memory_space<vmem>>, vector<512x4xf32>
    %42 = arith.truncf %41 : vector<512x4xf32> to vector<512x4xbf16>
    %c6 = arith.constant 6 : index
    %c0_34 = arith.constant 0 : index
    %c0_35 = arith.constant 0 : index
    %43 = vector.load %arg1[%c6, %c0_34, %c0_35] : memref<9x4x8xbf16, #tpu.memory_space<vmem>>, vector<1x4x8xbf16>
    %44 = vector.shape_cast %43 : vector<1x4x8xbf16> to vector<4x8xbf16>
    %cst_36 = arith.constant dense<0.000000e+00> : vector<512x8xf32>
    %45 = tpu.matmul %42, %44, %cst_36 {dimension_numbers = #tpu.dot_dimension_numbers<[1], [0], [0], [1], [0, 0, 1, 1], [], []>} : vector<512x4xbf16>, vector<4x8xbf16>, vector<512x8xf32> -> vector<512x8xf32>
    %46 = arith.addf %40, %45 : vector<512x8xf32>
    %c33 = arith.constant 33 : index
    %c0_37 = arith.constant 0 : index
    %47 = vector.load %arg14[%c33, %c0_37] : memref<552x4xf32, #tpu.memory_space<vmem>>, vector<512x4xf32>
    %48 = arith.truncf %47 : vector<512x4xf32> to vector<512x4xbf16>
    %c7 = arith.constant 7 : index
    %c0_38 = arith.constant 0 : index
    %c0_39 = arith.constant 0 : index
    %49 = vector.load %arg1[%c7, %c0_38, %c0_39] : memref<9x4x8xbf16, #tpu.memory_space<vmem>>, vector<1x4x8xbf16>
    %50 = vector.shape_cast %49 : vector<1x4x8xbf16> to vector<4x8xbf16>
    %cst_40 = arith.constant dense<0.000000e+00> : vector<512x8xf32>
    %51 = tpu.matmul %48, %50, %cst_40 {dimension_numbers = #tpu.dot_dimension_numbers<[1], [0], [0], [1], [0, 0, 1, 1], [], []>} : vector<512x4xbf16>, vector<4x8xbf16>, vector<512x8xf32> -> vector<512x8xf32>
    %52 = arith.addf %46, %51 : vector<512x8xf32>
    %c34 = arith.constant 34 : index
    %c0_41 = arith.constant 0 : index
    %53 = vector.load %arg14[%c34, %c0_41] : memref<552x4xf32, #tpu.memory_space<vmem>>, vector<512x4xf32>
    %54 = arith.truncf %53 : vector<512x4xf32> to vector<512x4xbf16>
    %c8 = arith.constant 8 : index
    %c0_42 = arith.constant 0 : index
    %c0_43 = arith.constant 0 : index
    %55 = vector.load %arg1[%c8, %c0_42, %c0_43] : memref<9x4x8xbf16, #tpu.memory_space<vmem>>, vector<1x4x8xbf16>
    %56 = vector.shape_cast %55 : vector<1x4x8xbf16> to vector<4x8xbf16>
    %cst_44 = arith.constant dense<0.000000e+00> : vector<512x8xf32>
    %57 = tpu.matmul %54, %56, %cst_44 {dimension_numbers = #tpu.dot_dimension_numbers<[1], [0], [0], [1], [0, 0, 1, 1], [], []>} : vector<512x4xbf16>, vector<4x8xbf16>, vector<512x8xf32> -> vector<512x8xf32>
    %58 = arith.addf %52, %57 : vector<512x8xf32>
    %c0_45 = arith.constant 0 : index
    %c0_46 = arith.constant 0 : index
    %59 = vector.load %arg2[%c0_45, %c0_46] : memref<1x8xf32, #tpu.memory_space<vmem>>, vector<1x8xf32>
    %60 = vector.broadcast %59 : vector<1x8xf32> to vector<512x8xf32>
    %61 = arith.addf %58, %60 : vector<512x8xf32>
    %c0_47 = arith.constant 0 : index
    %c0_48 = arith.constant 0 : index
    %62 = vector.load %arg11[%c0_47, %c0_48] : memref<512x1xf32, #tpu.memory_space<vmem>>, vector<512x1xf32>
    %63 = vector.broadcast %62 : vector<512x1xf32> to vector<512x8xf32>
    %64 = arith.mulf %61, %63 : vector<512x8xf32>
    %cst_49 = arith.constant dense<0.000000e+00> : vector<8xf32>
    %65 = vector.multi_reduction <add>, %64, %cst_49 [0] : vector<512x8xf32> to vector<8xf32>
    %66 = vector.shape_cast %65 : vector<8xf32> to vector<1x8xf32>
    %cst_50 = arith.constant 0.00255102036 : f32
    %67 = vector.broadcast %cst_50 : f32 to vector<1x8xf32>
    %68 = arith.mulf %66, %67 : vector<1x8xf32>
    %69 = vector.broadcast %68 : vector<1x8xf32> to vector<512x8xf32>
    %70 = arith.subf %61, %69 : vector<512x8xf32>
    %71 = vector.broadcast %62 : vector<512x1xf32> to vector<512x8xf32>
    %72 = arith.mulf %70, %71 : vector<512x8xf32>
    %73 = arith.mulf %72, %72 : vector<512x8xf32>
    %cst_51 = arith.constant dense<0.000000e+00> : vector<8xf32>
    %74 = vector.multi_reduction <add>, %73, %cst_51 [0] : vector<512x8xf32> to vector<8xf32>
    %75 = vector.shape_cast %74 : vector<8xf32> to vector<1x8xf32>
    %cst_52 = arith.constant 0.00255102036 : f32
    %76 = vector.broadcast %cst_52 : f32 to vector<1x8xf32>
    %77 = arith.mulf %75, %76 : vector<1x8xf32>
    %c0_53 = arith.constant 0 : index
    %c0_54 = arith.constant 0 : index
    %78 = vector.load %arg3[%c0_53, %c0_54] : memref<1x8xf32, #tpu.memory_space<vmem>>, vector<1x8xf32>
    %cst_55 = arith.constant 9.99999974E-6 : f32
    %79 = vector.broadcast %cst_55 : f32 to vector<1x8xf32>
    %80 = arith.addf %77, %79 : vector<1x8xf32>
    %81 = math.rsqrt %80 : vector<1x8xf32>
    %82 = arith.mulf %78, %81 : vector<1x8xf32>
    %83 = vector.broadcast %68 : vector<1x8xf32> to vector<512x8xf32>
    %84 = arith.subf %61, %83 : vector<512x8xf32>
    %85 = vector.broadcast %82 : vector<1x8xf32> to vector<512x8xf32>
    %86 = arith.mulf %84, %85 : vector<512x8xf32>
    %c0_56 = arith.constant 0 : index
    %c0_57 = arith.constant 0 : index
    %87 = vector.load %arg4[%c0_56, %c0_57] : memref<1x8xf32, #tpu.memory_space<vmem>>, vector<1x8xf32>
    %88 = vector.broadcast %87 : vector<1x8xf32> to vector<512x8xf32>
    %89 = arith.addf %86, %88 : vector<512x8xf32>
    %cst_58 = arith.constant 0.000000e+00 : f32
    %90 = vector.broadcast %cst_58 : f32 to vector<512x8xf32>
    %91 = arith.maximumf %89, %90 : vector<512x8xf32>
    %c0_59 = arith.constant 0 : index
    %c0_60 = arith.constant 0 : index
    %92 = vector.load %arg15[%c0_59, %c0_60] : memref<552x8xf32, #tpu.memory_space<vmem>>, vector<512x8xf32>
    tpu.vector_store %arg15[%c0_59, %c0_60], %91 {strides = array<i32>} : memref<552x8xf32, #tpu.memory_space<vmem>>, vector<512x8xf32>,
    %cst_61 = arith.constant 0.000000e+00 : f32
    %93 = vector.broadcast %cst_61 : f32 to vector<40x8xf32>
    %c512_62 = arith.constant 512 : index
    %c0_63 = arith.constant 0 : index
    %94 = vector.load %arg15[%c512_62, %c0_63] : memref<552x8xf32, #tpu.memory_space<vmem>>, vector<40x8xf32>
    tpu.vector_store %arg15[%c512_62, %c0_63], %93 {strides = array<i32>} : memref<552x8xf32, #tpu.memory_space<vmem>>, vector<40x8xf32>,
    %cst_64 = arith.constant 0.000000e+00 : f32
    %95 = vector.broadcast %cst_64 : f32 to vector<512x8xf32>
    %c0_65 = arith.constant 0 : index
    %c0_66 = arith.constant 0 : index
    %96 = vector.load %arg15[%c0_65, %c0_66] : memref<552x8xf32, #tpu.memory_space<vmem>>, vector<512x8xf32>
    %97 = arith.truncf %96 : vector<512x8xf32> to vector<512x8xbf16>
    %c0_67 = arith.constant 0 : index
    %c0_68 = arith.constant 0 : index
    %c0_69 = arith.constant 0 : index
    %98 = vector.load %arg5[%c0_67, %c0_68, %c0_69] : memref<9x8x8xbf16, #tpu.memory_space<vmem>>, vector<1x8x8xbf16>
    %99 = vector.shape_cast %98 : vector<1x8x8xbf16> to vector<8x8xbf16>
    %cst_70 = arith.constant dense<0.000000e+00> : vector<512x8xf32>
    %100 = tpu.matmul %97, %99, %cst_70 {dimension_numbers = #tpu.dot_dimension_numbers<[1], [0], [0], [1], [0, 0, 1, 1], [], []>} : vector<512x8xbf16>, vector<8x8xbf16>, vector<512x8xf32> -> vector<512x8xf32>
    %101 = arith.addf %95, %100 : vector<512x8xf32>
    %c1_71 = arith.constant 1 : index
    %c0_72 = arith.constant 0 : index
    %102 = vector.load %arg15[%c1_71, %c0_72] : memref<552x8xf32, #tpu.memory_space<vmem>>, vector<512x8xf32>
    %103 = arith.truncf %102 : vector<512x8xf32> to vector<512x8xbf16>
    %c1_73 = arith.constant 1 : index
    %c0_74 = arith.constant 0 : index
    %c0_75 = arith.constant 0 : index
    %104 = vector.load %arg5[%c1_73, %c0_74, %c0_75] : memref<9x8x8xbf16, #tpu.memory_space<vmem>>, vector<1x8x8xbf16>
    %105 = vector.shape_cast %104 : vector<1x8x8xbf16> to vector<8x8xbf16>
    %cst_76 = arith.constant dense<0.000000e+00> : vector<512x8xf32>
    %106 = tpu.matmul %103, %105, %cst_76 {dimension_numbers = #tpu.dot_dimension_numbers<[1], [0], [0], [1], [0, 0, 1, 1], [], []>} : vector<512x8xbf16>, vector<8x8xbf16>, vector<512x8xf32> -> vector<512x8xf32>
    %107 = arith.addf %101, %106 : vector<512x8xf32>
    %c2_77 = arith.constant 2 : index
    %c0_78 = arith.constant 0 : index
    %108 = vector.load %arg15[%c2_77, %c0_78] : memref<552x8xf32, #tpu.memory_space<vmem>>, vector<512x8xf32>
    %109 = arith.truncf %108 : vector<512x8xf32> to vector<512x8xbf16>
    %c2_79 = arith.constant 2 : index
    %c0_80 = arith.constant 0 : index
    %c0_81 = arith.constant 0 : index
    %110 = vector.load %arg5[%c2_79, %c0_80, %c0_81] : memref<9x8x8xbf16, #tpu.memory_space<vmem>>, vector<1x8x8xbf16>
    %111 = vector.shape_cast %110 : vector<1x8x8xbf16> to vector<8x8xbf16>
    %cst_82 = arith.constant dense<0.000000e+00> : vector<512x8xf32>
    %112 = tpu.matmul %109, %111, %cst_82 {dimension_numbers = #tpu.dot_dimension_numbers<[1], [0], [0], [1], [0, 0, 1, 1], [], []>} : vector<512x8xbf16>, vector<8x8xbf16>, vector<512x8xf32> -> vector<512x8xf32>
    %113 = arith.addf %107, %112 : vector<512x8xf32>
    %c16_83 = arith.constant 16 : index
    %c0_84 = arith.constant 0 : index
    %114 = vector.load %arg15[%c16_83, %c0_84] : memref<552x8xf32, #tpu.memory_space<vmem>>, vector<512x8xf32>
    %115 = arith.truncf %114 : vector<512x8xf32> to vector<512x8xbf16>
    %c3_85 = arith.constant 3 : index
    %c0_86 = arith.constant 0 : index
    %c0_87 = arith.constant 0 : index
    %116 = vector.load %arg5[%c3_85, %c0_86, %c0_87] : memref<9x8x8xbf16, #tpu.memory_space<vmem>>, vector<1x8x8xbf16>
    %117 = vector.shape_cast %116 : vector<1x8x8xbf16> to vector<8x8xbf16>
    %cst_88 = arith.constant dense<0.000000e+00> : vector<512x8xf32>
    %118 = tpu.matmul %115, %117, %cst_88 {dimension_numbers = #tpu.dot_dimension_numbers<[1], [0], [0], [1], [0, 0, 1, 1], [], []>} : vector<512x8xbf16>, vector<8x8xbf16>, vector<512x8xf32> -> vector<512x8xf32>
    %119 = arith.addf %113, %118 : vector<512x8xf32>
    %c17_89 = arith.constant 17 : index
    %c0_90 = arith.constant 0 : index
    %120 = vector.load %arg15[%c17_89, %c0_90] : memref<552x8xf32, #tpu.memory_space<vmem>>, vector<512x8xf32>
    %121 = arith.truncf %120 : vector<512x8xf32> to vector<512x8xbf16>
    %c4_91 = arith.constant 4 : index
    %c0_92 = arith.constant 0 : index
    %c0_93 = arith.constant 0 : index
    %122 = vector.load %arg5[%c4_91, %c0_92, %c0_93] : memref<9x8x8xbf16, #tpu.memory_space<vmem>>, vector<1x8x8xbf16>
    %123 = vector.shape_cast %122 : vector<1x8x8xbf16> to vector<8x8xbf16>
    %cst_94 = arith.constant dense<0.000000e+00> : vector<512x8xf32>
    %124 = tpu.matmul %121, %123, %cst_94 {dimension_numbers = #tpu.dot_dimension_numbers<[1], [0], [0], [1], [0, 0, 1, 1], [], []>} : vector<512x8xbf16>, vector<8x8xbf16>, vector<512x8xf32> -> vector<512x8xf32>
    %125 = arith.addf %119, %124 : vector<512x8xf32>
    %c18_95 = arith.constant 18 : index
    %c0_96 = arith.constant 0 : index
    %126 = vector.load %arg15[%c18_95, %c0_96] : memref<552x8xf32, #tpu.memory_space<vmem>>, vector<512x8xf32>
    %127 = arith.truncf %126 : vector<512x8xf32> to vector<512x8xbf16>
    %c5_97 = arith.constant 5 : index
    %c0_98 = arith.constant 0 : index
    %c0_99 = arith.constant 0 : index
    %128 = vector.load %arg5[%c5_97, %c0_98, %c0_99] : memref<9x8x8xbf16, #tpu.memory_space<vmem>>, vector<1x8x8xbf16>
    %129 = vector.shape_cast %128 : vector<1x8x8xbf16> to vector<8x8xbf16>
    %cst_100 = arith.constant dense<0.000000e+00> : vector<512x8xf32>
    %130 = tpu.matmul %127, %129, %cst_100 {dimension_numbers = #tpu.dot_dimension_numbers<[1], [0], [0], [1], [0, 0, 1, 1], [], []>} : vector<512x8xbf16>, vector<8x8xbf16>, vector<512x8xf32> -> vector<512x8xf32>
    %131 = arith.addf %125, %130 : vector<512x8xf32>
    %c32_101 = arith.constant 32 : index
    %c0_102 = arith.constant 0 : index
    %132 = vector.load %arg15[%c32_101, %c0_102] : memref<552x8xf32, #tpu.memory_space<vmem>>, vector<512x8xf32>
    %133 = arith.truncf %132 : vector<512x8xf32> to vector<512x8xbf16>
    %c6_103 = arith.constant 6 : index
    %c0_104 = arith.constant 0 : index
    %c0_105 = arith.constant 0 : index
    %134 = vector.load %arg5[%c6_103, %c0_104, %c0_105] : memref<9x8x8xbf16, #tpu.memory_space<vmem>>, vector<1x8x8xbf16>
    %135 = vector.shape_cast %134 : vector<1x8x8xbf16> to vector<8x8xbf16>
    %cst_106 = arith.constant dense<0.000000e+00> : vector<512x8xf32>
    %136 = tpu.matmul %133, %135, %cst_106 {dimension_numbers = #tpu.dot_dimension_numbers<[1], [0], [0], [1], [0, 0, 1, 1], [], []>} : vector<512x8xbf16>, vector<8x8xbf16>, vector<512x8xf32> -> vector<512x8xf32>
    %137 = arith.addf %131, %136 : vector<512x8xf32>
    %c33_107 = arith.constant 33 : index
    %c0_108 = arith.constant 0 : index
    %138 = vector.load %arg15[%c33_107, %c0_108] : memref<552x8xf32, #tpu.memory_space<vmem>>, vector<512x8xf32>
    %139 = arith.truncf %138 : vector<512x8xf32> to vector<512x8xbf16>
    %c7_109 = arith.constant 7 : index
    %c0_110 = arith.constant 0 : index
    %c0_111 = arith.constant 0 : index
    %140 = vector.load %arg5[%c7_109, %c0_110, %c0_111] : memref<9x8x8xbf16, #tpu.memory_space<vmem>>, vector<1x8x8xbf16>
    %141 = vector.shape_cast %140 : vector<1x8x8xbf16> to vector<8x8xbf16>
    %cst_112 = arith.constant dense<0.000000e+00> : vector<512x8xf32>
    %142 = tpu.matmul %139, %141, %cst_112 {dimension_numbers = #tpu.dot_dimension_numbers<[1], [0], [0], [1], [0, 0, 1, 1], [], []>} : vector<512x8xbf16>, vector<8x8xbf16>, vector<512x8xf32> -> vector<512x8xf32>
    %143 = arith.addf %137, %142 : vector<512x8xf32>
    %c34_113 = arith.constant 34 : index
    %c0_114 = arith.constant 0 : index
    %144 = vector.load %arg15[%c34_113, %c0_114] : memref<552x8xf32, #tpu.memory_space<vmem>>, vector<512x8xf32>
    %145 = arith.truncf %144 : vector<512x8xf32> to vector<512x8xbf16>
    %c8_115 = arith.constant 8 : index
    %c0_116 = arith.constant 0 : index
    %c0_117 = arith.constant 0 : index
    %146 = vector.load %arg5[%c8_115, %c0_116, %c0_117] : memref<9x8x8xbf16, #tpu.memory_space<vmem>>, vector<1x8x8xbf16>
    %147 = vector.shape_cast %146 : vector<1x8x8xbf16> to vector<8x8xbf16>
    %cst_118 = arith.constant dense<0.000000e+00> : vector<512x8xf32>
    %148 = tpu.matmul %145, %147, %cst_118 {dimension_numbers = #tpu.dot_dimension_numbers<[1], [0], [0], [1], [0, 0, 1, 1], [], []>} : vector<512x8xbf16>, vector<8x8xbf16>, vector<512x8xf32> -> vector<512x8xf32>
    %149 = arith.addf %143, %148 : vector<512x8xf32>
    %c0_119 = arith.constant 0 : index
    %c0_120 = arith.constant 0 : index
    %150 = vector.load %arg6[%c0_119, %c0_120] : memref<1x8xf32, #tpu.memory_space<vmem>>, vector<1x8xf32>
    %151 = vector.broadcast %150 : vector<1x8xf32> to vector<512x8xf32>
    %152 = arith.addf %149, %151 : vector<512x8xf32>
    %c0_121 = arith.constant 0 : index
    %c0_122 = arith.constant 0 : index
    %153 = vector.load %arg12[%c0_121, %c0_122] : memref<512x1xf32, #tpu.memory_space<vmem>>, vector<512x1xf32>
    %154 = vector.broadcast %153 : vector<512x1xf32> to vector<512x8xf32>
    %155 = arith.mulf %152, %154 : vector<512x8xf32>
    %cst_123 = arith.constant dense<0.000000e+00> : vector<8xf32>
    %156 = vector.multi_reduction <add>, %155, %cst_123 [0] : vector<512x8xf32> to vector<8xf32>
    %157 = vector.shape_cast %156 : vector<8xf32> to vector<1x8xf32>
    %cst_124 = arith.constant 0.00347222225 : f32
    %158 = vector.broadcast %cst_124 : f32 to vector<1x8xf32>
    %159 = arith.mulf %157, %158 : vector<1x8xf32>
    %160 = vector.broadcast %159 : vector<1x8xf32> to vector<512x8xf32>
    %161 = arith.subf %152, %160 : vector<512x8xf32>
    %162 = vector.broadcast %153 : vector<512x1xf32> to vector<512x8xf32>
    %163 = arith.mulf %161, %162 : vector<512x8xf32>
    %164 = arith.mulf %163, %163 : vector<512x8xf32>
    %cst_125 = arith.constant dense<0.000000e+00> : vector<8xf32>
    %165 = vector.multi_reduction <add>, %164, %cst_125 [0] : vector<512x8xf32> to vector<8xf32>
    %166 = vector.shape_cast %165 : vector<8xf32> to vector<1x8xf32>
    %cst_126 = arith.constant 0.00347222225 : f32
    %167 = vector.broadcast %cst_126 : f32 to vector<1x8xf32>
    %168 = arith.mulf %166, %167 : vector<1x8xf32>
    %c0_127 = arith.constant 0 : index
    %c0_128 = arith.constant 0 : index
    %169 = vector.load %arg7[%c0_127, %c0_128] : memref<1x8xf32, #tpu.memory_space<vmem>>, vector<1x8xf32>
    %cst_129 = arith.constant 9.99999974E-6 : f32
    %170 = vector.broadcast %cst_129 : f32 to vector<1x8xf32>
    %171 = arith.addf %168, %170 : vector<1x8xf32>
    %172 = math.rsqrt %171 : vector<1x8xf32>
    %173 = arith.mulf %169, %172 : vector<1x8xf32>
    %174 = vector.broadcast %159 : vector<1x8xf32> to vector<512x8xf32>
    %175 = arith.subf %152, %174 : vector<512x8xf32>
    %176 = vector.broadcast %173 : vector<1x8xf32> to vector<512x8xf32>
    %177 = arith.mulf %175, %176 : vector<512x8xf32>
    %c0_130 = arith.constant 0 : index
    %c0_131 = arith.constant 0 : index
    %178 = vector.load %arg8[%c0_130, %c0_131] : memref<1x8xf32, #tpu.memory_space<vmem>>, vector<1x8xf32>
    %179 = vector.broadcast %178 : vector<1x8xf32> to vector<512x8xf32>
    %180 = arith.addf %177, %179 : vector<512x8xf32>
    %cst_132 = arith.constant 0.000000e+00 : f32
    %181 = vector.broadcast %cst_132 : f32 to vector<512x8xf32>
    %182 = arith.maximumf %180, %181 : vector<512x8xf32>
    %183 = arith.truncf %182 : vector<512x8xf32> to vector<512x8xbf16>
    %c0_133 = arith.constant 0 : index
    %c0_134 = arith.constant 0 : index
    %184 = vector.load %arg9[%c0_133, %c0_134] : memref<8x16xbf16, #tpu.memory_space<vmem>>, vector<8x16xbf16>
    %cst_135 = arith.constant dense<0.000000e+00> : vector<512x16xf32>
    %185 = tpu.matmul %183, %184, %cst_135 {dimension_numbers = #tpu.dot_dimension_numbers<[1], [0], [0], [1], [0, 0, 1, 1], [], []>} : vector<512x8xbf16>, vector<8x16xbf16>, vector<512x16xf32> -> vector<512x16xf32>
    %c0_136 = arith.constant 0 : index
    %c0_137 = arith.constant 0 : index
    %186 = vector.load %arg10[%c0_136, %c0_137] : memref<1x16xf32, #tpu.memory_space<vmem>>, vector<1x16xf32>
    %187 = vector.broadcast %186 : vector<1x16xf32> to vector<512x16xf32>
    %188 = arith.addf %185, %187 : vector<512x16xf32>
    %c0_138 = arith.constant 0 : index
    %c0_139 = arith.constant 0 : index
    %189 = vector.load %arg13[%c0_138, %c0_139] : memref<512x16xf32, #tpu.memory_space<vmem>>, vector<512x16xf32>
    tpu.vector_store %arg13[%c0_138, %c0_139], %188 {strides = array<i32>} : memref<512x16xf32, #tpu.memory_space<vmem>>, vector<512x16xf32>,
    return
  }
}

</mosaic_0001>

<bundles_post_ra>
// kernel: tile.6
= control target key start
LH: loop header
LB: loop body
LE: loop exit
PB: predicated region body
PF: predicated region fallthrough
CT: control target
= control target key end

     0   :  { %s22_s0 = inlined_call_operand.vmem [shape: f32[4], index: 0, kind: input, shape index: {}]   ;;  %s23_s1 = inlined_call_operand.vmem [shape: f32[4,4], index: 1, kind: output, shape index: {}]  }
   0x1   :  { %v4_v0 = vld [vmem:[%s22_s0] ss:$0 sm:$0xff] }
   0x2   :  { %5 = vst [vmem:[%s23_s1] sm:$0xf] %v4_v0 }

// kernel: tile.7
= control target key start
LH: loop header
LB: loop body
LE: loop exit
PB: predicated region body
PF: predicated region fallthrough
CT: control target
= control target key end

     0   :  { %vm7_vm0 = vcmask 31744   ;;  %s37_s8 = smov 4   ;;  %s38_s9 = smov 8   ;;  %vm13_vm1 = vcmask 130144   ;;  %vm19_vm2 = vcmask 97344   ;;  %vm25_vm3 = vcmask 64544   ;;  %s55_s0 = inlined_call_operand.vmem [shape: f32[4,4], index: 0, kind: input, shape index: {}]   ;;  %s56_s1 = inlined_call_operand.vmem [shape: f32[1,16], index: 1, kind: output, shape index: {}]  }
   0x1   :  { %v4_v0 = vld [vmem:[%s55_s0] sm:$0xf]  ;;  %s36_s0 = smov 12  }
   0x2   :  { %5 = vst [vmem:[#allocation1] sm:$0xf] %v4_v0 }
   0x9   :  { %v10_v1 = vld [vmem:[#allocation1 + $0x3] sm:$0x1]   ;;  %v22_v2 = vld [vmem:[#allocation1 + $0x1] sm:$0x1]   ;;  %v6_v3 = vld [vmem:[#allocation1] sm:$0x1]  }
   0xa   :  { %11 = vrot.lane.b32.xlu0 %v10_v1, %s36_s0  ;;  %23 = vrot.lane.b32.xlu1 %v22_v2, %s37_s8  ;;  %v16_v4 = vld [vmem:[#allocation1 + $0x2] sm:$0x1]   ;;  %8 = vst.msk [vmem:[#allocation0] sm:$0x1] %vm7_vm0, %v6_v3  }
   0xe   :  { %17 = vrot.lane.b32.xlu0 %v16_v4, %s38_s9 }
  0x7c   :  { %v12_v5 = vpop.permute.xlu0 %11   ;;  %v24_v6 = vpop.permute.xlu1 %23  }
  0x7d   :  { %14 = vst.msk [vmem:[#allocation0] sm:$0x1] %vm13_vm1, %v12_v5  }
  0x80   :  { %v18_v7 = vpop.permute.xlu0 %17  }
  0x81   :  { %20 = vst.msk [vmem:[#allocation0] sm:$0x1] %vm19_vm2, %v18_v7  }
  0x82   :  { %26 = vst.msk [vmem:[#allocation0] sm:$0x1] %vm25_vm3, %v24_v6  }
  0x89   :  { %v30_v8 = vld [vmem:[#allocation0] sm:$0x1] }
  0x8a   :  { %32 = vst [vmem:[%s56_s1] sm:$0x1] %v30_v8 }

// kernel: decoder_block_forward.1
= control target key start
LH: loop header
LB: loop body
LE: loop exit
PB: predicated region body
PF: predicated region fallthrough
CT: control target
= control target key end

     0   :  { %18 = vsyncpa [#allocation5], 0  ;;  %s16372_s25 = smov [#allocation4]   ;;  %s21706_s0 = inlined_call_operand.vmem [shape: f32[512,4], index: 0, kind: input, shape index: {}]   ;;  %s21707_s1 = inlined_call_operand.vmem [shape: bf16[9,4,8], index: 1, kind: input, shape index: {}]   ;;  %s21708_s2 = inlined_call_operand.vmem [shape: f32[1,8], index: 2, kind: input, shape index: {}]   ;;  %s21709_s3 = inlined_call_operand.vmem [shape: f32[1,8], index: 3, kind: input, shape index: {}, may-alias: {3,7}]   ;;  %s21710_s4 = inlined_call_operand.vmem [shape: f32[1,8], index: 4, kind: input, shape index: {}, may-alias: {4,8}]   ;;  %s21711_s5 = inlined_call_operand.vmem [shape: bf16[9,8,8], index: 5, kind: input, shape index: {}]   ;;  %s21712_s6 = inlined_call_operand.vmem [shape: f32[1,8], index: 6, kind: input, shape index: {}]   ;;  %s21713_s7 = inlined_call_operand.vmem [shape: f32[1,8], index: 7, kind: input, shape index: {}, may-alias: {3,7}]   ;;  %s21714_s8 = inlined_call_operand.vmem [shape: f32[1,8], index: 8, kind: input, shape index: {}, may-alias: {4,8}]   ;;  %s21715_s9 = inlined_call_operand.vmem [shape: bf16[8,16], index: 9, kind: input, shape index: {}]   ;;  %s21716_s10 = inlined_call_operand.vmem [shape: f32[1,16], index: 10, kind: input, shape index: {}]   ;;  %s21717_s11 = inlined_call_operand.hbm [shape: f32[512,1], index: 11, kind: input, shape index: {}]   ;;  %s21718_s12 = inlined_call_operand.vmem [shape: f32[512,1], index: 12, kind: input, shape index: {}]   ;;  %s21719_s13 = inlined_call_operand.vmem [shape: f32[512,16], index: 13, kind: output, shape index: {}]  }
   0x1   :  { %s46_s26 = sshll.u32 %s16372_s25, 4  ;;  %s16348_s29 = scalar_lea.hbm %s21717_s11, 8192  ;;  %s47_s26 = int_to_ptr.vmem [resolvable:$true] %s46_s26 }
   0x2   :  { %p16349_p0 = scmp.ne.s32.totalorder %s21717_s11, %s16348_s29  ;;  %p16352_p1 = scmp.lt.u32.totalorder %s16348_s29, %s21717_s11 }
   0x4   :  { %p16354_p2 = pnand %p16352_p1, %p16349_p0 }
   0x6   :  { %16357 = shalt.err (!%p16354_p2)
}
   0x7   :  { %s16358_s17 = scalar_lea.vmem %s47_s26, 8192  ;;  %p16363_p4 = scmp.lt.s32.totalorder %s47_s26, %s47_s26 }
   0x8   :  { %p16359_p3 = scmp.ne.s32.totalorder %s47_s26, %s16358_s17  ;;  %p16364_p5 = scmp.lt.s32.totalorder %s16358_s17, %s16358_s17 }
   0xa   :  { %p16365_p6 = por %p16364_p5, %p16363_p4 }
   0xc   :  { %p16366_p7 = pnand %p16365_p6, %p16359_p3 }
   0xe   :  { %16369 = shalt.err (!%p16366_p7)
}
   0xf   :  { %s16373_s18 = smov 128   ;;  %s16374_s19 = smov 8  }
  0x10   :  { %52 = dma.hbm_to_vmem [thread:$0]  %s21717_s11, 8192, %s47_s26, [#allocation5], %s16373_s18, %s16373_s18, %s16374_s19  }
  0x11   :  { %16370 = dma.done.wait [#allocation5], 8192  }
  0x12   :  { %16371 = vsyncadd [#allocation5], 4294959104  ;;  %vm484_vm0 = vcmask 1041408   ;;  %vm123_vm1 = vcmask 31744   ;;  %v12781_v0 = vld [vmem:[%s21707_s1 + $0x2] sm:$0x3] }
  0x13   :  { %v59_v1 = vld [vmem:[%s21706_s0] sm:$0xff]  ;;  %v60_v2 = vld [vmem:[%s21706_s0 + $0x8] sm:$0xff]  ;;  %16317 = vmatprep.subr.msk.bf16.mxu0 %vm484_vm0, %v12781_v0  ;;  %v486_v3 = vsel %vm484_vm0, %v12781_v0, 0  ;;  %v61_v4 = vld [vmem:[%s21706_s0 + $0x10] sm:$0xff]  ;;  %16318 = vmatprep.subr.msk.bf16.mxu1 %vm484_vm0, %v12781_v0  ;;  %vm5534_vm2 = vcmask 64512   ;;  %vm6564_vm3 = vcmask 1043456  }
  0x14   :  { %124 = vst.msk [vmem:[#allocation2] sm:$0xff] %vm123_vm1, %v59_v1  ;;  %125 = vst.msk [vmem:[#allocation2 + $0x8] sm:$0xff] %vm123_vm1, %v60_v2  ;;  %v289_v5 = vld [vmem:[%s21707_s1] sm:$0x3]  ;;  %v62_v6 = vld [vmem:[%s21706_s0 + $0x18] sm:$0xff]  ;;  %14038 = vmatpush3.bf16.msra.mxu0 %v486_v3  ;;  %15292 = vmatpush3.bf16.msra.mxu1 %v486_v3  ;;  %vm12711_vm4 = vcmask 130048  }
  0x15   :  { %126 = vst.msk [vmem:[#allocation2 + $0x10] sm:$0xff] %vm123_vm1, %v61_v4  ;;  %v63_v7 = vld [vmem:[%s21706_s0 + $0x20] sm:$0xff]  ;;  %127 = vst.msk [vmem:[#allocation2 + $0x18] sm:$0xff] %vm123_vm1, %v62_v6  ;;  %v64_v8 = vld [vmem:[%s21706_s0 + $0x28] sm:$0xff]  ;;  %16319 = vmatprep.subr.msk.bf16.mxu0 %vm484_vm0, %v289_v5  ;;  %v874_v36 = vsel %vm484_vm0, %v289_v5, 0 }
  0x16   :  { %v65_v9 = vld [vmem:[%s21706_s0 + $0x30] sm:$0xff]  ;;  %128 = vst.msk [vmem:[#allocation2 + $0x20] sm:$0xff] %vm123_vm1, %v63_v7  ;;  %129 = vst.msk [vmem:[#allocation2 + $0x28] sm:$0xff] %vm123_vm1, %v64_v8  ;;  %v66_v10 = vld [vmem:[%s21706_s0 + $0x38] sm:$0xff] }
  0x17   :  { %130 = vst.msk [vmem:[#allocation2 + $0x30] sm:$0xff] %vm123_vm1, %v65_v9  ;;  %v67_v11 = vld [vmem:[%s21706_s0 + $0x40] sm:$0xff]  ;;  %v68_v12 = vld [vmem:[%s21706_s0 + $0x48] sm:$0xff]  ;;  %131 = vst.msk [vmem:[#allocation2 + $0x38] sm:$0xff] %vm123_vm1, %v66_v10 }
  0x18   :  { %132 = vst.msk [vmem:[#allocation2 + $0x40] sm:$0xff] %vm123_vm1, %v67_v11  ;;  %v69_v13 = vld [vmem:[%s21706_s0 + $0x50] sm:$0xff]  ;;  %133 = vst.msk [vmem:[#allocation2 + $0x48] sm:$0xff] %vm123_vm1, %v68_v12  ;;  %v70_v14 = vld [vmem:[%s21706_s0 + $0x58] sm:$0xff] }
  0x19   :  { %v71_v15 = vld [vmem:[%s21706_s0 + $0x60] sm:$0xff]  ;;  %134 = vst.msk [vmem:[#allocation2 + $0x50] sm:$0xff] %vm123_vm1, %v69_v13  ;;  %135 = vst.msk [vmem:[#allocation2 + $0x58] sm:$0xff] %vm123_vm1, %v70_v14  ;;  %v72_v16 = vld [vmem:[%s21706_s0 + $0x68] sm:$0xff] }
  0x1a   :  { %136 = vst.msk [vmem:[#allocation2 + $0x60] sm:$0xff] %vm123_vm1, %v71_v15  ;;  %v73_v17 = vld [vmem:[%s21706_s0 + $0x70] sm:$0xff]  ;;  %v74_v18 = vld [vmem:[%s21706_s0 + $0x78] sm:$0xff]  ;;  %137 = vst.msk [vmem:[#allocation2 + $0x68] sm:$0xff] %vm123_vm1, %v72_v16 }
  0x1b   :  { %138 = vst.msk [vmem:[#allocation2 + $0x70] sm:$0xff] %vm123_vm1, %v73_v17  ;;  %v75_v19 = vld [vmem:[%s21706_s0 + $0x80] sm:$0xff]  ;;  %139 = vst.msk [vmem:[#allocation2 + $0x78] sm:$0xff] %vm123_vm1, %v74_v18  ;;  %v76_v20 = vld [vmem:[%s21706_s0 + $0x88] sm:$0xff] }
  0x1c   :  { %v77_v21 = vld [vmem:[%s21706_s0 + $0x90] sm:$0xff]  ;;  %140 = vst.msk [vmem:[#allocation2 + $0x80] sm:$0xff] %vm123_vm1, %v75_v19  ;;  %141 = vst.msk [vmem:[#allocation2 + $0x88] sm:$0xff] %vm123_vm1, %v76_v20  ;;  %v78_v22 = vld [vmem:[%s21706_s0 + $0x98] sm:$0xff] }
  0x1d   :  { %142 = vst.msk [vmem:[#allocation2 + $0x90] sm:$0xff] %vm123_vm1, %v77_v21  ;;  %v79_v23 = vld [vmem:[%s21706_s0 + $0xa0] sm:$0xff]  ;;  %v80_v24 = vld [vmem:[%s21706_s0 + $0xa8] sm:$0xff]  ;;  %143 = vst.msk [vmem:[#allocation2 + $0x98] sm:$0xff] %vm123_vm1, %v78_v22 }
  0x1e   :  { %v290_v25 = vld [vmem:[#allocation2 + $0x1] sm:$0xff]  ;;  %144 = vst.msk [vmem:[#allocation2 + $0xa0] sm:$0xff] %vm123_vm1, %v79_v23  ;;  %v81_v26 = vld [vmem:[%s21706_s0 + $0xb0] sm:$0xff]  ;;  %145 = vst.msk [vmem:[#allocation2 + $0xa8] sm:$0xff] %vm123_vm1, %v80_v24 }
  0x1f   :  { %v82_v27 = vld [vmem:[%s21706_s0 + $0xb8] sm:$0xff]  ;;  %v291_v28 = vld [vmem:[#allocation2 + $0x9] sm:$0xff]  ;;  %146 = vst.msk [vmem:[#allocation2 + $0xb0] sm:$0xff] %vm123_vm1, %v81_v26  ;;  %v83_v30 = vld [vmem:[%s21706_s0 + $0xc0] sm:$0xff] }
  0x20   :  { %v292_v29 = vld [vmem:[#allocation2 + $0x11] sm:$0xff]  ;;  %147 = vst.msk [vmem:[#allocation2 + $0xb8] sm:$0xff] %vm123_vm1, %v82_v27  ;;  %v354_v31 = vpack.c.bf16 %v291_v28, %v290_v25  ;;  %v293_v32 = vld [vmem:[#allocation2 + $0x19] sm:$0xff]  ;;  %v294_v33 = vld [vmem:[#allocation2 + $0x21] sm:$0xff] }
  0x21   :  { %v295_v34 = vld [vmem:[#allocation2 + $0x29] sm:$0xff]  ;;  %148 = vst.msk [vmem:[#allocation2 + $0xc0] sm:$0xff] %vm123_vm1, %v83_v30  ;;  %v355_v35 = vpack.c.bf16 %v293_v32, %v292_v29  ;;  %v296_v38 = vld [vmem:[#allocation2 + $0x31] sm:$0xff]  ;;  %v297_v39 = vld [vmem:[#allocation2 + $0x39] sm:$0xff] }
  0x22   :  { %v356_v37 = vpack.c.bf16 %v295_v34, %v294_v33  ;;  %14039 = vmatprep.mubr.msk.bf16.mxu0 %vm123_vm1, %v354_v31  ;;  %v298_v40 = vld [vmem:[#allocation2 + $0x41] sm:$0xff]  ;;  %v299_v41 = vld [vmem:[#allocation2 + $0x49] sm:$0xff]  ;;  %v357_v43 = vpack.c.bf16 %v297_v39, %v296_v38  ;;  %v86_v45 = vld [vmem:[%s21706_s0 + $0xd8] sm:$0xff] }
  0x23   :  { %14040 = vmatmul.mubr.msk.bf16.vlgmr.msra.gmra.mrb[0].mxu0 %vm123_vm1, %v355_v35  ;;  %v84_v42 = vld [vmem:[%s21706_s0 + $0xc8] sm:$0xff]  ;;  %v85_v44 = vld [vmem:[%s21706_s0 + $0xd0] sm:$0xff]  ;;  %v358_v46 = vpack.c.bf16 %v299_v41, %v298_v40  ;;  %v87_v47 = vld [vmem:[%s21706_s0 + $0xe0] sm:$0xff]  ;;  %151 = vst.msk [vmem:[#allocation2 + $0xd8] sm:$0xff] %vm123_vm1, %v86_v45 }
  0x24   :  { %14104 = vmatpush3.bf16.msra.mxu0 %v874_v36  ;;  %14043 = vmatprep.mubr.msk.bf16.mxu0 %vm123_vm1, %v356_v37  ;;  %149 = vst.msk [vmem:[#allocation2 + $0xc8] sm:$0xff] %vm123_vm1, %v84_v42  ;;  %150 = vst.msk [vmem:[#allocation2 + $0xd0] sm:$0xff] %vm123_vm1, %v85_v44  ;;  %v88_v48 = vld [vmem:[%s21706_s0 + $0xe8] sm:$0xff]  ;;  %v89_v49 = vld [vmem:[%s21706_s0 + $0xf0] sm:$0xff] }
  0x25   :  { %152 = vst.msk [vmem:[#allocation2 + $0xe0] sm:$0xff] %vm123_vm1, %v87_v47  ;;  %153 = vst.msk [vmem:[#allocation2 + $0xe8] sm:$0xff] %vm123_vm1, %v88_v48  ;;  %v90_v50 = vld [vmem:[%s21706_s0 + $0xf8] sm:$0xff]  ;;  %v91_v51 = vld [vmem:[%s21706_s0 + $0x100] sm:$0xff] }
  0x26   :  { %154 = vst.msk [vmem:[#allocation2 + $0xf0] sm:$0xff] %vm123_vm1, %v89_v49  ;;  %155 = vst.msk [vmem:[#allocation2 + $0xf8] sm:$0xff] %vm123_vm1, %v90_v50  ;;  %v16608_v52 = vld [vmem:[%s21707_s1 + $0x4] sm:$0x3]  ;;  %v300_v53 = vld [vmem:[#allocation2 + $0x51] sm:$0xff] }
  0x27   :  { %156 = vst.msk [vmem:[#allocation2 + $0x100] sm:$0xff] %vm123_vm1, %v91_v51  ;;  %16320 = vmatprep.subr.msk.bf16.mxu0 %vm484_vm0, %v16608_v52  ;;  %v301_v54 = vld [vmem:[#allocation2 + $0x59] sm:$0xff]  ;;  %v302_v55 = vld [vmem:[#allocation2 + $0x61] sm:$0xff]  ;;  %v303_v56 = vld [vmem:[#allocation2 + $0x69] sm:$0xff] }
  0x28   :  { %v359_v57 = vpack.c.bf16 %v301_v54, %v300_v53  ;;  %v360_v58 = vpack.c.bf16 %v303_v56, %v302_v55  ;;  %v304_v59 = vld [vmem:[#allocation2 + $0x71] sm:$0xff]  ;;  %v305_v60 = vld [vmem:[#allocation2 + $0x79] sm:$0xff]  ;;  %v306_v61 = vld [vmem:[#allocation2 + $0x81] sm:$0xff] }
  0x29   :  { %v307_v62 = vld [vmem:[#allocation2 + $0x89] sm:$0xff]  ;;  %v361_v63 = vpack.c.bf16 %v305_v60, %v304_v59  ;;  %v94_v3 = vld [vmem:[%s21706_s0 + $0x118] sm:$0xff]  ;;  %v95_v4 = vld [vmem:[%s21706_s0 + $0x120] sm:$0xff] }
  0x2a   :  { %v92_v0 = vld [vmem:[%s21706_s0 + $0x108] sm:$0xff]  ;;  %v362_v1 = vpack.c.bf16 %v307_v62, %v306_v61  ;;  %v93_v2 = vld [vmem:[%s21706_s0 + $0x110] sm:$0xff]  ;;  %159 = vst.msk [vmem:[#allocation2 + $0x118] sm:$0xff] %vm123_vm1, %v94_v3  ;;  %160 = vst.msk [vmem:[#allocation2 + $0x120] sm:$0xff] %vm123_vm1, %v95_v4 }
  0x2b   :  { %14044 = vmatmul.mubr.msk.bf16.gmra.mrb[4].mxu0 %vm123_vm1, %v357_v43  ;;  %157 = vst.msk [vmem:[#allocation2 + $0x108] sm:$0xff] %vm123_vm1, %v92_v0  ;;  %158 = vst.msk [vmem:[#allocation2 + $0x110] sm:$0xff] %vm123_vm1, %v93_v2  ;;  %v96_v5 = vld [vmem:[%s21706_s0 + $0x128] sm:$0xff]  ;;  %v97_v6 = vld [vmem:[%s21706_s0 + $0x130] sm:$0xff] }
  0x2c   :  { %14047 = vmatprep.mubr.msk.bf16.mxu0 %vm123_vm1, %v358_v46  ;;  %v98_v7 = vld [vmem:[%s21706_s0 + $0x138] sm:$0xff]  ;;  %161 = vst.msk [vmem:[#allocation2 + $0x128] sm:$0xff] %vm123_vm1, %v96_v5  ;;  %162 = vst.msk [vmem:[#allocation2 + $0x130] sm:$0xff] %vm123_vm1, %v97_v6  ;;  %v99_v10 = vld [vmem:[%s21706_s0 + $0x140] sm:$0xff] }
  0x2d   :  { %v308_v8 = vld [vmem:[#allocation2 + $0x91] sm:$0xff]  ;;  %v309_v9 = vld [vmem:[#allocation2 + $0x99] sm:$0xff]  ;;  %163 = vst.msk [vmem:[#allocation2 + $0x138] sm:$0xff] %vm123_vm1, %v98_v7  ;;  %v100_v11 = vld [vmem:[%s21706_s0 + $0x148] sm:$0xff] }
  0x2e   :  { %v101_v12 = vld [vmem:[%s21706_s0 + $0x150] sm:$0xff]  ;;  %v310_v13 = vld [vmem:[#allocation2 + $0xa1] sm:$0xff]  ;;  %164 = vst.msk [vmem:[#allocation2 + $0x140] sm:$0xff] %vm123_vm1, %v99_v10  ;;  %165 = vst.msk [vmem:[#allocation2 + $0x148] sm:$0xff] %vm123_vm1, %v100_v11  ;;  %v363_v24 = vpack.c.bf16 %v309_v9, %v308_v8 }
  0x2f   :  { %v311_v14 = vld [vmem:[#allocation2 + $0xa9] sm:$0xff]  ;;  %v102_v15 = vld [vmem:[%s21706_s0 + $0x158] sm:$0xff]  ;;  %166 = vst.msk [vmem:[#allocation2 + $0x150] sm:$0xff] %vm123_vm1, %v101_v12  ;;  %v103_v16 = vld [vmem:[%s21706_s0 + $0x160] sm:$0xff] }
  0x30   :  { %v104_v17 = vld [vmem:[%s21706_s0 + $0x168] sm:$0xff]  ;;  %167 = vst.msk [vmem:[#allocation2 + $0x158] sm:$0xff] %vm123_vm1, %v102_v15  ;;  %168 = vst.msk [vmem:[#allocation2 + $0x160] sm:$0xff] %vm123_vm1, %v103_v16  ;;  %v105_v18 = vld [vmem:[%s21706_s0 + $0x170] sm:$0xff]  ;;  %v364_v27 = vpack.c.bf16 %v311_v14, %v310_v13 }
  0x31   :  { %169 = vst.msk [vmem:[#allocation2 + $0x168] sm:$0xff] %vm123_vm1, %v104_v17  ;;  %v106_v19 = vld [vmem:[%s21706_s0 + $0x178] sm:$0xff]  ;;  %v107_v20 = vld [vmem:[%s21706_s0 + $0x180] sm:$0xff]  ;;  %170 = vst.msk [vmem:[#allocation2 + $0x170] sm:$0xff] %vm123_vm1, %v105_v18 }
  0x32   :  { %171 = vst.msk [vmem:[#allocation2 + $0x178] sm:$0xff] %vm123_vm1, %v106_v19  ;;  %v108_v21 = vld [vmem:[%s21706_s0 + $0x188] sm:$0xff]  ;;  %172 = vst.msk [vmem:[#allocation2 + $0x180] sm:$0xff] %vm123_vm1, %v107_v20  ;;  %v109_v22 = vld [vmem:[%s21706_s0 + $0x190] sm:$0xff] }
  0x33   :  { %14048 = vmatmul.mubr.msk.bf16.gmra.mrb[8].mxu0 %vm123_vm1, %v359_v57  ;;  %v110_v23 = vld [vmem:[%s21706_s0 + $0x198] sm:$0xff]  ;;  %173 = vst.msk [vmem:[#allocation2 + $0x188] sm:$0xff] %vm123_vm1, %v108_v21  ;;  %174 = vst.msk [vmem:[#allocation2 + $0x190] sm:$0xff] %vm123_vm1, %v109_v22  ;;  %v111_v25 = vld [vmem:[%s21706_s0 + $0x1a0] sm:$0xff] }
  0x34   :  { %14051 = vmatprep.mubr.msk.bf16.mxu0 %vm123_vm1, %v360_v58  ;;  %175 = vst.msk [vmem:[#allocation2 + $0x198] sm:$0xff] %vm123_vm1, %v110_v23  ;;  %v112_v26 = vld [vmem:[%s21706_s0 + $0x1a8] sm:$0xff]  ;;  %176 = vst.msk [vmem:[#allocation2 + $0x1a0] sm:$0xff] %vm123_vm1, %v111_v25  ;;  %v312_v28 = vld [vmem:[#allocation2 + $0xb1] sm:$0xff] }
  0x35   :  { %177 = vst.msk [vmem:[#allocation2 + $0x1a8] sm:$0xff] %vm123_vm1, %v112_v26  ;;  %v313_v29 = vld [vmem:[#allocation2 + $0xb9] sm:$0xff]  ;;  %v314_v30 = vld [vmem:[#allocation2 + $0xc1] sm:$0xff]  ;;  %v315_v31 = vld [vmem:[#allocation2 + $0xc9] sm:$0xff] }
  0x36   :  { %v113_v32 = vld [vmem:[%s21706_s0 + $0x1b0] sm:$0xff]  ;;  %v114_v33 = vld [vmem:[%s21706_s0 + $0x1b8] sm:$0xff]  ;;  %v365_v34 = vpack.c.bf16 %v313_v29, %v312_v28  ;;  %v115_v35 = vld [vmem:[%s21706_s0 + $0x1c0] sm:$0xff]  ;;  %v366_v36 = vpack.c.bf16 %v315_v31, %v314_v30 }
  0x37   :  { %178 = vst.msk [vmem:[#allocation2 + $0x1b0] sm:$0xff] %vm123_vm1, %v113_v32  ;;  %179 = vst.msk [vmem:[#allocation2 + $0x1b8] sm:$0xff] %vm123_vm1, %v114_v33  ;;  %v116_v37 = vld [vmem:[%s21706_s0 + $0x1c8] sm:$0xff]  ;;  %v117_v38 = vld [vmem:[%s21706_s0 + $0x1d0] sm:$0xff] }
  0x38   :  { %180 = vst.msk [vmem:[#allocation2 + $0x1c0] sm:$0xff] %vm123_vm1, %v115_v35  ;;  %v118_v39 = vld [vmem:[%s21706_s0 + $0x1d8] sm:$0xff]  ;;  %181 = vst.msk [vmem:[#allocation2 + $0x1c8] sm:$0xff] %vm123_vm1, %v116_v37  ;;  %v318_v42 = vld [vmem:[#allocation2 + $0xe1] sm:$0xff] }
  0x39   :  { %182 = vst.msk [vmem:[#allocation2 + $0x1d0] sm:$0xff] %vm123_vm1, %v117_v38  ;;  %183 = vst.msk [vmem:[#allocation2 + $0x1d8] sm:$0xff] %vm123_vm1, %v118_v39  ;;  %v316_v40 = vld [vmem:[#allocation2 + $0xd1] sm:$0xff]  ;;  %v317_v41 = vld [vmem:[#allocation2 + $0xd9] sm:$0xff] }
  0x3a   :  { %v319_v43 = vld [vmem:[#allocation2 + $0xe9] sm:$0xff]  ;;  %v367_v44 = vpack.c.bf16 %v317_v41, %v316_v40  ;;  %v119_v45 = vld [vmem:[%s21706_s0 + $0x1e0] sm:$0xff]  ;;  %v122_v49 = vld [vmem:[%s21706_s0 + $0x1f8] sm:$0xff] }
  0x3b   :  { %14052 = vmatmul.mubr.msk.bf16.gmra.mrb[12].mxu0 %vm123_vm1, %v361_v63  ;;  %v120_v46 = vld [vmem:[%s21706_s0 + $0x1e8] sm:$0xff]  ;;  %v368_v47 = vpack.c.bf16 %v319_v43, %v318_v42  ;;  %184 = vst.msk [vmem:[#allocation2 + $0x1e0] sm:$0xff] %vm123_vm1, %v119_v45  ;;  %v121_v48 = vld [vmem:[%s21706_s0 + $0x1f0] sm:$0xff]  ;;  %187 = vst.msk [vmem:[#allocation2 + $0x1f8] sm:$0xff] %vm123_vm1, %v122_v49  ;;  %v1360_v63 = vsel %vm484_vm0, %v16608_v52, 0 }
  0x3c   :  { %14055 = vmatprep.mubr.msk.bf16.mxu0 %vm123_vm1, %v362_v1  ;;  %185 = vst.msk [vmem:[#allocation2 + $0x1e8] sm:$0xff] %vm123_vm1, %v120_v46  ;;  %186 = vst.msk [vmem:[#allocation2 + $0x1f0] sm:$0xff] %vm123_vm1, %v121_v48  ;;  %v320_v50 = vld [vmem:[#allocation2 + $0xf1] sm:$0xff]  ;;  %v321_v51 = vld [vmem:[#allocation2 + $0xf9] sm:$0xff] }
  0x3d   :  { %v193_v53 = vld [vmem:[#allocation2] sm:$0xff]  ;;  %v194_v54 = vld [vmem:[#allocation2 + $0x8] sm:$0xff]  ;;  %v369_v55 = vpack.c.bf16 %v321_v51, %v320_v50  ;;  %v195_v57 = vld [vmem:[#allocation2 + $0x10] sm:$0xff] }
  0x3e   :  { %v257_v56 = vpack.c.bf16 %v194_v54, %v193_v53  ;;  %v196_v58 = vld [vmem:[#allocation2 + $0x18] sm:$0xff]  ;;  %v197_v59 = vld [vmem:[#allocation2 + $0x20] sm:$0xff]  ;;  %v198_v60 = vld [vmem:[#allocation2 + $0x28] sm:$0xff] }
  0x3f   :  { %v16750_v61 = vpack.c.bf16 %v196_v58, %v195_v57  ;;  %v16752_v62 = vpack.c.bf16 %v198_v60, %v197_v59  ;;  %v16759_v0 = vld [vmem:[%s21707_s1 + $0x6] sm:$0x3]  ;;  %v199_v1 = vld [vmem:[#allocation2 + $0x30] sm:$0xff]  ;;  %v200_v2 = vld [vmem:[#allocation2 + $0x38] sm:$0xff] }
  0x40   :  { %v201_v3 = vld [vmem:[#allocation2 + $0x40] sm:$0xff]  ;;  %v202_v4 = vld [vmem:[#allocation2 + $0x48] sm:$0xff]  ;;  %v16767_v52 = vpack.c.bf16 %v200_v2, %v199_v1  ;;  %v203_v6 = vld [vmem:[#allocation2 + $0x50] sm:$0xff] }
  0x41   :  { %v16769_v5 = vpack.c.bf16 %v202_v4, %v201_v3  ;;  %v204_v7 = vld [vmem:[#allocation2 + $0x58] sm:$0xff]  ;;  %v205_v8 = vld [vmem:[#allocation2 + $0x60] sm:$0xff]  ;;  %v206_v9 = vld [vmem:[#allocation2 + $0x68] sm:$0xff] }
  0x42   :  { %v16775_v10 = vpack.c.bf16 %v204_v7, %v203_v6  ;;  %v16777_v11 = vpack.c.bf16 %v206_v9, %v205_v8  ;;  %v207_v12 = vld [vmem:[#allocation2 + $0x70] sm:$0xff]  ;;  %v208_v13 = vld [vmem:[#allocation2 + $0x78] sm:$0xff]  ;;  %v209_v14 = vld [vmem:[#allocation2 + $0x80] sm:$0xff] }
  0x43   :  { %14056 = vmatmul.mubr.msk.bf16.gmra.mrb[16].mxu0 %vm123_vm1, %v363_v24  ;;  %v210_v15 = vld [vmem:[#allocation2 + $0x88] sm:$0xff]  ;;  %v16783_v16 = vpack.c.bf16 %v208_v13, %v207_v12  ;;  %v211_v18 = vld [vmem:[#allocation2 + $0x90] sm:$0xff]  ;;  %v212_v19 = vld [vmem:[#allocation2 + $0x98] sm:$0xff] }
  0x44   :  { %14059 = vmatprep.mubr.msk.bf16.mxu0 %vm123_vm1, %v364_v27  ;;  %v16785_v17 = vpack.c.bf16 %v210_v15, %v209_v14  ;;  %v213_v20 = vld [vmem:[#allocation2 + $0xa0] sm:$0xff]  ;;  %v214_v21 = vld [vmem:[#allocation2 + $0xa8] sm:$0xff]  ;;  %v16791_v22 = vpack.c.bf16 %v212_v19, %v211_v18  ;;  %v215_v24 = vld [vmem:[#allocation2 + $0xb0] sm:$0xff] }
  0x45   :  { %v16793_v23 = vpack.c.bf16 %v214_v21, %v213_v20  ;;  %v216_v25 = vld [vmem:[#allocation2 + $0xb8] sm:$0xff]  ;;  %v217_v26 = vld [vmem:[#allocation2 + $0xc0] sm:$0xff]  ;;  %v218_v27 = vld [vmem:[#allocation2 + $0xc8] sm:$0xff] }
  0x46   :  { %v16799_v28 = vpack.c.bf16 %v216_v25, %v215_v24  ;;  %v16801_v29 = vpack.c.bf16 %v218_v27, %v217_v26  ;;  %v219_v30 = vld [vmem:[#allocation2 + $0xd0] sm:$0xff]  ;;  %v220_v31 = vld [vmem:[#allocation2 + $0xd8] sm:$0xff]  ;;  %v221_v32 = vld [vmem:[#allocation2 + $0xe0] sm:$0xff] }
  0x47   :  { %v222_v33 = vld [vmem:[#allocation2 + $0xe8] sm:$0xff]  ;;  %v224_v37 = vld [vmem:[#allocation2 + $0xf8] sm:$0xff]  ;;  %v225_v38 = vld [vmem:[#allocation2 + $0x100] sm:$0xff] }
  0x48   :  { %v16809_v35 = vpack.c.bf16 %v222_v33, %v221_v32  ;;  %v226_v39 = vld [vmem:[#allocation2 + $0x108] sm:$0xff]  ;;  %v227_v42 = vld [vmem:[#allocation2 + $0x110] sm:$0xff]  ;;  %v228_v43 = vld [vmem:[#allocation2 + $0x118] sm:$0xff]  ;;  %v21720_v33 = vmov 0.0  }
  0x49   :  { %v16817_v41 = vpack.c.bf16 %v226_v39, %v225_v38  ;;  %v230_v45 = vld [vmem:[#allocation2 + $0x128] sm:$0xff]  ;;  %v16823_v46 = vpack.c.bf16 %v228_v43, %v227_v42  ;;  %v231_v48 = vld [vmem:[#allocation2 + $0x130] sm:$0xff]  ;;  %v232_v49 = vld [vmem:[#allocation2 + $0x138] sm:$0xff]  ;;  %188 = vst.msk [vmem:[#allocation2 + $0x200] sm:$0xff] %vm123_vm1, %v21720_v33 }
  0x4a   :  { %v233_v50 = vld [vmem:[#allocation2 + $0x140] sm:$0xff]  ;;  %v234_v51 = vld [vmem:[#allocation2 + $0x148] sm:$0xff]  ;;  %v16831_v53 = vpack.c.bf16 %v232_v49, %v231_v48  ;;  %v240_v1 = vld [vmem:[#allocation2 + $0x178] sm:$0xff]  ;;  %189 = vst.msk [vmem:[#allocation2 + $0x208] sm:$0xff] %vm123_vm1, %v21720_v33 }
  0x4b   :  { %14060 = vmatmul.mubr.msk.bf16.gmra.mrb[20].mxu0 %vm123_vm1, %v365_v34  ;;  %v16807_v34 = vpack.c.bf16 %v220_v31, %v219_v30  ;;  %v16833_v54 = vpack.c.bf16 %v234_v51, %v233_v50  ;;  %v237_v57 = vld [vmem:[#allocation2 + $0x160] sm:$0xff]  ;;  %v238_v58 = vld [vmem:[#allocation2 + $0x168] sm:$0xff]  ;;  %v243_v7 = vld [vmem:[#allocation2 + $0x190] sm:$0xff]  ;;  %190 = vst.msk [vmem:[#allocation2 + $0x210] sm:$0xff] %vm123_vm1, %v21720_v33 }
  0x4c   :  { %14063 = vmatprep.mubr.msk.bf16.mxu0 %vm123_vm1, %v366_v36  ;;  %v223_v36 = vld [vmem:[#allocation2 + $0xf0] sm:$0xff]  ;;  %v16841_v60 = vpack.c.bf16 %v238_v58, %v237_v57  ;;  %v241_v2 = vld [vmem:[#allocation2 + $0x180] sm:$0xff]  ;;  %v242_v3 = vld [vmem:[#allocation2 + $0x188] sm:$0xff]  ;;  %191 = vst.msk [vmem:[#allocation2 + $0x218] sm:$0xff] %vm123_vm1, %v21720_v33 }
  0x4d   :  { %v16815_v40 = vpack.c.bf16 %v224_v37, %v223_v36  ;;  %v16849_v6 = vpack.c.bf16 %v242_v3, %v241_v2  ;;  %v244_v8 = vld [vmem:[#allocation2 + $0x198] sm:$0xff]  ;;  %v245_v9 = vld [vmem:[#allocation2 + $0x1a0] sm:$0xff]  ;;  %v246_v12 = vld [vmem:[#allocation2 + $0x1a8] sm:$0xff]  ;;  %192 = vst.msk [vmem:[#allocation2 + $0x220] sm:$0xff] %vm123_vm1, %v21720_v33 }
  0x4e   :  { %v16855_v13 = vpack.c.bf16 %v244_v8, %v243_v7  ;;  %v16857_v14 = vpack.c.bf16 %v246_v12, %v245_v9  ;;  %v247_v15 = vld [vmem:[#allocation2 + $0x1b0] sm:$0xff]  ;;  %v248_v18 = vld [vmem:[#allocation2 + $0x1b8] sm:$0xff]  ;;  %v249_v19 = vld [vmem:[#allocation2 + $0x1c0] sm:$0xff] }
  0x4f   :  { %v250_v20 = vld [vmem:[#allocation2 + $0x1c8] sm:$0xff]  ;;  %v16863_v21 = vpack.c.bf16 %v248_v18, %v247_v15  ;;  %v251_v25 = vld [vmem:[#allocation2 + $0x1d0] sm:$0xff]  ;;  %v252_v26 = vld [vmem:[#allocation2 + $0x1d8] sm:$0xff] }
  0x50   :  { %v16865_v24 = vpack.c.bf16 %v250_v20, %v249_v19  ;;  %v253_v27 = vld [vmem:[#allocation2 + $0x1e0] sm:$0xff]  ;;  %v254_v30 = vld [vmem:[#allocation2 + $0x1e8] sm:$0xff]  ;;  %v16871_v31 = vpack.c.bf16 %v252_v26, %v251_v25  ;;  %v255_v36 = vld [vmem:[#allocation2 + $0x1f0] sm:$0xff] }
  0x51   :  { %v16873_v32 = vpack.c.bf16 %v254_v30, %v253_v27  ;;  %v256_v37 = vld [vmem:[#allocation2 + $0x1f8] sm:$0xff]  ;;  %v1165_v38 = vld [vmem:[#allocation2 + $0x2] sm:$0xff]  ;;  %v1166_v39 = vld [vmem:[#allocation2 + $0xa] sm:$0xff] }
  0x52   :  { %v16889_v42 = vpack.c.bf16 %v256_v37, %v255_v36  ;;  %v1229_v43 = vpack.c.bf16 %v1166_v39, %v1165_v38  ;;  %v1169_v48 = vld [vmem:[#allocation2 + $0x22] sm:$0xff]  ;;  %v1170_v49 = vld [vmem:[#allocation2 + $0x2a] sm:$0xff]  ;;  %v1171_v57 = vld [vmem:[#allocation2 + $0x32] sm:$0xff] }
  0x53   :  { %14064 = vmatmul.mubr.msk.bf16.gmra.mrb[24].mxu0 %vm123_vm1, %v367_v44  ;;  %v229_v44 = vld [vmem:[#allocation2 + $0x120] sm:$0xff]  ;;  %v16896_v51 = vpack.c.bf16 %v1170_v49, %v1169_v48  ;;  %v1175_v3 = vld [vmem:[#allocation2 + $0x52] sm:$0xff]  ;;  %v1178_v9 = vld [vmem:[#allocation2 + $0x6a] sm:$0xff] }
  0x54   :  { %14067 = vmatprep.mubr.msk.bf16.mxu0 %vm123_vm1, %v368_v47  ;;  %v16825_v47 = vpack.c.bf16 %v230_v45, %v229_v44  ;;  %v1167_v44 = vld [vmem:[#allocation2 + $0x12] sm:$0xff]  ;;  %v1168_v45 = vld [vmem:[#allocation2 + $0x1a] sm:$0xff]  ;;  %v1177_v8 = vld [vmem:[#allocation2 + $0x62] sm:$0xff] }
  0x55   :  { %v16894_v50 = vpack.c.bf16 %v1168_v45, %v1167_v44  ;;  %v1172_v58 = vld [vmem:[#allocation2 + $0x3a] sm:$0xff]  ;;  %v16921_v15 = vpack.c.bf16 %v1178_v9, %v1177_v8  ;;  %v1179_v18 = vld [vmem:[#allocation2 + $0x72] sm:$0xff]  ;;  %v1181_v20 = vld [vmem:[#allocation2 + $0x82] sm:$0xff] }
  0x56   :  { %v1176_v7 = vld [vmem:[#allocation2 + $0x5a] sm:$0xff]  ;;  %v1182_v25 = vld [vmem:[#allocation2 + $0x8a] sm:$0xff]  ;;  %v1183_v30 = vld [vmem:[#allocation2 + $0x92] sm:$0xff] }
  0x57   :  { %v16919_v12 = vpack.c.bf16 %v1176_v7, %v1175_v3  ;;  %v1180_v19 = vld [vmem:[#allocation2 + $0x7a] sm:$0xff]  ;;  %v16929_v27 = vpack.c.bf16 %v1182_v25, %v1181_v20  ;;  %v1185_v37 = vld [vmem:[#allocation2 + $0xa2] sm:$0xff]  ;;  %v1186_v38 = vld [vmem:[#allocation2 + $0xaa] sm:$0xff] }
  0x58   :  { %v16927_v26 = vpack.c.bf16 %v1180_v19, %v1179_v18  ;;  %v1184_v36 = vld [vmem:[#allocation2 + $0x9a] sm:$0xff]  ;;  %v1187_v44 = vld [vmem:[#allocation2 + $0xb2] sm:$0xff]  ;;  %v1189_v48 = vld [vmem:[#allocation2 + $0xc2] sm:$0xff] }
  0x59   :  { %v16935_v39 = vpack.c.bf16 %v1184_v36, %v1183_v30  ;;  %v1188_v45 = vld [vmem:[#allocation2 + $0xba] sm:$0xff]  ;;  %v1190_v49 = vld [vmem:[#allocation2 + $0xca] sm:$0xff]  ;;  %v1195_v9 = vld [vmem:[#allocation2 + $0xf2] sm:$0xff] }
  0x5a   :  { %v1194_v3 = vld [vmem:[#allocation2 + $0xea] sm:$0xff]  ;;  %v1196_v18 = vld [vmem:[#allocation2 + $0xfa] sm:$0xff]  ;;  %v1197_v19 = vld [vmem:[#allocation2 + $0x102] sm:$0xff] }
  0x5b   :  { %14068 = vmatmul.mubr.msk.bf16.gmra.mrb[28].mxu0 %vm123_vm1, %v369_v55  ;;  %v235_v55 = vld [vmem:[#allocation2 + $0x150] sm:$0xff]  ;;  %v16959_v25 = vpack.c.bf16 %v1196_v18, %v1195_v9 }
  0x5c   :  { %14105 = vmatprep.mubr.msk.bf16.mxu0 %vm123_vm1, %v257_v56  ;;  %v236_v56 = vld [vmem:[#allocation2 + $0x158] sm:$0xff]  ;;  %v1198_v20 = vld [vmem:[#allocation2 + $0x10a] sm:$0xff] }
  0x5d   :  { %v16839_v59 = vpack.c.bf16 %v236_v56, %v235_v55  ;;  %v1910_v55 = vsel %vm484_vm0, %v16759_v0, 0  ;;  %v16903_v56 = vld [vmem:[%s21707_s1 + $0x8] sm:$0x3]  ;;  %v16961_v30 = vpack.c.bf16 %v1198_v20, %v1197_v19  ;;  %v1199_v36 = vld [vmem:[#allocation2 + $0x112] sm:$0xff]  ;;  %v1208_v19 = vld [vmem:[#allocation2 + $0x15a] sm:$0xff] }
  0x5e   :  { %v1207_v18 = vld [vmem:[#allocation2 + $0x152] sm:$0xff]  ;;  %v1209_v20 = vld [vmem:[#allocation2 + $0x162] sm:$0xff] }
  0x63   :  { %14106 = vmatmul.mubr.msk.bf16.vlgmr.msra.gmra.mrb[0].mxu0 %vm123_vm1, %v16750_v61 }
  0x64   :  { %14170 = vmatpush3.bf16.msra.mxu0 %v1360_v63  ;;  %14109 = vmatprep.mubr.msk.bf16.mxu0 %vm123_vm1, %v16752_v62  ;;  %v239_v63 = vld [vmem:[#allocation2 + $0x170] sm:$0xff] }
  0x65   :  { %16321 = vmatprep.subr.msk.bf16.mxu0 %vm484_vm0, %v16759_v0  ;;  %v16847_v4 = vpack.c.bf16 %v240_v1, %v239_v63  ;;  %v1173_v63 = vld [vmem:[#allocation2 + $0x42] sm:$0xff]  ;;  %v1174_v1 = vld [vmem:[#allocation2 + $0x4a] sm:$0xff]  ;;  %v16911_v0 = vpack.c.bf16 %v1172_v58, %v1171_v57  ;;  %v16945_v57 = vpack.c.bf16 %v1190_v49, %v1189_v48  ;;  %v1191_v58 = vld [vmem:[#allocation2 + $0xd2] sm:$0xff] }
  0x66   :  { %v16913_v2 = vpack.c.bf16 %v1174_v1, %v1173_v63  ;;  %v1192_v63 = vld [vmem:[#allocation2 + $0xda] sm:$0xff]  ;;  %v1193_v1 = vld [vmem:[#allocation2 + $0xe2] sm:$0xff]  ;;  %v1203_v49 = vld [vmem:[#allocation2 + $0x132] sm:$0xff] }
  0x67   :  { %v16951_v7 = vpack.c.bf16 %v1192_v63, %v1191_v58  ;;  %v16953_v8 = vpack.c.bf16 %v1194_v3, %v1193_v1  ;;  %v1204_v58 = vld [vmem:[#allocation2 + $0x13a] sm:$0xff]  ;;  %v1205_v63 = vld [vmem:[#allocation2 + $0x142] sm:$0xff]  ;;  %v1206_v1 = vld [vmem:[#allocation2 + $0x14a] sm:$0xff] }
  0x68   :  { %v16975_v3 = vpack.c.bf16 %v1204_v58, %v1203_v49  ;;  %v16977_v9 = vpack.c.bf16 %v1206_v1, %v1205_v63  ;;  %v1212_v49 = vld [vmem:[#allocation2 + $0x17a] sm:$0xff]  ;;  %v1213_v58 = vld [vmem:[#allocation2 + $0x182] sm:$0xff]  ;;  %v1214_v63 = vld [vmem:[#allocation2 + $0x18a] sm:$0xff] }
  0x69   :  { %v16993_v33 = vpack.c.bf16 %v1214_v63, %v1213_v58  ;;  %v1221_v58 = vld [vmem:[#allocation2 + $0x1c2] sm:$0xff]  ;;  %v1222_v63 = vld [vmem:[#allocation2 + $0x1ca] sm:$0xff] }
  0x6b   :  { %14110 = vmatmul.mubr.msk.bf16.gmra.mrb[4].mxu0 %vm123_vm1, %v16767_v52  ;;  %21951 = vst [vmem:[#allocation10_spill] sm:$0xff] %v16993_v33 }
  0x6c   :  { %14113 = vmatprep.mubr.msk.bf16.mxu0 %vm123_vm1, %v16769_v5 }
  0x73   :  { %14114 = vmatmul.mubr.msk.bf16.gmra.mrb[8].mxu0 %vm123_vm1, %v16775_v10 }
  0x74   :  { %14117 = vmatprep.mubr.msk.bf16.mxu0 %vm123_vm1, %v16777_v11 }
  0x7b   :  { %14118 = vmatmul.mubr.msk.bf16.gmra.mrb[12].mxu0 %vm123_vm1, %v16783_v16 }
  0x7c   :  { %14121 = vmatprep.mubr.msk.bf16.mxu0 %vm123_vm1, %v16785_v17 }
  0x83   :  { %14122 = vmatmul.mubr.msk.bf16.gmra.mrb[16].mxu0 %vm123_vm1, %v16791_v22 }
  0x84   :  { %14125 = vmatprep.mubr.msk.bf16.mxu0 %vm123_vm1, %v16793_v23 }
  0x8b   :  { %14126 = vmatmul.mubr.msk.bf16.gmra.mrb[20].mxu0 %vm123_vm1, %v16799_v28 }
  0x8c   :  { %14129 = vmatprep.mubr.msk.bf16.mxu0 %vm123_vm1, %v16801_v29 }
  0x93   :  { %14130 = vmatmul.mubr.msk.bf16.gmra.mrb[24].mxu0 %vm123_vm1, %v16807_v34 }
  0x94   :  { %14133 = vmatprep.mubr.msk.bf16.mxu0 %vm123_vm1, %v16809_v35 }
  0x9b   :  { %14134 = vmatmul.mubr.msk.bf16.gmra.mrb[28].mxu0 %vm123_vm1, %v16815_v40 }
  0x9c   :  { %14137 = vmatprep.mubr.msk.bf16.mxu0 %vm123_vm1, %v16817_v41 }
  0xa3   :  { %14138 = vmatmul.mubr.msk.bf16.gmra.mrb[32].mxu0 %vm123_vm1, %v16823_v46 }
  0xa4   :  { %14141 = vmatprep.mubr.msk.bf16.mxu0 %vm123_vm1, %v16825_v47 }
  0xab   :  { %14142 = vmatmul.mubr.msk.bf16.gmra.mrb[36].mxu0 %vm123_vm1, %v16831_v53 }
  0xac   :  { %14145 = vmatprep.mubr.msk.bf16.mxu0 %vm123_vm1, %v16833_v54 }
  0xb3   :  { %14146 = vmatmul.mubr.msk.bf16.gmra.mrb[40].mxu0 %vm123_vm1, %v16839_v59 }
  0xb4   :  { %14149 = vmatprep.mubr.msk.bf16.mxu0 %vm123_vm1, %v16841_v60 }
  0xbb   :  { %14150 = vmatmul.mubr.msk.bf16.gmra.mrb[44].mxu0 %vm123_vm1, %v16847_v4 }
  0xbc   :  { %14153 = vmatprep.mubr.msk.bf16.mxu0 %vm123_vm1, %v16849_v6 }
  0xc3   :  { %14154 = vmatmul.mubr.msk.bf16.gmra.mrb[48].mxu0 %vm123_vm1, %v16855_v13 }
  0xc4   :  { %14157 = vmatprep.mubr.msk.bf16.mxu0 %vm123_vm1, %v16857_v14 }
  0xcb   :  { %14158 = vmatmul.mubr.msk.bf16.gmra.mrb[52].mxu0 %vm123_vm1, %v16863_v21 }
  0xcc   :  { %14161 = vmatprep.mubr.msk.bf16.mxu0 %vm123_vm1, %v16865_v24 }
  0xd3   :  { %14162 = vmatmul.mubr.msk.bf16.gmra.mrb[56].mxu0 %vm123_vm1, %v16871_v31 }
  0xd4   :  { %14165 = vmatprep.mubr.msk.bf16.mxu0 %vm123_vm1, %v16873_v32 }
  0xdb   :  { %14166 = vmatmul.mubr.msk.bf16.gmra.mrb[60].mxu0 %vm123_vm1, %v16889_v42 }
  0xdc   :  { %14171 = vmatprep.mubr.msk.bf16.mxu0 %vm123_vm1, %v1229_v43  ;;  %v16937_v43 = vpack.c.bf16 %v1186_v38, %v1185_v37  ;;  %v1200_v37 = vld [vmem:[#allocation2 + $0x11a] sm:$0xff]  ;;  %v1201_v38 = vld [vmem:[#allocation2 + $0x122] sm:$0xff] }
  0xe3   :  { %14172 = vmatmul.mubr.msk.bf16.vlgmr.msra.gmra.mrb[0].mxu0 %vm123_vm1, %v16894_v50 }
  0xe4   :  { %14236 = vmatpush3.bf16.msra.mxu0 %v1910_v55  ;;  %14175 = vmatprep.mubr.msk.bf16.mxu0 %vm123_vm1, %v16896_v51  ;;  %v16943_v55 = vpack.c.bf16 %v1188_v45, %v1187_v44  ;;  %v1202_v44 = vld [vmem:[#allocation2 + $0x12a] sm:$0xff]  ;;  %v16967_v45 = vpack.c.bf16 %v1200_v37, %v1199_v36  ;;  %v16983_v37 = vpack.c.bf16 %v1208_v19, %v1207_v18  ;;  %v1215_v18 = vld [vmem:[#allocation2 + $0x192] sm:$0xff]  ;;  %v1216_v19 = vld [vmem:[#allocation2 + $0x19a] sm:$0xff] }
  0xe5   :  { %16322 = vmatprep.subr.msk.bf16.mxu0 %vm484_vm0, %v16903_v56  ;;  %v16969_v48 = vpack.c.bf16 %v1202_v44, %v1201_v38  ;;  %v1210_v36 = vld [vmem:[#allocation2 + $0x16a] sm:$0xff]  ;;  %v1211_v44 = vld [vmem:[#allocation2 + $0x172] sm:$0xff] }
  0xe6   :  { %21948 = vst [vmem:[#allocation7_spill] sm:$0xff] %v16983_v37  ;;  %v16985_v38 = vpack.c.bf16 %v1210_v36, %v1209_v20  ;;  %v16991_v1 = vpack.c.bf16 %v1212_v49, %v1211_v44  ;;  %v1217_v20 = vld [vmem:[#allocation2 + $0x1a2] sm:$0xff]  ;;  %v1218_v36 = vld [vmem:[#allocation2 + $0x1aa] sm:$0xff]  ;;  %v1219_v44 = vld [vmem:[#allocation2 + $0x1b2] sm:$0xff] }
  0xe7   :  { %v1220_v49 = vld [vmem:[#allocation2 + $0x1ba] sm:$0xff] }
  0xe8   :  { %21949 = vst [vmem:[#allocation8_spill] sm:$0xff] %v16985_v38  ;;  %21950 = vst [vmem:[#allocation9_spill] sm:$0xff] %v16991_v1 }
  0xeb   :  { %14176 = vmatmul.mubr.msk.bf16.gmra.mrb[4].mxu0 %vm123_vm1, %v16911_v0 }
  0xec   :  { %14179 = vmatprep.mubr.msk.bf16.mxu0 %vm123_vm1, %v16913_v2 }
  0xf3   :  { %14180 = vmatmul.mubr.msk.bf16.gmra.mrb[8].mxu0 %vm123_vm1, %v16919_v12 }
  0xf4   :  { %14183 = vmatprep.mubr.msk.bf16.mxu0 %vm123_vm1, %v16921_v15 }
  0xfb   :  { %14184 = vmatmul.mubr.msk.bf16.gmra.mrb[12].mxu0 %vm123_vm1, %v16927_v26 }
  0xfc   :  { %14187 = vmatprep.mubr.msk.bf16.mxu0 %vm123_vm1, %v16929_v27 }
 0x103   :  { %14188 = vmatmul.mubr.msk.bf16.gmra.mrb[16].mxu0 %vm123_vm1, %v16935_v39 }
 0x104   :  { %14191 = vmatprep.mubr.msk.bf16.mxu0 %vm123_vm1, %v16937_v43 }
 0x10b   :  { %14192 = vmatmul.mubr.msk.bf16.gmra.mrb[20].mxu0 %vm123_vm1, %v16943_v55 }
 0x10c   :  { %14195 = vmatprep.mubr.msk.bf16.mxu0 %vm123_vm1, %v16945_v57 }
 0x113   :  { %14196 = vmatmul.mubr.msk.bf16.gmra.mrb[24].mxu0 %vm123_vm1, %v16951_v7 }
 0x114   :  { %14199 = vmatprep.mubr.msk.bf16.mxu0 %vm123_vm1, %v16953_v8 }
 0x11b   :  { %14200 = vmatmul.mubr.msk.bf16.gmra.mrb[28].mxu0 %vm123_vm1, %v16959_v25 }
 0x11c   :  { %14203 = vmatprep.mubr.msk.bf16.mxu0 %vm123_vm1, %v16961_v30 }
 0x123   :  { %14204 = vmatmul.mubr.msk.bf16.gmra.mrb[32].mxu0 %vm123_vm1, %v16967_v45 }
 0x124   :  { %14207 = vmatprep.mubr.msk.bf16.mxu0 %vm123_vm1, %v16969_v48 }
 0x12b   :  { %14208 = vmatmul.mubr.msk.bf16.gmra.mrb[36].mxu0 %vm123_vm1, %v16975_v3 }
 0x12c   :  { %14211 = vmatprep.mubr.msk.bf16.mxu0 %vm123_vm1, %v16977_v9 }
 0x133   :  { %14212 = vmatmul.mubr.msk.bf16.gmra.mrb[40].mxu0 %vm123_vm1, %v16983_v37  ;;  %v16999_v37 = vpack.c.bf16 %v1216_v19, %v1215_v18  ;;  %v1223_v18 = vld [vmem:[#allocation2 + $0x1d2] sm:$0xff]  ;;  %v1224_v19 = vld [vmem:[#allocation2 + $0x1da] sm:$0xff] }
 0x134   :  { %14215 = vmatprep.mubr.msk.bf16.mxu0 %vm123_vm1, %v16985_v38  ;;  %v17001_v38 = vpack.c.bf16 %v1218_v36, %v1217_v20  ;;  %v1225_v20 = vld [vmem:[#allocation2 + $0x1e2] sm:$0xff]  ;;  %v1226_v36 = vld [vmem:[#allocation2 + $0x1ea] sm:$0xff] }
 0x135   :  { %21952 = vst [vmem:[#allocation11_spill] sm:$0xff] %v16999_v37 }
 0x136   :  { %21953 = vst [vmem:[#allocation12_spill] sm:$0xff] %v17001_v38 }
 0x13b   :  { %14216 = vmatmul.mubr.msk.bf16.gmra.mrb[44].mxu0 %vm123_vm1, %v16991_v1  ;;  %v17007_v1 = vpack.c.bf16 %v1220_v49, %v1219_v44  ;;  %v1227_v44 = vld [vmem:[#allocation2 + $0x1f2] sm:$0xff]  ;;  %v1228_v49 = vld [vmem:[#allocation2 + $0x1fa] sm:$0xff] }
 0x13c   :  { %14219 = vmatprep.mubr.msk.bf16.mxu0 %vm123_vm1, %v16993_v33  ;;  %v17009_v33 = vpack.c.bf16 %v1222_v63, %v1221_v58  ;;  %v17023_v58 = vpack.c.bf16 %v1228_v49, %v1227_v44  ;;  %v2460_v63 = vsel %vm484_vm0, %v16903_v56, 0  ;;  %v2286_v44 = vld [vmem:[#allocation2 + $0xb9] sm:$0xff] }
 0x143   :  { %14220 = vmatmul.mubr.msk.bf16.gmra.mrb[48].mxu0 %vm123_vm1, %v16999_v37  ;;  %v17015_v37 = vpack.c.bf16 %v1224_v19, %v1223_v18  ;;  %v12945_v18 = vld [vmem:[%s21707_s1 + $0xa] sm:$0x3]  ;;  %v2283_v19 = vld [vmem:[#allocation2 + $0xa1] sm:$0xff] }
 0x144   :  { %14223 = vmatprep.mubr.msk.bf16.mxu0 %vm123_vm1, %v17001_v38  ;;  %v17017_v38 = vpack.c.bf16 %v1226_v36, %v1225_v20  ;;  %v2284_v20 = vld [vmem:[#allocation2 + $0xa9] sm:$0xff]  ;;  %v2285_v36 = vld [vmem:[#allocation2 + $0xb1] sm:$0xff] }
 0x145   :  { %v17140_v49 = vpack.c.bf16 %v2284_v20, %v2283_v19  ;;  %v2303_v20 = vld [vmem:[#allocation2 + $0x141] sm:$0xff] }
 0x14b   :  { %14224 = vmatmul.mubr.msk.bf16.gmra.mrb[52].mxu0 %vm123_vm1, %v17007_v1 }
 0x14c   :  { %14227 = vmatprep.mubr.msk.bf16.mxu0 %vm123_vm1, %v17009_v33 }
 0x153   :  { %14228 = vmatmul.mubr.msk.bf16.gmra.mrb[56].mxu0 %vm123_vm1, %v17015_v37 }
 0x154   :  { %14231 = vmatprep.mubr.msk.bf16.mxu0 %vm123_vm1, %v17017_v38 }
 0x15b   :  { %14232 = vmatmul.mubr.msk.bf16.gmra.mrb[60].mxu0 %vm123_vm1, %v17023_v58 }
 0x15c   :  { %14237 = vmatprep.mubr.msk.bf16.mxu0 %vm123_vm1, %v16750_v61  ;;  %v1777_v61 = vld [vmem:[#allocation2 + $0x200] sm:$0xff] }
 0x163   :  { %14238 = vmatmul.mubr.msk.bf16.vlgmr.msra.gmra.mrb[0].mxu0 %vm123_vm1, %v16752_v62  ;;  %v1778_v62 = vld [vmem:[#allocation2 + $0x208] sm:$0xff] }
 0x164   :  { %14302 = vmatpush3.bf16.msra.mxu0 %v2460_v63  ;;  %14241 = vmatprep.mubr.msk.bf16.mxu0 %vm123_vm1, %v16767_v52  ;;  %v2265_v52 = vld [vmem:[#allocation2 + $0x11] sm:$0xff]  ;;  %v17142_v63 = vpack.c.bf16 %v2286_v44, %v2285_v36  ;;  %v2304_v36 = vld [vmem:[#allocation2 + $0x149] sm:$0xff] }
 0x165   :  { %16323 = vmatprep.subr.msk.bf16.mxu0 %vm484_vm0, %v12945_v18  ;;  %v2305_v44 = vld [vmem:[#allocation2 + $0x151] sm:$0xff] }
 0x16b   :  { %14242 = vmatmul.mubr.msk.bf16.gmra.mrb[4].mxu0 %vm123_vm1, %v16769_v5  ;;  %v2266_v5 = vld [vmem:[#allocation2 + $0x19] sm:$0xff] }
 0x16c   :  { %14245 = vmatprep.mubr.msk.bf16.mxu0 %vm123_vm1, %v16775_v10  ;;  %v17095_v10 = vpack.c.bf16 %v1778_v62, %v1777_v61  ;;  %v2288_v61 = vld [vmem:[#allocation2 + $0xc9] sm:$0xff]  ;;  %v2289_v62 = vld [vmem:[#allocation2 + $0xd1] sm:$0xff] }
 0x173   :  { %14246 = vmatmul.mubr.msk.bf16.gmra.mrb[8].mxu0 %vm123_vm1, %v16777_v11  ;;  %v2329_v11 = vpack.c.bf16 %v2266_v5, %v2265_v52  ;;  %v2290_v52 = vld [vmem:[#allocation2 + $0xd9] sm:$0xff] }
 0x174   :  { %14249 = vmatprep.mubr.msk.bf16.mxu0 %vm123_vm1, %v16783_v16  ;;  %v2267_v16 = vld [vmem:[#allocation2 + $0x21] sm:$0xff] }
 0x17b   :  { %14250 = vmatmul.mubr.msk.bf16.gmra.mrb[12].mxu0 %vm123_vm1, %v16785_v17  ;;  %v2268_v17 = vld [vmem:[#allocation2 + $0x29] sm:$0xff] }
 0x17c   :  { %14253 = vmatprep.mubr.msk.bf16.mxu0 %vm123_vm1, %v16791_v22  ;;  %v2269_v22 = vld [vmem:[#allocation2 + $0x31] sm:$0xff] }
 0x183   :  { %14254 = vmatmul.mubr.msk.bf16.gmra.mrb[16].mxu0 %vm123_vm1, %v16793_v23  ;;  %v2270_v23 = vld [vmem:[#allocation2 + $0x39] sm:$0xff] }
 0x184   :  { %14257 = vmatprep.mubr.msk.bf16.mxu0 %vm123_vm1, %v16799_v28  ;;  %v17100_v28 = vpack.c.bf16 %v2268_v17, %v2267_v16  ;;  %v2291_v16 = vld [vmem:[#allocation2 + $0xe1] sm:$0xff]  ;;  %v2292_v17 = vld [vmem:[#allocation2 + $0xe9] sm:$0xff] }
 0x18b   :  { %14258 = vmatmul.mubr.msk.bf16.gmra.mrb[20].mxu0 %vm123_vm1, %v16801_v29  ;;  %v17102_v29 = vpack.c.bf16 %v2270_v23, %v2269_v22  ;;  %v2293_v22 = vld [vmem:[#allocation2 + $0xf1] sm:$0xff]  ;;  %v2294_v23 = vld [vmem:[#allocation2 + $0xf9] sm:$0xff] }
 0x18c   :  { %14261 = vmatprep.mubr.msk.bf16.mxu0 %vm123_vm1, %v16807_v34  ;;  %v3010_v34 = vsel %vm484_vm0, %v12945_v18, 0  ;;  %v2287_v18 = vld [vmem:[#allocation2 + $0xc1] sm:$0xff] }
 0x18d   :  { %v17148_v5 = vpack.c.bf16 %v2288_v61, %v2287_v18  ;;  %v2306_v18 = vld [vmem:[#allocation2 + $0x159] sm:$0xff]  ;;  %v17180_v61 = vpack.c.bf16 %v2304_v36, %v2303_v20  ;;  %v2316_v20 = vld [vmem:[#allocation2 + $0x1a9] sm:$0xff]  ;;  %v2317_v36 = vld [vmem:[#allocation2 + $0x1b1] sm:$0xff] }
 0x193   :  { %14262 = vmatmul.mubr.msk.bf16.gmra.mrb[24].mxu0 %vm123_vm1, %v16809_v35  ;;  %v17108_v35 = vld [vmem:[%s21707_s1 + $0xc] sm:$0x3] }
 0x194   :  { %14265 = vmatprep.mubr.msk.bf16.mxu0 %vm123_vm1, %v16815_v40  ;;  %v2271_v40 = vld [vmem:[#allocation2 + $0x41] sm:$0xff] }
 0x19b   :  { %14266 = vmatmul.mubr.msk.bf16.gmra.mrb[28].mxu0 %vm123_vm1, %v16817_v41  ;;  %v2272_v41 = vld [vmem:[#allocation2 + $0x49] sm:$0xff] }
 0x19c   :  { %14269 = vmatprep.mubr.msk.bf16.mxu0 %vm123_vm1, %v16823_v46  ;;  %v2273_v46 = vld [vmem:[#allocation2 + $0x51] sm:$0xff] }
 0x1a3   :  { %14270 = vmatmul.mubr.msk.bf16.gmra.mrb[32].mxu0 %vm123_vm1, %v16825_v47  ;;  %v2274_v47 = vld [vmem:[#allocation2 + $0x59] sm:$0xff] }
 0x1a4   :  { %14273 = vmatprep.mubr.msk.bf16.mxu0 %vm123_vm1, %v16831_v53  ;;  %v17116_v53 = vpack.c.bf16 %v2272_v41, %v2271_v40  ;;  %v17158_v40 = vpack.c.bf16 %v2294_v23, %v2293_v22  ;;  %v2295_v41 = vld [vmem:[#allocation2 + $0x101] sm:$0xff]  ;;  %v2310_v22 = vld [vmem:[#allocation2 + $0x179] sm:$0xff] }
 0x1ab   :  { %14274 = vmatmul.mubr.msk.bf16.gmra.mrb[36].mxu0 %vm123_vm1, %v16833_v54  ;;  %v17118_v54 = vpack.c.bf16 %v2274_v47, %v2273_v46  ;;  %v2296_v46 = vld [vmem:[#allocation2 + $0x109] sm:$0xff]  ;;  %v2297_v47 = vld [vmem:[#allocation2 + $0x111] sm:$0xff] }
 0x1ac   :  { %14277 = vmatprep.mubr.msk.bf16.mxu0 %vm123_vm1, %v16839_v59  ;;  %v2275_v59 = vld [vmem:[#allocation2 + $0x61] sm:$0xff] }
 0x1b3   :  { %14278 = vmatmul.mubr.msk.bf16.gmra.mrb[40].mxu0 %vm123_vm1, %v16841_v60  ;;  %v2276_v60 = vld [vmem:[#allocation2 + $0x69] sm:$0xff] }
 0x1b4   :  { %14281 = vmatprep.mubr.msk.bf16.mxu0 %vm123_vm1, %v16847_v4  ;;  %v2277_v4 = vld [vmem:[#allocation2 + $0x71] sm:$0xff] }
 0x1bb   :  { %14282 = vmatmul.mubr.msk.bf16.gmra.mrb[44].mxu0 %vm123_vm1, %v16849_v6  ;;  %v2278_v6 = vld [vmem:[#allocation2 + $0x79] sm:$0xff] }
 0x1bc   :  { %14285 = vmatprep.mubr.msk.bf16.mxu0 %vm123_vm1, %v16855_v13  ;;  %v17124_v13 = vpack.c.bf16 %v2276_v60, %v2275_v59  ;;  %v2298_v59 = vld [vmem:[#allocation2 + $0x119] sm:$0xff]  ;;  %v17164_v60 = vpack.c.bf16 %v2296_v46, %v2295_v41  ;;  %v2311_v46 = vld [vmem:[#allocation2 + $0x181] sm:$0xff] }
 0x1c3   :  { %14286 = vmatmul.mubr.msk.bf16.gmra.mrb[48].mxu0 %vm123_vm1, %v16857_v14  ;;  %v17126_v14 = vpack.c.bf16 %v2278_v6, %v2277_v4  ;;  %v17166_v4 = vpack.c.bf16 %v2298_v59, %v2297_v47  ;;  %v2299_v6 = vld [vmem:[#allocation2 + $0x121] sm:$0xff]  ;;  %v2312_v47 = vld [vmem:[#allocation2 + $0x189] sm:$0xff]  ;;  %v2313_v59 = vld [vmem:[#allocation2 + $0x191] sm:$0xff] }
 0x1c4   :  { %14289 = vmatprep.mubr.msk.bf16.mxu0 %vm123_vm1, %v16863_v21  ;;  %v2279_v21 = vld [vmem:[#allocation2 + $0x81] sm:$0xff] }
 0x1cb   :  { %14290 = vmatmul.mubr.msk.bf16.gmra.mrb[52].mxu0 %vm123_vm1, %v16865_v24  ;;  %v2280_v24 = vld [vmem:[#allocation2 + $0x89] sm:$0xff] }
 0x1cc   :  { %14293 = vmatprep.mubr.msk.bf16.mxu0 %vm123_vm1, %v16871_v31  ;;  %v2281_v31 = vld [vmem:[#allocation2 + $0x91] sm:$0xff] }
 0x1d3   :  { %14294 = vmatmul.mubr.msk.bf16.gmra.mrb[56].mxu0 %vm123_vm1, %v16873_v32  ;;  %v2282_v32 = vld [vmem:[#allocation2 + $0x99] sm:$0xff] }
 0x1d4   :  { %14297 = vmatprep.mubr.msk.bf16.mxu0 %vm123_vm1, %v16889_v42  ;;  %v17132_v42 = vpack.c.bf16 %v2280_v24, %v2279_v21  ;;  %v17134_v56 = vpack.c.bf16 %v2282_v32, %v2281_v31  ;;  %v2300_v21 = vld [vmem:[#allocation2 + $0x129] sm:$0xff]  ;;  %v2301_v24 = vld [vmem:[#allocation2 + $0x131] sm:$0xff]  ;;  %v2302_v31 = vld [vmem:[#allocation2 + $0x139] sm:$0xff] }
 0x1d5   :  { %v17172_v32 = vpack.c.bf16 %v2300_v21, %v2299_v6  ;;  %v17174_v19 = vpack.c.bf16 %v2302_v31, %v2301_v24  ;;  %v2314_v6 = vld [vmem:[#allocation2 + $0x199] sm:$0xff]  ;;  %v2352_v21 = vpack.c.bf16 %v2312_v47, %v2311_v46  ;;  %v2315_v31 = vld [vmem:[#allocation2 + $0x1a1] sm:$0xff] }
 0x1d6   :  { %v2353_v24 = vpack.c.bf16 %v2314_v6, %v2313_v59  ;;  %v2323_v47 = vld [vmem:[#allocation2 + $0x1e1] sm:$0xff]  ;;  %v2324_v59 = vld [vmem:[#allocation2 + $0x1e9] sm:$0xff]  ;;  %v2325_v6 = vld [vmem:[#allocation2 + $0x1f1] sm:$0xff] }
 0x1db   :  { %14298 = vmatmul.mubr.msk.bf16.gmra.mrb[60].mxu0 %vm123_vm1, %v17095_v10 }
 0x1dc   :  { %14303 = vmatprep.mubr.msk.bf16.mxu0 %vm123_vm1, %v2329_v11  ;;  %v17150_v11 = vpack.c.bf16 %v2290_v52, %v2289_v62  ;;  %v17182_v62 = vpack.c.bf16 %v2306_v18, %v2305_v44  ;;  %v2307_v52 = vld [vmem:[#allocation2 + $0x161] sm:$0xff]  ;;  %v2318_v44 = vld [vmem:[#allocation2 + $0x1b9] sm:$0xff]  ;;  %v2354_v18 = vpack.c.bf16 %v2316_v20, %v2315_v31 }
 0x1dd   :  { %v2327_v20 = vld [vmem:[#allocation2 + $0x201] sm:$0xff] }
 0x1e3   :  { %14304 = vmatmul.mubr.msk.bf16.vlgmr.msra.gmra.mrb[0].mxu0 %vm123_vm1, %v17100_v28 }
 0x1e4   :  { %14368 = vmatpush3.bf16.msra.mxu0 %v3010_v34  ;;  %14307 = vmatprep.mubr.msk.bf16.mxu0 %vm123_vm1, %v17102_v29  ;;  %v17156_v34 = vpack.c.bf16 %v2292_v17, %v2291_v16  ;;  %v2308_v16 = vld [vmem:[#allocation2 + $0x169] sm:$0xff]  ;;  %v2309_v17 = vld [vmem:[#allocation2 + $0x171] sm:$0xff] }
 0x1e5   :  { %16324 = vmatprep.subr.msk.bf16.mxu0 %vm484_vm0, %v17108_v35  ;;  %v2350_v23 = vpack.c.bf16 %v2308_v16, %v2307_v52  ;;  %v2351_v41 = vpack.c.bf16 %v2310_v22, %v2309_v17  ;;  %v2355_v52 = vpack.c.bf16 %v2318_v44, %v2317_v36  ;;  %v2319_v16 = vld [vmem:[#allocation2 + $0x1c1] sm:$0xff]  ;;  %v2320_v17 = vld [vmem:[#allocation2 + $0x1c9] sm:$0xff]  ;;  %v2321_v22 = vld [vmem:[#allocation2 + $0x1d1] sm:$0xff] }
 0x1e6   :  { %v2328_v36 = vld [vmem:[#allocation2 + $0x209] sm:$0xff] }
 0x1e7   :  { %v2360_v44 = vpack.c.bf16 %v2328_v36, %v2327_v20  ;;  %v17277_v36 = vld [vmem:[%s21707_s1 + $0x10] sm:$0x3] }
 0x1eb   :  { %14308 = vmatmul.mubr.msk.bf16.gmra.mrb[4].mxu0 %vm123_vm1, %v17116_v53 }
 0x1ec   :  { %14311 = vmatprep.mubr.msk.bf16.mxu0 %vm123_vm1, %v17118_v54 }
 0x1f3   :  { %14312 = vmatmul.mubr.msk.bf16.gmra.mrb[8].mxu0 %vm123_vm1, %v17124_v13 }
 0x1f4   :  { %14315 = vmatprep.mubr.msk.bf16.mxu0 %vm123_vm1, %v17126_v14 }
 0x1fb   :  { %14316 = vmatmul.mubr.msk.bf16.gmra.mrb[12].mxu0 %vm123_vm1, %v17132_v42 }
 0x1fc   :  { %14319 = vmatprep.mubr.msk.bf16.mxu0 %vm123_vm1, %v17134_v56 }
 0x203   :  { %14320 = vmatmul.mubr.msk.bf16.gmra.mrb[16].mxu0 %vm123_vm1, %v17140_v49 }
 0x204   :  { %14323 = vmatprep.mubr.msk.bf16.mxu0 %vm123_vm1, %v17142_v63 }
 0x20b   :  { %14324 = vmatmul.mubr.msk.bf16.gmra.mrb[20].mxu0 %vm123_vm1, %v17148_v5 }
 0x20c   :  { %14327 = vmatprep.mubr.msk.bf16.mxu0 %vm123_vm1, %v17150_v11 }
 0x213   :  { %14328 = vmatmul.mubr.msk.bf16.gmra.mrb[24].mxu0 %vm123_vm1, %v17156_v34 }
 0x214   :  { %14331 = vmatprep.mubr.msk.bf16.mxu0 %vm123_vm1, %v17158_v40 }
 0x21b   :  { %14332 = vmatmul.mubr.msk.bf16.gmra.mrb[28].mxu0 %vm123_vm1, %v17164_v60 }
 0x21c   :  { %14335 = vmatprep.mubr.msk.bf16.mxu0 %vm123_vm1, %v17166_v4 }
 0x223   :  { %14336 = vmatmul.mubr.msk.bf16.gmra.mrb[32].mxu0 %vm123_vm1, %v17172_v32 }
 0x224   :  { %14339 = vmatprep.mubr.msk.bf16.mxu0 %vm123_vm1, %v17174_v19 }
 0x22b   :  { %14340 = vmatmul.mubr.msk.bf16.gmra.mrb[36].mxu0 %vm123_vm1, %v17180_v61 }
 0x22c   :  { %14343 = vmatprep.mubr.msk.bf16.mxu0 %vm123_vm1, %v17182_v62 }
 0x233   :  { %14344 = vmatmul.mubr.msk.bf16.gmra.mrb[40].mxu0 %vm123_vm1, %v2350_v23  ;;  %v2322_v23 = vld [vmem:[#allocation2 + $0x1d9] sm:$0xff] }
 0x234   :  { %14347 = vmatprep.mubr.msk.bf16.mxu0 %vm123_vm1, %v2351_v41  ;;  %v2356_v41 = vpack.c.bf16 %v2320_v17, %v2319_v16  ;;  %v2357_v46 = vpack.c.bf16 %v2322_v23, %v2321_v22  ;;  %v3366_v16 = vld [vmem:[#allocation2 + $0x28] sm:$0xff]  ;;  %v5100_v17 = vld [vmem:[#allocation4 + $0x70] sm:$0xff] }
 0x23b   :  { %14348 = vmatmul.mubr.msk.bf16.gmra.mrb[44].mxu0 %vm123_vm1, %v2352_v21  ;;  %v2326_v21 = vld [vmem:[#allocation2 + $0x1f9] sm:$0xff] }
 0x23c   :  { %14351 = vmatprep.mubr.msk.bf16.mxu0 %vm123_vm1, %v2353_v24  ;;  %v2358_v24 = vpack.c.bf16 %v2324_v59, %v2323_v47  ;;  %v2359_v31 = vpack.c.bf16 %v2326_v21, %v2325_v6  ;;  %v3369_v47 = vld [vmem:[#allocation2 + $0x40] sm:$0xff]  ;;  %v3370_v59 = vld [vmem:[#allocation2 + $0x48] sm:$0xff]  ;;  %v5103_v6 = vld [vmem:[#allocation4 + $0x88] sm:$0xff] }
 0x23d   :  { %v5104_v21 = vld [vmem:[#allocation4 + $0x90] sm:$0xff] }
 0x243   :  { %14352 = vmatmul.mubr.msk.bf16.gmra.mrb[48].mxu0 %vm123_vm1, %v2354_v18  ;;  %v3560_v18 = vsel %vm484_vm0, %v17108_v35, 0  ;;  %v3365_v35 = vld [vmem:[#allocation2 + $0x20] sm:$0xff] }
 0x244   :  { %14355 = vmatprep.mubr.msk.bf16.mxu0 %vm123_vm1, %v2355_v52  ;;  %v17206_v52 = vld [vmem:[%s21707_s1 + $0xe] sm:$0x3]  ;;  %v3429_v23 = vpack.c.bf16 %v3366_v16, %v3365_v35  ;;  %v5115_v16 = vld [vmem:[#allocation4 + $0xe8] sm:$0xff] }
 0x245   :  { %v4110_v20 = vsel %vm484_vm0, %v17206_v52, 0  ;;  %v3382_v35 = vld [vmem:[#allocation2 + $0xa8] sm:$0xff] }
 0x24b   :  { %14356 = vmatmul.mubr.msk.bf16.gmra.mrb[52].mxu0 %vm123_vm1, %v2356_v41  ;;  %v5102_v41 = vld [vmem:[#allocation4 + $0x80] sm:$0xff] }
 0x24c   :  { %14359 = vmatprep.mubr.msk.bf16.mxu0 %vm123_vm1, %v2357_v46  ;;  %v3367_v46 = vld [vmem:[#allocation2 + $0x30] sm:$0xff] }
 0x253   :  { %14360 = vmatmul.mubr.msk.bf16.gmra.mrb[56].mxu0 %vm123_vm1, %v2358_v24 }
 0x254   :  { %14363 = vmatprep.mubr.msk.bf16.mxu0 %vm123_vm1, %v2359_v31  ;;  %v3431_v31 = vpack.c.bf16 %v3370_v59, %v3369_v47  ;;  %v3386_v47 = vld [vmem:[#allocation2 + $0xc8] sm:$0xff]  ;;  %v5119_v59 = vld [vmem:[#allocation4 + $0x108] sm:$0xff] }
 0x25b   :  { %14364 = vmatmul.mubr.msk.bf16.gmra.mrb[60].mxu0 %vm123_vm1, %v2360_v44  ;;  %v3371_v44 = vld [vmem:[#allocation2 + $0x50] sm:$0xff] }
 0x25c   :  { %14369 = vmatprep.mubr.msk.bf16.mxu0 %vm123_vm1, %v16894_v50  ;;  %v21954_v50 = vld [vmem:[#allocation7_spill] sm:$0xff] }
 0x263   :  { %14370 = vmatmul.mubr.msk.bf16.vlgmr.msra.gmra.mrb[0].mxu0 %vm123_vm1, %v16896_v51  ;;  %v21955_v51 = vld [vmem:[#allocation8_spill] sm:$0xff] }
 0x264   :  { %14434 = vmatpush3.bf16.msra.mxu0 %v3560_v18  ;;  %14373 = vmatprep.mubr.msk.bf16.mxu0 %vm123_vm1, %v16911_v0  ;;  %v21956_v0 = vld [vmem:[#allocation9_spill] sm:$0xff]  ;;  %v3372_v18 = vld [vmem:[#allocation2 + $0x58] sm:$0xff] }
 0x265   :  { %16325 = vmatprep.subr.msk.bf16.mxu0 %vm484_vm0, %v17206_v52  ;;  %v5107_v52 = vld [vmem:[#allocation4 + $0xa8] sm:$0xff] }
 0x26b   :  { %14374 = vmatmul.mubr.msk.bf16.gmra.mrb[4].mxu0 %vm123_vm1, %v16913_v2  ;;  %v21957_v2 = vld [vmem:[#allocation10_spill] sm:$0xff] }
 0x26c   :  { %14377 = vmatprep.mubr.msk.bf16.mxu0 %vm123_vm1, %v16919_v12  ;;  %v5086_v12 = vld [vmem:[#allocation4] sm:$0xff] }
 0x273   :  { %14378 = vmatmul.mubr.msk.bf16.gmra.mrb[8].mxu0 %vm123_vm1, %v16921_v15  ;;  %v5088_v15 = vld [vmem:[#allocation4 + $0x10] sm:$0xff] }
 0x274   :  { %14381 = vmatprep.mubr.msk.bf16.mxu0 %vm123_vm1, %v16927_v26  ;;  %v21958_v26 = vld [vmem:[#allocation11_spill] sm:$0xff] }
 0x27b   :  { %14382 = vmatmul.mubr.msk.bf16.gmra.mrb[12].mxu0 %vm123_vm1, %v16929_v27  ;;  %v16376_v27 = vmov 0  }
 0x27c   :  { %14385 = vmatprep.mubr.msk.bf16.mxu0 %vm123_vm1, %v16935_v39  ;;  %16342 = vset.pattern.permute.xlu0 %v16376_v27  ;;  %v5087_v39 = vld [vmem:[#allocation4 + $0x8] sm:$0xff] }
 0x27d   :  { %5152 = vperm.xlu0 %16342, %v5086_v12   ;;  %16343 = vset.pattern.permute.xlu1 %v16376_v27  ;;  %v3432_v12 = vpack.c.bf16 %v3372_v18, %v3371_v44  ;;  %v5109_v27 = vld [vmem:[#allocation4 + $0xb8] sm:$0xff]  ;;  %v3387_v44 = vld [vmem:[#allocation2 + $0xd0] sm:$0xff]  ;;  %v3388_v18 = vld [vmem:[#allocation2 + $0xd8] sm:$0xff] }
 0x27e   :  { %5162 = vperm.xlu1 %16343, %v5088_v15   ;;  %v5108_v15 = vld [vmem:[#allocation4 + $0xb0] sm:$0xff] }
 0x281   :  { %5157 = vperm.xlu0 %16342, %v5087_v39   ;;  %v5110_v39 = vld [vmem:[#allocation4 + $0xc0] sm:$0xff] }
 0x283   :  { %14386 = vmatmul.mubr.msk.bf16.gmra.mrb[16].mxu0 %vm123_vm1, %v16937_v43  ;;  %v21959_v43 = vld [vmem:[#allocation12_spill] sm:$0xff] }
 0x284   :  { %14389 = vmatprep.mubr.msk.bf16.mxu0 %vm123_vm1, %v16943_v55  ;;  %v5089_v55 = vld [vmem:[#allocation4 + $0x18] sm:$0xff] }
 0x285   :  { %5167 = vperm.xlu1 %16343, %v5089_v55   ;;  %v3376_v55 = vld [vmem:[#allocation2 + $0x78] sm:$0xff] }
 0x28b   :  { %14390 = vmatmul.mubr.msk.bf16.gmra.mrb[20].mxu0 %vm123_vm1, %v16945_v57  ;;  %v5090_v57 = vld [vmem:[#allocation4 + $0x20] sm:$0xff] }
 0x28c   :  { %14393 = vmatprep.mubr.msk.bf16.mxu0 %vm123_vm1, %v16951_v7  ;;  %5172 = vperm.xlu0 %16342, %v5090_v57   ;;  %v5091_v7 = vld [vmem:[#allocation4 + $0x28] sm:$0xff]  ;;  %v3377_v57 = vld [vmem:[#allocation2 + $0x80] sm:$0xff] }
 0x28d   :  { %5177 = vperm.xlu1 %16343, %v5091_v7   ;;  %v3378_v7 = vld [vmem:[#allocation2 + $0x88] sm:$0xff] }
 0x293   :  { %14394 = vmatmul.mubr.msk.bf16.gmra.mrb[24].mxu0 %vm123_vm1, %v16953_v8  ;;  %v5092_v8 = vld [vmem:[#allocation4 + $0x30] sm:$0xff] }
 0x294   :  { %14397 = vmatprep.mubr.msk.bf16.mxu0 %vm123_vm1, %v16959_v25  ;;  %5182 = vperm.xlu0 %16342, %v5092_v8   ;;  %v5093_v25 = vld [vmem:[#allocation4 + $0x38] sm:$0xff]  ;;  %v5111_v8 = vld [vmem:[#allocation4 + $0xc8] sm:$0xff] }
 0x295   :  { %5187 = vperm.xlu1 %16343, %v5093_v25  }
 0x29b   :  { %14398 = vmatmul.mubr.msk.bf16.gmra.mrb[28].mxu0 %vm123_vm1, %v16961_v30  ;;  %v5094_v30 = vld [vmem:[#allocation4 + $0x40] sm:$0xff] }
 0x29c   :  { %14401 = vmatprep.mubr.msk.bf16.mxu0 %vm123_vm1, %v16967_v45  ;;  %5192 = vperm.xlu0 %16342, %v5094_v30   ;;  %v5095_v45 = vld [vmem:[#allocation4 + $0x48] sm:$0xff]  ;;  %v5112_v30 = vld [vmem:[#allocation4 + $0xd0] sm:$0xff] }
 0x29d   :  { %5197 = vperm.xlu1 %16343, %v5095_v45   ;;  %v3435_v45 = vpack.c.bf16 %v3378_v7, %v3377_v57  ;;  %v5127_v57 = vld [vmem:[#allocation4 + $0x148] sm:$0xff] }
 0x2a3   :  { %14402 = vmatmul.mubr.msk.bf16.gmra.mrb[32].mxu0 %vm123_vm1, %v16969_v48  ;;  %v5096_v48 = vld [vmem:[#allocation4 + $0x50] sm:$0xff] }
 0x2a4   :  { %14405 = vmatprep.mubr.msk.bf16.mxu0 %vm123_vm1, %v16975_v3  ;;  %5202 = vperm.xlu0 %16342, %v5096_v48   ;;  %v5097_v3 = vld [vmem:[#allocation4 + $0x58] sm:$0xff] }
 0x2a5   :  { %5207 = vperm.xlu1 %16343, %v5097_v3   ;;  %v5113_v48 = vld [vmem:[#allocation4 + $0xd8] sm:$0xff]  ;;  %v5114_v3 = vld [vmem:[#allocation4 + $0xe0] sm:$0xff] }
 0x2ab   :  { %14406 = vmatmul.mubr.msk.bf16.gmra.mrb[36].mxu0 %vm123_vm1, %v16977_v9  ;;  %v5098_v9 = vld [vmem:[#allocation4 + $0x60] sm:$0xff] }
 0x2ac   :  { %14409 = vmatprep.mubr.msk.bf16.mxu0 %vm123_vm1, %v21954_v50  ;;  %5212 = vperm.xlu0 %16342, %v5098_v9   ;;  %v5105_v50 = vld [vmem:[#allocation4 + $0x98] sm:$0xff]  ;;  %v3379_v9 = vld [vmem:[#allocation2 + $0x90] sm:$0xff] }
 0x2b0   :  { %5222 = vperm.xlu0 %16342, %v5100_v17   ;;  %v5116_v17 = vld [vmem:[#allocation4 + $0xf0] sm:$0xff] }
 0x2b3   :  { %14410 = vmatmul.mubr.msk.bf16.gmra.mrb[40].mxu0 %vm123_vm1, %v21955_v51  ;;  %v5106_v51 = vld [vmem:[#allocation4 + $0xa0] sm:$0xff] }
 0x2b4   :  { %14413 = vmatprep.mubr.msk.bf16.mxu0 %vm123_vm1, %v21956_v0  ;;  %5232 = vperm.xlu0 %16342, %v5102_v41   ;;  %v3373_v0 = vld [vmem:[#allocation2 + $0x60] sm:$0xff]  ;;  %v3383_v41 = vld [vmem:[#allocation2 + $0xb0] sm:$0xff] }
 0x2b8   :  { %5242 = vperm.xlu0 %16342, %v5104_v21   ;;  %v5120_v21 = vld [vmem:[#allocation4 + $0x110] sm:$0xff] }
 0x2bb   :  { %14414 = vmatmul.mubr.msk.bf16.gmra.mrb[44].mxu0 %vm123_vm1, %v21957_v2  ;;  %v3374_v2 = vld [vmem:[#allocation2 + $0x68] sm:$0xff] }
 0x2bc   :  { %14417 = vmatprep.mubr.msk.bf16.mxu0 %vm123_vm1, %v21958_v26  ;;  %5252 = vperm.xlu0 %16342, %v5106_v51   ;;  %v3433_v26 = vpack.c.bf16 %v3374_v2, %v3373_v0  ;;  %v3390_v51 = vld [vmem:[#allocation2 + $0xe8] sm:$0xff]  ;;  %v5123_v0 = vld [vmem:[#allocation4 + $0x128] sm:$0xff]  ;;  %v3440_v2 = vpack.c.bf16 %v3388_v18, %v3387_v44  ;;  %v3405_v44 = vld [vmem:[#allocation2 + $0x160] sm:$0xff] }
 0x2bd   :  { %v3406_v18 = vld [vmem:[#allocation2 + $0x168] sm:$0xff] }
 0x2c0   :  { %5262 = vperm.xlu0 %16342, %v5108_v15   ;;  %v5125_v15 = vld [vmem:[#allocation4 + $0x138] sm:$0xff] }
 0x2c3   :  { %14418 = vmatmul.mubr.msk.bf16.gmra.mrb[48].mxu0 %vm123_vm1, %v21959_v43  ;;  %v3375_v43 = vld [vmem:[#allocation2 + $0x70] sm:$0xff] }
 0x2c4   :  { %14421 = vmatprep.mubr.msk.bf16.mxu0 %vm123_vm1, %v17007_v1  ;;  %v2878_v1 = vld [vmem:[#allocation2 + $0x20a] sm:$0xff]  ;;  %5272 = vperm.xlu0 %16342, %v5110_v39   ;;  %v3434_v25 = vpack.c.bf16 %v3376_v55, %v3375_v43  ;;  %v3392_v39 = vld [vmem:[#allocation2 + $0xf8] sm:$0xff]  ;;  %v3393_v43 = vld [vmem:[#allocation2 + $0x100] sm:$0xff] }
 0x2c5   :  { %v3394_v55 = vld [vmem:[#allocation2 + $0x108] sm:$0xff] }
 0x2c8   :  { %5282 = vperm.xlu0 %16342, %v5112_v30   ;;  %v5129_v30 = vld [vmem:[#allocation4 + $0x158] sm:$0xff] }
 0x2cb   :  { %14422 = vmatmul.mubr.msk.bf16.gmra.mrb[52].mxu0 %vm123_vm1, %v17009_v33  ;;  %v2877_v33 = vld [vmem:[#allocation2 + $0x202] sm:$0xff] }
 0x2cc   :  { %14425 = vmatprep.mubr.msk.bf16.mxu0 %vm123_vm1, %v17015_v37  ;;  %v5099_v37 = vld [vmem:[#allocation4 + $0x68] sm:$0xff]  ;;  %v2910_v22 = vpack.c.bf16 %v2878_v1, %v2877_v33  ;;  %v3381_v1 = vld [vmem:[#allocation2 + $0xa0] sm:$0xff]  ;;  %5292 = vperm.xlu0 %16342, %v5114_v3  }
 0x2cd   :  { %5217 = vperm.xlu1 %16343, %v5099_v37   ;;  %v3380_v33 = vld [vmem:[#allocation2 + $0x98] sm:$0xff] }
 0x2ce   :  { %v3436_v37 = vpack.c.bf16 %v3380_v33, %v3379_v9  ;;  %v3396_v3 = vld [vmem:[#allocation2 + $0x118] sm:$0xff]  ;;  %v3397_v9 = vld [vmem:[#allocation2 + $0x120] sm:$0xff]  ;;  %v3398_v33 = vld [vmem:[#allocation2 + $0x128] sm:$0xff] }
 0x2d0   :  { %5302 = vperm.xlu0 %16342, %v5116_v17   ;;  %v5133_v17 = vld [vmem:[#allocation4 + $0x178] sm:$0xff] }
 0x2d3   :  { %14426 = vmatmul.mubr.msk.bf16.gmra.mrb[56].mxu0 %vm123_vm1, %v17017_v38  ;;  %v5101_v38 = vld [vmem:[#allocation4 + $0x78] sm:$0xff] }
 0x2d4   :  { %14429 = vmatprep.mubr.msk.bf16.mxu0 %vm123_vm1, %v17023_v58  ;;  %v3368_v58 = vld [vmem:[#allocation2 + $0x38] sm:$0xff]  ;;  %5227 = vperm.xlu1 %16343, %v5101_v38   ;;  %v5118_v38 = vld [vmem:[#allocation4 + $0x100] sm:$0xff] }
 0x2d5   :  { %v3430_v24 = vpack.c.bf16 %v3368_v58, %v3367_v46  ;;  %v3384_v46 = vld [vmem:[#allocation2 + $0xb8] sm:$0xff]  ;;  %v3385_v58 = vld [vmem:[#allocation2 + $0xc0] sm:$0xff]  ;;  %5312 = vperm.xlu0 %16342, %v5118_v38  }
 0x2d6   :  { %v3400_v38 = vld [vmem:[#allocation2 + $0x138] sm:$0xff] }
 0x2d8   :  { %5237 = vperm.xlu1 %16343, %v5103_v6   ;;  %v3438_v6 = vpack.c.bf16 %v3384_v46, %v3383_v41  ;;  %v3401_v41 = vld [vmem:[#allocation2 + $0x140] sm:$0xff]  ;;  %v3402_v46 = vld [vmem:[#allocation2 + $0x148] sm:$0xff] }
 0x2d9   :  { %5322 = vperm.xlu0 %16342, %v5120_v21   ;;  %v5137_v21 = vld [vmem:[#allocation4 + $0x198] sm:$0xff] }
 0x2db   :  { %14430 = vmatmul.mubr.msk.bf16.gmra.mrb[60].mxu0 %vm123_vm1, %v2910_v22  ;;  %v3437_v22 = vpack.c.bf16 %v3382_v35, %v3381_v1  ;;  %v5131_v1 = vld [vmem:[#allocation4 + $0x168] sm:$0xff] }
 0x2dc   :  { %14435 = vmatprep.mubr.msk.bf16.mxu0 %vm123_vm1, %v3429_v23  ;;  %5247 = vperm.xlu1 %16343, %v5105_v50   ;;  %v5117_v23 = vld [vmem:[#allocation4 + $0xf8] sm:$0xff]  ;;  %v3389_v50 = vld [vmem:[#allocation2 + $0xe0] sm:$0xff] }
 0x2e0   :  { %5257 = vperm.xlu1 %16343, %v5107_v52   ;;  %v5124_v52 = vld [vmem:[#allocation4 + $0x130] sm:$0xff] }
 0x2e3   :  { %14436 = vmatmul.mubr.msk.bf16.vlgmr.msra.gmra.mrb[0].mxu0 %vm123_vm1, %v3430_v24  ;;  %v3439_v24 = vpack.c.bf16 %v3386_v47, %v3385_v58  ;;  %v5135_v58 = vld [vmem:[#allocation4 + $0x188] sm:$0xff] }
 0x2e4   :  { %14500 = vmatpush3.bf16.msra.mxu0 %v4110_v20  ;;  %14439 = vmatprep.mubr.msk.bf16.mxu0 %vm123_vm1, %v3431_v31  ;;  %v5121_v31 = vld [vmem:[#allocation4 + $0x118] sm:$0xff]  ;;  %v5122_v20 = vld [vmem:[#allocation4 + $0x120] sm:$0xff] }
 0x2e5   :  { %16326 = vmatprep.subr.msk.bf16.mxu0 %vm484_vm0, %v17277_v36  ;;  %5267 = vperm.xlu1 %16343, %v5109_v27   ;;  %v3391_v27 = vld [vmem:[#allocation2 + $0xf0] sm:$0xff] }
 0x2e6   :  { %5332 = vperm.xlu0 %16342, %v5122_v20   ;;  %v3442_v7 = vpack.c.bf16 %v3392_v39, %v3391_v27  ;;  %v3404_v20 = vld [vmem:[#allocation2 + $0x158] sm:$0xff]  ;;  %v3409_v27 = vld [vmem:[#allocation2 + $0x180] sm:$0xff]  ;;  %v3410_v39 = vld [vmem:[#allocation2 + $0x188] sm:$0xff] }
 0x2e9   :  { %5277 = vperm.xlu1 %16343, %v5111_v8   ;;  %v5128_v8 = vld [vmem:[#allocation4 + $0x150] sm:$0xff] }
 0x2ea   :  { %5342 = vperm.xlu0 %16342, %v5124_v52   ;;  %v5141_v52 = vld [vmem:[#allocation4 + $0x1b8] sm:$0xff] }
 0x2eb   :  { %14440 = vmatmul.mubr.msk.bf16.gmra.mrb[4].mxu0 %vm123_vm1, %v3432_v12  ;;  %v3441_v12 = vpack.c.bf16 %v3390_v51, %v3389_v50  ;;  %v5139_v50 = vld [vmem:[#allocation4 + $0x1a8] sm:$0xff] }
 0x2ec   :  { %14443 = vmatprep.mubr.msk.bf16.mxu0 %vm123_vm1, %v3433_v26  ;;  %v5126_v26 = vld [vmem:[#allocation4 + $0x140] sm:$0xff] }
 0x2ed   :  { %5287 = vperm.xlu1 %16343, %v5113_v48   ;;  %v3395_v48 = vld [vmem:[#allocation2 + $0x110] sm:$0xff] }
 0x2ee   :  { %5352 = vperm.xlu0 %16342, %v5126_v26   ;;  %v3444_v35 = vpack.c.bf16 %v3396_v3, %v3395_v48  ;;  %v3408_v26 = vld [vmem:[#allocation2 + $0x178] sm:$0xff]  ;;  %v3413_v48 = vld [vmem:[#allocation2 + $0x1a0] sm:$0xff]  ;;  %v3414_v3 = vld [vmem:[#allocation2 + $0x1a8] sm:$0xff] }
 0x2f1   :  { %5297 = vperm.xlu1 %16343, %v5115_v16   ;;  %v5132_v16 = vld [vmem:[#allocation4 + $0x170] sm:$0xff] }
 0x2f2   :  { %5362 = vperm.xlu0 %16342, %v5128_v8   ;;  %v5145_v8 = vld [vmem:[#allocation4 + $0x1d8] sm:$0xff] }
 0x2f3   :  { %14444 = vmatmul.mubr.msk.bf16.gmra.mrb[8].mxu0 %vm123_vm1, %v3434_v25  ;;  %v3443_v25 = vpack.c.bf16 %v3394_v55, %v3393_v43  ;;  %v5143_v43 = vld [vmem:[#allocation4 + $0x1c8] sm:$0xff] }
 0x2f4   :  { %14447 = vmatprep.mubr.msk.bf16.mxu0 %vm123_vm1, %v3435_v45  ;;  %v5130_v45 = vld [vmem:[#allocation4 + $0x160] sm:$0xff] }
 0x2f5   :  { %5307 = vperm.xlu1 %16343, %v5117_v23   ;;  %v3399_v23 = vld [vmem:[#allocation2 + $0x130] sm:$0xff] }
 0x2f6   :  { %5372 = vperm.xlu0 %16342, %v5130_v45   ;;  %v3446_v47 = vpack.c.bf16 %v3400_v38, %v3399_v23  ;;  %v3412_v45 = vld [vmem:[#allocation2 + $0x198] sm:$0xff]  ;;  %v3417_v23 = vld [vmem:[#allocation2 + $0x1c0] sm:$0xff]  ;;  %v3418_v38 = vld [vmem:[#allocation2 + $0x1c8] sm:$0xff] }
 0x2f9   :  { %5317 = vperm.xlu1 %16343, %v5119_v59   ;;  %v5136_v59 = vld [vmem:[#allocation4 + $0x190] sm:$0xff] }
 0x2fa   :  { %5382 = vperm.xlu0 %16342, %v5132_v16   ;;  %v5149_v16 = vld [vmem:[#allocation4 + $0x1f8] sm:$0xff] }
 0x2fb   :  { %14448 = vmatmul.mubr.msk.bf16.gmra.mrb[12].mxu0 %vm123_vm1, %v3436_v37  ;;  %v3445_v37 = vpack.c.bf16 %v3398_v33, %v3397_v9  ;;  %v5147_v9 = vld [vmem:[#allocation4 + $0x1e8] sm:$0xff] }
 0x2fc   :  { %14451 = vmatprep.mubr.msk.bf16.mxu0 %vm123_vm1, %v3437_v22  ;;  %v5134_v22 = vld [vmem:[#allocation4 + $0x180] sm:$0xff] }
 0x2fd   :  { %5327 = vperm.xlu1 %16343, %v5121_v31   ;;  %v3403_v31 = vld [vmem:[#allocation2 + $0x150] sm:$0xff] }
 0x2fe   :  { %5392 = vperm.xlu0 %16342, %v5134_v22   ;;  %v3448_v51 = vpack.c.bf16 %v3404_v20, %v3403_v31  ;;  %v3416_v22 = vld [vmem:[#allocation2 + $0x1b8] sm:$0xff]  ;;  %v3421_v31 = vld [vmem:[#allocation2 + $0x1e0] sm:$0xff]  ;;  %v3422_v20 = vld [vmem:[#allocation2 + $0x1e8] sm:$0xff] }
 0x301   :  { %5337 = vperm.xlu1 %16343, %v5123_v0   ;;  %v5140_v0 = vld [vmem:[#allocation4 + $0x1b0] sm:$0xff] }
 0x302   :  { %5402 = vperm.xlu0 %16342, %v5136_v59   ;;  %v11169_v59 = vld [vmem:[%s21718_s12 + $0x18] sm:$0xff] }
 0x303   :  { %14452 = vmatmul.mubr.msk.bf16.gmra.mrb[16].mxu0 %vm123_vm1, %v3438_v6  ;;  %v3447_v6 = vpack.c.bf16 %v3402_v46, %v3401_v41  ;;  %v11167_v41 = vld [vmem:[%s21718_s12 + $0x8] sm:$0xff] }
 0x304   :  { %14455 = vmatprep.mubr.msk.bf16.mxu0 %vm123_vm1, %v3439_v24  ;;  %v5138_v24 = vld [vmem:[#allocation4 + $0x1a0] sm:$0xff] }
 0x305   :  { %5347 = vperm.xlu1 %16343, %v5125_v15   ;;  %v3407_v15 = vld [vmem:[#allocation2 + $0x170] sm:$0xff] }
 0x306   :  { %5412 = vperm.xlu0 %16342, %v5138_v24   ;;  %v3450_v55 = vpack.c.bf16 %v3408_v26, %v3407_v15  ;;  %v3420_v24 = vld [vmem:[#allocation2 + $0x1d8] sm:$0xff]  ;;  %v11175_v15 = vld [vmem:[%s21718_s12 + $0x48] sm:$0xff] }
 0x309   :  { %5357 = vperm.xlu1 %16343, %v5127_v57   ;;  %v5144_v57 = vld [vmem:[#allocation4 + $0x1d0] sm:$0xff] }
 0x30a   :  { %5422 = vperm.xlu0 %16342, %v5140_v0   ;;  %v11173_v0 = vld [vmem:[%s21718_s12 + $0x38] sm:$0xff] }
 0x30b   :  { %14456 = vmatmul.mubr.msk.bf16.gmra.mrb[20].mxu0 %vm123_vm1, %v3440_v2  ;;  %v3449_v2 = vpack.c.bf16 %v3406_v18, %v3405_v44  ;;  %v11171_v44 = vld [vmem:[%s21718_s12 + $0x28] sm:$0xff] }
 0x30c   :  { %14459 = vmatprep.mubr.msk.bf16.mxu0 %vm123_vm1, %v3441_v12  ;;  %v5142_v12 = vld [vmem:[#allocation4 + $0x1c0] sm:$0xff] }
 0x30d   :  { %5367 = vperm.xlu1 %16343, %v5129_v30   ;;  %v3411_v30 = vld [vmem:[#allocation2 + $0x190] sm:$0xff] }
 0x30e   :  { %5432 = vperm.xlu0 %16342, %v5142_v12   ;;  %v3452_v33 = vpack.c.bf16 %v3412_v45, %v3411_v30  ;;  %v3424_v12 = vld [vmem:[#allocation2 + $0x1f8] sm:$0xff]  ;;  %v11182_v30 = vld [vmem:[%s21718_s12 + $0x80] sm:$0xff]  ;;  %v11183_v45 = vld [vmem:[%s21718_s12 + $0x88] sm:$0xff] }
 0x311   :  { %5377 = vperm.xlu1 %16343, %v5131_v1   ;;  %v5148_v1 = vld [vmem:[#allocation4 + $0x1f0] sm:$0xff] }
 0x312   :  { %5442 = vperm.xlu0 %16342, %v5144_v57   ;;  %v3428_v57 = vld [vmem:[#allocation2 + $0x218] sm:$0xff] }
 0x313   :  { %14460 = vmatmul.mubr.msk.bf16.gmra.mrb[24].mxu0 %vm123_vm1, %v3442_v7  ;;  %v3451_v7 = vpack.c.bf16 %v3410_v39, %v3409_v27  ;;  %v11176_v27 = vld [vmem:[%s21718_s12 + $0x50] sm:$0xff]  ;;  %v11177_v39 = vld [vmem:[%s21718_s12 + $0x58] sm:$0xff] }
 0x314   :  { %14463 = vmatprep.mubr.msk.bf16.mxu0 %vm123_vm1, %v3443_v25  ;;  %v5146_v25 = vld [vmem:[#allocation4 + $0x1e0] sm:$0xff] }
 0x315   :  { %5387 = vperm.xlu1 %16343, %v5133_v17   ;;  %v3415_v17 = vld [vmem:[#allocation2 + $0x1b0] sm:$0xff] }
 0x316   :  { %5452 = vperm.xlu0 %16342, %v5146_v25   ;;  %v3454_v46 = vpack.c.bf16 %v3416_v22, %v3415_v17  ;;  %v11180_v25 = vld [vmem:[%s21718_s12 + $0x70] sm:$0xff] }
 0x317   :  { %v11192_v17 = vld [vmem:[%s21718_s12 + $0xd0] sm:$0xff] }
 0x319   :  { %5397 = vperm.xlu1 %16343, %v5135_v58   ;;  %v11168_v58 = vld [vmem:[%s21718_s12 + $0x10] sm:$0xff] }
 0x31a   :  { %5462 = vperm.xlu0 %16342, %v5148_v1   ;;  %v17392_v1 = vpop.permute.xlu1 %5162 }
 0x31b   :  { %14464 = vmatmul.mubr.msk.bf16.gmra.mrb[28].mxu0 %vm123_vm1, %v3444_v35  ;;  %v3453_v35 = vpack.c.bf16 %v3414_v3, %v3413_v48  ;;  %v11184_v48 = vld [vmem:[%s21718_s12 + $0x90] sm:$0xff]  ;;  %v4660_v3 = vsel %vm484_vm0, %v17277_v36, 0  ;;  %21961 = vst [vmem:[#allocation8_spill] sm:$0xff] %v17392_v1 }
 0x31c   :  { %14467 = vmatprep.mubr.msk.bf16.mxu0 %vm123_vm1, %v3445_v37  ;;  %v11166_v37 = vld [vmem:[%s21718_s12] sm:$0xff]  ;;  %v11188_v36 = vld [vmem:[%s21718_s12 + $0xb0] sm:$0xff] }
 0x31d   :  { %5407 = vperm.xlu1 %16343, %v5137_v21   ;;  %v3419_v21 = vld [vmem:[#allocation2 + $0x1d0] sm:$0xff] }
 0x31e   :  { %11232 = vperm.xlu0 %16342, %v11166_v37   ;;  %v3456_v18 = vpack.c.bf16 %v3420_v24, %v3419_v21  ;;  %v11191_v37 = vld [vmem:[%s21718_s12 + $0xc8] sm:$0xff]  ;;  %v11202_v24 = vld [vmem:[%s21718_s12 + $0x120] sm:$0xff] }
 0x321   :  { %5417 = vperm.xlu1 %16343, %v5139_v50   ;;  %v11172_v50 = vld [vmem:[%s21718_s12 + $0x30] sm:$0xff] }
 0x322   :  { %11242 = vperm.xlu0 %16342, %v11168_v58   ;;  %v11197_v58 = vld [vmem:[%s21718_s12 + $0xf8] sm:$0xff] }
 0x323   :  { %14468 = vmatmul.mubr.msk.bf16.gmra.mrb[32].mxu0 %vm123_vm1, %v3446_v47  ;;  %v3455_v47 = vpack.c.bf16 %v3418_v38, %v3417_v23  ;;  %v11194_v23 = vld [vmem:[%s21718_s12 + $0xe0] sm:$0xff] }
 0x324   :  { %14471 = vmatprep.mubr.msk.bf16.mxu0 %vm123_vm1, %v3447_v6  ;;  %v11170_v6 = vld [vmem:[%s21718_s12 + $0x20] sm:$0xff] }
 0x325   :  { %5427 = vperm.xlu1 %16343, %v5141_v52   ;;  %v3423_v52 = vld [vmem:[#allocation2 + $0x1f0] sm:$0xff] }
 0x326   :  { %11252 = vperm.xlu0 %16342, %v11170_v6   ;;  %v3458_v26 = vpack.c.bf16 %v3424_v12, %v3423_v52  ;;  %v11200_v6 = vld [vmem:[%s21718_s12 + $0x110] sm:$0xff]  ;;  %v11209_v52 = vld [vmem:[%s21718_s12 + $0x158] sm:$0xff]  ;;  %v11210_v12 = vld [vmem:[%s21718_s12 + $0x160] sm:$0xff] }
 0x329   :  { %5437 = vperm.xlu1 %16343, %v5143_v43   ;;  %v11178_v43 = vld [vmem:[%s21718_s12 + $0x60] sm:$0xff] }
 0x32a   :  { %11262 = vperm.xlu0 %16342, %v11172_v50   ;;  %v11206_v50 = vld [vmem:[%s21718_s12 + $0x140] sm:$0xff] }
 0x32b   :  { %14472 = vmatmul.mubr.msk.bf16.gmra.mrb[36].mxu0 %vm123_vm1, %v3448_v51  ;;  %v3457_v51 = vpack.c.bf16 %v3422_v20, %v3421_v31  ;;  %v11203_v20 = vld [vmem:[%s21718_s12 + $0x128] sm:$0xff] }
 0x32c   :  { %14475 = vmatprep.mubr.msk.bf16.mxu0 %vm123_vm1, %v3449_v2  ;;  %v11174_v2 = vld [vmem:[%s21718_s12 + $0x40] sm:$0xff] }
 0x32d   :  { %5447 = vperm.xlu1 %16343, %v5145_v8  }
 0x32e   :  { %11272 = vperm.xlu0 %16342, %v11174_v2  }
 0x331   :  { %5457 = vperm.xlu1 %16343, %v5147_v9   ;;  %v11186_v9 = vld [vmem:[%s21718_s12 + $0xa0] sm:$0xff] }
 0x332   :  { %11282 = vperm.xlu0 %16342, %v11176_v27  }
 0x333   :  { %14476 = vmatmul.mubr.msk.bf16.gmra.mrb[40].mxu0 %vm123_vm1, %v3450_v55  ;;  %v3427_v55 = vld [vmem:[#allocation2 + $0x210] sm:$0xff] }
 0x334   :  { %14479 = vmatprep.mubr.msk.bf16.mxu0 %vm123_vm1, %v3451_v7  ;;  %v11179_v7 = vld [vmem:[%s21718_s12 + $0x68] sm:$0xff]  ;;  %v3460_v8 = vpack.c.bf16 %v3428_v57, %v3427_v55 }
 0x335   :  { %5467 = vperm.xlu1 %16343, %v5149_v16   ;;  %v323_v57 = vld [vmem:[#allocation2 + $0x109] sm:$0xff] }
 0x336   :  { %11292 = vperm.xlu0 %16342, %v11178_v43   ;;  %v322_v43 = vld [vmem:[#allocation2 + $0x101] sm:$0xff] }
 0x339   :  { %11237 = vperm.xlu1 %16343, %v11167_v41   ;;  %v11195_v41 = vld [vmem:[%s21718_s12 + $0xe8] sm:$0xff] }
 0x33a   :  { %11302 = vperm.xlu0 %16342, %v11180_v25   ;;  %v370_v25 = vpack.c.bf16 %v323_v57, %v322_v43  ;;  %v11226_v43 = vld [vmem:[%s21718_s12 + $0x1e0] sm:$0xff]  ;;  %v3961_v57 = vld [vmem:[#allocation2 + $0x191] sm:$0xff] }
 0x33b   :  { %14480 = vmatmul.mubr.msk.bf16.gmra.mrb[44].mxu0 %vm123_vm1, %v3452_v33  ;;  %v17384_v33 = vpop.permute.xlu0 %5152 }
 0x33c   :  { %14483 = vmatprep.mubr.msk.bf16.mxu0 %vm123_vm1, %v3453_v35  ;;  %21960 = vst [vmem:[#allocation7_spill] sm:$0xff] %v17384_v33  ;;  %v11190_v35 = vld [vmem:[%s21718_s12 + $0xc0] sm:$0xff]  ;;  %14071 = vmatprep.mubr.msk.bf16.mxu1 %vm123_vm1, %v370_v25 }
 0x33d   :  { %11247 = vperm.xlu1 %16343, %v11169_v59   ;;  %v3963_v25 = vld [vmem:[#allocation2 + $0x1a1] sm:$0xff] }
 0x33e   :  { %11312 = vperm.xlu0 %16342, %v11182_v30  }
 0x33f   :  { %v17404_v16 = vpop.permute.xlu0 %5157 }
 0x340   :  { %21962 = vst [vmem:[#allocation9_spill] sm:$0xff] %v17404_v16 }
 0x341   :  { %11257 = vperm.xlu1 %16343, %v11171_v44   ;;  %v11204_v44 = vld [vmem:[%s21718_s12 + $0x130] sm:$0xff] }
 0x342   :  { %11322 = vperm.xlu0 %16342, %v11184_v48   ;;  %v11217_v48 = vld [vmem:[%s21718_s12 + $0x198] sm:$0xff] }
 0x343   :  { %14484 = vmatmul.mubr.msk.bf16.gmra.mrb[48].mxu0 %vm123_vm1, %v3454_v46  ;;  %v17414_v22 = vpop.permute.xlu0 %5172 }
 0x344   :  { %14487 = vmatprep.mubr.msk.bf16.mxu0 %vm123_vm1, %v3455_v47  ;;  %21964 = vst [vmem:[#allocation11_spill] sm:$0xff] %v17414_v22  ;;  %v11198_v47 = vld [vmem:[%s21718_s12 + $0x100] sm:$0xff] }
 0x345   :  { %11267 = vperm.xlu1 %16343, %v11173_v0   ;;  %v11207_v0 = vld [vmem:[%s21718_s12 + $0x148] sm:$0xff] }
 0x346   :  { %11332 = vperm.xlu0 %16342, %v11186_v9   ;;  %v327_v9 = vld [vmem:[#allocation2 + $0x129] sm:$0xff] }
 0x347   :  { %v17434_v46 = vpop.permute.xlu0 %5182 }
 0x348   :  { %21966 = vst [vmem:[#allocation13_spill] sm:$0xff] %v17434_v46 }
 0x349   :  { %11277 = vperm.xlu1 %16343, %v11175_v15  }
 0x34a   :  { %11342 = vperm.xlu0 %16342, %v11188_v36   ;;  %v329_v36 = vld [vmem:[#allocation2 + $0x139] sm:$0xff] }
 0x34b   :  { %14488 = vmatmul.mubr.msk.bf16.gmra.mrb[52].mxu0 %vm123_vm1, %v3456_v18  ;;  %v17448_v59 = vpop.permute.xlu0 %5192 }
 0x34c   :  { %14491 = vmatprep.mubr.msk.bf16.mxu0 %vm123_vm1, %v3457_v51  ;;  %21968 = vst [vmem:[#allocation15_spill] sm:$0xff] %v17448_v59 }
 0x34d   :  { %11287 = vperm.xlu1 %16343, %v11177_v39   ;;  %v11214_v39 = vld [vmem:[%s21718_s12 + $0x180] sm:$0xff] }
 0x34e   :  { %11352 = vperm.xlu0 %16342, %v11190_v35   ;;  %v3956_v35 = vld [vmem:[#allocation2 + $0x169] sm:$0xff] }
 0x34f   :  { %v17468_v31 = vpop.permute.xlu0 %5202 }
 0x350   :  { %21970 = vst [vmem:[#allocation17_spill] sm:$0xff] %v17468_v31 }
 0x351   :  { %11297 = vperm.xlu1 %16343, %v11179_v7   ;;  %v324_v7 = vld [vmem:[#allocation2 + $0x111] sm:$0xff] }
 0x352   :  { %11362 = vperm.xlu0 %16342, %v11192_v17  }
 0x353   :  { %14492 = vmatmul.mubr.msk.bf16.gmra.mrb[56].mxu0 %vm123_vm1, %v3458_v26  ;;  %v17478_v18 = vpop.permute.xlu0 %5212  ;;  %v11212_v26 = vld [vmem:[%s21718_s12 + $0x170] sm:$0xff] }
 0x354   :  { %14495 = vmatprep.mubr.msk.bf16.mxu0 %vm123_vm1, %v17095_v10  ;;  %v11181_v10 = vld [vmem:[%s21718_s12 + $0x78] sm:$0xff]  ;;  %21972 = vst [vmem:[#allocation19_spill] sm:$0xff] %v17478_v18 }
 0x355   :  { %11307 = vperm.xlu1 %16343, %v11181_v10   ;;  %v11215_v10 = vld [vmem:[%s21718_s12 + $0x188] sm:$0xff] }
 0x356   :  { %11372 = vperm.xlu0 %16342, %v11194_v23  }
 0x357   :  { %v17498_v2 = vpop.permute.xlu0 %5222 }
 0x358   :  { %21974 = vst [vmem:[#allocation21_spill] sm:$0xff] %v17498_v2 }
 0x359   :  { %11317 = vperm.xlu1 %16343, %v11183_v45  }
 0x35b   :  { %14496 = vmatmul.mubr.msk.bf16.gmra.mrb[60].mxu0 %vm123_vm1, %v3460_v8  ;;  %v17512_v15 = vpop.permute.xlu0 %5232  ;;  %v325_v8 = vld [vmem:[#allocation2 + $0x119] sm:$0xff] }
 0x35c   :  { %14501 = vmatprep.mubr.msk.bf16.mxu0 %vm123_vm1, %v17100_v28  ;;  %v11185_v28 = vld [vmem:[%s21718_s12 + $0x98] sm:$0xff]  ;;  %21976 = vst [vmem:[#allocation23_spill] sm:$0xff] %v17512_v15 }
 0x35d   :  { %11327 = vperm.xlu1 %16343, %v11185_v28   ;;  %v326_v28 = vld [vmem:[#allocation2 + $0x121] sm:$0xff] }
 0x35f   :  { %v17532_v55 = vpop.permute.xlu0 %5242 }
 0x360   :  { %21978 = vst [vmem:[#allocation25_spill] sm:$0xff] %v17532_v55 }
 0x363   :  { %14502 = vmatmul.mubr.msk.bf16.vlgmr.msra.gmra.mrb[0].mxu0 %vm123_vm1, %v17102_v29  ;;  %v11187_v29 = vld [vmem:[%s21718_s12 + $0xa8] sm:$0xff]  ;;  %v17544_v45 = vpop.permute.xlu0 %5252 }
 0x364   :  { %14566 = vmatpush3.bf16.msra.mxu0 %v4660_v3  ;;  %14505 = vmatprep.mubr.msk.bf16.mxu0 %vm123_vm1, %v17116_v53  ;;  %v11189_v53 = vld [vmem:[%s21718_s12 + $0xb8] sm:$0xff]  ;;  %21980 = vst [vmem:[#allocation27_spill] sm:$0xff] %v17544_v45  ;;  %v11218_v3 = vld [vmem:[%s21718_s12 + $0x1a0] sm:$0xff] }
 0x365   :  { %11337 = vperm.xlu1 %16343, %v11187_v29   ;;  %v328_v29 = vld [vmem:[#allocation2 + $0x131] sm:$0xff] }
 0x366   :  { %v373_v17 = vpack.c.bf16 %v329_v36, %v328_v29  ;;  %v11229_v29 = vld [vmem:[%s21718_s12 + $0x1f8] sm:$0xff] }
 0x367   :  { %v3965_v36 = vld [vmem:[#allocation2 + $0x1b1] sm:$0xff] }
 0x369   :  { %11347 = vperm.xlu1 %16343, %v11189_v53   ;;  %v3955_v53 = vld [vmem:[#allocation2 + $0x161] sm:$0xff] }
 0x36a   :  { %v3999_v23 = vpack.c.bf16 %v3956_v35, %v3955_v53  ;;  %v3966_v53 = vld [vmem:[#allocation2 + $0x1b9] sm:$0xff]  ;;  %v3967_v35 = vld [vmem:[#allocation2 + $0x1c1] sm:$0xff] }
 0x36b   :  { %14506 = vmatmul.mubr.msk.bf16.gmra.mrb[4].mxu0 %vm123_vm1, %v17118_v54  ;;  %v17409_v54 = vpop.permute.xlu1 %5167 }
 0x36c   :  { %14509 = vmatprep.mubr.msk.bf16.mxu0 %vm123_vm1, %v17124_v13  ;;  %21963 = vst [vmem:[#allocation10_spill] sm:$0xff] %v17409_v54  ;;  %v11193_v13 = vld [vmem:[%s21718_s12 + $0xd8] sm:$0xff] }
 0x36d   :  { %11357 = vperm.xlu1 %16343, %v11191_v37  }
 0x36f   :  { %v17426_v38 = vpop.permute.xlu1 %5177 }
 0x370   :  { %21965 = vst [vmem:[#allocation12_spill] sm:$0xff] %v17426_v38 }
 0x371   :  { %11367 = vperm.xlu1 %16343, %v11193_v13   ;;  %v11219_v13 = vld [vmem:[%s21718_s12 + $0x1a8] sm:$0xff] }
 0x373   :  { %14510 = vmatmul.mubr.msk.bf16.gmra.mrb[8].mxu0 %vm123_vm1, %v17126_v14  ;;  %v11196_v14 = vld [vmem:[%s21718_s12 + $0xf0] sm:$0xff] }
 0x374   :  { %14513 = vmatprep.mubr.msk.bf16.mxu0 %vm123_vm1, %v17132_v42  ;;  %11382 = vperm.xlu0 %16342, %v11196_v14   ;;  %v17438_v42 = vpop.permute.xlu1 %5187  ;;  %v3957_v14 = vld [vmem:[#allocation2 + $0x171] sm:$0xff] }
 0x375   :  { %11377 = vperm.xlu1 %16343, %v11195_v41   ;;  %21967 = vst [vmem:[#allocation14_spill] sm:$0xff] %v17438_v42  ;;  %v17565_v41 = vpop.permute.xlu0 %5262 }
 0x376   :  { %21982 = vst [vmem:[#allocation29_spill] sm:$0xff] %v17565_v41 }
 0x378   :  { %11392 = vperm.xlu0 %16342, %v11198_v47   ;;  %v17456_v21 = vpop.permute.xlu1 %5197 }
 0x379   :  { %11387 = vperm.xlu1 %16343, %v11197_v58   ;;  %21969 = vst [vmem:[#allocation16_spill] sm:$0xff] %v17456_v21  ;;  %v3958_v58 = vld [vmem:[#allocation2 + $0x179] sm:$0xff] }
 0x37b   :  { %14514 = vmatmul.mubr.msk.bf16.gmra.mrb[12].mxu0 %vm123_vm1, %v17134_v56  ;;  %v11199_v56 = vld [vmem:[%s21718_s12 + $0x108] sm:$0xff] }
 0x37c   :  { %14517 = vmatprep.mubr.msk.bf16.mxu0 %vm123_vm1, %v17140_v49  ;;  %11402 = vperm.xlu0 %16342, %v11200_v6   ;;  %v11201_v49 = vld [vmem:[%s21718_s12 + $0x118] sm:$0xff]  ;;  %v11222_v6 = vld [vmem:[%s21718_s12 + $0x1c0] sm:$0xff] }
 0x37d   :  { %11397 = vperm.xlu1 %16343, %v11199_v56   ;;  %v11221_v56 = vld [vmem:[%s21718_s12 + $0x1b8] sm:$0xff] }
 0x380   :  { %11412 = vperm.xlu0 %16342, %v11202_v24   ;;  %v331_v24 = vld [vmem:[#allocation2 + $0x149] sm:$0xff] }
 0x381   :  { %11407 = vperm.xlu1 %16343, %v11201_v49   ;;  %v330_v49 = vld [vmem:[#allocation2 + $0x141] sm:$0xff] }
 0x383   :  { %14518 = vmatmul.mubr.msk.bf16.gmra.mrb[16].mxu0 %vm123_vm1, %v17142_v63  ;;  %v17473_v63 = vpop.permute.xlu1 %5207 }
 0x384   :  { %14521 = vmatprep.mubr.msk.bf16.mxu0 %vm123_vm1, %v17148_v5  ;;  %21971 = vst [vmem:[#allocation18_spill] sm:$0xff] %v17473_v63  ;;  %11422 = vperm.xlu0 %16342, %v11204_v44   ;;  %v11205_v5 = vld [vmem:[%s21718_s12 + $0x138] sm:$0xff] }
 0x385   :  { %11417 = vperm.xlu1 %16343, %v11203_v20   ;;  %v332_v20 = vld [vmem:[#allocation2 + $0x151] sm:$0xff]  ;;  %v333_v44 = vld [vmem:[#allocation2 + $0x159] sm:$0xff] }
 0x387   :  { %v17490_v51 = vpop.permute.xlu1 %5217 }
 0x388   :  { %21973 = vst [vmem:[#allocation20_spill] sm:$0xff] %v17490_v51  ;;  %11432 = vperm.xlu0 %16342, %v11206_v50   ;;  %v3960_v50 = vld [vmem:[#allocation2 + $0x189] sm:$0xff] }
 0x389   :  { %11427 = vperm.xlu1 %16343, %v11205_v5   ;;  %v3959_v5 = vld [vmem:[#allocation2 + $0x181] sm:$0xff] }
 0x38b   :  { %14522 = vmatmul.mubr.msk.bf16.gmra.mrb[20].mxu0 %vm123_vm1, %v17150_v11  ;;  %v11208_v11 = vld [vmem:[%s21718_s12 + $0x150] sm:$0xff] }
 0x38c   :  { %14525 = vmatprep.mubr.msk.bf16.mxu0 %vm123_vm1, %v17156_v34  ;;  %11442 = vperm.xlu0 %16342, %v11208_v11   ;;  %v17502_v34 = vpop.permute.xlu1 %5227  ;;  %v17579_v11 = vpop.permute.xlu0 %5272 }
 0x38d   :  { %11437 = vperm.xlu1 %16343, %v11207_v0   ;;  %21975 = vst [vmem:[#allocation22_spill] sm:$0xff] %v17502_v34  ;;  %v375_v0 = vpack.c.bf16 %v333_v44, %v332_v20  ;;  %21984 = vst [vmem:[#allocation31_spill] sm:$0xff] %v17579_v11  ;;  %v3974_v20 = vld [vmem:[#allocation2 + $0x1f9] sm:$0xff]  ;;  %v3975_v44 = vld [vmem:[#allocation2 + $0x201] sm:$0xff] }
 0x390   :  { %11452 = vperm.xlu0 %16342, %v11210_v12   ;;  %v17520_v27 = vpop.permute.xlu1 %5237  ;;  %v4000_v12 = vpack.c.bf16 %v3958_v58, %v3957_v14  ;;  %v3970_v14 = vld [vmem:[#allocation2 + $0x1d9] sm:$0xff]  ;;  %v3971_v58 = vld [vmem:[#allocation2 + $0x1e1] sm:$0xff] }
 0x391   :  { %11447 = vperm.xlu1 %16343, %v11209_v52   ;;  %21977 = vst [vmem:[#allocation24_spill] sm:$0xff] %v17520_v27  ;;  %v11223_v52 = vld [vmem:[%s21718_s12 + $0x1c8] sm:$0xff] }
 0x393   :  { %14526 = vmatmul.mubr.msk.bf16.gmra.mrb[24].mxu0 %vm123_vm1, %v17158_v40  ;;  %v11211_v40 = vld [vmem:[%s21718_s12 + $0x168] sm:$0xff] }
 0x394   :  { %14529 = vmatprep.mubr.msk.bf16.mxu0 %vm123_vm1, %v17164_v60  ;;  %11462 = vperm.xlu0 %16342, %v11212_v26   ;;  %v11213_v60 = vld [vmem:[%s21718_s12 + $0x178] sm:$0xff]  ;;  %v17537_v30 = vpop.permute.xlu1 %5247  ;;  %v4001_v26 = vpack.c.bf16 %v3960_v50, %v3959_v5  ;;  %v3976_v5 = vld [vmem:[#allocation2 + $0x209] sm:$0xff] }
 0x395   :  { %11457 = vperm.xlu1 %16343, %v11211_v40   ;;  %21979 = vst [vmem:[#allocation26_spill] sm:$0xff] %v17537_v30  ;;  %v11224_v40 = vld [vmem:[%s21718_s12 + $0x1d0] sm:$0xff] }
 0x398   :  { %11472 = vperm.xlu0 %16342, %v11214_v39   ;;  %v17556_v37 = vpop.permute.xlu1 %5257  ;;  %v11225_v39 = vld [vmem:[%s21718_s12 + $0x1d8] sm:$0xff] }
 0x399   :  { %11467 = vperm.xlu1 %16343, %v11213_v60   ;;  %21981 = vst [vmem:[#allocation28_spill] sm:$0xff] %v17556_v37 }
 0x39b   :  { %14530 = vmatmul.mubr.msk.bf16.gmra.mrb[28].mxu0 %vm123_vm1, %v17166_v4  ;;  %v371_v4 = vpack.c.bf16 %v325_v8, %v324_v7  ;;  %v3962_v7 = vld [vmem:[#allocation2 + $0x199] sm:$0xff]  ;;  %v17600_v8 = vpop.permute.xlu0 %5282 }
 0x39c   :  { %14533 = vmatprep.mubr.msk.bf16.mxu0 %vm123_vm1, %v17172_v32  ;;  %v11216_v32 = vld [vmem:[%s21718_s12 + $0x190] sm:$0xff]  ;;  %v17570_v47 = vpop.permute.xlu1 %5267  ;;  %21986 = vst [vmem:[#allocation33_spill] sm:$0xff] %v17600_v8 }
 0x39d   :  { %14072 = vmatmul.mubr.msk.bf16.vlgmr.msra.gmra.mrb[0].mxu1 %vm123_vm1, %v371_v4  ;;  %11477 = vperm.xlu1 %16343, %v11215_v10   ;;  %21983 = vst [vmem:[#allocation30_spill] sm:$0xff] %v17570_v47  ;;  %v3964_v4 = vld [vmem:[#allocation2 + $0x1a9] sm:$0xff] }
 0x39e   :  { %11482 = vperm.xlu0 %16342, %v11216_v32   ;;  %v11227_v10 = vld [vmem:[%s21718_s12 + $0x1e8] sm:$0xff]  ;;  %v4002_v32 = vpack.c.bf16 %v3962_v7, %v3961_v57  ;;  %v4468_v57 = vld [vmem:[#allocation2 + $0x3a] sm:$0xff] }
 0x39f   :  { %v4469_v7 = vld [vmem:[#allocation2 + $0x42] sm:$0xff] }
 0x3a0   :  { %v17589_v60 = vpop.permute.xlu1 %5277 }
 0x3a1   :  { %11487 = vperm.xlu1 %16343, %v11217_v48   ;;  %21985 = vst [vmem:[#allocation32_spill] sm:$0xff] %v17589_v60 }
 0x3a2   :  { %11492 = vperm.xlu0 %16342, %v11218_v3   ;;  %v11228_v3 = vld [vmem:[%s21718_s12 + $0x1f0] sm:$0xff] }
 0x3a3   :  { %14534 = vmatmul.mubr.msk.bf16.gmra.mrb[32].mxu0 %vm123_vm1, %v17174_v19  ;;  %v372_v19 = vpack.c.bf16 %v327_v9, %v326_v28  ;;  %v4003_v28 = vpack.c.bf16 %v3964_v4, %v3963_v25  ;;  %v17612_v9 = vpop.permute.xlu0 %5292  ;;  %v4470_v25 = vld [vmem:[#allocation2 + $0x4a] sm:$0xff] }
 0x3a4   :  { %14537 = vmatprep.mubr.msk.bf16.mxu0 %vm123_vm1, %v17180_v61  ;;  %v11220_v61 = vld [vmem:[%s21718_s12 + $0x1b0] sm:$0xff]  ;;  %v17605_v48 = vpop.permute.xlu1 %5287  ;;  %21988 = vst [vmem:[#allocation35_spill] sm:$0xff] %v17612_v9 }
 0x3a5   :  { %14075 = vmatprep.mubr.msk.bf16.mxu1 %vm123_vm1, %v372_v19  ;;  %11497 = vperm.xlu1 %16343, %v11219_v13   ;;  %21987 = vst [vmem:[#allocation34_spill] sm:$0xff] %v17605_v48  ;;  %v3968_v19 = vld [vmem:[#allocation2 + $0x1c9] sm:$0xff]  ;;  %v4004_v13 = vpack.c.bf16 %v3966_v53, %v3965_v36 }
 0x3a6   :  { %14076 = vmatmul.mubr.msk.bf16.gmra.mrb[4].mxu1 %vm123_vm1, %v373_v17  ;;  %11502 = vperm.xlu0 %16342, %v11220_v61   ;;  %v4005_v61 = vpack.c.bf16 %v3968_v19, %v3967_v35  ;;  %v4475_v35 = vld [vmem:[#allocation2 + $0x72] sm:$0xff]  ;;  %v4476_v19 = vld [vmem:[#allocation2 + $0x7a] sm:$0xff] }
 0x3a8   :  { %v17619_v17 = vpop.permute.xlu1 %5297 }
 0x3a9   :  { %11507 = vperm.xlu1 %16343, %v11221_v56   ;;  %21989 = vst [vmem:[#allocation36_spill] sm:$0xff] %v17619_v17  ;;  %v3972_v56 = vld [vmem:[#allocation2 + $0x1e9] sm:$0xff] }
 0x3aa   :  { %11512 = vperm.xlu0 %16342, %v11222_v6  }
 0x3ab   :  { %14538 = vmatmul.mubr.msk.bf16.gmra.mrb[36].mxu0 %vm123_vm1, %v17182_v62  ;;  %v374_v62 = vpack.c.bf16 %v331_v24, %v330_v49  ;;  %v4007_v49 = vpack.c.bf16 %v3972_v56, %v3971_v58  ;;  %v3973_v24 = vld [vmem:[#allocation2 + $0x1f1] sm:$0xff]  ;;  %v4480_v56 = vld [vmem:[#allocation2 + $0x9a] sm:$0xff] }
 0x3ac   :  { %14541 = vmatprep.mubr.msk.bf16.mxu0 %vm123_vm1, %v3999_v23  ;;  %v4008_v50 = vpack.c.bf16 %v3974_v20, %v3973_v24  ;;  %v4479_v58 = vld [vmem:[#allocation2 + $0x92] sm:$0xff] }
 0x3ad   :  { %14079 = vmatprep.mubr.msk.bf16.mxu1 %vm123_vm1, %v374_v62  ;;  %11517 = vperm.xlu1 %16343, %v11223_v52   ;;  %v4009_v62 = vpack.c.bf16 %v3976_v5, %v3975_v44  ;;  %v3978_v52 = vld [vmem:[#allocation2 + $0x219] sm:$0xff]  ;;  %v4536_v24 = vpack.c.bf16 %v4480_v56, %v4479_v58 }
 0x3ae   :  { %14080 = vmatmul.mubr.msk.bf16.gmra.mrb[8].mxu1 %vm123_vm1, %v375_v0  ;;  %11522 = vperm.xlu0 %16342, %v11224_v40   ;;  %v3977_v0 = vld [vmem:[#allocation2 + $0x211] sm:$0xff]  ;;  %v4484_v5 = vld [vmem:[#allocation2 + $0xba] sm:$0xff] }
 0x3af   :  { %14083 = vmatprep.mubr.msk.bf16.mxu1 %vm123_vm1, %v3999_v23  ;;  %v3969_v23 = vld [vmem:[#allocation2 + $0x1d1] sm:$0xff] }
 0x3b0   :  { %v4006_v6 = vpack.c.bf16 %v3970_v14, %v3969_v23  ;;  %v4466_v40 = vld [vmem:[#allocation2 + $0x2a] sm:$0xff]  ;;  %v4534_v23 = vpack.c.bf16 %v4476_v19, %v4475_v35  ;;  %v4483_v44 = vld [vmem:[#allocation2 + $0xb2] sm:$0xff] }
 0x3b1   :  { %11527 = vperm.xlu1 %16343, %v11225_v39  }
 0x3b2   :  { %11532 = vperm.xlu0 %16342, %v11226_v43   ;;  %v4467_v43 = vld [vmem:[#allocation2 + $0x32] sm:$0xff] }
 0x3b3   :  { %14542 = vmatmul.mubr.msk.bf16.gmra.mrb[40].mxu0 %vm123_vm1, %v4000_v12  ;;  %v4530_v4 = vpack.c.bf16 %v4468_v57, %v4467_v43 }
 0x3b4   :  { %14545 = vmatprep.mubr.msk.bf16.mxu0 %vm123_vm1, %v4001_v26 }
 0x3b5   :  { %11537 = vperm.xlu1 %16343, %v11227_v10   ;;  %v4531_v10 = vpack.c.bf16 %v4470_v25, %v4469_v7  ;;  %v4491_v7 = vld [vmem:[#allocation2 + $0xf2] sm:$0xff]  ;;  %v4492_v25 = vld [vmem:[#allocation2 + $0xfa] sm:$0xff] }
 0x3b6   :  { %14084 = vmatmul.mubr.msk.bf16.gmra.mrb[12].mxu1 %vm123_vm1, %v4000_v12  ;;  %11542 = vperm.xlu0 %16342, %v11228_v3   ;;  %v4465_v12 = vld [vmem:[#allocation2 + $0x22] sm:$0xff]  ;;  %v4472_v3 = vld [vmem:[#allocation2 + $0x5a] sm:$0xff] }
 0x3b7   :  { %14087 = vmatprep.mubr.msk.bf16.mxu1 %vm123_vm1, %v4001_v26  ;;  %v4010_v26 = vpack.c.bf16 %v3978_v52, %v3977_v0  ;;  %v4529_v39 = vpack.c.bf16 %v4466_v40, %v4465_v12  ;;  %v4538_v0 = vpack.c.bf16 %v4484_v5, %v4483_v44  ;;  %v4487_v12 = vld [vmem:[#allocation2 + $0xd2] sm:$0xff]  ;;  %v4488_v40 = vld [vmem:[#allocation2 + $0xda] sm:$0xff] }
 0x3b8   :  { %v4540_v43 = vpack.c.bf16 %v4488_v40, %v4487_v12 }
 0x3b9   :  { %11547 = vperm.xlu1 %16343, %v11229_v29   ;;  %v4474_v29 = vld [vmem:[#allocation2 + $0x6a] sm:$0xff] }
 0x3bb   :  { %14546 = vmatmul.mubr.msk.bf16.gmra.mrb[44].mxu0 %vm123_vm1, %v4002_v32 }
 0x3bc   :  { %14549 = vmatprep.mubr.msk.bf16.mxu0 %vm123_vm1, %v4003_v28 }
 0x3be   :  { %14088 = vmatmul.mubr.msk.bf16.gmra.mrb[16].mxu1 %vm123_vm1, %v4002_v32  ;;  %v4471_v32 = vld [vmem:[#allocation2 + $0x52] sm:$0xff] }
 0x3bf   :  { %14091 = vmatprep.mubr.msk.bf16.mxu1 %vm123_vm1, %v4003_v28  ;;  %v4473_v28 = vld [vmem:[#allocation2 + $0x62] sm:$0xff]  ;;  %v4532_v36 = vpack.c.bf16 %v4472_v3, %v4471_v32  ;;  %v4542_v32 = vpack.c.bf16 %v4492_v25, %v4491_v7 }
 0x3c0   :  { %v4533_v53 = vpack.c.bf16 %v4474_v29, %v4473_v28  ;;  %v4495_v28 = vld [vmem:[#allocation2 + $0x112] sm:$0xff]  ;;  %v4496_v29 = vld [vmem:[#allocation2 + $0x11a] sm:$0xff] }
 0x3c1   :  { %v4544_v35 = vpack.c.bf16 %v4496_v29, %v4495_v28  ;;  %v4518_v28 = vld [vmem:[#allocation2 + $0x1ca] sm:$0xff] }
 0x3c3   :  { %14550 = vmatmul.mubr.msk.bf16.gmra.mrb[48].mxu0 %vm123_vm1, %v4004_v13 }
 0x3c4   :  { %14553 = vmatprep.mubr.msk.bf16.mxu0 %vm123_vm1, %v4005_v61 }
 0x3c6   :  { %14092 = vmatmul.mubr.msk.bf16.gmra.mrb[20].mxu1 %vm123_vm1, %v4004_v13  ;;  %v4477_v13 = vld [vmem:[#allocation2 + $0x82] sm:$0xff] }
 0x3c7   :  { %14095 = vmatprep.mubr.msk.bf16.mxu1 %vm123_vm1, %v4005_v61  ;;  %v4478_v61 = vld [vmem:[#allocation2 + $0x8a] sm:$0xff] }
 0x3c8   :  { %v4535_v14 = vpack.c.bf16 %v4478_v61, %v4477_v13  ;;  %v4499_v13 = vld [vmem:[#allocation2 + $0x132] sm:$0xff]  ;;  %v4500_v61 = vld [vmem:[#allocation2 + $0x13a] sm:$0xff] }
 0x3c9   :  { %v4546_v58 = vpack.c.bf16 %v4500_v61, %v4499_v13  ;;  %v4522_v13 = vld [vmem:[#allocation2 + $0x1ea] sm:$0xff] }
 0x3cb   :  { %14554 = vmatmul.mubr.msk.bf16.gmra.mrb[52].mxu0 %vm123_vm1, %v4006_v6 }
 0x3cc   :  { %14557 = vmatprep.mubr.msk.bf16.mxu0 %vm123_vm1, %v4007_v49 }
 0x3ce   :  { %14096 = vmatmul.mubr.msk.bf16.gmra.mrb[24].mxu1 %vm123_vm1, %v4006_v6  ;;  %v4481_v6 = vld [vmem:[#allocation2 + $0xa2] sm:$0xff] }
 0x3cf   :  { %14099 = vmatprep.mubr.msk.bf16.mxu1 %vm123_vm1, %v4007_v49  ;;  %v4482_v49 = vld [vmem:[#allocation2 + $0xaa] sm:$0xff] }
 0x3d0   :  { %v4537_v20 = vpack.c.bf16 %v4482_v49, %v4481_v6  ;;  %v4503_v6 = vld [vmem:[#allocation2 + $0x152] sm:$0xff]  ;;  %v4504_v49 = vld [vmem:[#allocation2 + $0x15a] sm:$0xff] }
 0x3d1   :  { %v4548_v44 = vpack.c.bf16 %v4504_v49, %v4503_v6  ;;  %v4526_v6 = vld [vmem:[#allocation2 + $0x20a] sm:$0xff] }
 0x3d3   :  { %14558 = vmatmul.mubr.msk.bf16.gmra.mrb[56].mxu0 %vm123_vm1, %v4008_v50 }
 0x3d4   :  { %14561 = vmatprep.mubr.msk.bf16.mxu0 %vm123_vm1, %v4009_v62  ;;  %v4486_v62 = vld [vmem:[#allocation2 + $0xca] sm:$0xff] }
 0x3d6   :  { %14100 = vmatmul.mubr.msk.bf16.gmra.mrb[28].mxu1 %vm123_vm1, %v4008_v50  ;;  %v4485_v50 = vld [vmem:[#allocation2 + $0xc2] sm:$0xff] }
 0x3d7   :  { %v4539_v52 = vpack.c.bf16 %v4486_v62, %v4485_v50  ;;  %v4507_v50 = vld [vmem:[#allocation2 + $0x172] sm:$0xff]  ;;  %v4508_v62 = vld [vmem:[#allocation2 + $0x17a] sm:$0xff] }
 0x3d8   :  { %v4550_v12 = vpack.c.bf16 %v4508_v62, %v4507_v50 }
 0x3db   :  { %14562 = vmatmul.mubr.msk.bf16.gmra.mrb[60].mxu0 %vm123_vm1, %v4010_v26  ;;  %v4489_v26 = vld [vmem:[#allocation2 + $0xe2] sm:$0xff] }
 0x3dc   :  { %14567 = vmatprep.mubr.msk.bf16.mxu0 %vm123_vm1, %v4529_v39  ;;  %v4490_v39 = vld [vmem:[#allocation2 + $0xea] sm:$0xff] }
 0x3dd   :  { %v4541_v57 = vpack.c.bf16 %v4490_v39, %v4489_v26  ;;  %v4511_v26 = vld [vmem:[#allocation2 + $0x192] sm:$0xff]  ;;  %v4512_v39 = vld [vmem:[#allocation2 + $0x19a] sm:$0xff] }
 0x3de   :  { %v4552_v7 = vpack.c.bf16 %v4512_v39, %v4511_v26 }
 0x3e3   :  { %14568 = vmatmul.mubr.msk.bf16.vlgmr.msra.gmra.mrb[0].mxu0 %vm123_vm1, %v4530_v4  ;;  %v4493_v4 = vld [vmem:[#allocation2 + $0x102] sm:$0xff] }
 0x3e4   :  { %14571 = vmatprep.mubr.msk.bf16.mxu0 %vm123_vm1, %v4531_v10  ;;  %v4494_v10 = vld [vmem:[#allocation2 + $0x10a] sm:$0xff] }
 0x3e5   :  { %v4543_v3 = vpack.c.bf16 %v4494_v10, %v4493_v4  ;;  %v21990_v4 = vmov 0.0   ;;  %v4515_v10 = vld [vmem:[#allocation2 + $0x1b2] sm:$0xff] }
 0x3e6   :  { %6268 = vst.msk [vmem:[#allocation3 + $0x200] sm:$0xff] %vm5534_vm2, %v21990_v4  ;;  %6269 = vst.msk [vmem:[#allocation3 + $0x208] sm:$0xff] %vm5534_vm2, %v21990_v4 }
 0x3e7   :  { %6270 = vst.msk [vmem:[#allocation3 + $0x210] sm:$0xff] %vm5534_vm2, %v21990_v4  ;;  %6271 = vst.msk [vmem:[#allocation3 + $0x218] sm:$0xff] %vm5534_vm2, %v21990_v4 }
 0x3e8   :  { %6272 = vst.msk [vmem:[#allocation3 + $0x220] sm:$0xff] %vm5534_vm2, %v21990_v4 }
 0x3eb   :  { %14572 = vmatmul.mubr.msk.bf16.gmra.mrb[4].mxu0 %vm123_vm1, %v4532_v36  ;;  %v4497_v36 = vld [vmem:[#allocation2 + $0x122] sm:$0xff] }
 0x3ec   :  { %14575 = vmatprep.mubr.msk.bf16.mxu0 %vm123_vm1, %v4533_v53  ;;  %v4498_v53 = vld [vmem:[#allocation2 + $0x12a] sm:$0xff] }
 0x3ed   :  { %v4545_v19 = vpack.c.bf16 %v4498_v53, %v4497_v36  ;;  %v4519_v53 = vld [vmem:[#allocation2 + $0x1d2] sm:$0xff] }
 0x3f3   :  { %14576 = vmatmul.mubr.msk.bf16.gmra.mrb[8].mxu0 %vm123_vm1, %v4534_v23  ;;  %v4501_v23 = vld [vmem:[#allocation2 + $0x142] sm:$0xff] }
 0x3f4   :  { %14579 = vmatprep.mubr.msk.bf16.mxu0 %vm123_vm1, %v4535_v14  ;;  %v4502_v14 = vld [vmem:[#allocation2 + $0x14a] sm:$0xff] }
 0x3f5   :  { %v4547_v56 = vpack.c.bf16 %v4502_v14, %v4501_v23  ;;  %v4523_v14 = vld [vmem:[#allocation2 + $0x1f2] sm:$0xff] }
 0x3fb   :  { %14580 = vmatmul.mubr.msk.bf16.gmra.mrb[12].mxu0 %vm123_vm1, %v4536_v24  ;;  %v4505_v24 = vld [vmem:[#allocation2 + $0x162] sm:$0xff] }
 0x3fc   :  { %14583 = vmatprep.mubr.msk.bf16.mxu0 %vm123_vm1, %v4537_v20  ;;  %v4506_v20 = vld [vmem:[#allocation2 + $0x16a] sm:$0xff] }
 0x3fd   :  { %v4549_v5 = vpack.c.bf16 %v4506_v20, %v4505_v24  ;;  %v4527_v20 = vld [vmem:[#allocation2 + $0x212] sm:$0xff] }
 0x403   :  { %14584 = vmatmul.mubr.msk.bf16.gmra.mrb[16].mxu0 %vm123_vm1, %v4538_v0  ;;  %v4509_v0 = vld [vmem:[#allocation2 + $0x182] sm:$0xff] }
 0x404   :  { %14587 = vmatprep.mubr.msk.bf16.mxu0 %vm123_vm1, %v4539_v52  ;;  %v4510_v52 = vld [vmem:[#allocation2 + $0x18a] sm:$0xff] }
 0x405   :  { %v4551_v40 = vpack.c.bf16 %v4510_v52, %v4509_v0 }
 0x40b   :  { %14588 = vmatmul.mubr.msk.bf16.gmra.mrb[20].mxu0 %vm123_vm1, %v4540_v43  ;;  %v4513_v43 = vld [vmem:[#allocation2 + $0x1a2] sm:$0xff] }
 0x40c   :  { %14591 = vmatprep.mubr.msk.bf16.mxu0 %vm123_vm1, %v4541_v57  ;;  %v4514_v57 = vld [vmem:[#allocation2 + $0x1aa] sm:$0xff] }
 0x40d   :  { %v4553_v25 = vpack.c.bf16 %v4514_v57, %v4513_v43 }
 0x413   :  { %14592 = vmatmul.mubr.msk.bf16.gmra.mrb[24].mxu0 %vm123_vm1, %v4542_v32  ;;  %v4516_v32 = vld [vmem:[#allocation2 + $0x1ba] sm:$0xff] }
 0x414   :  { %14595 = vmatprep.mubr.msk.bf16.mxu0 %vm123_vm1, %v4543_v3  ;;  %v4517_v3 = vld [vmem:[#allocation2 + $0x1c2] sm:$0xff]  ;;  %v4554_v29 = vpack.c.bf16 %v4516_v32, %v4515_v10 }
 0x415   :  { %v4555_v36 = vpack.c.bf16 %v4518_v28, %v4517_v3 }
 0x41b   :  { %14596 = vmatmul.mubr.msk.bf16.gmra.mrb[28].mxu0 %vm123_vm1, %v4544_v35  ;;  %v4520_v35 = vld [vmem:[#allocation2 + $0x1da] sm:$0xff] }
 0x41c   :  { %14599 = vmatprep.mubr.msk.bf16.mxu0 %vm123_vm1, %v4545_v19  ;;  %v4521_v19 = vld [vmem:[#allocation2 + $0x1e2] sm:$0xff]  ;;  %v4556_v61 = vpack.c.bf16 %v4520_v35, %v4519_v53 }
 0x41d   :  { %v4557_v23 = vpack.c.bf16 %v4522_v13, %v4521_v19 }
 0x423   :  { %14600 = vmatmul.mubr.msk.bf16.gmra.mrb[32].mxu0 %vm123_vm1, %v4546_v58  ;;  %v4524_v58 = vld [vmem:[#allocation2 + $0x1fa] sm:$0xff] }
 0x424   :  { %14603 = vmatprep.mubr.msk.bf16.mxu0 %vm123_vm1, %v4547_v56  ;;  %v4525_v56 = vld [vmem:[#allocation2 + $0x202] sm:$0xff]  ;;  %v4558_v49 = vpack.c.bf16 %v4524_v58, %v4523_v14 }
 0x425   :  { %v4559_v24 = vpack.c.bf16 %v4526_v6, %v4525_v56 }
 0x42b   :  { %14604 = vmatmul.mubr.msk.bf16.gmra.mrb[36].mxu0 %vm123_vm1, %v4548_v44  ;;  %v4528_v44 = vld [vmem:[#allocation2 + $0x21a] sm:$0xff] }
 0x42c   :  { %14607 = vmatprep.mubr.msk.bf16.mxu0 %vm123_vm1, %v4549_v5  ;;  %v4560_v5 = vpack.c.bf16 %v4528_v44, %v4527_v20  ;;  %v17744_v44 = vld [vmem:[%s21708_s2] ss:$0 sm:$0xff] }
 0x433   :  { %14608 = vmatmul.mubr.msk.bf16.gmra.mrb[40].mxu0 %vm123_vm1, %v4550_v12 }
 0x434   :  { %14611 = vmatprep.mubr.msk.bf16.mxu0 %vm123_vm1, %v4551_v40 }
 0x43b   :  { %14612 = vmatmul.mubr.msk.bf16.gmra.mrb[44].mxu0 %vm123_vm1, %v4552_v7 }
 0x43c   :  { %14615 = vmatprep.mubr.msk.bf16.mxu0 %vm123_vm1, %v4553_v25 }
 0x443   :  { %14616 = vmatmul.mubr.msk.bf16.gmra.mrb[48].mxu0 %vm123_vm1, %v4554_v29 }
 0x444   :  { %14619 = vmatprep.mubr.msk.bf16.mxu0 %vm123_vm1, %v4555_v36 }
 0x44b   :  { %14620 = vmatmul.mubr.msk.bf16.gmra.mrb[52].mxu0 %vm123_vm1, %v4556_v61 }
 0x44c   :  { %14623 = vmatprep.mubr.msk.bf16.mxu0 %vm123_vm1, %v4557_v23 }
 0x453   :  { %14624 = vmatmul.mubr.msk.bf16.gmra.mrb[56].mxu0 %vm123_vm1, %v4558_v49 }
 0x454   :  { %14627 = vmatprep.mubr.msk.bf16.mxu0 %vm123_vm1, %v4559_v24 }
 0x45b   :  { %14628 = vmatmul.mubr.msk.bf16.gmra.mrb[60].mxu0 %vm123_vm1, %v4560_v5 }
 0x470   :  { %v17677_v50 = vpop.f32.mrb[0].mxu1 }
 0x471   :  { %v17679_v62 = vpop.f32.mrb[1].mxu1 }
 0x472   :  { %v17681_v0 = vpop.f32.mrb[2].mxu1 }
 0x473   :  { %v17683_v52 = vpop.f32.mrb[3].mxu1 }
 0x479   :  { %v17685_v12 = vpop.f32.mrb[4].mxu1 }
 0x47a   :  { %v17687_v40 = vpop.f32.mrb[5].mxu1 }
 0x47b   :  { %v17689_v26 = vpop.f32.mrb[6].mxu1 }
 0x47c   :  { %v17691_v39 = vpop.f32.mrb[7].mxu1 }
 0x481   :  { %v17693_v43 = vpop.f32.mrb[8].mxu1 }
 0x482   :  { %v17695_v57 = vpop.f32.mrb[9].mxu1 }
 0x483   :  { %v17697_v7 = vpop.f32.mrb[10].mxu1 }
 0x484   :  { %v17699_v25 = vpop.f32.mrb[11].mxu1 }
 0x489   :  { %v17701_v4 = vpop.f32.mrb[12].mxu1 }
 0x48a   :  { %v17703_v10 = vpop.f32.mrb[13].mxu1 }
 0x48b   :  { %v17705_v32 = vpop.f32.mrb[14].mxu1 }
 0x48c   :  { %v17707_v3 = vpop.f32.mrb[15].mxu1 }
 0x491   :  { %v17709_v28 = vpop.f32.mrb[16].mxu1 }
 0x492   :  { %v17711_v29 = vpop.f32.mrb[17].mxu1 }
 0x493   :  { %v17713_v36 = vpop.f32.mrb[18].mxu1 }
 0x494   :  { %v17715_v53 = vpop.f32.mrb[19].mxu1 }
 0x499   :  { %v17717_v35 = vpop.f32.mrb[20].mxu1 }
 0x49a   :  { %21991 = vst [vmem:[#allocation37_spill] sm:$0xff] %v17717_v35  ;;  %v17719_v19 = vpop.f32.mrb[21].mxu1 }
 0x49b   :  { %21992 = vst [vmem:[#allocation38_spill] sm:$0xff] %v17719_v19  ;;  %v17721_v13 = vpop.f32.mrb[22].mxu1 }
 0x49c   :  { %21993 = vst [vmem:[#allocation39_spill] sm:$0xff] %v17721_v13  ;;  %v17723_v61 = vpop.f32.mrb[23].mxu1 }
 0x49d   :  { %21994 = vst [vmem:[#allocation40_spill] sm:$0xff] %v17723_v61 }
 0x4a1   :  { %v17725_v23 = vpop.f32.mrb[24].mxu1 }
 0x4a2   :  { %21995 = vst [vmem:[#allocation41_spill] sm:$0xff] %v17725_v23  ;;  %v17727_v14 = vpop.f32.mrb[25].mxu1 }
 0x4a3   :  { %21996 = vst [vmem:[#allocation42_spill] sm:$0xff] %v17727_v14  ;;  %v17729_v58 = vpop.f32.mrb[26].mxu1 }
 0x4a4   :  { %21997 = vst [vmem:[#allocation43_spill] sm:$0xff] %v17729_v58  ;;  %v17731_v56 = vpop.f32.mrb[27].mxu1 }
 0x4a5   :  { %21998 = vst [vmem:[#allocation44_spill] sm:$0xff] %v17731_v56 }
 0x4a9   :  { %v17733_v6 = vpop.f32.mrb[28].mxu1 }
 0x4aa   :  { %21999 = vst [vmem:[#allocation45_spill] sm:$0xff] %v17733_v6  ;;  %v17735_v49 = vpop.f32.mrb[29].mxu1 }
 0x4ab   :  { %22000 = vst [vmem:[#allocation46_spill] sm:$0xff] %v17735_v49  ;;  %v17737_v24 = vpop.f32.mrb[30].mxu1 }
 0x4ac   :  { %22001 = vst [vmem:[#allocation47_spill] sm:$0xff] %v17737_v24  ;;  %v17739_v20 = vpop.f32.mrb[31].mxu1 }
 0x4ad   :  { %22002 = vst [vmem:[#allocation48_spill] sm:$0xff] %v17739_v20 }
 0x4b6   :  { %v14569_v5 = vpop.f32.mrb[0].mxu0 }
 0x4b7   :  { %v4696_v23 = vpop.f32.mrb[1].mxu0  ;;  %v17747_v14 = vadd.f32 %v14569_v5, %v17744_v44 }
 0x4b8   :  { %v17750_v56 = vadd.f32 %v17744_v44, %v4696_v23  ;;  %v14570_v6 = vpop.f32.mrb[2].mxu0 }
 0x4b9   :  { %22003 = vst [vmem:[#allocation49_spill] sm:$0xff] %v17747_v14  ;;  %v4699_v58 = vpop.f32.mrb[3].mxu0  ;;  %v17755_v20 = vadd.f32 %v14570_v6, %v17744_v44  ;;  %v5472_v61 = vmul.f32 %v17392_v1, %v17747_v14 }
 0x4ba   :  { %22004 = vst [vmem:[#allocation50_spill] sm:$0xff] %v17750_v56  ;;  %v5470_v24 = vmul.f32 %v17384_v33, %v17750_v56  ;;  %v17758_v49 = vadd.f32 %v17744_v44, %v4699_v58 }
 0x4bb   :  { %v5473_v13 = vmul.f32 %v17409_v54, %v17755_v20  ;;  %v5538_v35 = vsel %vm5534_vm2, %v5472_v61, 0.0 }
 0x4bc   :  { %22005 = vst [vmem:[#allocation51_spill] sm:$0xff] %v17758_v49  ;;  %v5471_v5 = vmul.f32 %v17404_v16, %v17758_v49  ;;  %v5535_v23 = vsel %vm5534_vm2, %v5470_v24, 0.0 }
 0x4bd   :  { %v5540_v24 = vsel %vm5534_vm2, %v5473_v13, 0.0 }
 0x4be   :  { %v5536_v19 = vsel %vm5534_vm2, %v5471_v5, 0.0  ;;  %v14573_v33 = vpop.f32.mrb[4].mxu0 }
 0x4bf   :  { %v5537_v56 = vadd.f32 %v5536_v19, %v5535_v23  ;;  %v4712_v6 = vpop.f32.mrb[5].mxu0  ;;  %v17770_v58 = vadd.f32 %v14573_v33, %v17744_v44 }
 0x4c0   :  { %v17773_v1 = vadd.f32 %v17744_v44, %v4712_v6  ;;  %v14574_v14 = vpop.f32.mrb[6].mxu0 }
 0x4c1   :  { %v5539_v16 = vadd.f32 %v5538_v35, %v5537_v56  ;;  %v4715_v49 = vpop.f32.mrb[7].mxu0  ;;  %v17779_v5 = vadd.f32 %v14574_v14, %v17744_v44  ;;  %v5476_v33 = vmul.f32 %v17434_v46, %v17770_v58 }
 0x4c2   :  { %22006 = vst [vmem:[#allocation52_spill] sm:$0xff] %v17773_v1  ;;  %v5474_v54 = vmul.f32 %v17414_v22, %v17773_v1  ;;  %v17782_v19 = vadd.f32 %v17744_v44, %v4715_v49 }
 0x4c3   :  { %v5541_v61 = vadd.f32 %v5540_v24, %v5539_v16  ;;  %v5477_v13 = vmul.f32 %v17438_v42, %v17779_v5  ;;  %v5546_v49 = vsel %vm5534_vm2, %v5476_v33, 0.0 }
 0x4c4   :  { %v5542_v23 = vsel %vm5534_vm2, %v5474_v54, 0.0  ;;  %v5475_v35 = vmul.f32 %v17426_v38, %v17782_v19 }
 0x4c5   :  { %v5543_v56 = vadd.f32 %v5542_v23, %v5541_v61  ;;  %v5548_v61 = vsel %vm5534_vm2, %v5477_v13, 0.0 }
 0x4c6   :  { %v5544_v6 = vsel %vm5534_vm2, %v5475_v35, 0.0  ;;  %v14577_v14 = vpop.f32.mrb[8].mxu0 }
 0x4c7   :  { %v5545_v22 = vadd.f32 %v5544_v6, %v5543_v56  ;;  %v4728_v1 = vpop.f32.mrb[9].mxu0  ;;  %v17794_v16 = vadd.f32 %v14577_v14, %v17744_v44 }
 0x4c8   :  { %v17797_v24 = vadd.f32 %v17744_v44, %v4728_v1  ;;  %v14578_v54 = vpop.f32.mrb[10].mxu0 }
 0x4c9   :  { %v5547_v46 = vadd.f32 %v5546_v49, %v5545_v22  ;;  %v4731_v38 = vpop.f32.mrb[11].mxu0  ;;  %v17803_v35 = vadd.f32 %v14578_v54, %v17744_v44  ;;  %v5480_v6 = vmul.f32 %v17468_v31, %v17794_v16 }
 0x4ca   :  { %v5478_v23 = vmul.f32 %v17448_v59, %v17797_v24  ;;  %v17806_v56 = vadd.f32 %v17744_v44, %v4731_v38 }
 0x4cb   :  { %v5549_v33 = vadd.f32 %v5548_v61, %v5547_v46  ;;  %v5481_v13 = vmul.f32 %v17473_v63, %v17803_v35  ;;  %v5554_v38 = vsel %vm5534_vm2, %v5480_v6, 0.0 }
 0x4cc   :  { %v5550_v1 = vsel %vm5534_vm2, %v5478_v23, 0.0  ;;  %v5479_v22 = vmul.f32 %v17456_v21, %v17806_v56 }
 0x4cd   :  { %v5551_v14 = vadd.f32 %v5550_v1, %v5549_v33  ;;  %v5556_v33 = vsel %vm5534_vm2, %v5481_v13, 0.0 }
 0x4ce   :  { %v5552_v49 = vsel %vm5534_vm2, %v5479_v22, 0.0  ;;  %v14581_v54 = vpop.f32.mrb[12].mxu0 }
 0x4cf   :  { %v5553_v59 = vadd.f32 %v5552_v49, %v5551_v14  ;;  %v4744_v42 = vpop.f32.mrb[13].mxu0  ;;  %v17818_v46 = vadd.f32 %v14581_v54, %v17744_v44  ;;  %v17837_v54 = vpop.permute.xlu0 %5302 }
 0x4d0   :  { %v17821_v61 = vadd.f32 %v17744_v44, %v4744_v42  ;;  %v14582_v23 = vpop.f32.mrb[14].mxu0  ;;  %22009 = vst [vmem:[#allocation55_spill] sm:$0xff] %v17837_v54 }
 0x4d1   :  { %22007 = vst [vmem:[#allocation53_spill] sm:$0xff] %v17818_v46  ;;  %v5555_v31 = vadd.f32 %v5554_v38, %v5553_v59  ;;  %v4747_v21 = vpop.f32.mrb[15].mxu0  ;;  %v17827_v22 = vadd.f32 %v14582_v23, %v17744_v44  ;;  %v5484_v49 = vmul.f32 %v17498_v2, %v17818_v46 }
 0x4d2   :  { %v5482_v1 = vmul.f32 %v17478_v18, %v17821_v61  ;;  %v17830_v14 = vadd.f32 %v17744_v44, %v4747_v21  ;;  %v17842_v21 = vpop.permute.xlu1 %5307 }
 0x4d3   :  { %22008 = vst [vmem:[#allocation54_spill] sm:$0xff] %v17827_v22  ;;  %v5557_v6 = vadd.f32 %v5556_v33, %v5555_v31  ;;  %v5485_v38 = vmul.f32 %v17502_v34, %v17827_v22  ;;  %v5562_v2 = vsel %vm5534_vm2, %v5484_v49, 0.0  ;;  %v17860_v49 = vpop.permute.xlu0 %5312 }
 0x4d4   :  { %v5558_v42 = vsel %vm5534_vm2, %v5482_v1, 0.0  ;;  %v5483_v59 = vmul.f32 %v17490_v51, %v17830_v14  ;;  %22013 = vst [vmem:[#allocation59_spill] sm:$0xff] %v17860_v49 }
 0x4d5   :  { %v5559_v13 = vadd.f32 %v5558_v42, %v5557_v6  ;;  %v5564_v34 = vsel %vm5534_vm2, %v5485_v38, 0.0 }
 0x4d6   :  { %v5560_v23 = vsel %vm5534_vm2, %v5483_v59, 0.0  ;;  %v14585_v18 = vpop.f32.mrb[16].mxu0 }
 0x4d7   :  { %v5561_v31 = vadd.f32 %v5560_v23, %v5559_v13  ;;  %v4760_v33 = vpop.f32.mrb[17].mxu0  ;;  %v17846_v1 = vadd.f32 %v14585_v18, %v17744_v44 }
 0x4d8   :  { %v17849_v51 = vadd.f32 %v17744_v44, %v4760_v33  ;;  %v14586_v46 = vpop.f32.mrb[18].mxu0 }
 0x4d9   :  { %22010 = vst [vmem:[#allocation56_spill] sm:$0xff] %v17846_v1  ;;  %v5563_v6 = vadd.f32 %v5562_v2, %v5561_v31  ;;  %v4763_v42 = vpop.f32.mrb[19].mxu0  ;;  %v17855_v22 = vadd.f32 %v14586_v46, %v17744_v44  ;;  %v5488_v23 = vmul.f32 %v17532_v55, %v17846_v1  ;;  %v17867_v31 = vpop.permute.xlu1 %5317 }
 0x4da   :  { %22011 = vst [vmem:[#allocation57_spill] sm:$0xff] %v17849_v51  ;;  %v5486_v59 = vmul.f32 %v17512_v15, %v17849_v51  ;;  %v17858_v13 = vadd.f32 %v17744_v44, %v4763_v42  ;;  %22014 = vst [vmem:[#allocation60_spill] sm:$0xff] %v17867_v31 }
 0x4db   :  { %22012 = vst [vmem:[#allocation58_spill] sm:$0xff] %v17855_v22  ;;  %v5565_v18 = vadd.f32 %v5564_v34, %v5563_v6  ;;  %v5489_v46 = vmul.f32 %v17537_v30, %v17855_v22  ;;  %v5570_v34 = vsel %vm5534_vm2, %v5488_v23, 0.0 }
 0x4dc   :  { %v5566_v2 = vsel %vm5534_vm2, %v5486_v59, 0.0  ;;  %v5487_v38 = vmul.f32 %v17520_v27, %v17858_v13  ;;  %v17879_v27 = vpop.permute.xlu0 %5322 }
 0x4dd   :  { %v5567_v33 = vadd.f32 %v5566_v2, %v5565_v18  ;;  %22016 = vst [vmem:[#allocation62_spill] sm:$0xff] %v17879_v27  ;;  %v5572_v30 = vsel %vm5534_vm2, %v5489_v46, 0.0 }
 0x4de   :  { %v5568_v42 = vsel %vm5534_vm2, %v5487_v38, 0.0  ;;  %v14589_v15 = vpop.f32.mrb[20].mxu0 }
 0x4df   :  { %v5569_v51 = vadd.f32 %v5568_v42, %v5567_v33  ;;  %v4776_v63 = vpop.f32.mrb[21].mxu0  ;;  %v17874_v6 = vadd.f32 %v14589_v15, %v17744_v44  ;;  %v17890_v15 = vpop.permute.xlu1 %5327 }
 0x4e0   :  { %v17877_v59 = vadd.f32 %v17744_v44, %v4776_v63  ;;  %v14590_v55 = vpop.f32.mrb[22].mxu0 }
 0x4e1   :  { %v5571_v18 = vadd.f32 %v5570_v34, %v5569_v51  ;;  %v4779_v2 = vpop.f32.mrb[23].mxu0  ;;  %v17885_v33 = vadd.f32 %v14590_v55, %v17744_v44  ;;  %v5492_v42 = vmul.f32 %v17565_v41, %v17874_v6 }
 0x4e2   :  { %22015 = vst [vmem:[#allocation61_spill] sm:$0xff] %v17877_v59  ;;  %v5490_v38 = vmul.f32 %v17544_v45, %v17877_v59  ;;  %v17888_v23 = vadd.f32 %v17744_v44, %v4779_v2  ;;  %v17900_v2 = vpop.permute.xlu0 %5332 }
 0x4e3   :  { %v5573_v63 = vadd.f32 %v5572_v30, %v5571_v18  ;;  %v5493_v45 = vmul.f32 %v17570_v47, %v17885_v33  ;;  %22017 = vst [vmem:[#allocation63_spill] sm:$0xff] %v17900_v2  ;;  %v5578_v30 = vsel %vm5534_vm2, %v5492_v42, 0.0 }
 0x4e4   :  { %v5574_v51 = vsel %vm5534_vm2, %v5490_v38, 0.0  ;;  %v5491_v46 = vmul.f32 %v17556_v37, %v17888_v23 }
 0x4e5   :  { %v5575_v34 = vadd.f32 %v5574_v51, %v5573_v63  ;;  %v17909_v63 = vpop.permute.xlu1 %5337 }
 0x4e6   :  { %v5576_v55 = vsel %vm5534_vm2, %v5491_v46, 0.0  ;;  %v14593_v59 = vpop.f32.mrb[24].mxu0  ;;  %22020 = vst [vmem:[#allocation66_spill] sm:$0xff] %v17909_v63  ;;  %v5580_v46 = vsel %vm5534_vm2, %v5493_v45, 0.0 }
 0x4e7   :  { %v5577_v22 = vadd.f32 %v5576_v55, %v5575_v34  ;;  %v4792_v1 = vpop.f32.mrb[25].mxu0  ;;  %v17904_v18 = vadd.f32 %v14593_v59, %v17744_v44 }
 0x4e8   :  { %v17907_v38 = vadd.f32 %v17744_v44, %v4792_v1  ;;  %v14594_v41 = vpop.f32.mrb[26].mxu0 }
 0x4e9   :  { %22018 = vst [vmem:[#allocation64_spill] sm:$0xff] %v17904_v18  ;;  %v5579_v51 = vadd.f32 %v5578_v30, %v5577_v22  ;;  %v4795_v47 = vpop.f32.mrb[27].mxu0  ;;  %v17915_v34 = vadd.f32 %v14594_v41, %v17744_v44  ;;  %v5496_v1 = vmul.f32 %v17600_v8, %v17904_v18  ;;  %v17925_v30 = vpop.permute.xlu0 %5342 }
 0x4ea   :  { %22019 = vst [vmem:[#allocation65_spill] sm:$0xff] %v17907_v38  ;;  %v5494_v37 = vmul.f32 %v17579_v11, %v17907_v38  ;;  %v17918_v42 = vadd.f32 %v17744_v44, %v4795_v47  ;;  %22023 = vst [vmem:[#allocation69_spill] sm:$0xff] %v17925_v30  ;;  %v17930_v47 = vpop.permute.xlu1 %5347 }
 0x4eb   :  { %22021 = vst [vmem:[#allocation67_spill] sm:$0xff] %v17915_v34  ;;  %v5581_v59 = vadd.f32 %v5580_v46, %v5579_v51  ;;  %v5497_v11 = vmul.f32 %v17605_v48, %v17915_v34  ;;  %v5586_v8 = vsel %vm5534_vm2, %v5496_v1, 0.0 }
 0x4ec   :  { %22022 = vst [vmem:[#allocation68_spill] sm:$0xff] %v17918_v42  ;;  %v5582_v55 = vsel %vm5534_vm2, %v5494_v37, 0.0  ;;  %v5495_v22 = vmul.f32 %v17589_v60, %v17918_v42 }
 0x4ed   :  { %v5583_v45 = vadd.f32 %v5582_v55, %v5581_v59  ;;  %v5588_v48 = vsel %vm5534_vm2, %v5497_v11, 0.0 }
 0x4ee   :  { %v5584_v41 = vsel %vm5534_vm2, %v5495_v22, 0.0  ;;  %v14597_v38 = vpop.f32.mrb[28].mxu0 }
 0x4ef   :  { %v5585_v51 = vadd.f32 %v5584_v41, %v5583_v45  ;;  %v4808_v46 = vpop.f32.mrb[29].mxu0  ;;  %v17934_v37 = vadd.f32 %v14597_v38, %v17744_v44  ;;  %v17945_v45 = vpop.permute.xlu0 %5352 }
 0x4f0   :  { %v17937_v60 = vadd.f32 %v17744_v44, %v4808_v46  ;;  %v14598_v18 = vpop.f32.mrb[30].mxu0  ;;  %22026 = vst [vmem:[#allocation72_spill] sm:$0xff] %v17945_v45 }
 0x4f1   :  { %22024 = vst [vmem:[#allocation70_spill] sm:$0xff] %v17934_v37  ;;  %v5587_v59 = vadd.f32 %v5586_v8, %v5585_v51  ;;  %v4811_v55 = vpop.f32.mrb[31].mxu0  ;;  %v5500_v38 = vmul.f32 %v17837_v54, %v17934_v37  ;;  %v17951_v46 = vadd.f32 %v14598_v18, %v17744_v44  ;;  %v17955_v8 = vpop.permute.xlu1 %5357 }
 0x4f2   :  { %22025 = vst [vmem:[#allocation71_spill] sm:$0xff] %v17937_v60  ;;  %v5498_v22 = vmul.f32 %v17612_v9, %v17937_v60  ;;  %v17943_v34 = vadd.f32 %v17744_v44, %v4811_v55  ;;  %22027 = vst [vmem:[#allocation73_spill] sm:$0xff] %v17955_v8 }
 0x4f3   :  { %v5589_v1 = vadd.f32 %v5588_v48, %v5587_v59  ;;  %v5594_v54 = vsel %vm5534_vm2, %v5500_v38, 0.0  ;;  %v17963_v42 = vpop.permute.xlu0 %5362 }
 0x4f4   :  { %v5590_v41 = vsel %vm5534_vm2, %v5498_v22, 0.0  ;;  %v5499_v11 = vmul.f32 %v17619_v17, %v17943_v34  ;;  %v5501_v22 = vmul.f32 %v17842_v21, %v17951_v46  ;;  %22028 = vst [vmem:[#allocation74_spill] sm:$0xff] %v17963_v42 }
 0x4f5   :  { %v5591_v51 = vadd.f32 %v5590_v41, %v5589_v1  ;;  %v17973_v38 = vpop.permute.xlu1 %5367 }
 0x4f6   :  { %v5592_v55 = vsel %vm5534_vm2, %v5499_v11, 0.0  ;;  %v14601_v9 = vpop.f32.mrb[32].mxu0  ;;  %22030 = vst [vmem:[#allocation76_spill] sm:$0xff] %v17973_v38 }
 0x4f7   :  { %v5593_v60 = vadd.f32 %v5592_v55, %v5591_v51  ;;  %v15293_v48 = vadd.f32 %v14601_v9, %v17677_v50  ;;  %v4824_v59 = vpop.f32.mrb[33].mxu0  ;;  %v5596_v51 = vsel %vm5534_vm2, %v5501_v22, 0.0 }
 0x4f8   :  { %v15294_v18 = vadd.f32 %v4824_v59, %v17679_v62  ;;  %v14602_v37 = vpop.f32.mrb[34].mxu0  ;;  %v17989_v59 = vpop.permute.xlu0 %5372 }
 0x4f9   :  { %v5595_v17 = vadd.f32 %v5594_v54, %v5593_v60  ;;  %v15295_v1 = vadd.f32 %v14602_v37, %v17681_v0  ;;  %v4827_v41 = vpop.f32.mrb[35].mxu0  ;;  %v17967_v11 = vadd.f32 %v15293_v48, %v17744_v44  ;;  %22031 = vst [vmem:[#allocation77_spill] sm:$0xff] %v17989_v59 }
 0x4fa   :  { %v17970_v9 = vadd.f32 %v15294_v18, %v17744_v44  ;;  %v15296_v50 = vadd.f32 %v4827_v41, %v17683_v52 }
 0x4fb   :  { %22029 = vst [vmem:[#allocation75_spill] sm:$0xff] %v17967_v11  ;;  %v17979_v60 = vadd.f32 %v15295_v1, %v17744_v44  ;;  %v5597_v54 = vadd.f32 %v5596_v51, %v5595_v17  ;;  %v5504_v37 = vmul.f32 %v17879_v27, %v17967_v11  ;;  %v17996_v27 = vpop.permute.xlu1 %5377 }
 0x4fc   :  { %v5502_v62 = vmul.f32 %v17860_v49, %v17970_v9  ;;  %v17982_v0 = vadd.f32 %v15296_v50, %v17744_v44  ;;  %22032 = vst [vmem:[#allocation78_spill] sm:$0xff] %v17996_v27 }
 0x4fd   :  { %v5505_v41 = vmul.f32 %v17890_v15, %v17979_v60  ;;  %v5602_v11 = vsel %vm5534_vm2, %v5504_v37, 0.0  ;;  %v18016_v37 = vpop.permute.xlu0 %5382 }
 0x4fe   :  { %v5598_v55 = vsel %vm5534_vm2, %v5502_v62, 0.0  ;;  %v5503_v52 = vmul.f32 %v17867_v31, %v17982_v0  ;;  %v14605_v48 = vpop.f32.mrb[36].mxu0  ;;  %22033 = vst [vmem:[#allocation79_spill] sm:$0xff] %v18016_v37 }
 0x4ff   :  { %v5599_v22 = vadd.f32 %v5598_v55, %v5597_v54  ;;  %v15297_v18 = vadd.f32 %v14605_v48, %v17685_v12  ;;  %v4840_v1 = vpop.f32.mrb[37].mxu0 }
 0x500   :  { %v5600_v17 = vsel %vm5534_vm2, %v5503_v52, 0.0  ;;  %v15298_v50 = vadd.f32 %v4840_v1, %v17687_v40  ;;  %v14606_v51 = vpop.f32.mrb[38].mxu0  ;;  %v5604_v40 = vsel %vm5534_vm2, %v5505_v41, 0.0  ;;  %v18023_v41 = vpop.permute.xlu1 %5387 }
 0x501   :  { %v5601_v62 = vadd.f32 %v5600_v17, %v5599_v22  ;;  %v15299_v31 = vadd.f32 %v14606_v51, %v17689_v26  ;;  %v4843_v49 = vpop.f32.mrb[39].mxu0  ;;  %v18001_v54 = vadd.f32 %v15297_v18, %v17744_v44  ;;  %22034 = vst [vmem:[#allocation80_spill] sm:$0xff] %v18023_v41 }
 0x502   :  { %v18004_v12 = vadd.f32 %v15298_v50, %v17744_v44  ;;  %v15300_v55 = vadd.f32 %v4843_v49, %v17691_v39 }
 0x503   :  { %v5603_v52 = vadd.f32 %v5602_v11, %v5601_v62  ;;  %v18011_v22 = vadd.f32 %v15299_v31, %v17744_v44  ;;  %v5508_v1 = vmul.f32 %v17925_v30, %v18001_v54 }
 0x504   :  { %v5506_v48 = vmul.f32 %v17900_v2, %v18004_v12  ;;  %v18014_v26 = vadd.f32 %v15300_v55, %v17744_v44 }
 0x505   :  { %v5605_v18 = vadd.f32 %v5604_v40, %v5603_v52  ;;  %v5509_v51 = vmul.f32 %v17930_v47, %v18011_v22 }
 0x506   :  { %v5606_v39 = vsel %vm5534_vm2, %v5506_v48, 0.0  ;;  %v5507_v49 = vmul.f32 %v17909_v63, %v18014_v26  ;;  %v14609_v11 = vpop.f32.mrb[40].mxu0  ;;  %v5610_v63 = vsel %vm5534_vm2, %v5508_v1, 0.0 }
 0x507   :  { %v5607_v17 = vadd.f32 %v5606_v39, %v5605_v18  ;;  %v15301_v31 = vadd.f32 %v14609_v11, %v17693_v43  ;;  %v4856_v50 = vpop.f32.mrb[41].mxu0  ;;  %v18039_v39 = vpop.permute.xlu0 %5392 }
 0x508   :  { %v5608_v62 = vsel %vm5534_vm2, %v5507_v49, 0.0  ;;  %v15302_v55 = vadd.f32 %v4856_v50, %v17695_v57  ;;  %v14610_v52 = vpop.f32.mrb[42].mxu0  ;;  %22036 = vst [vmem:[#allocation82_spill] sm:$0xff] %v18039_v39  ;;  %v5612_v57 = vsel %vm5534_vm2, %v5509_v51, 0.0 }
 0x509   :  { %v5609_v40 = vadd.f32 %v5608_v62, %v5607_v17  ;;  %v15303_v48 = vadd.f32 %v14610_v52, %v17697_v7  ;;  %v4859_v30 = vpop.f32.mrb[43].mxu0  ;;  %v18033_v2 = vadd.f32 %v15301_v31, %v17744_v44  ;;  %v18050_v17 = vpop.permute.xlu1 %5397 }
 0x50a   :  { %v18036_v43 = vadd.f32 %v15302_v55, %v17744_v44  ;;  %v15304_v18 = vadd.f32 %v4859_v30, %v17699_v25  ;;  %22038 = vst [vmem:[#allocation84_spill] sm:$0xff] %v18050_v17 }
 0x50b   :  { %22035 = vst [vmem:[#allocation81_spill] sm:$0xff] %v18033_v2  ;;  %v5611_v49 = vadd.f32 %v5610_v63, %v5609_v40  ;;  %v18045_v7 = vadd.f32 %v15303_v48, %v17744_v44  ;;  %v5512_v25 = vmul.f32 %v17963_v42, %v18033_v2 }
 0x50c   :  { %v5510_v11 = vmul.f32 %v17945_v45, %v18036_v43  ;;  %v18048_v1 = vadd.f32 %v15304_v18, %v17744_v44 }
 0x50d   :  { %22037 = vst [vmem:[#allocation83_spill] sm:$0xff] %v18045_v7  ;;  %v5613_v31 = vadd.f32 %v5612_v57, %v5611_v49  ;;  %v5513_v52 = vmul.f32 %v17973_v38, %v18045_v7  ;;  %v18062_v49 = vpop.permute.xlu0 %5402 }
 0x50e   :  { %v5614_v30 = vsel %vm5534_vm2, %v5510_v11, 0.0  ;;  %v5511_v63 = vmul.f32 %v17955_v8, %v18048_v1  ;;  %v14613_v50 = vpop.f32.mrb[44].mxu0  ;;  %22039 = vst [vmem:[#allocation85_spill] sm:$0xff] %v18062_v49  ;;  %v5618_v8 = vsel %vm5534_vm2, %v5512_v25, 0.0 }
 0x50f   :  { %v5615_v51 = vadd.f32 %v5614_v30, %v5613_v31  ;;  %v15305_v62 = vadd.f32 %v14613_v50, %v17701_v4  ;;  %v4872_v55 = vpop.f32.mrb[45].mxu0  ;;  %v5620_v50 = vsel %vm5534_vm2, %v5513_v52, 0.0 }
 0x510   :  { %v5616_v40 = vsel %vm5534_vm2, %v5511_v63, 0.0  ;;  %v15306_v48 = vadd.f32 %v4872_v55, %v17703_v10  ;;  %v14614_v18 = vpop.f32.mrb[46].mxu0  ;;  %v18073_v63 = vpop.permute.xlu1 %5407 }
 0x511   :  { %v5617_v57 = vadd.f32 %v5616_v40, %v5615_v51  ;;  %v15307_v11 = vadd.f32 %v14614_v18, %v17705_v32  ;;  %v4875_v42 = vpop.f32.mrb[47].mxu0  ;;  %v18067_v31 = vadd.f32 %v15305_v62, %v17744_v44  ;;  %22042 = vst [vmem:[#allocation88_spill] sm:$0xff] %v18073_v63  ;;  %v18089_v52 = vpop.permute.xlu0 %5412 }
 0x512   :  { %v18070_v4 = vadd.f32 %v15306_v48, %v17744_v44  ;;  %v15308_v30 = vadd.f32 %v4875_v42, %v17707_v3  ;;  %22045 = vst [vmem:[#allocation91_spill] sm:$0xff] %v18089_v52 }
 0x513   :  { %22040 = vst [vmem:[#allocation86_spill] sm:$0xff] %v18067_v31  ;;  %v5619_v10 = vadd.f32 %v5618_v8, %v5617_v57  ;;  %v18079_v32 = vadd.f32 %v15307_v11, %v17744_v44  ;;  %v5516_v55 = vmul.f32 %v18016_v37, %v18067_v31 }
 0x514   :  { %22041 = vst [vmem:[#allocation87_spill] sm:$0xff] %v18070_v4  ;;  %v5514_v51 = vmul.f32 %v17989_v59, %v18070_v4  ;;  %v18082_v25 = vadd.f32 %v15308_v30, %v17744_v44 }
 0x515   :  { %22043 = vst [vmem:[#allocation89_spill] sm:$0xff] %v18079_v32  ;;  %v5621_v62 = vadd.f32 %v5620_v50, %v5619_v10  ;;  %v5517_v57 = vmul.f32 %v18023_v41, %v18079_v32  ;;  %v18096_v50 = vpop.permute.xlu1 %5417  ;;  %v5626_v59 = vsel %vm5534_vm2, %v5516_v55, 0.0  ;;  %v18116_v55 = vpop.permute.xlu0 %5422 }
 0x516   :  { %22044 = vst [vmem:[#allocation90_spill] sm:$0xff] %v18082_v25  ;;  %v5622_v3 = vsel %vm5534_vm2, %v5514_v51, 0.0  ;;  %v5515_v42 = vmul.f32 %v17996_v27, %v18082_v25  ;;  %v14617_v8 = vpop.f32.mrb[48].mxu0  ;;  %22046 = vst [vmem:[#allocation92_spill] sm:$0xff] %v18096_v50 }
 0x517   :  { %v5623_v40 = vadd.f32 %v5622_v3, %v5621_v62  ;;  %v15309_v48 = vadd.f32 %v14617_v8, %v17709_v28  ;;  %v4888_v18 = vpop.f32.mrb[49].mxu0  ;;  %22047 = vst [vmem:[#allocation93_spill] sm:$0xff] %v18116_v55 }
 0x518   :  { %v5624_v11 = vsel %vm5534_vm2, %v5515_v42, 0.0  ;;  %v15310_v30 = vadd.f32 %v4888_v18, %v17711_v29  ;;  %v14618_v10 = vpop.f32.mrb[50].mxu0  ;;  %v5628_v29 = vsel %vm5534_vm2, %v5517_v57, 0.0 }
 0x519   :  { %v5625_v51 = vadd.f32 %v5624_v11, %v5623_v40  ;;  %v15311_v37 = vadd.f32 %v14618_v10, %v17713_v36  ;;  %v4891_v27 = vpop.f32.mrb[51].mxu0  ;;  %v18101_v62 = vadd.f32 %v15309_v48, %v17744_v44  ;;  %v18123_v57 = vpop.permute.xlu1 %5427 }
 0x51a   :  { %v18104_v28 = vadd.f32 %v15310_v30, %v17744_v44  ;;  %v15312_v3 = vadd.f32 %v4891_v27, %v17715_v53  ;;  %22048 = vst [vmem:[#allocation94_spill] sm:$0xff] %v18123_v57 }
 0x51b   :  { %v5627_v42 = vadd.f32 %v5626_v59, %v5625_v51  ;;  %v18111_v40 = vadd.f32 %v15311_v37, %v17744_v44  ;;  %v5520_v18 = vmul.f32 %v18062_v49, %v18101_v62  ;;  %v22049_v37 = vld [vmem:[#allocation37_spill] sm:$0xff] }
 0x51c   :  { %v5518_v8 = vmul.f32 %v18039_v39, %v18104_v28  ;;  %v18114_v36 = vadd.f32 %v15312_v3, %v17744_v44 }
 0x51d   :  { %v5629_v48 = vadd.f32 %v5628_v29, %v5627_v42  ;;  %v5521_v51 = vmul.f32 %v18073_v63, %v18111_v40  ;;  %v22050_v42 = vld [vmem:[#allocation38_spill] sm:$0xff] }
 0x51e   :  { %v5630_v27 = vsel %vm5534_vm2, %v5518_v8, 0.0  ;;  %v5519_v53 = vmul.f32 %v18050_v17, %v18114_v36  ;;  %v14621_v59 = vpop.f32.mrb[52].mxu0  ;;  %v22051_v8 = vld [vmem:[#allocation39_spill] sm:$0xff]  ;;  %v5634_v17 = vsel %vm5534_vm2, %v5520_v18, 0.0 }
 0x51f   :  { %v5631_v11 = vadd.f32 %v5630_v27, %v5629_v48  ;;  %v15313_v30 = vadd.f32 %v14621_v59, %v22049_v37  ;;  %v4904_v10 = vpop.f32.mrb[53].mxu0  ;;  %v22052_v27 = vld [vmem:[#allocation40_spill] sm:$0xff]  ;;  %v18139_v37 = vpop.permute.xlu0 %5432 }
 0x520   :  { %v5632_v3 = vsel %vm5534_vm2, %v5519_v53, 0.0  ;;  %v15314_v29 = vadd.f32 %v4904_v10, %v22050_v42  ;;  %v14622_v49 = vpop.f32.mrb[54].mxu0  ;;  %22053 = vst [vmem:[#allocation37_spill] sm:$0xff] %v18139_v37  ;;  %v5636_v10 = vsel %vm5534_vm2, %v5521_v51, 0.0 }
 0x521   :  { %v5633_v39 = vadd.f32 %v5632_v3, %v5631_v11  ;;  %v15315_v41 = vadd.f32 %v14622_v49, %v22051_v8  ;;  %v4907_v32 = vpop.f32.mrb[55].mxu0  ;;  %v18133_v31 = vadd.f32 %v15313_v30, %v17744_v44  ;;  %v18150_v30 = vpop.permute.xlu1 %5437 }
 0x522   :  { %v18136_v48 = vadd.f32 %v15314_v29, %v17744_v44  ;;  %v15316_v59 = vadd.f32 %v4907_v32, %v22052_v27  ;;  %22054 = vst [vmem:[#allocation38_spill] sm:$0xff] %v18150_v30  ;;  %v22055_v29 = vld [vmem:[#allocation41_spill] sm:$0xff] }
 0x523   :  { %v5635_v53 = vadd.f32 %v5634_v17, %v5633_v39  ;;  %v18145_v49 = vadd.f32 %v15315_v41, %v17744_v44  ;;  %v5524_v32 = vmul.f32 %v18116_v55, %v18133_v31  ;;  %v18162_v63 = vpop.permute.xlu0 %5442 }
 0x524   :  { %v5522_v11 = vmul.f32 %v18089_v52, %v18136_v48  ;;  %v18148_v18 = vadd.f32 %v15316_v59, %v17744_v44  ;;  %v22056_v52 = vld [vmem:[#allocation42_spill] sm:$0xff]  ;;  %22057 = vst [vmem:[#allocation39_spill] sm:$0xff] %v18162_v63 }
 0x525   :  { %v5637_v3 = vadd.f32 %v5636_v10, %v5635_v53  ;;  %v5525_v27 = vmul.f32 %v18123_v57, %v18145_v49 }
 0x526   :  { %v5638_v42 = vsel %vm5534_vm2, %v5522_v11, 0.0  ;;  %v5523_v39 = vmul.f32 %v18096_v50, %v18148_v18  ;;  %v14625_v17 = vpop.f32.mrb[56].mxu0  ;;  %v22058_v11 = vld [vmem:[#allocation43_spill] sm:$0xff]  ;;  %v5642_v50 = vsel %vm5534_vm2, %v5524_v32, 0.0 }
 0x527   :  { %v5639_v51 = vadd.f32 %v5638_v42, %v5637_v3  ;;  %v15317_v8 = vadd.f32 %v14625_v17, %v22055_v29  ;;  %v4920_v41 = vpop.f32.mrb[57].mxu0  ;;  %v22059_v17 = vld [vmem:[#allocation44_spill] sm:$0xff] }
 0x528   :  { %v5640_v59 = vsel %vm5534_vm2, %v5523_v39, 0.0  ;;  %v15318_v53 = vadd.f32 %v4920_v41, %v22056_v52  ;;  %v14626_v10 = vpop.f32.mrb[58].mxu0  ;;  %v18173_v39 = vpop.permute.xlu1 %5447  ;;  %v5644_v41 = vsel %vm5534_vm2, %v5525_v27, 0.0 }
 0x529   :  { %v5641_v55 = vadd.f32 %v5640_v59, %v5639_v51  ;;  %v15319_v38 = vadd.f32 %v14626_v10, %v22058_v11  ;;  %v4923_v25 = vpop.f32.mrb[59].mxu0  ;;  %v18167_v3 = vadd.f32 %v15317_v8, %v17744_v44  ;;  %22060 = vst [vmem:[#allocation40_spill] sm:$0xff] %v18173_v39 }
 0x52a   :  { %v18170_v42 = vadd.f32 %v15318_v53, %v17744_v44  ;;  %v15320_v29 = vadd.f32 %v4923_v25, %v22059_v17  ;;  %v18184_v17 = vpop.permute.xlu0 %5452 }
 0x52b   :  { %v5643_v52 = vadd.f32 %v5642_v50, %v5641_v55  ;;  %v5081_v59 = vadd.f32 %v15319_v38, %v17744_v44  ;;  %v5528_v8 = vmul.f32 %v18162_v63, %v18167_v3  ;;  %22061 = vst [vmem:[#allocation41_spill] sm:$0xff] %v18184_v17  ;;  %v22062_v55 = vld [vmem:[#allocation45_spill] sm:$0xff] }
 0x52c   :  { %v5526_v51 = vmul.f32 %v18139_v37, %v18170_v42  ;;  %v5079_v32 = vadd.f32 %v15320_v29, %v17744_v44  ;;  %v22063_v29 = vld [vmem:[#allocation46_spill] sm:$0xff]  ;;  %v18190_v4 = vpop.permute.xlu1 %5457 }
 0x52d   :  { %v5645_v10 = vadd.f32 %v5644_v41, %v5643_v52  ;;  %v5529_v37 = vmul.f32 %v18173_v39, %v5081_v59  ;;  %22064 = vst [vmem:[#allocation42_spill] sm:$0xff] %v18190_v4  ;;  %v5650_v45 = vsel %vm5534_vm2, %v5528_v8, 0.0 }
 0x52e   :  { %v5646_v53 = vsel %vm5534_vm2, %v5526_v51, 0.0  ;;  %v5527_v25 = vmul.f32 %v18150_v30, %v5079_v32  ;;  %v14629_v11 = vpop.f32.mrb[60].mxu0  ;;  %v22065_v51 = vld [vmem:[#allocation47_spill] sm:$0xff] }
 0x52f   :  { %v5647_v50 = vadd.f32 %v5646_v53, %v5645_v10  ;;  %v15321_v27 = vadd.f32 %v14629_v11, %v22062_v55  ;;  %v4936_v57 = vpop.f32.mrb[61].mxu0  ;;  %v22066_v11 = vld [vmem:[#allocation48_spill] sm:$0xff] }
 0x530   :  { %v5648_v38 = vsel %vm5534_vm2, %v5527_v25, 0.0  ;;  %v15322_v52 = vadd.f32 %v4936_v57, %v22063_v29  ;;  %v14630_v41 = vpop.f32.mrb[62].mxu0  ;;  %v5652_v25 = vsel %vm5534_vm2, %v5529_v37, 0.0 }
 0x531   :  { %v5649_v63 = vadd.f32 %v5648_v38, %v5647_v50  ;;  %v15323_v7 = vadd.f32 %v14630_v41, %v22065_v51  ;;  %v4939_v30 = vpop.f32.mrb[63].mxu0  ;;  %v5084_v10 = vadd.f32 %v15321_v27, %v17744_v44  ;;  %v18201_v38 = vpop.permute.xlu0 %5462 }
 0x532   :  { %v5082_v53 = vadd.f32 %v15322_v52, %v17744_v44  ;;  %v15324_v55 = vadd.f32 %v4939_v30, %v22066_v11  ;;  %22067 = vst [vmem:[#allocation43_spill] sm:$0xff] %v18201_v38  ;;  %v18206_v51 = vpop.permute.xlu1 %5467 }
 0x533   :  { %v5651_v39 = vadd.f32 %v5650_v45, %v5649_v63  ;;  %v5085_v29 = vadd.f32 %v15323_v7, %v17744_v44  ;;  %v5532_v8 = vmul.f32 %v18201_v38, %v5084_v10 }
 0x534   :  { %v5530_v57 = vmul.f32 %v18184_v17, %v5082_v53  ;;  %v5083_v50 = vadd.f32 %v15324_v55, %v17744_v44 }
 0x535   :  { %v5653_v41 = vadd.f32 %v5652_v25, %v5651_v39  ;;  %v5533_v63 = vmul.f32 %v18206_v51, %v5085_v29  ;;  %v5658_v7 = vsel %vm5534_vm2, %v5532_v8, 0.0 }
 0x536   :  { %v5654_v27 = vsel %vm5534_vm2, %v5530_v57, 0.0  ;;  %v5531_v52 = vmul.f32 %v18190_v4, %v5083_v50 }
 0x537   :  { %v5655_v45 = vadd.f32 %v5654_v27, %v5653_v41  ;;  %v5660_v11 = vsel %vm5534_vm2, %v5533_v63, 0.0 }
 0x538   :  { %v5656_v37 = vsel %vm5534_vm2, %v5531_v52, 0.0 }
 0x539   :  { %v5657_v30 = vadd.f32 %v5656_v37, %v5655_v45  ;;  %v22074_v37 = vld [vmem:[#allocation9_spill] sm:$0xff] }
 0x53b   :  { %v5659_v44 = vadd.f32 %v5658_v7, %v5657_v30  ;;  %v22075_v7 = vld [vmem:[#allocation52_spill] sm:$0xff] }
 0x53d   :  { %v5661_v39 = vadd.f32 %v5660_v11, %v5659_v44  ;;  %v22077_v11 = vld [vmem:[#allocation8_spill] sm:$0xff] }
 0x53f   :  { %v5662_v55 = vrot.slane %v5661_v39, 4 }
 0x541   :  { %v5663_v25 = vadd.f32 %v5662_v55, %v5661_v39 }
 0x543   :  { %v5664_v38 = vrot.slane %v5663_v25, 2 }
 0x545   :  { %v5665_v57 = vadd.f32 %v5664_v38, %v5663_v25  ;;  %v22078_v25 = vld [vmem:[#allocation10_spill] sm:$0xff] }
 0x547   :  { %v5666_v17 = vrot.slane %v5665_v57, 1 }
 0x549   :  { %v5667_v4 = vadd.f32 %v5666_v17, %v5665_v57 }
 0x54b   :  { %v18212_v2 = vmul.f32 0.0025510204, %v5667_v4 }
 0x54d   :  { %v18216_v41 = vsub.f32 %v18104_v28, %v18212_v2  ;;  %v18220_v27 = vsub.f32 %v18114_v36, %v18212_v2  ;;  %v18224_v8 = vsub.f32 %v18101_v62, %v18212_v2  ;;  %v18228_v52 = vsub.f32 %v18111_v40, %v18212_v2 }
 0x54e   :  { %v18232_v4 = vsub.f32 %v18136_v48, %v18212_v2  ;;  %v18236_v28 = vsub.f32 %v18148_v18, %v18212_v2  ;;  %v18240_v36 = vsub.f32 %v18133_v31, %v18212_v2  ;;  %v18244_v62 = vsub.f32 %v18145_v49, %v18212_v2 }
 0x54f   :  { %v18248_v40 = vsub.f32 %v18170_v42, %v18212_v2  ;;  %v18251_v17 = vsub.f32 %v5079_v32, %v18212_v2  ;;  %v18255_v48 = vsub.f32 %v18167_v3, %v18212_v2  ;;  %v18258_v18 = vsub.f32 %v5081_v59, %v18212_v2  ;;  %v22068_v32 = vld [vmem:[#allocation50_spill] sm:$0xff]  ;;  %v22069_v3 = vld [vmem:[#allocation51_spill] sm:$0xff] }
 0x550   :  { %v18261_v31 = vsub.f32 %v5082_v53, %v18212_v2  ;;  %v18264_v49 = vsub.f32 %v5083_v50, %v18212_v2  ;;  %v18267_v38 = vsub.f32 %v5084_v10, %v18212_v2  ;;  %v18270_v42 = vsub.f32 %v5085_v29, %v18212_v2  ;;  %v22070_v53 = vld [vmem:[#allocation49_spill] sm:$0xff]  ;;  %v22073_v10 = vld [vmem:[#allocation7_spill] sm:$0xff] }
 0x551   :  { %v18274_v45 = vsub.f32 %v22068_v32, %v18212_v2  ;;  %v18278_v59 = vsub.f32 %v22069_v3, %v18212_v2  ;;  %v18282_v63 = vsub.f32 %v22070_v53, %v18212_v2  ;;  %v18286_v50 = vsub.f32 %v17755_v20, %v18212_v2  ;;  %v22079_v53 = vld [vmem:[#allocation11_spill] sm:$0xff] }
 0x552   :  { %v18294_v44 = vsub.f32 %v22075_v7, %v18212_v2  ;;  %v18300_v55 = vsub.f32 %v17782_v19, %v18212_v2  ;;  %v18306_v3 = vsub.f32 %v17770_v58, %v18212_v2  ;;  %v18312_v7 = vsub.f32 %v17779_v5, %v18212_v2 }
 0x553   :  { %22071 = vst [vmem:[#allocation44_spill] sm:$0xff] %v18282_v63  ;;  %22072 = vst [vmem:[#allocation45_spill] sm:$0xff] %v18286_v50  ;;  %v5733_v29 = vmul.f32 %v18274_v45, %v22073_v10  ;;  %v5734_v30 = vmul.f32 %v18278_v59, %v22074_v37  ;;  %v5735_v39 = vmul.f32 %v18282_v63, %v22077_v11  ;;  %v22080_v11 = vld [vmem:[#allocation12_spill] sm:$0xff] }
 0x554   :  { %22076 = vst [vmem:[#allocation46_spill] sm:$0xff] %v18294_v44  ;;  %v5736_v20 = vmul.f32 %v18286_v50, %v22078_v25  ;;  %v5737_v10 = vmul.f32 %v18294_v44, %v22079_v53  ;;  %v5738_v19 = vmul.f32 %v18300_v55, %v22080_v11  ;;  %v18320_v58 = vsub.f32 %v17797_v24, %v18212_v2  ;;  %v22081_v50 = vld [vmem:[#allocation13_spill] sm:$0xff] }
 0x555   :  { %v5797_v57 = vmul.f32 %v5733_v29, %v5733_v29  ;;  %v5798_v32 = vmul.f32 %v5734_v30, %v5734_v30  ;;  %v5799_v37 = vmul.f32 %v5735_v39, %v5735_v39  ;;  %v5739_v39 = vmul.f32 %v18306_v3, %v22081_v50  ;;  %v22085_v50 = vld [vmem:[#allocation15_spill] sm:$0xff] }
 0x556   :  { %v5800_v63 = vmul.f32 %v5736_v20, %v5736_v20  ;;  %v5801_v53 = vmul.f32 %v5737_v10, %v5737_v10  ;;  %v18327_v11 = vsub.f32 %v17806_v56, %v18212_v2  ;;  %v22083_v20 = vld [vmem:[#allocation14_spill] sm:$0xff]  ;;  %v18334_v24 = vsub.f32 %v17794_v16, %v18212_v2 }
 0x557   :  { %v5861_v25 = vsel %vm5534_vm2, %v5797_v57, 0.0  ;;  %v5862_v29 = vsel %vm5534_vm2, %v5798_v32, 0.0  ;;  %v5864_v5 = vsel %vm5534_vm2, %v5799_v37, 0.0  ;;  %v5740_v57 = vmul.f32 %v18312_v7, %v22083_v20  ;;  %v22087_v20 = vld [vmem:[#allocation16_spill] sm:$0xff] }
 0x558   :  { %v5863_v30 = vadd.f32 %v5862_v29, %v5861_v25  ;;  %22082 = vst [vmem:[#allocation47_spill] sm:$0xff] %v18327_v11  ;;  %v5802_v32 = vmul.f32 %v5738_v19, %v5738_v19  ;;  %v5866_v25 = vsel %vm5534_vm2, %v5800_v63, 0.0  ;;  %22084 = vst [vmem:[#allocation48_spill] sm:$0xff] %v18334_v24  ;;  %v5741_v10 = vmul.f32 %v18320_v58, %v22085_v50  ;;  %v22088_v50 = vld [vmem:[#allocation17_spill] sm:$0xff] }
 0x559   :  { %v5803_v37 = vmul.f32 %v5739_v39, %v5739_v39  ;;  %v18341_v56 = vsub.f32 %v17803_v35, %v18212_v2  ;;  %v5742_v19 = vmul.f32 %v18327_v11, %v22087_v20  ;;  %v5804_v63 = vmul.f32 %v5740_v57, %v5740_v57  ;;  %v22090_v20 = vld [vmem:[#allocation18_spill] sm:$0xff] }
 0x55a   :  { %v5865_v44 = vadd.f32 %v5864_v5, %v5863_v30  ;;  %v5868_v30 = vsel %vm5534_vm2, %v5801_v53, 0.0  ;;  %v18348_v16 = vsub.f32 %v17821_v61, %v18212_v2  ;;  %v5743_v39 = vmul.f32 %v18334_v24, %v22088_v50  ;;  %v22091_v61 = vld [vmem:[#allocation53_spill] sm:$0xff]  ;;  %v22093_v50 = vld [vmem:[#allocation19_spill] sm:$0xff] }
 0x55b   :  { %22086 = vst [vmem:[#allocation50_spill] sm:$0xff] %v18341_v56  ;;  %v5805_v53 = vmul.f32 %v5741_v10, %v5741_v10  ;;  %v18355_v35 = vsub.f32 %v17830_v14, %v18212_v2  ;;  %v5744_v57 = vmul.f32 %v18341_v56, %v22090_v20  ;;  %v18362_v11 = vsub.f32 %v22091_v61, %v18212_v2  ;;  %v22094_v14 = vld [vmem:[#allocation54_spill] sm:$0xff]  ;;  %v22096_v20 = vld [vmem:[#allocation20_spill] sm:$0xff]  ;;  %v22097_v61 = vld [vmem:[#allocation57_spill] sm:$0xff] }
 0x55c   :  { %v5867_v29 = vadd.f32 %v5866_v25, %v5865_v44  ;;  %v5870_v44 = vsel %vm5534_vm2, %v5802_v32, 0.0  ;;  %v5806_v32 = vmul.f32 %v5742_v19, %v5742_v19  ;;  %v5745_v10 = vmul.f32 %v18348_v16, %v22093_v50  ;;  %v22098_v50 = vld [vmem:[#allocation21_spill] sm:$0xff] }
 0x55d   :  { %22089 = vst [vmem:[#allocation51_spill] sm:$0xff] %v18355_v35  ;;  %22092 = vst [vmem:[#allocation49_spill] sm:$0xff] %v18362_v11  ;;  %v18369_v24 = vsub.f32 %v22094_v14, %v18212_v2  ;;  %v5746_v19 = vmul.f32 %v18355_v35, %v22096_v20  ;;  %v18376_v56 = vsub.f32 %v22097_v61, %v18212_v2  ;;  %v22099_v20 = vld [vmem:[#allocation22_spill] sm:$0xff]  ;;  %v22100_v61 = vld [vmem:[#allocation56_spill] sm:$0xff] }
 0x55e   :  { %v5869_v5 = vadd.f32 %v5868_v30, %v5867_v29  ;;  %v5872_v29 = vsel %vm5534_vm2, %v5803_v37, 0.0  ;;  %v5807_v37 = vmul.f32 %v5743_v39, %v5743_v39  ;;  %v5747_v39 = vmul.f32 %v18362_v11, %v22098_v50  ;;  %v22101_v50 = vld [vmem:[#allocation23_spill] sm:$0xff] }
 0x55f   :  { %22095 = vst [vmem:[#allocation7_spill] sm:$0xff] %v18369_v24  ;;  %v18383_v14 = vsub.f32 %v17858_v13, %v18212_v2  ;;  %v18390_v35 = vsub.f32 %v22100_v61, %v18212_v2  ;;  %v22102_v13 = vld [vmem:[#allocation58_spill] sm:$0xff]  ;;  %v22105_v61 = vld [vmem:[#allocation61_spill] sm:$0xff] }
 0x560   :  { %v5871_v25 = vadd.f32 %v5870_v44, %v5869_v5  ;;  %v5874_v5 = vsel %vm5534_vm2, %v5804_v63, 0.0  ;;  %v5808_v63 = vmul.f32 %v5744_v57, %v5744_v57  ;;  %v5748_v57 = vmul.f32 %v18369_v24, %v22099_v20  ;;  %v22104_v20 = vld [vmem:[#allocation24_spill] sm:$0xff] }
 0x561   :  { %v18397_v11 = vsub.f32 %v22102_v13, %v18212_v2  ;;  %v18404_v24 = vsub.f32 %v22105_v61, %v18212_v2  ;;  %v18411_v13 = vsub.f32 %v17888_v23, %v18212_v2  ;;  %v18418_v61 = vsub.f32 %v17874_v6, %v18212_v2  ;;  %v22114_v6 = vld [vmem:[#allocation65_spill] sm:$0xff] }
 0x562   :  { %v5873_v30 = vadd.f32 %v5872_v29, %v5871_v25  ;;  %v5876_v25 = vsel %vm5534_vm2, %v5805_v53, 0.0  ;;  %v5809_v53 = vmul.f32 %v5745_v10, %v5745_v10  ;;  %v5749_v10 = vmul.f32 %v18376_v56, %v22101_v50  ;;  %v22107_v50 = vld [vmem:[#allocation25_spill] sm:$0xff] }
 0x563   :  { %22103 = vst [vmem:[#allocation9_spill] sm:$0xff] %v18397_v11  ;;  %22106 = vst [vmem:[#allocation52_spill] sm:$0xff] %v18404_v24  ;;  %v18425_v23 = vsub.f32 %v17885_v33, %v18212_v2  ;;  %v22116_v33 = vld [vmem:[#allocation68_spill] sm:$0xff] }
 0x564   :  { %v5875_v44 = vadd.f32 %v5874_v5, %v5873_v30  ;;  %v5878_v30 = vsel %vm5534_vm2, %v5806_v32, 0.0  ;;  %v5810_v32 = vmul.f32 %v5746_v19, %v5746_v19  ;;  %v5750_v19 = vmul.f32 %v18383_v14, %v22104_v20  ;;  %22108 = vst [vmem:[#allocation8_spill] sm:$0xff] %v18411_v13  ;;  %v22109_v20 = vld [vmem:[#allocation26_spill] sm:$0xff]  ;;  %22110 = vst [vmem:[#allocation10_spill] sm:$0xff] %v18418_v61 }
 0x565   :  { %22112 = vst [vmem:[#allocation11_spill] sm:$0xff] %v18425_v23 }
 0x566   :  { %v5877_v29 = vadd.f32 %v5876_v25, %v5875_v44  ;;  %v5880_v44 = vsel %vm5534_vm2, %v5807_v37, 0.0  ;;  %v5811_v37 = vmul.f32 %v5747_v39, %v5747_v39  ;;  %v5751_v39 = vmul.f32 %v18390_v35, %v22107_v50  ;;  %v22111_v50 = vld [vmem:[#allocation27_spill] sm:$0xff] }
 0x568   :  { %v5879_v5 = vadd.f32 %v5878_v30, %v5877_v29  ;;  %v5882_v29 = vsel %vm5534_vm2, %v5808_v63, 0.0  ;;  %v5812_v63 = vmul.f32 %v5748_v57, %v5748_v57  ;;  %v5752_v57 = vmul.f32 %v18397_v11, %v22109_v20  ;;  %v22113_v20 = vld [vmem:[#allocation28_spill] sm:$0xff] }
 0x569   :  { %v18432_v11 = vsub.f32 %v22114_v6, %v18212_v2  ;;  %v22119_v6 = vld [vmem:[#allocation64_spill] sm:$0xff] }
 0x56a   :  { %v5881_v25 = vadd.f32 %v5880_v44, %v5879_v5  ;;  %v5884_v5 = vsel %vm5534_vm2, %v5809_v53, 0.0  ;;  %v5813_v53 = vmul.f32 %v5749_v10, %v5749_v10  ;;  %v5753_v10 = vmul.f32 %v18404_v24, %v22111_v50  ;;  %v22115_v50 = vld [vmem:[#allocation29_spill] sm:$0xff] }
 0x56b   :  { %v18439_v24 = vsub.f32 %v22116_v33, %v18212_v2  ;;  %v22121_v33 = vld [vmem:[#allocation67_spill] sm:$0xff] }
 0x56c   :  { %v5883_v30 = vadd.f32 %v5882_v29, %v5881_v25  ;;  %v5886_v25 = vsel %vm5534_vm2, %v5810_v32, 0.0  ;;  %v5814_v32 = vmul.f32 %v5750_v19, %v5750_v19  ;;  %v5754_v19 = vmul.f32 %v18411_v13, %v22113_v20  ;;  %v22118_v20 = vld [vmem:[#allocation30_spill] sm:$0xff] }
 0x56d   :  { %22117 = vst [vmem:[#allocation12_spill] sm:$0xff] %v18439_v24  ;;  %v18446_v13 = vsub.f32 %v22119_v6, %v18212_v2  ;;  %v22123_v6 = vld [vmem:[#allocation71_spill] sm:$0xff] }
 0x56e   :  { %v5885_v44 = vadd.f32 %v5884_v5, %v5883_v30  ;;  %v5888_v30 = vsel %vm5534_vm2, %v5811_v37, 0.0  ;;  %v5815_v37 = vmul.f32 %v5751_v39, %v5751_v39  ;;  %v5755_v39 = vmul.f32 %v18418_v61, %v22115_v50  ;;  %v22120_v50 = vld [vmem:[#allocation31_spill] sm:$0xff] }
 0x56f   :  { %v18453_v61 = vsub.f32 %v22121_v33, %v18212_v2  ;;  %v18467_v33 = vsub.f32 %v17943_v34, %v18212_v2  ;;  %v18481_v34 = vsub.f32 %v17951_v46, %v18212_v2  ;;  %v18495_v46 = vsub.f32 %v17982_v0, %v18212_v2 }
 0x570   :  { %v5887_v29 = vadd.f32 %v5886_v25, %v5885_v44  ;;  %v5890_v44 = vsel %vm5534_vm2, %v5812_v63, 0.0  ;;  %v5816_v63 = vmul.f32 %v5752_v57, %v5752_v57  ;;  %v5756_v57 = vmul.f32 %v18425_v23, %v22118_v20  ;;  %v22122_v20 = vld [vmem:[#allocation32_spill] sm:$0xff] }
 0x571   :  { %v18460_v23 = vsub.f32 %v22123_v6, %v18212_v2  ;;  %v22126_v6 = vld [vmem:[#allocation70_spill] sm:$0xff]  ;;  %v18509_v0 = vsub.f32 %v17979_v60, %v18212_v2  ;;  %v18523_v60 = vsub.f32 %v18014_v26, %v18212_v2  ;;  %v18537_v26 = vsub.f32 %v18011_v22, %v18212_v2 }
 0x572   :  { %v5889_v5 = vadd.f32 %v5888_v30, %v5887_v29  ;;  %v5892_v29 = vsel %vm5534_vm2, %v5813_v53, 0.0  ;;  %v5817_v53 = vmul.f32 %v5753_v10, %v5753_v10  ;;  %v5757_v10 = vmul.f32 %v18432_v11, %v22120_v50  ;;  %v22124_v50 = vld [vmem:[#allocation33_spill] sm:$0xff] }
 0x573   :  { %22135 = vst [vmem:[#allocation13_spill] sm:$0xff] %v18537_v26  ;;  %v18551_v22 = vsub.f32 %v18048_v1, %v18212_v2  ;;  %v22143_v1 = vld [vmem:[#allocation83_spill] sm:$0xff] }
 0x574   :  { %v5891_v25 = vadd.f32 %v5890_v44, %v5889_v5  ;;  %v5894_v5 = vsel %vm5534_vm2, %v5814_v32, 0.0  ;;  %v5818_v32 = vmul.f32 %v5754_v19, %v5754_v19  ;;  %v5758_v19 = vmul.f32 %v18439_v24, %v22122_v20  ;;  %v22125_v20 = vld [vmem:[#allocation34_spill] sm:$0xff] }
 0x575   :  { %v18474_v24 = vsub.f32 %v22126_v6, %v18212_v2  ;;  %v18488_v6 = vsub.f32 %v17970_v9, %v18212_v2  ;;  %v22130_v9 = vld [vmem:[#allocation75_spill] sm:$0xff]  ;;  %22139 = vst [vmem:[#allocation15_spill] sm:$0xff] %v18551_v22 }
 0x576   :  { %v5893_v30 = vadd.f32 %v5892_v29, %v5891_v25  ;;  %v5896_v25 = vsel %vm5534_vm2, %v5815_v37, 0.0  ;;  %v5819_v37 = vmul.f32 %v5755_v39, %v5755_v39  ;;  %v5759_v39 = vmul.f32 %v18446_v13, %v22124_v50  ;;  %v22127_v50 = vld [vmem:[#allocation35_spill] sm:$0xff] }
 0x578   :  { %v5895_v44 = vadd.f32 %v5894_v5, %v5893_v30  ;;  %v5898_v30 = vsel %vm5534_vm2, %v5816_v63, 0.0  ;;  %v5820_v63 = vmul.f32 %v5756_v57, %v5756_v57  ;;  %v5760_v57 = vmul.f32 %v18453_v61, %v22125_v20  ;;  %v22128_v20 = vld [vmem:[#allocation36_spill] sm:$0xff] }
 0x57a   :  { %v5897_v29 = vadd.f32 %v5896_v25, %v5895_v44  ;;  %v5900_v44 = vsel %vm5534_vm2, %v5817_v53, 0.0  ;;  %v5821_v53 = vmul.f32 %v5757_v10, %v5757_v10  ;;  %v5761_v10 = vmul.f32 %v18460_v23, %v22127_v50  ;;  %v22129_v50 = vld [vmem:[#allocation55_spill] sm:$0xff] }
 0x57c   :  { %v5899_v5 = vadd.f32 %v5898_v30, %v5897_v29  ;;  %v5902_v29 = vsel %vm5534_vm2, %v5818_v32, 0.0  ;;  %v5822_v32 = vmul.f32 %v5758_v19, %v5758_v19  ;;  %v5762_v19 = vmul.f32 %v18467_v33, %v22128_v20 }
 0x57e   :  { %v5901_v25 = vadd.f32 %v5900_v44, %v5899_v5  ;;  %v5904_v5 = vsel %vm5534_vm2, %v5819_v37, 0.0  ;;  %v5823_v37 = vmul.f32 %v5759_v39, %v5759_v39  ;;  %v5763_v39 = vmul.f32 %v18474_v24, %v22129_v50  ;;  %v22131_v50 = vld [vmem:[#allocation59_spill] sm:$0xff] }
 0x580   :  { %v5903_v30 = vadd.f32 %v5902_v29, %v5901_v25  ;;  %v5906_v25 = vsel %vm5534_vm2, %v5820_v63, 0.0  ;;  %v5824_v63 = vmul.f32 %v5760_v57, %v5760_v57  ;;  %v5764_v57 = vmul.f32 %v18481_v34, %v17842_v21  ;;  %v22132_v21 = vld [vmem:[#allocation60_spill] sm:$0xff] }
 0x582   :  { %v5905_v44 = vadd.f32 %v5904_v5, %v5903_v30  ;;  %v5908_v30 = vsel %vm5534_vm2, %v5821_v53, 0.0  ;;  %v5825_v53 = vmul.f32 %v5761_v10, %v5761_v10  ;;  %v5765_v10 = vmul.f32 %v18488_v6, %v22131_v50  ;;  %v22133_v50 = vld [vmem:[#allocation62_spill] sm:$0xff] }
 0x584   :  { %v5907_v29 = vadd.f32 %v5906_v25, %v5905_v44  ;;  %v5910_v44 = vsel %vm5534_vm2, %v5822_v32, 0.0  ;;  %v5826_v32 = vmul.f32 %v5762_v19, %v5762_v19  ;;  %v5766_v19 = vmul.f32 %v18495_v46, %v22132_v21 }
 0x586   :  { %v5909_v5 = vadd.f32 %v5908_v30, %v5907_v29  ;;  %v5912_v29 = vsel %vm5534_vm2, %v5823_v37, 0.0  ;;  %v5827_v37 = vmul.f32 %v5763_v39, %v5763_v39 }
 0x588   :  { %v5911_v25 = vadd.f32 %v5910_v44, %v5909_v5  ;;  %v5914_v5 = vsel %vm5534_vm2, %v5824_v63, 0.0  ;;  %v18502_v44 = vsub.f32 %v22130_v9, %v18212_v2  ;;  %v5828_v63 = vmul.f32 %v5764_v57, %v5764_v57 }
 0x589   :  { %v18516_v9 = vsub.f32 %v18004_v12, %v18212_v2  ;;  %v5768_v57 = vmul.f32 %v18509_v0, %v17890_v15  ;;  %v18530_v12 = vsub.f32 %v18001_v54, %v18212_v2  ;;  %v22136_v15 = vld [vmem:[#allocation66_spill] sm:$0xff]  ;;  %v18544_v54 = vsub.f32 %v18036_v43, %v18212_v2  ;;  %v22140_v43 = vld [vmem:[#allocation81_spill] sm:$0xff] }
 0x58a   :  { %v5913_v30 = vadd.f32 %v5912_v29, %v5911_v25  ;;  %v5916_v25 = vsel %vm5534_vm2, %v5825_v53, 0.0  ;;  %v5767_v39 = vmul.f32 %v18502_v44, %v22133_v50  ;;  %v5829_v53 = vmul.f32 %v5765_v10, %v5765_v10 }
 0x58b   :  { %22137 = vst [vmem:[#allocation14_spill] sm:$0xff] %v18544_v54 }
 0x58c   :  { %v5915_v20 = vadd.f32 %v5914_v5, %v5913_v30  ;;  %v5918_v30 = vsel %vm5534_vm2, %v5826_v32, 0.0  ;;  %v5830_v32 = vmul.f32 %v5766_v19, %v5766_v19  ;;  %v5770_v19 = vmul.f32 %v18523_v60, %v22136_v15 }
 0x58d   :  { %v18558_v15 = vsub.f32 %v22140_v43, %v18212_v2  ;;  %v22145_v43 = vld [vmem:[#allocation87_spill] sm:$0xff] }
 0x58e   :  { %v5917_v29 = vadd.f32 %v5916_v25, %v5915_v20  ;;  %v5920_v20 = vsel %vm5534_vm2, %v5827_v37, 0.0  ;;  %v5831_v37 = vmul.f32 %v5767_v39, %v5767_v39 }
 0x58f   :  { %22141 = vst [vmem:[#allocation16_spill] sm:$0xff] %v18558_v15 }
 0x590   :  { %v5919_v5 = vadd.f32 %v5918_v30, %v5917_v29  ;;  %v5922_v29 = vsel %vm5534_vm2, %v5828_v63, 0.0  ;;  %v22134_v30 = vld [vmem:[#allocation63_spill] sm:$0xff]  ;;  %v5832_v63 = vmul.f32 %v5768_v57, %v5768_v57  ;;  %v5772_v57 = vmul.f32 %v18537_v26, %v17930_v47  ;;  %v22144_v47 = vld [vmem:[#allocation73_spill] sm:$0xff] }
 0x591   :  { %v5769_v10 = vmul.f32 %v18516_v9, %v22134_v30  ;;  %v18572_v26 = vsub.f32 %v22145_v43, %v18212_v2  ;;  %v22151_v43 = vld [vmem:[#allocation86_spill] sm:$0xff] }
 0x592   :  { %v5921_v25 = vadd.f32 %v5920_v20, %v5919_v5  ;;  %v5924_v5 = vsel %vm5534_vm2, %v5829_v53, 0.0  ;;  %v5926_v20 = vsel %vm5534_vm2, %v5830_v32, 0.0  ;;  %v5834_v32 = vmul.f32 %v5770_v19, %v5770_v19 }
 0x593   :  { %v5833_v53 = vmul.f32 %v5769_v10, %v5769_v10  ;;  %v5774_v19 = vmul.f32 %v18551_v22, %v22144_v47  ;;  %22146 = vst [vmem:[#allocation17_spill] sm:$0xff] %v18572_v26  ;;  %v22150_v47 = vld [vmem:[#allocation76_spill] sm:$0xff]  ;;  %v18586_v22 = vsub.f32 %v22151_v43, %v18212_v2 }
 0x594   :  { %v5923_v21 = vadd.f32 %v5922_v29, %v5921_v25  ;;  %v22138_v29 = vld [vmem:[#allocation69_spill] sm:$0xff] }
 0x595   :  { %v5771_v39 = vmul.f32 %v18530_v12, %v22138_v29  ;;  %22152 = vst [vmem:[#allocation53_spill] sm:$0xff] %v18586_v22 }
 0x596   :  { %v5925_v50 = vadd.f32 %v5924_v5, %v5923_v21  ;;  %v5928_v21 = vsel %vm5534_vm2, %v5831_v37, 0.0  ;;  %v5930_v5 = vsel %vm5534_vm2, %v5832_v63, 0.0  ;;  %v5836_v63 = vmul.f32 %v5772_v57, %v5772_v57 }
 0x597   :  { %v5835_v37 = vmul.f32 %v5771_v39, %v5771_v39 }
 0x598   :  { %v5927_v25 = vadd.f32 %v5926_v20, %v5925_v50  ;;  %v22142_v20 = vld [vmem:[#allocation72_spill] sm:$0xff] }
 0x599   :  { %v5773_v10 = vmul.f32 %v18544_v54, %v22142_v20  ;;  %v22147_v20 = vld [vmem:[#allocation74_spill] sm:$0xff] }
 0x59a   :  { %v5929_v30 = vadd.f32 %v5928_v21, %v5927_v25  ;;  %v5932_v25 = vsel %vm5534_vm2, %v5833_v53, 0.0  ;;  %v18565_v21 = vsub.f32 %v22143_v1, %v18212_v2  ;;  %v5775_v39 = vmul.f32 %v18558_v15, %v22147_v20  ;;  %v22148_v1 = vld [vmem:[#allocation90_spill] sm:$0xff]  ;;  %v22153_v20 = vld [vmem:[#allocation77_spill] sm:$0xff] }
 0x59b   :  { %v5837_v53 = vmul.f32 %v5773_v10, %v5773_v10  ;;  %v18579_v54 = vsub.f32 %v22148_v1, %v18212_v2  ;;  %v5777_v10 = vmul.f32 %v18572_v26, %v22153_v20  ;;  %v22159_v26 = vld [vmem:[#allocation82_spill] sm:$0xff] }
 0x59c   :  { %v5931_v50 = vadd.f32 %v5930_v5, %v5929_v30  ;;  %v5934_v30 = vsel %vm5534_vm2, %v5834_v32, 0.0  ;;  %v5776_v57 = vmul.f32 %v18565_v21, %v22150_v47  ;;  %v5838_v32 = vmul.f32 %v5774_v19, %v5774_v19  ;;  %v13079_v19 = vld [vmem:[%s21711_s5 + $0x4] sm:$0xf] }
 0x59d   :  { %22149 = vst [vmem:[#allocation18_spill] sm:$0xff] %v18579_v54  ;;  %16327 = vmatprep.subr.msk.bf16.mxu1 %vm6564_vm3, %v13079_v19  ;;  %v5841_v20 = vmul.f32 %v5777_v10, %v5777_v10 }
 0x59e   :  { %v5933_v29 = vadd.f32 %v5932_v25, %v5931_v50  ;;  %v5936_v50 = vsel %vm5534_vm2, %v5835_v37, 0.0  ;;  %v5839_v37 = vmul.f32 %v5775_v39, %v5775_v39  ;;  %v5840_v47 = vmul.f32 %v5776_v57, %v5776_v57 }
 0x59f   :  { %v6566_v39 = vsel %vm6564_vm3, %v13079_v19, 0 }
 0x5a0   :  { %v5935_v5 = vadd.f32 %v5934_v30, %v5933_v29  ;;  %v5938_v29 = vsel %vm5534_vm2, %v5836_v63, 0.0  ;;  %v22155_v63 = vld [vmem:[#allocation78_spill] sm:$0xff]  ;;  %14632 = vmatpush3.bf16.msra.mxu1 %v6566_v39  ;;  %v5948_v39 = vsel %vm5534_vm2, %v5841_v20, 0.0 }
 0x5a2   :  { %v5937_v25 = vadd.f32 %v5936_v50, %v5935_v5  ;;  %v5940_v5 = vsel %vm5534_vm2, %v5837_v53, 0.0  ;;  %v22154_v50 = vld [vmem:[#allocation89_spill] sm:$0xff] }
 0x5a3   :  { %v18593_v1 = vsub.f32 %v22154_v50, %v18212_v2  ;;  %v18606_v2 = vld [vmem:[%s21711_s5] sm:$0xf] }
 0x5a4   :  { %v5939_v30 = vadd.f32 %v5938_v29, %v5937_v25  ;;  %v5778_v25 = vmul.f32 %v18579_v54, %v22155_v63  ;;  %v5942_v29 = vsel %vm5534_vm2, %v5838_v32, 0.0  ;;  %22156 = vst [vmem:[#allocation19_spill] sm:$0xff] %v18606_v2  ;;  %16328 = vmatprep.subr.msk.bf16.mxu1 %vm6564_vm3, %v18606_v2  ;;  %v22158_v32 = vld [vmem:[#allocation80_spill] sm:$0xff]  ;;  %v5946_v63 = vsel %vm5534_vm2, %v5840_v47, 0.0  ;;  %v22161_v2 = vld [vmem:[#allocation85_spill] sm:$0xff] }
 0x5a5   :  { %v5780_v50 = vmul.f32 %v18593_v1, %v22158_v32 }
 0x5a6   :  { %v5941_v15 = vadd.f32 %v5940_v5, %v5939_v30  ;;  %v22157_v30 = vld [vmem:[#allocation79_spill] sm:$0xff]  ;;  %v5944_v5 = vsel %vm5534_vm2, %v5839_v37, 0.0  ;;  %v5842_v19 = vmul.f32 %v5778_v25, %v5778_v25  ;;  %v5783_v25 = vmul.f32 %v18224_v8, %v22161_v2 }
 0x5a7   :  { %v5779_v43 = vmul.f32 %v18586_v22, %v22157_v30  ;;  %v22160_v30 = vld [vmem:[#allocation84_spill] sm:$0xff]  ;;  %v5844_v22 = vmul.f32 %v5780_v50, %v5780_v50 }
 0x5a8   :  { %v5943_v53 = vadd.f32 %v5942_v29, %v5941_v15  ;;  %v5781_v15 = vmul.f32 %v18216_v41, %v22159_v26  ;;  %v5782_v37 = vmul.f32 %v18220_v27, %v22160_v30  ;;  %v5847_v30 = vmul.f32 %v5783_v25, %v5783_v25 }
 0x5a9   :  { %v5843_v29 = vmul.f32 %v5779_v43, %v5779_v43 }
 0x5aa   :  { %v5945_v57 = vadd.f32 %v5944_v5, %v5943_v53  ;;  %v5950_v53 = vsel %vm5534_vm2, %v5842_v19, 0.0  ;;  %v5845_v32 = vmul.f32 %v5781_v15, %v5781_v15  ;;  %v5846_v43 = vmul.f32 %v5782_v37, %v5782_v37 }
 0x5ab   :  { %v5952_v47 = vsel %vm5534_vm2, %v5843_v29, 0.0 }
 0x5ac   :  { %v5947_v54 = vadd.f32 %v5946_v63, %v5945_v57  ;;  %v22162_v63 = vld [vmem:[#allocation88_spill] sm:$0xff]  ;;  %v5956_v19 = vsel %vm5534_vm2, %v5845_v32, 0.0  ;;  %v5958_v29 = vsel %vm5534_vm2, %v5846_v43, 0.0 }
 0x5ad   :  { %v5784_v26 = vmul.f32 %v18228_v52, %v22162_v63 }
 0x5ae   :  { %v5949_v10 = vadd.f32 %v5948_v39, %v5947_v54  ;;  %v5954_v54 = vsel %vm5534_vm2, %v5844_v22, 0.0  ;;  %v22163_v39 = vld [vmem:[#allocation91_spill] sm:$0xff]  ;;  %v5960_v22 = vsel %vm5534_vm2, %v5847_v30, 0.0 }
 0x5af   :  { %v5785_v50 = vmul.f32 %v18232_v4, %v22163_v39  ;;  %v5848_v15 = vmul.f32 %v5784_v26, %v5784_v26 }
 0x5b0   :  { %v5951_v5 = vadd.f32 %v5950_v53, %v5949_v10  ;;  %v22164_v53 = vld [vmem:[#allocation92_spill] sm:$0xff] }
 0x5b1   :  { %v5786_v2 = vmul.f32 %v18236_v28, %v22164_v53  ;;  %v5849_v63 = vmul.f32 %v5785_v50, %v5785_v50  ;;  %v5962_v32 = vsel %vm5534_vm2, %v5848_v15, 0.0 }
 0x5b2   :  { %v5953_v57 = vadd.f32 %v5952_v47, %v5951_v5  ;;  %v22165_v47 = vld [vmem:[#allocation93_spill] sm:$0xff] }
 0x5b3   :  { %v5787_v37 = vmul.f32 %v18240_v36, %v22165_v47  ;;  %v5850_v39 = vmul.f32 %v5786_v2, %v5786_v2  ;;  %v5964_v43 = vsel %vm5534_vm2, %v5849_v63, 0.0 }
 0x5b4   :  { %v5955_v20 = vadd.f32 %v5954_v54, %v5953_v57  ;;  %v22166_v54 = vld [vmem:[#allocation94_spill] sm:$0xff] }
 0x5b5   :  { %v5788_v25 = vmul.f32 %v18244_v62, %v22166_v54  ;;  %v5851_v53 = vmul.f32 %v5787_v37, %v5787_v37  ;;  %v5966_v30 = vsel %vm5534_vm2, %v5850_v39, 0.0 }
 0x5b6   :  { %v5957_v10 = vadd.f32 %v5956_v19, %v5955_v20  ;;  %v22167_v19 = vld [vmem:[#allocation37_spill] sm:$0xff] }
 0x5b7   :  { %v5789_v26 = vmul.f32 %v18248_v40, %v22167_v19  ;;  %v5852_v47 = vmul.f32 %v5788_v25, %v5788_v25  ;;  %v5968_v15 = vsel %vm5534_vm2, %v5851_v53, 0.0 }
 0x5b8   :  { %v5959_v5 = vadd.f32 %v5958_v29, %v5957_v10  ;;  %v22168_v29 = vld [vmem:[#allocation38_spill] sm:$0xff] }
 0x5b9   :  { %v5790_v50 = vmul.f32 %v18251_v17, %v22168_v29  ;;  %v5853_v54 = vmul.f32 %v5789_v26, %v5789_v26  ;;  %v5970_v63 = vsel %vm5534_vm2, %v5852_v47, 0.0 }
 0x5ba   :  { %v5961_v57 = vadd.f32 %v5960_v22, %v5959_v5  ;;  %v22169_v22 = vld [vmem:[#allocation39_spill] sm:$0xff] }
 0x5bb   :  { %v5791_v2 = vmul.f32 %v18255_v48, %v22169_v22  ;;  %v5854_v19 = vmul.f32 %v5790_v50, %v5790_v50  ;;  %v5972_v39 = vsel %vm5534_vm2, %v5853_v54, 0.0 }
 0x5bc   :  { %v5963_v20 = vadd.f32 %v5962_v32, %v5961_v57  ;;  %v22170_v32 = vld [vmem:[#allocation40_spill] sm:$0xff] }
 0x5bd   :  { %v5792_v37 = vmul.f32 %v18258_v18, %v22170_v32  ;;  %v5855_v29 = vmul.f32 %v5791_v2, %v5791_v2  ;;  %v5974_v53 = vsel %vm5534_vm2, %v5854_v19, 0.0  ;;  %v5796_v2 = vmul.f32 %v18270_v42, %v18206_v51 }
 0x5be   :  { %v5965_v10 = vadd.f32 %v5964_v43, %v5963_v20  ;;  %v22171_v43 = vld [vmem:[#allocation41_spill] sm:$0xff] }
 0x5bf   :  { %v5793_v25 = vmul.f32 %v18261_v31, %v22171_v43  ;;  %v5856_v22 = vmul.f32 %v5792_v37, %v5792_v37  ;;  %v5976_v47 = vsel %vm5534_vm2, %v5855_v29, 0.0  ;;  %v5860_v19 = vmul.f32 %v5796_v2, %v5796_v2 }
 0x5c0   :  { %v5967_v5 = vadd.f32 %v5966_v30, %v5965_v10  ;;  %v22172_v30 = vld [vmem:[#allocation42_spill] sm:$0xff] }
 0x5c1   :  { %v5794_v26 = vmul.f32 %v18264_v49, %v22172_v30  ;;  %v5857_v32 = vmul.f32 %v5793_v25, %v5793_v25  ;;  %v5978_v54 = vsel %vm5534_vm2, %v5856_v22, 0.0  ;;  %v5986_v29 = vsel %vm5534_vm2, %v5860_v19, 0.0  ;;  %v18681_v19 = vld [vmem:[%s21710_s4] ss:$0 sm:$0xff] }
 0x5c2   :  { %v5969_v57 = vadd.f32 %v5968_v15, %v5967_v5  ;;  %v22173_v15 = vld [vmem:[#allocation43_spill] sm:$0xff] }
 0x5c3   :  { %v5795_v50 = vmul.f32 %v18267_v38, %v22173_v15  ;;  %v5980_v37 = vsel %vm5534_vm2, %v5857_v32, 0.0  ;;  %v6000_v32 = vlaneseq }
 0x5c4   :  { %v5971_v20 = vadd.f32 %v5970_v63, %v5969_v57  ;;  %v5858_v63 = vmul.f32 %v5794_v26, %v5794_v26 }
 0x5c5   :  { %v5859_v43 = vmul.f32 %v5795_v50, %v5795_v50  ;;  %v18668_v2 = vshrl.u32 %v6000_v32, 7 }
 0x5c6   :  { %v5973_v10 = vadd.f32 %v5972_v39, %v5971_v20 }
 0x5c7   :  { %v5984_v25 = vsel %vm5534_vm2, %v5859_v43, 0.0  ;;  %22174 = vst [vmem:[#allocation54_spill] sm:$0xff] %v18668_v2 }
 0x5c8   :  { %v5975_v5 = vadd.f32 %v5974_v53, %v5973_v10  ;;  %v5982_v10 = vsel %vm5534_vm2, %v5858_v63, 0.0  ;;  %v5995_v63 = vld [vmem:[%s21709_s3] sm:$0x1] }
 0x5ca   :  { %v5977_v57 = vadd.f32 %v5976_v47, %v5975_v5 }
 0x5cc   :  { %v5979_v20 = vadd.f32 %v5978_v54, %v5977_v57 }
 0x5ce   :  { %v5981_v39 = vadd.f32 %v5980_v37, %v5979_v20  ;;  %v21834_v20 = vsub.s32 0, %v18668_v2 }
 0x5d0   :  { %v5983_v30 = vadd.f32 %v5982_v10, %v5981_v39 }
 0x5d2   :  { %v5985_v53 = vadd.f32 %v5984_v25, %v5983_v30 }
 0x5d4   :  { %v5987_v5 = vadd.f32 %v5986_v29, %v5985_v53  ;;  %v22175_v53 = vld [vmem:[#allocation44_spill] sm:$0xff] }
 0x5d6   :  { %v5988_v15 = vrot.slane %v5987_v5, 4 }
 0x5d8   :  { %v5989_v51 = vadd.f32 %v5988_v15, %v5987_v5  ;;  %v22176_v5 = vld [vmem:[#allocation45_spill] sm:$0xff] }
 0x5da   :  { %v5990_v26 = vrot.slane %v5989_v51, 2 }
 0x5dc   :  { %v5991_v47 = vadd.f32 %v5990_v26, %v5989_v51  ;;  %v22177_v51 = vld [vmem:[#allocation46_spill] sm:$0xff] }
 0x5de   :  { %v5992_v22 = vrot.slane %v5991_v47, 1 }
 0x5e0   :  { %v5993_v57 = vadd.f32 %v5992_v22, %v5991_v47 }
 0x5e2   :  { %v5994_v50 = vmul.f32 0.0025510204, %v5993_v57  ;;  %v22178_v57 = vld [vmem:[#allocation47_spill] sm:$0xff] }
 0x5e4   :  { %v5996_v54 = vadd.f32 1e-05, %v5994_v50 }
 0x5e6   :  { %16344 = vrsqrt.f32 %v5996_v54 }
 0x5f0   :  { %v16345_v43 = vpop.eup %16344 }
 0x5f1   :  { %v5998_v37 = vmul.f32 %v16345_v43, %v5995_v63  ;;  %v22181_v63 = vld [vmem:[#allocation51_spill] sm:$0xff] }
 0x5f3   :  { %v18676_v39 = vrot.slane %v5998_v37, %v21834_v20  ;;  %v22182_v37 = vld [vmem:[#allocation49_spill] sm:$0xff] }
 0x5f5   :  { %v6066_v10 = vmul.f32 %v18676_v39, %v18264_v49  ;;  %v18687_v30 = vmul.f32 %v18676_v39, %v18274_v45  ;;  %v18691_v25 = vmul.f32 %v18676_v39, %v18278_v59  ;;  %v18695_v29 = vmul.f32 %v18676_v39, %v22175_v53  ;;  %v22183_v53 = vld [vmem:[#allocation7_spill] sm:$0xff] }
 0x5f6   :  { %v18699_v15 = vmul.f32 %v18676_v39, %v22176_v5  ;;  %v18703_v26 = vmul.f32 %v18676_v39, %v22177_v51  ;;  %v18707_v49 = vmul.f32 %v18676_v39, %v18300_v55  ;;  %v18711_v45 = vmul.f32 %v18676_v39, %v18306_v3  ;;  %v22179_v55 = vld [vmem:[#allocation48_spill] sm:$0xff]  ;;  %v22180_v3 = vld [vmem:[#allocation50_spill] sm:$0xff] }
 0x5f7   :  { %v6137_v59 = vadd.f32 %v18681_v19, %v6066_v10  ;;  %v18716_v47 = vmul.f32 %v18676_v39, %v18312_v7  ;;  %v18720_v22 = vmul.f32 %v18676_v39, %v18320_v58  ;;  %v18724_v50 = vmul.f32 %v18676_v39, %v22178_v57 }
 0x5f8   :  { %v18728_v54 = vmul.f32 %v18676_v39, %v22179_v55  ;;  %v18732_v32 = vmul.f32 %v18676_v39, %v22180_v3  ;;  %v18736_v7 = vmul.f32 %v18676_v39, %v18348_v16  ;;  %v18740_v58 = vmul.f32 %v18676_v39, %v22181_v63  ;;  %v22185_v3 = vld [vmem:[#allocation52_spill] sm:$0xff] }
 0x5f9   :  { %v6201_v43 = vmax.f32 %v6137_v59, 0.0  ;;  %v18744_v10 = vmul.f32 %v18676_v39, %v22182_v37  ;;  %v18748_v5 = vmul.f32 %v18676_v39, %v22183_v53  ;;  %v18752_v51 = vmul.f32 %v18676_v39, %v18376_v56  ;;  %v22184_v59 = vld [vmem:[#allocation9_spill] sm:$0xff]  ;;  %v22186_v56 = vld [vmem:[#allocation8_spill] sm:$0xff] }
 0x5fa   :  { %v18756_v16 = vmul.f32 %v18676_v39, %v18383_v14  ;;  %v18760_v57 = vmul.f32 %v18676_v39, %v18390_v35  ;;  %v18764_v55 = vmul.f32 %v18676_v39, %v22184_v59  ;;  %v18768_v63 = vmul.f32 %v18676_v39, %v22185_v3  ;;  %v22187_v14 = vld [vmem:[#allocation10_spill] sm:$0xff]  ;;  %v22188_v35 = vld [vmem:[#allocation11_spill] sm:$0xff]  ;;  %v22189_v3 = vld [vmem:[#allocation12_spill] sm:$0xff] }
 0x5fb   :  { %6265 = vst.msk [vmem:[#allocation3 + $0x1e8] sm:$0xff] %vm5534_vm2, %v6201_v43  ;;  %v18773_v37 = vmul.f32 %v18676_v39, %v22186_v56  ;;  %v18777_v53 = vmul.f32 %v18676_v39, %v22187_v14  ;;  %v18781_v20 = vmul.f32 %v18676_v39, %v22188_v35  ;;  %v18785_v59 = vmul.f32 %v18676_v39, %v18432_v11 }
 0x5fc   :  { %v18789_v2 = vmul.f32 %v18676_v39, %v22189_v3  ;;  %v18793_v43 = vmul.f32 %v18676_v39, %v18446_v13  ;;  %v18797_v56 = vmul.f32 %v18676_v39, %v18453_v61  ;;  %v18801_v14 = vmul.f32 %v18676_v39, %v18460_v23  ;;  %v22194_v3 = vld [vmem:[#allocation13_spill] sm:$0xff] }
 0x5fd   :  { %v18805_v11 = vmul.f32 %v18676_v39, %v18467_v33  ;;  %v18809_v35 = vmul.f32 %v18676_v39, %v18474_v24  ;;  %v18813_v13 = vmul.f32 %v18676_v39, %v18481_v34  ;;  %v18817_v61 = vmul.f32 %v18676_v39, %v18488_v6 }
 0x5fe   :  { %v18821_v23 = vmul.f32 %v18676_v39, %v18495_v46  ;;  %v18825_v33 = vmul.f32 %v18676_v39, %v18502_v44  ;;  %v18829_v24 = vmul.f32 %v18676_v39, %v18509_v0  ;;  %v18833_v34 = vmul.f32 %v18676_v39, %v18516_v9 }
 0x5ff   :  { %v18837_v6 = vmul.f32 %v18676_v39, %v18523_v60  ;;  %v18841_v46 = vmul.f32 %v18676_v39, %v18530_v12  ;;  %v18845_v44 = vmul.f32 %v18676_v39, %v22194_v3  ;;  %v18861_v12 = vmul.f32 %v18676_v39, %v18565_v21 }
 0x600   :  { %22190 = vst [vmem:[#allocation20_spill] sm:$0xff] %v18825_v33  ;;  %22191 = vst [vmem:[#allocation57_spill] sm:$0xff] %v18829_v24  ;;  %v22196_v33 = vld [vmem:[#allocation14_spill] sm:$0xff]  ;;  %v22198_v24 = vld [vmem:[#allocation15_spill] sm:$0xff]  ;;  %v18881_v21 = vmul.f32 %v18676_v39, %v18216_v41  ;;  %v18901_v41 = vmul.f32 %v18676_v39, %v18236_v28  ;;  %v18921_v28 = vmul.f32 %v18676_v39, %v18255_v48 }
 0x601   :  { %22192 = vst [vmem:[#allocation21_spill] sm:$0xff] %v18833_v34  ;;  %22193 = vst [vmem:[#allocation22_spill] sm:$0xff] %v18841_v46  ;;  %v18849_v0 = vmul.f32 %v18676_v39, %v22196_v33  ;;  %v18853_v9 = vmul.f32 %v18676_v39, %v22198_v24  ;;  %v22199_v34 = vld [vmem:[#allocation16_spill] sm:$0xff]  ;;  %v22200_v46 = vld [vmem:[#allocation17_spill] sm:$0xff]  ;;  %v18941_v48 = vadd.f32 %v18681_v19, %v18687_v30 }
 0x602   :  { %22195 = vst [vmem:[#allocation56_spill] sm:$0xff] %v18845_v44  ;;  %v18857_v60 = vmul.f32 %v18676_v39, %v22199_v34  ;;  %v18865_v3 = vmul.f32 %v18676_v39, %v22200_v46  ;;  %v22201_v44 = vld [vmem:[#allocation18_spill] sm:$0xff]  ;;  %v18877_v34 = vmul.f32 %v18676_v39, %v18593_v1  ;;  %v18885_v46 = vmul.f32 %v18676_v39, %v18220_v27 }
 0x603   :  { %22197 = vst [vmem:[#allocation23_spill] sm:$0xff] %v18849_v0  ;;  %v18869_v33 = vmul.f32 %v18676_v39, %v22201_v44  ;;  %v22202_v0 = vld [vmem:[#allocation53_spill] sm:$0xff]  ;;  %v18889_v44 = vmul.f32 %v18676_v39, %v18224_v8  ;;  %v18897_v1 = vmul.f32 %v18676_v39, %v18232_v4  ;;  %v18905_v27 = vmul.f32 %v18676_v39, %v18240_v36 }
 0x604   :  { %v18873_v24 = vmul.f32 %v18676_v39, %v22202_v0  ;;  %v18893_v0 = vmul.f32 %v18676_v39, %v18228_v52  ;;  %v18909_v8 = vmul.f32 %v18676_v39, %v18244_v62  ;;  %v18913_v52 = vmul.f32 %v18676_v39, %v18248_v40 }
 0x605   :  { %v18917_v4 = vmul.f32 %v18676_v39, %v18251_v17  ;;  %v18925_v36 = vmul.f32 %v18676_v39, %v18258_v18  ;;  %v18929_v62 = vmul.f32 %v18676_v39, %v18261_v31  ;;  %v18933_v40 = vmul.f32 %v18676_v39, %v18267_v38 }
 0x606   :  { %v18937_v17 = vmul.f32 %v18676_v39, %v18270_v42  ;;  %v18945_v18 = vadd.f32 %v18681_v19, %v18691_v25  ;;  %v18949_v31 = vadd.f32 %v18681_v19, %v18695_v29  ;;  %v18953_v38 = vadd.f32 %v18681_v19, %v18699_v15 }
 0x607   :  { %v18957_v42 = vadd.f32 %v18681_v19, %v18703_v26  ;;  %v18961_v39 = vadd.f32 %v18681_v19, %v18707_v49  ;;  %v18965_v30 = vadd.f32 %v18681_v19, %v18711_v45  ;;  %v18969_v25 = vadd.f32 %v18681_v19, %v18716_v47 }
 0x608   :  { %v18973_v29 = vadd.f32 %v18681_v19, %v18720_v22  ;;  %v18977_v15 = vadd.f32 %v18681_v19, %v18724_v50  ;;  %v18981_v26 = vadd.f32 %v18681_v19, %v18728_v54  ;;  %v18985_v49 = vadd.f32 %v18681_v19, %v18732_v32 }
 0x609   :  { %v18989_v45 = vadd.f32 %v18681_v19, %v18736_v7  ;;  %v18993_v47 = vadd.f32 %v18681_v19, %v18740_v58  ;;  %v18997_v22 = vadd.f32 %v18681_v19, %v18744_v10  ;;  %v19001_v50 = vadd.f32 %v18681_v19, %v18748_v5 }
 0x60a   :  { %v19005_v54 = vadd.f32 %v18681_v19, %v18752_v51  ;;  %v19009_v32 = vadd.f32 %v18681_v19, %v18756_v16  ;;  %v19013_v7 = vadd.f32 %v18681_v19, %v18760_v57  ;;  %v19017_v58 = vadd.f32 %v18681_v19, %v18764_v55 }
 0x60b   :  { %v19021_v10 = vadd.f32 %v18681_v19, %v18768_v63  ;;  %v19025_v5 = vadd.f32 %v18681_v19, %v18773_v37  ;;  %v19029_v51 = vadd.f32 %v18681_v19, %v18777_v53  ;;  %v19033_v16 = vadd.f32 %v18681_v19, %v18781_v20 }
 0x60c   :  { %v19037_v57 = vadd.f32 %v18681_v19, %v18785_v59  ;;  %v19041_v55 = vadd.f32 %v18681_v19, %v18789_v2  ;;  %v19045_v63 = vadd.f32 %v18681_v19, %v18793_v43  ;;  %v19049_v37 = vadd.f32 %v18681_v19, %v18797_v56 }
 0x60d   :  { %v19053_v20 = vadd.f32 %v18681_v19, %v18801_v14  ;;  %v19057_v53 = vadd.f32 %v18681_v19, %v18805_v11  ;;  %v19061_v2 = vadd.f32 %v18681_v19, %v18809_v35  ;;  %v19065_v59 = vadd.f32 %v18681_v19, %v18813_v13  ;;  %v22207_v14 = vld [vmem:[#allocation20_spill] sm:$0xff] }
 0x60e   :  { %v19069_v43 = vadd.f32 %v18681_v19, %v18817_v61  ;;  %v19073_v56 = vadd.f32 %v18681_v19, %v18821_v23  ;;  %v19077_v11 = vadd.f32 %v18681_v19, %v22207_v14  ;;  %v19089_v61 = vadd.f32 %v18681_v19, %v18837_v6 }
 0x60f   :  { %22203 = vst [vmem:[#allocation58_spill] sm:$0xff] %v19057_v53  ;;  %22204 = vst [vmem:[#allocation24_spill] sm:$0xff] %v19061_v2  ;;  %v22209_v53 = vld [vmem:[#allocation57_spill] sm:$0xff]  ;;  %v19109_v6 = vadd.f32 %v18681_v19, %v18857_v60  ;;  %v19129_v60 = vadd.f32 %v18681_v19, %v18877_v34  ;;  %v19149_v34 = vadd.f32 %v18681_v19, %v18897_v1 }
 0x610   :  { %22205 = vst [vmem:[#allocation61_spill] sm:$0xff] %v19069_v43  ;;  %22206 = vst [vmem:[#allocation25_spill] sm:$0xff] %v19073_v56  ;;  %v19081_v35 = vadd.f32 %v18681_v19, %v22209_v53  ;;  %v22210_v2 = vld [vmem:[#allocation21_spill] sm:$0xff]  ;;  %v22211_v43 = vld [vmem:[#allocation22_spill] sm:$0xff]  ;;  %v19169_v1 = vadd.f32 %v18681_v19, %v18917_v4  ;;  %v19189_v4 = vadd.f32 %v18681_v19, %v18937_v17  ;;  %v6150_v17 = vmax.f32 %v18981_v26, 0.0 }
 0x611   :  { %22208 = vst [vmem:[#allocation26_spill] sm:$0xff] %v19077_v11  ;;  %v19085_v13 = vadd.f32 %v18681_v19, %v22210_v2  ;;  %v19093_v23 = vadd.f32 %v18681_v19, %v22211_v43  ;;  %v22212_v56 = vld [vmem:[#allocation56_spill] sm:$0xff]  ;;  %v22213_v11 = vld [vmem:[#allocation23_spill] sm:$0xff]  ;;  %v19105_v2 = vadd.f32 %v18681_v19, %v18853_v9  ;;  %v19113_v43 = vadd.f32 %v18681_v19, %v18861_v12 }
 0x612   :  { %v19097_v14 = vadd.f32 %v18681_v19, %v22212_v56  ;;  %v19101_v53 = vadd.f32 %v18681_v19, %v22213_v11  ;;  %v19117_v56 = vadd.f32 %v18681_v19, %v18865_v3  ;;  %v19121_v11 = vadd.f32 %v18681_v19, %v18869_v33  ;;  %22214 = vst [vmem:[#allocation27_spill] sm:$0xff] %v19169_v1 }
 0x613   :  { %v19125_v9 = vadd.f32 %v18681_v19, %v18873_v24  ;;  %v19133_v12 = vadd.f32 %v18681_v19, %v18881_v21  ;;  %v19137_v3 = vadd.f32 %v18681_v19, %v18885_v46  ;;  %v19141_v33 = vadd.f32 %v18681_v19, %v18889_v44  ;;  %6214 = vst.msk [vmem:[#allocation3 + $0x50] sm:$0xff] %vm5534_vm2, %v6150_v17 }
 0x614   :  { %v19145_v24 = vadd.f32 %v18681_v19, %v18893_v0  ;;  %v19153_v21 = vadd.f32 %v18681_v19, %v18901_v41  ;;  %v19157_v46 = vadd.f32 %v18681_v19, %v18905_v27  ;;  %v19161_v44 = vadd.f32 %v18681_v19, %v18909_v8 }
 0x615   :  { %v19165_v0 = vadd.f32 %v18681_v19, %v18913_v52  ;;  %v19173_v41 = vadd.f32 %v18681_v19, %v18921_v28  ;;  %v19177_v27 = vadd.f32 %v18681_v19, %v18925_v36  ;;  %v19181_v8 = vadd.f32 %v18681_v19, %v18929_v62 }
 0x616   :  { %v19185_v52 = vadd.f32 %v18681_v19, %v18933_v40  ;;  %v6140_v1 = vmax.f32 %v18941_v48, 0.0  ;;  %v6141_v28 = vmax.f32 %v18945_v18, 0.0  ;;  %v6143_v36 = vmax.f32 %v18953_v38, 0.0 }
 0x617   :  { %22215 = vst [vmem:[#allocation28_spill] sm:$0xff] %v19173_v41  ;;  %22216 = vst [vmem:[#allocation65_spill] sm:$0xff] %v19177_v27  ;;  %v6142_v41 = vmax.f32 %v18949_v31, 0.0  ;;  %v6144_v27 = vmax.f32 %v18957_v42, 0.0  ;;  %v6145_v62 = vmax.f32 %v18961_v39, 0.0  ;;  %v6147_v40 = vmax.f32 %v18969_v25, 0.0 }
 0x618   :  { %22217 = vst [vmem:[#allocation29_spill] sm:$0xff] %v19181_v8  ;;  %22218 = vst [vmem:[#allocation68_spill] sm:$0xff] %v19185_v52  ;;  %v6146_v8 = vmax.f32 %v18965_v30, 0.0  ;;  %v6148_v52 = vmax.f32 %v18973_v29, 0.0  ;;  %v6149_v19 = vmax.f32 %v18977_v15, 0.0  ;;  %v6151_v48 = vmax.f32 %v18985_v49, 0.0 }
 0x619   :  { %6204 = vst.msk [vmem:[#allocation3] sm:$0xff] %vm5534_vm2, %v6140_v1  ;;  %6205 = vst.msk [vmem:[#allocation3 + $0x8] sm:$0xff] %vm5534_vm2, %v6141_v28  ;;  %v6152_v18 = vmax.f32 %v18989_v45, 0.0  ;;  %v6153_v31 = vmax.f32 %v18993_v47, 0.0  ;;  %v6154_v38 = vmax.f32 %v18997_v22, 0.0  ;;  %v6155_v42 = vmax.f32 %v19001_v50, 0.0 }
 0x61a   :  { %6206 = vst.msk [vmem:[#allocation3 + $0x10] sm:$0xff] %vm5534_vm2, %v6142_v41  ;;  %6207 = vst.msk [vmem:[#allocation3 + $0x18] sm:$0xff] %vm5534_vm2, %v6143_v36  ;;  %v6156_v39 = vmax.f32 %v19005_v54, 0.0  ;;  %v6157_v30 = vmax.f32 %v19009_v32, 0.0  ;;  %v6158_v25 = vmax.f32 %v19013_v7, 0.0  ;;  %v6159_v29 = vmax.f32 %v19017_v58, 0.0 }
 0x61b   :  { %6208 = vst.msk [vmem:[#allocation3 + $0x20] sm:$0xff] %vm5534_vm2, %v6144_v27  ;;  %6209 = vst.msk [vmem:[#allocation3 + $0x28] sm:$0xff] %vm5534_vm2, %v6145_v62  ;;  %v6160_v15 = vmax.f32 %v19021_v10, 0.0  ;;  %v6161_v26 = vmax.f32 %v19025_v5, 0.0  ;;  %v6162_v49 = vmax.f32 %v19029_v51, 0.0  ;;  %v6163_v45 = vmax.f32 %v19033_v16, 0.0 }
 0x61c   :  { %6210 = vst.msk [vmem:[#allocation3 + $0x30] sm:$0xff] %vm5534_vm2, %v6146_v8  ;;  %6211 = vst.msk [vmem:[#allocation3 + $0x38] sm:$0xff] %vm5534_vm2, %v6147_v40  ;;  %v6164_v47 = vmax.f32 %v19037_v57, 0.0  ;;  %v6165_v22 = vmax.f32 %v19041_v55, 0.0  ;;  %v6166_v50 = vmax.f32 %v19045_v63, 0.0  ;;  %v6167_v54 = vmax.f32 %v19049_v37, 0.0 }
 0x61d   :  { %6212 = vst.msk [vmem:[#allocation3 + $0x40] sm:$0xff] %vm5534_vm2, %v6148_v52  ;;  %6213 = vst.msk [vmem:[#allocation3 + $0x48] sm:$0xff] %vm5534_vm2, %v6149_v19  ;;  %v6168_v32 = vmax.f32 %v19053_v20, 0.0  ;;  %v22219_v7 = vld [vmem:[#allocation58_spill] sm:$0xff]  ;;  %v22220_v10 = vld [vmem:[#allocation24_spill] sm:$0xff]  ;;  %v6171_v51 = vmax.f32 %v19065_v59, 0.0 }
 0x61e   :  { %6215 = vst.msk [vmem:[#allocation3 + $0x58] sm:$0xff] %vm5534_vm2, %v6151_v48  ;;  %6216 = vst.msk [vmem:[#allocation3 + $0x60] sm:$0xff] %vm5534_vm2, %v6152_v18  ;;  %v6169_v58 = vmax.f32 %v22219_v7, 0.0  ;;  %v6170_v5 = vmax.f32 %v22220_v10, 0.0  ;;  %v22221_v16 = vld [vmem:[#allocation61_spill] sm:$0xff]  ;;  %v22223_v37 = vld [vmem:[#allocation26_spill] sm:$0xff] }
 0x61f   :  { %6217 = vst.msk [vmem:[#allocation3 + $0x68] sm:$0xff] %vm5534_vm2, %v6153_v31  ;;  %6218 = vst.msk [vmem:[#allocation3 + $0x70] sm:$0xff] %vm5534_vm2, %v6154_v38  ;;  %v6172_v57 = vmax.f32 %v22221_v16, 0.0  ;;  %v22222_v55 = vld [vmem:[#allocation25_spill] sm:$0xff]  ;;  %v6174_v20 = vmax.f32 %v22223_v37, 0.0  ;;  %v6175_v1 = vmax.f32 %v19081_v35, 0.0 }
 0x620   :  { %6219 = vst.msk [vmem:[#allocation3 + $0x78] sm:$0xff] %vm5534_vm2, %v6155_v42  ;;  %6220 = vst.msk [vmem:[#allocation3 + $0x80] sm:$0xff] %vm5534_vm2, %v6156_v39  ;;  %v6173_v63 = vmax.f32 %v22222_v55, 0.0  ;;  %v6176_v41 = vmax.f32 %v19085_v13, 0.0  ;;  %v6177_v59 = vmax.f32 %v19089_v61, 0.0  ;;  %v6178_v27 = vmax.f32 %v19093_v23, 0.0 }
 0x621   :  { %6221 = vst.msk [vmem:[#allocation3 + $0x88] sm:$0xff] %vm5534_vm2, %v6157_v30  ;;  %6222 = vst.msk [vmem:[#allocation3 + $0x90] sm:$0xff] %vm5534_vm2, %v6158_v25  ;;  %v6179_v8 = vmax.f32 %v19097_v14, 0.0  ;;  %v6180_v52 = vmax.f32 %v19101_v53, 0.0  ;;  %v6181_v35 = vmax.f32 %v19105_v2, 0.0  ;;  %v6182_v13 = vmax.f32 %v19109_v6, 0.0 }
 0x622   :  { %6223 = vst.msk [vmem:[#allocation3 + $0x98] sm:$0xff] %vm5534_vm2, %v6159_v29  ;;  %6224 = vst.msk [vmem:[#allocation3 + $0xa0] sm:$0xff] %vm5534_vm2, %v6160_v15  ;;  %v6183_v61 = vmax.f32 %v19113_v43, 0.0  ;;  %v6184_v23 = vmax.f32 %v19117_v56, 0.0  ;;  %v6185_v14 = vmax.f32 %v19121_v11, 0.0  ;;  %v6186_v53 = vmax.f32 %v19125_v9, 0.0 }
 0x623   :  { %6225 = vst.msk [vmem:[#allocation3 + $0xa8] sm:$0xff] %vm5534_vm2, %v6161_v26  ;;  %6226 = vst.msk [vmem:[#allocation3 + $0xb0] sm:$0xff] %vm5534_vm2, %v6162_v49  ;;  %v6187_v2 = vmax.f32 %v19129_v60, 0.0  ;;  %v6188_v6 = vmax.f32 %v19133_v12, 0.0  ;;  %v6189_v43 = vmax.f32 %v19137_v3, 0.0  ;;  %v6190_v56 = vmax.f32 %v19141_v33, 0.0 }
 0x624   :  { %6227 = vst.msk [vmem:[#allocation3 + $0xb8] sm:$0xff] %vm5534_vm2, %v6163_v45  ;;  %6228 = vst.msk [vmem:[#allocation3 + $0xc0] sm:$0xff] %vm5534_vm2, %v6164_v47  ;;  %v6370_v11 = vld [vmem:[#allocation3 + $0x1] sm:$0xff]  ;;  %v6371_v9 = vld [vmem:[#allocation3 + $0x9] sm:$0xff]  ;;  %v6191_v28 = vmax.f32 %v19145_v24, 0.0  ;;  %v6192_v60 = vmax.f32 %v19149_v34, 0.0 }
 0x625   :  { %6229 = vst.msk [vmem:[#allocation3 + $0xc8] sm:$0xff] %vm5534_vm2, %v6165_v22  ;;  %6230 = vst.msk [vmem:[#allocation3 + $0xd0] sm:$0xff] %vm5534_vm2, %v6166_v50  ;;  %v6193_v12 = vmax.f32 %v19153_v21, 0.0  ;;  %v6194_v3 = vmax.f32 %v19157_v46, 0.0  ;;  %v6372_v33 = vld [vmem:[#allocation3 + $0x11] sm:$0xff]  ;;  %v6373_v36 = vld [vmem:[#allocation3 + $0x19] sm:$0xff]  ;;  %v6434_v39 = vpack.c.bf16 %v6371_v9, %v6370_v11 }
 0x626   :  { %6231 = vst.msk [vmem:[#allocation3 + $0xd8] sm:$0xff] %vm5534_vm2, %v6167_v54  ;;  %6232 = vst.msk [vmem:[#allocation3 + $0xe0] sm:$0xff] %vm5534_vm2, %v6168_v32  ;;  %v6195_v62 = vmax.f32 %v19161_v44, 0.0  ;;  %v6196_v24 = vmax.f32 %v19165_v0, 0.0  ;;  %v22224_v40 = vld [vmem:[#allocation27_spill] sm:$0xff]  ;;  %v22225_v19 = vld [vmem:[#allocation28_spill] sm:$0xff] }
 0x627   :  { %6233 = vst.msk [vmem:[#allocation3 + $0xe8] sm:$0xff] %vm5534_vm2, %v6169_v58  ;;  %6234 = vst.msk [vmem:[#allocation3 + $0xf0] sm:$0xff] %vm5534_vm2, %v6170_v5  ;;  %v6197_v34 = vmax.f32 %v22224_v40, 0.0  ;;  %v6198_v21 = vmax.f32 %v22225_v19, 0.0  ;;  %v22226_v46 = vld [vmem:[#allocation65_spill] sm:$0xff]  ;;  %v22228_v31 = vld [vmem:[#allocation68_spill] sm:$0xff]  ;;  %14633 = vmatprep.mubr.msk.bf16.mxu1 %vm5534_vm2, %v6434_v39 }
 0x628   :  { %6235 = vst.msk [vmem:[#allocation3 + $0xf8] sm:$0xff] %vm5534_vm2, %v6171_v51  ;;  %6236 = vst.msk [vmem:[#allocation3 + $0x100] sm:$0xff] %vm5534_vm2, %v6172_v57  ;;  %v6199_v17 = vmax.f32 %v22226_v46, 0.0  ;;  %v22227_v48 = vld [vmem:[#allocation29_spill] sm:$0xff]  ;;  %v6202_v44 = vmax.f32 %v22228_v31, 0.0  ;;  %v6203_v0 = vmax.f32 %v19189_v4, 0.0  ;;  %v6435_v4 = vpack.c.bf16 %v6373_v36, %v6372_v33 }
 0x629   :  { %6237 = vst.msk [vmem:[#allocation3 + $0x108] sm:$0xff] %vm5534_vm2, %v6173_v63  ;;  %6238 = vst.msk [vmem:[#allocation3 + $0x110] sm:$0xff] %vm5534_vm2, %v6174_v20  ;;  %v6200_v18 = vmax.f32 %v22227_v48, 0.0  ;;  %v6374_v38 = vld [vmem:[#allocation3 + $0x21] sm:$0xff]  ;;  %v6375_v42 = vld [vmem:[#allocation3 + $0x29] sm:$0xff] }
 0x62a   :  { %6239 = vst.msk [vmem:[#allocation3 + $0x118] sm:$0xff] %vm5534_vm2, %v6175_v1  ;;  %6240 = vst.msk [vmem:[#allocation3 + $0x120] sm:$0xff] %vm5534_vm2, %v6176_v41  ;;  %v22229_v30 = vld [vmem:[#allocation19_spill] sm:$0xff]  ;;  %v6436_v29 = vpack.c.bf16 %v6375_v42, %v6374_v38  ;;  %14634 = vmatmul.mubr.msk.bf16.vlgmr.msra.gmra.mrb[32].mxu1 %vm5534_vm2, %v6435_v4  ;;  %v6376_v15 = vld [vmem:[#allocation3 + $0x31] sm:$0xff] }
 0x62b   :  { %6241 = vst.msk [vmem:[#allocation3 + $0x128] sm:$0xff] %vm5534_vm2, %v6177_v59  ;;  %6242 = vst.msk [vmem:[#allocation3 + $0x130] sm:$0xff] %vm5534_vm2, %v6178_v27  ;;  %v6954_v25 = vsel %vm6564_vm3, %v22229_v30, 0  ;;  %v6377_v26 = vld [vmem:[#allocation3 + $0x39] sm:$0xff]  ;;  %v6378_v49 = vld [vmem:[#allocation3 + $0x41] sm:$0xff] }
 0x62c   :  { %6243 = vst.msk [vmem:[#allocation3 + $0x138] sm:$0xff] %vm5534_vm2, %v6179_v8  ;;  %6244 = vst.msk [vmem:[#allocation3 + $0x140] sm:$0xff] %vm5534_vm2, %v6180_v52  ;;  %14698 = vmatpush3.bf16.msra.mxu1 %v6954_v25  ;;  %14637 = vmatprep.mubr.msk.bf16.mxu1 %vm5534_vm2, %v6436_v29  ;;  %v6379_v45 = vld [vmem:[#allocation3 + $0x49] sm:$0xff]  ;;  %v6437_v47 = vpack.c.bf16 %v6377_v26, %v6376_v15  ;;  %v6380_v50 = vld [vmem:[#allocation3 + $0x51] sm:$0xff] }
 0x62d   :  { %6245 = vst.msk [vmem:[#allocation3 + $0x148] sm:$0xff] %vm5534_vm2, %v6181_v35  ;;  %6246 = vst.msk [vmem:[#allocation3 + $0x150] sm:$0xff] %vm5534_vm2, %v6182_v13  ;;  %v6438_v22 = vpack.c.bf16 %v6379_v45, %v6378_v49  ;;  %v6381_v54 = vld [vmem:[#allocation3 + $0x59] sm:$0xff]  ;;  %v6382_v32 = vld [vmem:[#allocation3 + $0x61] sm:$0xff] }
 0x62e   :  { %6247 = vst.msk [vmem:[#allocation3 + $0x158] sm:$0xff] %vm5534_vm2, %v6183_v61  ;;  %6248 = vst.msk [vmem:[#allocation3 + $0x160] sm:$0xff] %vm5534_vm2, %v6184_v23  ;;  %v6383_v7 = vld [vmem:[#allocation3 + $0x69] sm:$0xff]  ;;  %v6439_v58 = vpack.c.bf16 %v6381_v54, %v6380_v50  ;;  %v19327_v10 = vld [vmem:[%s21711_s5 + $0x8] sm:$0xf] }
 0x62f   :  { %6249 = vst.msk [vmem:[#allocation3 + $0x168] sm:$0xff] %vm5534_vm2, %v6185_v14  ;;  %6250 = vst.msk [vmem:[#allocation3 + $0x170] sm:$0xff] %vm5534_vm2, %v6186_v53  ;;  %v6440_v5 = vpack.c.bf16 %v6383_v7, %v6382_v32  ;;  %16329 = vmatprep.subr.msk.bf16.mxu1 %vm6564_vm3, %v19327_v10  ;;  %v6384_v51 = vld [vmem:[#allocation3 + $0x71] sm:$0xff]  ;;  %v6385_v16 = vld [vmem:[#allocation3 + $0x79] sm:$0xff] }
 0x630   :  { %6251 = vst.msk [vmem:[#allocation3 + $0x178] sm:$0xff] %vm5534_vm2, %v6187_v2  ;;  %6252 = vst.msk [vmem:[#allocation3 + $0x180] sm:$0xff] %vm5534_vm2, %v6188_v6  ;;  %v6386_v57 = vld [vmem:[#allocation3 + $0x81] sm:$0xff]  ;;  %v6387_v55 = vld [vmem:[#allocation3 + $0x89] sm:$0xff]  ;;  %v6441_v63 = vpack.c.bf16 %v6385_v16, %v6384_v51 }
 0x631   :  { %6253 = vst.msk [vmem:[#allocation3 + $0x188] sm:$0xff] %vm5534_vm2, %v6189_v43  ;;  %6254 = vst.msk [vmem:[#allocation3 + $0x190] sm:$0xff] %vm5534_vm2, %v6190_v56  ;;  %v6442_v37 = vpack.c.bf16 %v6387_v55, %v6386_v57  ;;  %v6388_v20 = vld [vmem:[#allocation3 + $0x91] sm:$0xff]  ;;  %v6389_v1 = vld [vmem:[#allocation3 + $0x99] sm:$0xff] }
 0x632   :  { %6255 = vst.msk [vmem:[#allocation3 + $0x198] sm:$0xff] %vm5534_vm2, %v6191_v28  ;;  %6256 = vst.msk [vmem:[#allocation3 + $0x1a0] sm:$0xff] %vm5534_vm2, %v6192_v60  ;;  %14638 = vmatmul.mubr.msk.bf16.gmra.mrb[36].mxu1 %vm5534_vm2, %v6437_v47  ;;  %v6390_v41 = vld [vmem:[#allocation3 + $0xa1] sm:$0xff]  ;;  %v6391_v59 = vld [vmem:[#allocation3 + $0xa9] sm:$0xff]  ;;  %v6443_v27 = vpack.c.bf16 %v6389_v1, %v6388_v20 }
 0x633   :  { %6257 = vst.msk [vmem:[#allocation3 + $0x1a8] sm:$0xff] %vm5534_vm2, %v6193_v12  ;;  %6258 = vst.msk [vmem:[#allocation3 + $0x1b0] sm:$0xff] %vm5534_vm2, %v6194_v3  ;;  %14641 = vmatprep.mubr.msk.bf16.mxu1 %vm5534_vm2, %v6438_v22  ;;  %v6444_v8 = vpack.c.bf16 %v6391_v59, %v6390_v41  ;;  %v6392_v52 = vld [vmem:[#allocation3 + $0xb1] sm:$0xff]  ;;  %v6393_v35 = vld [vmem:[#allocation3 + $0xb9] sm:$0xff] }
 0x634   :  { %6259 = vst.msk [vmem:[#allocation3 + $0x1b8] sm:$0xff] %vm5534_vm2, %v6195_v62  ;;  %6260 = vst.msk [vmem:[#allocation3 + $0x1c0] sm:$0xff] %vm5534_vm2, %v6196_v24  ;;  %v6394_v13 = vld [vmem:[#allocation3 + $0xc1] sm:$0xff]  ;;  %v6395_v61 = vld [vmem:[#allocation3 + $0xc9] sm:$0xff]  ;;  %v6445_v23 = vpack.c.bf16 %v6393_v35, %v6392_v52 }
 0x635   :  { %6261 = vst.msk [vmem:[#allocation3 + $0x1c8] sm:$0xff] %vm5534_vm2, %v6197_v34  ;;  %6262 = vst.msk [vmem:[#allocation3 + $0x1d0] sm:$0xff] %vm5534_vm2, %v6198_v21  ;;  %v6446_v14 = vpack.c.bf16 %v6395_v61, %v6394_v13  ;;  %v6396_v53 = vld [vmem:[#allocation3 + $0xd1] sm:$0xff]  ;;  %v6397_v2 = vld [vmem:[#allocation3 + $0xd9] sm:$0xff] }
 0x636   :  { %6263 = vst.msk [vmem:[#allocation3 + $0x1d8] sm:$0xff] %vm5534_vm2, %v6199_v17  ;;  %6264 = vst.msk [vmem:[#allocation3 + $0x1e0] sm:$0xff] %vm5534_vm2, %v6200_v18  ;;  %v6398_v6 = vld [vmem:[#allocation3 + $0xe1] sm:$0xff]  ;;  %v6399_v43 = vld [vmem:[#allocation3 + $0xe9] sm:$0xff]  ;;  %v6447_v56 = vpack.c.bf16 %v6397_v2, %v6396_v53 }
 0x637   :  { %6266 = vst.msk [vmem:[#allocation3 + $0x1f0] sm:$0xff] %vm5534_vm2, %v6202_v44  ;;  %6267 = vst.msk [vmem:[#allocation3 + $0x1f8] sm:$0xff] %vm5534_vm2, %v6203_v0  ;;  %v6448_v11 = vpack.c.bf16 %v6399_v43, %v6398_v6  ;;  %v6400_v9 = vld [vmem:[#allocation3 + $0xf1] sm:$0xff]  ;;  %v6401_v28 = vld [vmem:[#allocation3 + $0xf9] sm:$0xff]  ;;  %v7440_v6 = vsel %vm6564_vm3, %v19327_v10, 0 }
 0x638   :  { %v6402_v60 = vld [vmem:[#allocation3 + $0x101] sm:$0xff]  ;;  %v6403_v12 = vld [vmem:[#allocation3 + $0x109] sm:$0xff]  ;;  %v6449_v3 = vpack.c.bf16 %v6401_v28, %v6400_v9  ;;  %v6404_v36 = vld [vmem:[#allocation3 + $0x111] sm:$0xff] }
 0x639   :  { %v6450_v33 = vpack.c.bf16 %v6403_v12, %v6402_v60  ;;  %v6405_v62 = vld [vmem:[#allocation3 + $0x119] sm:$0xff]  ;;  %v6406_v24 = vld [vmem:[#allocation3 + $0x121] sm:$0xff]  ;;  %v6407_v40 = vld [vmem:[#allocation3 + $0x129] sm:$0xff] }
 0x63a   :  { %14642 = vmatmul.mubr.msk.bf16.gmra.mrb[40].mxu1 %vm5534_vm2, %v6439_v58  ;;  %v6451_v34 = vpack.c.bf16 %v6405_v62, %v6404_v36  ;;  %v6452_v19 = vpack.c.bf16 %v6407_v40, %v6406_v24  ;;  %v6408_v21 = vld [vmem:[#allocation3 + $0x131] sm:$0xff]  ;;  %v6409_v46 = vld [vmem:[#allocation3 + $0x139] sm:$0xff]  ;;  %v6410_v17 = vld [vmem:[#allocation3 + $0x141] sm:$0xff] }
 0x63b   :  { %14645 = vmatprep.mubr.msk.bf16.mxu1 %vm5534_vm2, %v6440_v5  ;;  %v6411_v48 = vld [vmem:[#allocation3 + $0x149] sm:$0xff]  ;;  %v6453_v18 = vpack.c.bf16 %v6409_v46, %v6408_v21  ;;  %v6412_v44 = vld [vmem:[#allocation3 + $0x151] sm:$0xff]  ;;  %v6413_v0 = vld [vmem:[#allocation3 + $0x159] sm:$0xff] }
 0x63c   :  { %v6454_v31 = vpack.c.bf16 %v6411_v48, %v6410_v17  ;;  %v6414_v38 = vld [vmem:[#allocation3 + $0x161] sm:$0xff]  ;;  %v6415_v42 = vld [vmem:[#allocation3 + $0x169] sm:$0xff]  ;;  %v6455_v39 = vpack.c.bf16 %v6413_v0, %v6412_v44  ;;  %v6416_v30 = vld [vmem:[#allocation3 + $0x171] sm:$0xff] }
 0x63d   :  { %v6456_v4 = vpack.c.bf16 %v6415_v42, %v6414_v38  ;;  %v6417_v25 = vld [vmem:[#allocation3 + $0x179] sm:$0xff]  ;;  %v6418_v29 = vld [vmem:[#allocation3 + $0x181] sm:$0xff]  ;;  %v6419_v15 = vld [vmem:[#allocation3 + $0x189] sm:$0xff] }
 0x63e   :  { %v6457_v26 = vpack.c.bf16 %v6417_v25, %v6416_v30  ;;  %v6458_v49 = vpack.c.bf16 %v6419_v15, %v6418_v29  ;;  %v6420_v45 = vld [vmem:[#allocation3 + $0x191] sm:$0xff]  ;;  %v6421_v47 = vld [vmem:[#allocation3 + $0x199] sm:$0xff]  ;;  %v6422_v22 = vld [vmem:[#allocation3 + $0x1a1] sm:$0xff] }
 0x63f   :  { %v6423_v50 = vld [vmem:[#allocation3 + $0x1a9] sm:$0xff]  ;;  %v6459_v54 = vpack.c.bf16 %v6421_v47, %v6420_v45  ;;  %v6424_v7 = vld [vmem:[#allocation3 + $0x1b1] sm:$0xff]  ;;  %v6425_v58 = vld [vmem:[#allocation3 + $0x1b9] sm:$0xff] }
 0x640   :  { %v6460_v32 = vpack.c.bf16 %v6423_v50, %v6422_v22  ;;  %v6426_v5 = vld [vmem:[#allocation3 + $0x1c1] sm:$0xff]  ;;  %v6427_v51 = vld [vmem:[#allocation3 + $0x1c9] sm:$0xff]  ;;  %v6461_v16 = vpack.c.bf16 %v6425_v58, %v6424_v7  ;;  %v6428_v55 = vld [vmem:[#allocation3 + $0x1d1] sm:$0xff] }
 0x641   :  { %v6462_v57 = vpack.c.bf16 %v6427_v51, %v6426_v5  ;;  %v6431_v20 = vld [vmem:[#allocation3 + $0x1e9] sm:$0xff]  ;;  %v6432_v59 = vld [vmem:[#allocation3 + $0x1f1] sm:$0xff]  ;;  %v6281_v10 = vld [vmem:[#allocation3 + $0x40] sm:$0xff] }
 0x642   :  { %14646 = vmatmul.mubr.msk.bf16.gmra.mrb[44].mxu1 %vm5534_vm2, %v6441_v63  ;;  %v6429_v63 = vld [vmem:[#allocation3 + $0x1d9] sm:$0xff]  ;;  %v6274_v52 = vld [vmem:[#allocation3 + $0x8] sm:$0xff]  ;;  %v6275_v61 = vld [vmem:[#allocation3 + $0x10] sm:$0xff] }
 0x643   :  { %14649 = vmatprep.mubr.msk.bf16.mxu1 %vm5534_vm2, %v6442_v37  ;;  %v6430_v37 = vld [vmem:[#allocation3 + $0x1e1] sm:$0xff]  ;;  %v6463_v1 = vpack.c.bf16 %v6429_v63, %v6428_v55  ;;  %v6280_v9 = vld [vmem:[#allocation3 + $0x38] sm:$0xff] }
 0x644   :  { %v6464_v41 = vpack.c.bf16 %v6431_v20, %v6430_v37  ;;  %v6278_v53 = vld [vmem:[#allocation3 + $0x28] sm:$0xff]  ;;  %v6285_v36 = vld [vmem:[#allocation3 + $0x60] sm:$0xff] }
 0x645   :  { %v6282_v28 = vld [vmem:[#allocation3 + $0x48] sm:$0xff]  ;;  %v6289_v21 = vld [vmem:[#allocation3 + $0x80] sm:$0xff] }
 0x646   :  { %v19378_v12 = vpack.c.bf16 %v6282_v28, %v6281_v10  ;;  %v6286_v62 = vld [vmem:[#allocation3 + $0x68] sm:$0xff]  ;;  %v6293_v44 = vld [vmem:[#allocation3 + $0xa0] sm:$0xff] }
 0x647   :  { %v19386_v40 = vpack.c.bf16 %v6286_v62, %v6285_v36  ;;  %v6290_v46 = vld [vmem:[#allocation3 + $0x88] sm:$0xff]  ;;  %v6297_v30 = vld [vmem:[#allocation3 + $0xc0] sm:$0xff]  ;;  %v6324_v36 = vld [vmem:[#allocation3 + $0x198] sm:$0xff] }
 0x648   :  { %v19394_v48 = vpack.c.bf16 %v6290_v46, %v6289_v21  ;;  %v6294_v0 = vld [vmem:[#allocation3 + $0xa8] sm:$0xff]  ;;  %v6301_v45 = vld [vmem:[#allocation3 + $0xe0] sm:$0xff]  ;;  %v6327_v46 = vld [vmem:[#allocation3 + $0x1b0] sm:$0xff] }
 0x649   :  { %v19402_v42 = vpack.c.bf16 %v6294_v0, %v6293_v44  ;;  %v6298_v25 = vld [vmem:[#allocation3 + $0xc8] sm:$0xff]  ;;  %v6305_v7 = vld [vmem:[#allocation3 + $0x100] sm:$0xff] }
 0x64a   :  { %14650 = vmatmul.mubr.msk.bf16.gmra.mrb[48].mxu1 %vm5534_vm2, %v6443_v27  ;;  %v6433_v27 = vld [vmem:[#allocation3 + $0x1f9] sm:$0xff]  ;;  %v19410_v15 = vpack.c.bf16 %v6298_v25, %v6297_v30  ;;  %v6302_v47 = vld [vmem:[#allocation3 + $0xe8] sm:$0xff] }
 0x64b   :  { %14653 = vmatprep.mubr.msk.bf16.mxu1 %vm5534_vm2, %v6444_v8  ;;  %v6273_v8 = vld [vmem:[#allocation3] sm:$0xff]  ;;  %v6465_v35 = vpack.c.bf16 %v6433_v27, %v6432_v59  ;;  %v19418_v50 = vpack.c.bf16 %v6302_v47, %v6301_v45  ;;  %v6306_v58 = vld [vmem:[#allocation3 + $0x108] sm:$0xff]  ;;  %v6332_v30 = vld [vmem:[#allocation3 + $0x1d8] sm:$0xff] }
 0x64c   :  { %v6337_v13 = vpack.c.bf16 %v6274_v52, %v6273_v8  ;;  %v19426_v51 = vpack.c.bf16 %v6306_v58, %v6305_v7  ;;  %v6309_v55 = vld [vmem:[#allocation3 + $0x120] sm:$0xff]  ;;  %v6310_v63 = vld [vmem:[#allocation3 + $0x128] sm:$0xff]  ;;  %v6335_v47 = vld [vmem:[#allocation3 + $0x1f0] sm:$0xff] }
 0x64d   :  { %v19434_v20 = vpack.c.bf16 %v6310_v63, %v6309_v55  ;;  %v6313_v59 = vld [vmem:[#allocation3 + $0x140] sm:$0xff]  ;;  %v6314_v27 = vld [vmem:[#allocation3 + $0x148] sm:$0xff] }
 0x64e   :  { %v19442_v52 = vpack.c.bf16 %v6314_v27, %v6313_v59  ;;  %v6322_v10 = vld [vmem:[#allocation3 + $0x188] sm:$0xff]  ;;  %v6325_v62 = vld [vmem:[#allocation3 + $0x1a0] sm:$0xff] }
 0x64f   :  { %v6330_v44 = vld [vmem:[#allocation3 + $0x1c8] sm:$0xff]  ;;  %v6333_v25 = vld [vmem:[#allocation3 + $0x1e0] sm:$0xff] }
 0x650   :  { %v7246_v7 = vld [vmem:[#allocation3 + $0xa] sm:$0xff]  ;;  %v7248_v55 = vld [vmem:[#allocation3 + $0x1a] sm:$0xff]  ;;  %v7249_v63 = vld [vmem:[#allocation3 + $0x22] sm:$0xff] }
 0x652   :  { %14654 = vmatmul.mubr.msk.bf16.gmra.mrb[52].mxu1 %vm5534_vm2, %v6445_v23  ;;  %v6276_v23 = vld [vmem:[#allocation3 + $0x18] sm:$0xff] }
 0x653   :  { %14657 = vmatprep.mubr.msk.bf16.mxu1 %vm5534_vm2, %v6446_v14  ;;  %v6277_v14 = vld [vmem:[#allocation3 + $0x20] sm:$0xff]  ;;  %v19359_v2 = vpack.c.bf16 %v6276_v23, %v6275_v61  ;;  %v6318_v23 = vld [vmem:[#allocation3 + $0x168] sm:$0xff] }
 0x654   :  { %v19363_v43 = vpack.c.bf16 %v6278_v53, %v6277_v14  ;;  %v6317_v61 = vld [vmem:[#allocation3 + $0x160] sm:$0xff] }
 0x655   :  { %v19450_v53 = vpack.c.bf16 %v6318_v23, %v6317_v61  ;;  %v7252_v61 = vld [vmem:[#allocation3 + $0x3a] sm:$0xff]  ;;  %v7254_v23 = vld [vmem:[#allocation3 + $0x4a] sm:$0xff] }
 0x65a   :  { %14658 = vmatmul.mubr.msk.bf16.gmra.mrb[56].mxu1 %vm5534_vm2, %v6447_v56  ;;  %v19368_v56 = vld [vmem:[%s21711_s5 + $0xc] sm:$0xf] }
 0x65b   :  { %14661 = vmatprep.mubr.msk.bf16.mxu1 %vm5534_vm2, %v6448_v11  ;;  %v6279_v11 = vld [vmem:[#allocation3 + $0x30] sm:$0xff]  ;;  %v7990_v59 = vsel %vm6564_vm3, %v19368_v56, 0 }
 0x65c   :  { %v19376_v60 = vpack.c.bf16 %v6280_v9, %v6279_v11  ;;  %v6320_v11 = vld [vmem:[#allocation3 + $0x178] sm:$0xff]  ;;  %v6321_v9 = vld [vmem:[#allocation3 + $0x180] sm:$0xff] }
 0x662   :  { %14662 = vmatmul.mubr.msk.bf16.gmra.mrb[60].mxu1 %vm5534_vm2, %v6449_v3  ;;  %v6283_v3 = vld [vmem:[#allocation3 + $0x50] sm:$0xff] }
 0x663   :  { %14665 = vmatprep.mubr.msk.bf16.mxu1 %vm5534_vm2, %v6450_v33  ;;  %v6284_v33 = vld [vmem:[#allocation3 + $0x58] sm:$0xff] }
 0x664   :  { %v19384_v24 = vpack.c.bf16 %v6284_v33, %v6283_v3  ;;  %v19458_v3 = vpack.c.bf16 %v6322_v10, %v6321_v9  ;;  %v6323_v33 = vld [vmem:[#allocation3 + $0x190] sm:$0xff]  ;;  %v7256_v10 = vld [vmem:[#allocation3 + $0x5a] sm:$0xff] }
 0x665   :  { %v7255_v9 = vld [vmem:[#allocation3 + $0x52] sm:$0xff] }
 0x66a   :  { %14666 = vmatmul.mubr.msk.bf16.gmra.mrb[64].mxu1 %vm5534_vm2, %v6451_v34  ;;  %v6287_v34 = vld [vmem:[#allocation3 + $0x70] sm:$0xff] }
 0x66b   :  { %14669 = vmatprep.mubr.msk.bf16.mxu1 %vm5534_vm2, %v6452_v19  ;;  %v6288_v19 = vld [vmem:[#allocation3 + $0x78] sm:$0xff] }
 0x66c   :  { %v19392_v17 = vpack.c.bf16 %v6288_v19, %v6287_v34  ;;  %v6326_v34 = vld [vmem:[#allocation3 + $0x1a8] sm:$0xff]  ;;  %v19464_v19 = vpack.c.bf16 %v6324_v36, %v6323_v33 }
 0x66d   :  { %v19466_v21 = vpack.c.bf16 %v6326_v34, %v6325_v62  ;;  %v7257_v33 = vld [vmem:[#allocation3 + $0x62] sm:$0xff]  ;;  %v7258_v36 = vld [vmem:[#allocation3 + $0x6a] sm:$0xff]  ;;  %v19518_v62 = vpack.c.bf16 %v7256_v10, %v7255_v9 }
 0x66e   :  { %v19520_v34 = vpack.c.bf16 %v7258_v36, %v7257_v33  ;;  %v7275_v33 = vld [vmem:[#allocation3 + $0xf2] sm:$0xff]  ;;  %v7276_v36 = vld [vmem:[#allocation3 + $0xfa] sm:$0xff] }
 0x672   :  { %14670 = vmatmul.mubr.msk.bf16.gmra.mrb[68].mxu1 %vm5534_vm2, %v6453_v18  ;;  %v6291_v18 = vld [vmem:[#allocation3 + $0x90] sm:$0xff] }
 0x673   :  { %14673 = vmatprep.mubr.msk.bf16.mxu1 %vm5534_vm2, %v6454_v31  ;;  %v6292_v31 = vld [vmem:[#allocation3 + $0x98] sm:$0xff] }
 0x674   :  { %v19400_v38 = vpack.c.bf16 %v6292_v31, %v6291_v18  ;;  %v6328_v18 = vld [vmem:[#allocation3 + $0x1b8] sm:$0xff]  ;;  %v6329_v31 = vld [vmem:[#allocation3 + $0x1c0] sm:$0xff] }
 0x675   :  { %v19472_v0 = vpack.c.bf16 %v6328_v18, %v6327_v46  ;;  %v7259_v46 = vld [vmem:[#allocation3 + $0x72] sm:$0xff]  ;;  %v7260_v18 = vld [vmem:[#allocation3 + $0x7a] sm:$0xff] }
 0x67a   :  { %14674 = vmatmul.mubr.msk.bf16.gmra.mrb[72].mxu1 %vm5534_vm2, %v6455_v39  ;;  %v6295_v39 = vld [vmem:[#allocation3 + $0xb0] sm:$0xff] }
 0x67b   :  { %14677 = vmatprep.mubr.msk.bf16.mxu1 %vm5534_vm2, %v6456_v4  ;;  %v6296_v4 = vld [vmem:[#allocation3 + $0xb8] sm:$0xff] }
 0x67c   :  { %v19408_v29 = vpack.c.bf16 %v6296_v4, %v6295_v39  ;;  %v19474_v39 = vpack.c.bf16 %v6330_v44, %v6329_v31  ;;  %v6331_v4 = vld [vmem:[#allocation3 + $0x1d0] sm:$0xff]  ;;  %v7261_v31 = vld [vmem:[#allocation3 + $0x82] sm:$0xff] }
 0x67d   :  { %v7262_v44 = vld [vmem:[#allocation3 + $0x8a] sm:$0xff] }
 0x682   :  { %14678 = vmatmul.mubr.msk.bf16.gmra.mrb[76].mxu1 %vm5534_vm2, %v6457_v26  ;;  %v6299_v26 = vld [vmem:[#allocation3 + $0xd0] sm:$0xff] }
 0x683   :  { %14681 = vmatprep.mubr.msk.bf16.mxu1 %vm5534_vm2, %v6458_v49  ;;  %v6300_v49 = vld [vmem:[#allocation3 + $0xd8] sm:$0xff] }
 0x684   :  { %v19416_v22 = vpack.c.bf16 %v6300_v49, %v6299_v26  ;;  %v6334_v26 = vld [vmem:[#allocation3 + $0x1e8] sm:$0xff]  ;;  %v19480_v49 = vpack.c.bf16 %v6332_v30, %v6331_v4  ;;  %v19526_v4 = vpack.c.bf16 %v7260_v18, %v7259_v46  ;;  %v19528_v30 = vpack.c.bf16 %v7262_v44, %v7261_v31 }
 0x685   :  { %v19482_v45 = vpack.c.bf16 %v6334_v26, %v6333_v25  ;;  %v7263_v25 = vld [vmem:[#allocation3 + $0x92] sm:$0xff]  ;;  %v7264_v26 = vld [vmem:[#allocation3 + $0x9a] sm:$0xff]  ;;  %v7277_v46 = vld [vmem:[#allocation3 + $0x102] sm:$0xff]  ;;  %v19558_v31 = vpack.c.bf16 %v7276_v36, %v7275_v33 }
 0x686   :  { %v7278_v18 = vld [vmem:[#allocation3 + $0x10a] sm:$0xff]  ;;  %v7287_v33 = vld [vmem:[#allocation3 + $0x152] sm:$0xff]  ;;  %v7288_v36 = vld [vmem:[#allocation3 + $0x15a] sm:$0xff] }
 0x687   :  { %v19560_v44 = vpack.c.bf16 %v7278_v18, %v7277_v46  ;;  %v7289_v46 = vld [vmem:[#allocation3 + $0x162] sm:$0xff]  ;;  %v7290_v18 = vld [vmem:[#allocation3 + $0x16a] sm:$0xff] }
 0x68a   :  { %14682 = vmatmul.mubr.msk.bf16.gmra.mrb[80].mxu1 %vm5534_vm2, %v6459_v54  ;;  %v6303_v54 = vld [vmem:[#allocation3 + $0xf0] sm:$0xff] }
 0x68b   :  { %14685 = vmatprep.mubr.msk.bf16.mxu1 %vm5534_vm2, %v6460_v32  ;;  %v6304_v32 = vld [vmem:[#allocation3 + $0xf8] sm:$0xff] }
 0x68c   :  { %v19424_v5 = vpack.c.bf16 %v6304_v32, %v6303_v54  ;;  %v6336_v54 = vld [vmem:[#allocation3 + $0x1f8] sm:$0xff]  ;;  %v7245_v32 = vld [vmem:[#allocation3 + $0x2] sm:$0xff] }
 0x68d   :  { %v19488_v58 = vpack.c.bf16 %v6336_v54, %v6335_v47  ;;  %v7265_v47 = vld [vmem:[#allocation3 + $0xa2] sm:$0xff]  ;;  %v7266_v54 = vld [vmem:[#allocation3 + $0xaa] sm:$0xff] }
 0x692   :  { %14686 = vmatmul.mubr.msk.bf16.gmra.mrb[84].mxu1 %vm5534_vm2, %v6461_v16  ;;  %v6307_v16 = vld [vmem:[#allocation3 + $0x110] sm:$0xff] }
 0x693   :  { %14689 = vmatprep.mubr.msk.bf16.mxu1 %vm5534_vm2, %v6462_v57  ;;  %v6308_v57 = vld [vmem:[#allocation3 + $0x118] sm:$0xff] }
 0x694   :  { %v19432_v37 = vpack.c.bf16 %v6308_v57, %v6307_v16  ;;  %v7309_v16 = vpack.c.bf16 %v7246_v7, %v7245_v32  ;;  %v7247_v57 = vld [vmem:[#allocation3 + $0x12] sm:$0xff]  ;;  %v19534_v32 = vpack.c.bf16 %v7264_v26, %v7263_v25  ;;  %v19536_v7 = vpack.c.bf16 %v7266_v54, %v7265_v47  ;;  %v7280_v26 = vld [vmem:[#allocation3 + $0x11a] sm:$0xff]  ;;  %v7281_v47 = vld [vmem:[#allocation3 + $0x122] sm:$0xff] }
 0x695   :  { %v7279_v25 = vld [vmem:[#allocation3 + $0x112] sm:$0xff]  ;;  %v7282_v54 = vld [vmem:[#allocation3 + $0x12a] sm:$0xff] }
 0x69a   :  { %14690 = vmatmul.mubr.msk.bf16.gmra.mrb[88].mxu1 %vm5534_vm2, %v6463_v1  ;;  %v6311_v1 = vld [vmem:[#allocation3 + $0x130] sm:$0xff] }
 0x69b   :  { %14693 = vmatprep.mubr.msk.bf16.mxu1 %vm5534_vm2, %v6464_v41  ;;  %v6312_v41 = vld [vmem:[#allocation3 + $0x138] sm:$0xff] }
 0x69c   :  { %v19440_v8 = vpack.c.bf16 %v6312_v41, %v6311_v1  ;;  %v7250_v1 = vld [vmem:[#allocation3 + $0x2a] sm:$0xff]  ;;  %v19493_v41 = vpack.c.bf16 %v7248_v55, %v7247_v57  ;;  %v7268_v57 = vld [vmem:[#allocation3 + $0xba] sm:$0xff]  ;;  %v7269_v55 = vld [vmem:[#allocation3 + $0xc2] sm:$0xff] }
 0x69d   :  { %v19497_v27 = vpack.c.bf16 %v7250_v1, %v7249_v63  ;;  %v7270_v63 = vld [vmem:[#allocation3 + $0xca] sm:$0xff] }
 0x6a2   :  { %14694 = vmatmul.mubr.msk.bf16.gmra.mrb[92].mxu1 %vm5534_vm2, %v6465_v35  ;;  %v6315_v35 = vld [vmem:[#allocation3 + $0x150] sm:$0xff] }
 0x6a3   :  { %14699 = vmatprep.mubr.msk.bf16.mxu1 %vm5534_vm2, %v6337_v13  ;;  %v6316_v13 = vld [vmem:[#allocation3 + $0x158] sm:$0xff] }
 0x6a4   :  { %v19448_v14 = vpack.c.bf16 %v6316_v13, %v6315_v35  ;;  %v19502_v35 = vld [vmem:[%s21711_s5 + $0x10] sm:$0xf]  ;;  %v7251_v13 = vld [vmem:[#allocation3 + $0x32] sm:$0xff] }
 0x6aa   :  { %14700 = vmatmul.mubr.msk.bf16.vlgmr.msra.gmra.mrb[32].mxu1 %vm5534_vm2, %v19359_v2 }
 0x6ab   :  { %14764 = vmatpush3.bf16.msra.mxu1 %v7440_v6  ;;  %14703 = vmatprep.mubr.msk.bf16.mxu1 %vm5534_vm2, %v19363_v43  ;;  %v6319_v6 = vld [vmem:[#allocation3 + $0x170] sm:$0xff] }
 0x6ac   :  { %16330 = vmatprep.subr.msk.bf16.mxu1 %vm6564_vm3, %v19368_v56  ;;  %v19456_v28 = vpack.c.bf16 %v6320_v11, %v6319_v6  ;;  %v7253_v56 = vld [vmem:[#allocation3 + $0x42] sm:$0xff]  ;;  %v19510_v6 = vpack.c.bf16 %v7252_v61, %v7251_v13  ;;  %v7271_v13 = vld [vmem:[#allocation3 + $0xd2] sm:$0xff]  ;;  %v7272_v61 = vld [vmem:[#allocation3 + $0xda] sm:$0xff] }
 0x6ad   :  { %v19512_v11 = vpack.c.bf16 %v7254_v23, %v7253_v56  ;;  %v7273_v56 = vld [vmem:[#allocation3 + $0xe2] sm:$0xff]  ;;  %v7274_v23 = vld [vmem:[#allocation3 + $0xea] sm:$0xff]  ;;  %v19550_v9 = vpack.c.bf16 %v7272_v61, %v7271_v13 }
 0x6ae   :  { %v19552_v10 = vpack.c.bf16 %v7274_v23, %v7273_v56  ;;  %v7285_v13 = vld [vmem:[#allocation3 + $0x142] sm:$0xff]  ;;  %v7286_v61 = vld [vmem:[#allocation3 + $0x14a] sm:$0xff] }
 0x6af   :  { %v19576_v23 = vpack.c.bf16 %v7286_v61, %v7285_v13 }
 0x6b2   :  { %14704 = vmatmul.mubr.msk.bf16.gmra.mrb[36].mxu1 %vm5534_vm2, %v19376_v60 }
 0x6b3   :  { %14707 = vmatprep.mubr.msk.bf16.mxu1 %vm5534_vm2, %v19378_v12 }
 0x6ba   :  { %14708 = vmatmul.mubr.msk.bf16.gmra.mrb[40].mxu1 %vm5534_vm2, %v19384_v24 }
 0x6bb   :  { %14711 = vmatprep.mubr.msk.bf16.mxu1 %vm5534_vm2, %v19386_v40 }
 0x6c2   :  { %14712 = vmatmul.mubr.msk.bf16.gmra.mrb[44].mxu1 %vm5534_vm2, %v19392_v17 }
 0x6c3   :  { %14715 = vmatprep.mubr.msk.bf16.mxu1 %vm5534_vm2, %v19394_v48 }
 0x6ca   :  { %14716 = vmatmul.mubr.msk.bf16.gmra.mrb[48].mxu1 %vm5534_vm2, %v19400_v38 }
 0x6cb   :  { %14719 = vmatprep.mubr.msk.bf16.mxu1 %vm5534_vm2, %v19402_v42 }
 0x6d2   :  { %14720 = vmatmul.mubr.msk.bf16.gmra.mrb[52].mxu1 %vm5534_vm2, %v19408_v29 }
 0x6d3   :  { %14723 = vmatprep.mubr.msk.bf16.mxu1 %vm5534_vm2, %v19410_v15 }
 0x6da   :  { %14724 = vmatmul.mubr.msk.bf16.gmra.mrb[56].mxu1 %vm5534_vm2, %v19416_v22 }
 0x6db   :  { %14727 = vmatprep.mubr.msk.bf16.mxu1 %vm5534_vm2, %v19418_v50 }
 0x6e2   :  { %14728 = vmatmul.mubr.msk.bf16.gmra.mrb[60].mxu1 %vm5534_vm2, %v19424_v5 }
 0x6e3   :  { %14731 = vmatprep.mubr.msk.bf16.mxu1 %vm5534_vm2, %v19426_v51 }
 0x6ea   :  { %14732 = vmatmul.mubr.msk.bf16.gmra.mrb[64].mxu1 %vm5534_vm2, %v19432_v37 }
 0x6eb   :  { %14735 = vmatprep.mubr.msk.bf16.mxu1 %vm5534_vm2, %v19434_v20 }
 0x6f2   :  { %14736 = vmatmul.mubr.msk.bf16.gmra.mrb[68].mxu1 %vm5534_vm2, %v19440_v8 }
 0x6f3   :  { %14739 = vmatprep.mubr.msk.bf16.mxu1 %vm5534_vm2, %v19442_v52 }
 0x6fa   :  { %14740 = vmatmul.mubr.msk.bf16.gmra.mrb[72].mxu1 %vm5534_vm2, %v19448_v14 }
 0x6fb   :  { %14743 = vmatprep.mubr.msk.bf16.mxu1 %vm5534_vm2, %v19450_v53 }
 0x702   :  { %14744 = vmatmul.mubr.msk.bf16.gmra.mrb[76].mxu1 %vm5534_vm2, %v19456_v28 }
 0x703   :  { %14747 = vmatprep.mubr.msk.bf16.mxu1 %vm5534_vm2, %v19458_v3 }
 0x70a   :  { %14748 = vmatmul.mubr.msk.bf16.gmra.mrb[80].mxu1 %vm5534_vm2, %v19464_v19 }
 0x70b   :  { %14751 = vmatprep.mubr.msk.bf16.mxu1 %vm5534_vm2, %v19466_v21 }
 0x712   :  { %14752 = vmatmul.mubr.msk.bf16.gmra.mrb[84].mxu1 %vm5534_vm2, %v19472_v0 }
 0x713   :  { %14755 = vmatprep.mubr.msk.bf16.mxu1 %vm5534_vm2, %v19474_v39 }
 0x71a   :  { %14756 = vmatmul.mubr.msk.bf16.gmra.mrb[88].mxu1 %vm5534_vm2, %v19480_v49 }
 0x71b   :  { %14759 = vmatprep.mubr.msk.bf16.mxu1 %vm5534_vm2, %v19482_v45 }
 0x722   :  { %14760 = vmatmul.mubr.msk.bf16.gmra.mrb[92].mxu1 %vm5534_vm2, %v19488_v58 }
 0x723   :  { %14765 = vmatprep.mubr.msk.bf16.mxu1 %vm5534_vm2, %v7309_v16  ;;  %v7267_v16 = vld [vmem:[#allocation3 + $0xb2] sm:$0xff] }
 0x724   :  { %v19542_v1 = vpack.c.bf16 %v7268_v57, %v7267_v16  ;;  %v19566_v16 = vpack.c.bf16 %v7280_v26, %v7279_v25  ;;  %v19568_v57 = vpack.c.bf16 %v7282_v54, %v7281_v47  ;;  %v19582_v25 = vpack.c.bf16 %v7288_v36, %v7287_v33  ;;  %v7291_v47 = vld [vmem:[#allocation3 + $0x172] sm:$0xff]  ;;  %v7292_v54 = vld [vmem:[#allocation3 + $0x17a] sm:$0xff] }
 0x725   :  { %v19584_v26 = vpack.c.bf16 %v7290_v18, %v7289_v46  ;;  %v19590_v13 = vpack.c.bf16 %v7292_v54, %v7291_v47  ;;  %v7295_v33 = vld [vmem:[#allocation3 + $0x192] sm:$0xff]  ;;  %v7296_v36 = vld [vmem:[#allocation3 + $0x19a] sm:$0xff]  ;;  %v7297_v46 = vld [vmem:[#allocation3 + $0x1a2] sm:$0xff] }
 0x726   :  { %22230 = vst [vmem:[#allocation30_spill] sm:$0xff] %v19582_v25  ;;  %v7298_v18 = vld [vmem:[#allocation3 + $0x1aa] sm:$0xff]  ;;  %v7299_v47 = vld [vmem:[#allocation3 + $0x1b2] sm:$0xff]  ;;  %v7300_v54 = vld [vmem:[#allocation3 + $0x1ba] sm:$0xff] }
 0x727   :  { %22231 = vst [vmem:[#allocation64_spill] sm:$0xff] %v19584_v26  ;;  %22232 = vst [vmem:[#allocation31_spill] sm:$0xff] %v19590_v13 }
 0x72a   :  { %14766 = vmatmul.mubr.msk.bf16.vlgmr.msra.gmra.mrb[32].mxu1 %vm5534_vm2, %v19493_v41 }
 0x72b   :  { %14830 = vmatpush3.bf16.msra.mxu1 %v7990_v59  ;;  %14769 = vmatprep.mubr.msk.bf16.mxu1 %vm5534_vm2, %v19497_v27  ;;  %v19544_v59 = vpack.c.bf16 %v7270_v63, %v7269_v55  ;;  %v7283_v55 = vld [vmem:[#allocation3 + $0x132] sm:$0xff]  ;;  %v7284_v63 = vld [vmem:[#allocation3 + $0x13a] sm:$0xff] }
 0x72c   :  { %16331 = vmatprep.subr.msk.bf16.mxu1 %vm6564_vm3, %v19502_v35  ;;  %v19574_v56 = vpack.c.bf16 %v7284_v63, %v7283_v55  ;;  %v7293_v55 = vld [vmem:[#allocation3 + $0x182] sm:$0xff]  ;;  %v7294_v63 = vld [vmem:[#allocation3 + $0x18a] sm:$0xff] }
 0x72d   :  { %v19592_v61 = vpack.c.bf16 %v7294_v63, %v7293_v55  ;;  %v7301_v55 = vld [vmem:[#allocation3 + $0x1c2] sm:$0xff]  ;;  %v7302_v63 = vld [vmem:[#allocation3 + $0x1ca] sm:$0xff] }
 0x72f   :  { %22233 = vst [vmem:[#allocation67_spill] sm:$0xff] %v19592_v61 }
 0x732   :  { %14770 = vmatmul.mubr.msk.bf16.gmra.mrb[36].mxu1 %vm5534_vm2, %v19510_v6 }
 0x733   :  { %14773 = vmatprep.mubr.msk.bf16.mxu1 %vm5534_vm2, %v19512_v11 }
 0x73a   :  { %14774 = vmatmul.mubr.msk.bf16.gmra.mrb[40].mxu1 %vm5534_vm2, %v19518_v62 }
 0x73b   :  { %14777 = vmatprep.mubr.msk.bf16.mxu1 %vm5534_vm2, %v19520_v34 }
 0x742   :  { %14778 = vmatmul.mubr.msk.bf16.gmra.mrb[44].mxu1 %vm5534_vm2, %v19526_v4 }
 0x743   :  { %14781 = vmatprep.mubr.msk.bf16.mxu1 %vm5534_vm2, %v19528_v30 }
 0x74a   :  { %14782 = vmatmul.mubr.msk.bf16.gmra.mrb[48].mxu1 %vm5534_vm2, %v19534_v32 }
 0x74b   :  { %14785 = vmatprep.mubr.msk.bf16.mxu1 %vm5534_vm2, %v19536_v7 }
 0x752   :  { %14786 = vmatmul.mubr.msk.bf16.gmra.mrb[52].mxu1 %vm5534_vm2, %v19542_v1 }
 0x753   :  { %14789 = vmatprep.mubr.msk.bf16.mxu1 %vm5534_vm2, %v19544_v59 }
 0x75a   :  { %14790 = vmatmul.mubr.msk.bf16.gmra.mrb[56].mxu1 %vm5534_vm2, %v19550_v9 }
 0x75b   :  { %14793 = vmatprep.mubr.msk.bf16.mxu1 %vm5534_vm2, %v19552_v10 }
 0x762   :  { %14794 = vmatmul.mubr.msk.bf16.gmra.mrb[60].mxu1 %vm5534_vm2, %v19558_v31 }
 0x763   :  { %14797 = vmatprep.mubr.msk.bf16.mxu1 %vm5534_vm2, %v19560_v44 }
 0x76a   :  { %14798 = vmatmul.mubr.msk.bf16.gmra.mrb[64].mxu1 %vm5534_vm2, %v19566_v16 }
 0x76b   :  { %14801 = vmatprep.mubr.msk.bf16.mxu1 %vm5534_vm2, %v19568_v57 }
 0x772   :  { %14802 = vmatmul.mubr.msk.bf16.gmra.mrb[68].mxu1 %vm5534_vm2, %v19574_v56 }
 0x773   :  { %14805 = vmatprep.mubr.msk.bf16.mxu1 %vm5534_vm2, %v19576_v23 }
 0x77a   :  { %14806 = vmatmul.mubr.msk.bf16.gmra.mrb[72].mxu1 %vm5534_vm2, %v19582_v25  ;;  %v19598_v25 = vpack.c.bf16 %v7296_v36, %v7295_v33  ;;  %v7303_v33 = vld [vmem:[#allocation3 + $0x1d2] sm:$0xff]  ;;  %v7304_v36 = vld [vmem:[#allocation3 + $0x1da] sm:$0xff] }
 0x77b   :  { %14809 = vmatprep.mubr.msk.bf16.mxu1 %vm5534_vm2, %v19584_v26  ;;  %v19600_v26 = vpack.c.bf16 %v7298_v18, %v7297_v46  ;;  %v7305_v46 = vld [vmem:[#allocation3 + $0x1e2] sm:$0xff]  ;;  %v7306_v18 = vld [vmem:[#allocation3 + $0x1ea] sm:$0xff] }
 0x77c   :  { %22234 = vst [vmem:[#allocation32_spill] sm:$0xff] %v19598_v25 }
 0x77d   :  { %22235 = vst [vmem:[#allocation71_spill] sm:$0xff] %v19600_v26 }
 0x782   :  { %14810 = vmatmul.mubr.msk.bf16.gmra.mrb[76].mxu1 %vm5534_vm2, %v19590_v13  ;;  %v19606_v13 = vpack.c.bf16 %v7300_v54, %v7299_v47  ;;  %v7307_v47 = vld [vmem:[#allocation3 + $0x1f2] sm:$0xff]  ;;  %v7308_v54 = vld [vmem:[#allocation3 + $0x1fa] sm:$0xff] }
 0x783   :  { %14813 = vmatprep.mubr.msk.bf16.mxu1 %vm5534_vm2, %v19592_v61  ;;  %v19608_v61 = vpack.c.bf16 %v7302_v63, %v7301_v55  ;;  %v19622_v55 = vpack.c.bf16 %v7308_v54, %v7307_v47  ;;  %v8540_v63 = vsel %vm6564_vm3, %v19502_v35, 0  ;;  %v8366_v47 = vld [vmem:[#allocation3 + $0xb9] sm:$0xff] }
 0x78a   :  { %14814 = vmatmul.mubr.msk.bf16.gmra.mrb[80].mxu1 %vm5534_vm2, %v19598_v25  ;;  %v19614_v25 = vpack.c.bf16 %v7304_v36, %v7303_v33  ;;  %v13243_v33 = vld [vmem:[%s21711_s5 + $0x14] sm:$0xf]  ;;  %v8363_v36 = vld [vmem:[#allocation3 + $0xa1] sm:$0xff] }
 0x78b   :  { %14817 = vmatprep.mubr.msk.bf16.mxu1 %vm5534_vm2, %v19600_v26  ;;  %v19616_v26 = vpack.c.bf16 %v7306_v18, %v7305_v46  ;;  %v8364_v46 = vld [vmem:[#allocation3 + $0xa9] sm:$0xff]  ;;  %v8365_v18 = vld [vmem:[#allocation3 + $0xb1] sm:$0xff] }
 0x78c   :  { %v19739_v54 = vpack.c.bf16 %v8364_v46, %v8363_v36  ;;  %v8383_v46 = vld [vmem:[#allocation3 + $0x141] sm:$0xff] }
 0x792   :  { %14818 = vmatmul.mubr.msk.bf16.gmra.mrb[84].mxu1 %vm5534_vm2, %v19606_v13 }
 0x793   :  { %14821 = vmatprep.mubr.msk.bf16.mxu1 %vm5534_vm2, %v19608_v61 }
 0x79a   :  { %14822 = vmatmul.mubr.msk.bf16.gmra.mrb[88].mxu1 %vm5534_vm2, %v19614_v25 }
 0x79b   :  { %14825 = vmatprep.mubr.msk.bf16.mxu1 %vm5534_vm2, %v19616_v26 }
 0x7a2   :  { %14826 = vmatmul.mubr.msk.bf16.gmra.mrb[92].mxu1 %vm5534_vm2, %v19622_v55 }
 0x7a3   :  { %14831 = vmatprep.mubr.msk.bf16.mxu1 %vm5534_vm2, %v19359_v2  ;;  %v7857_v2 = vld [vmem:[#allocation3 + $0x200] sm:$0xff] }
 0x7aa   :  { %14832 = vmatmul.mubr.msk.bf16.vlgmr.msra.gmra.mrb[32].mxu1 %vm5534_vm2, %v19363_v43  ;;  %v7858_v43 = vld [vmem:[#allocation3 + $0x208] sm:$0xff] }
 0x7ab   :  { %14896 = vmatpush3.bf16.msra.mxu1 %v8540_v63  ;;  %14835 = vmatprep.mubr.msk.bf16.mxu1 %vm5534_vm2, %v19376_v60  ;;  %v19694_v60 = vpack.c.bf16 %v7858_v43, %v7857_v2  ;;  %v19741_v63 = vpack.c.bf16 %v8366_v47, %v8365_v18  ;;  %v8368_v2 = vld [vmem:[#allocation3 + $0xc9] sm:$0xff]  ;;  %v8369_v43 = vld [vmem:[#allocation3 + $0xd1] sm:$0xff] }
 0x7ac   :  { %16332 = vmatprep.subr.msk.bf16.mxu1 %vm6564_vm3, %v13243_v33  ;;  %v8384_v18 = vld [vmem:[#allocation3 + $0x149] sm:$0xff]  ;;  %v8385_v47 = vld [vmem:[#allocation3 + $0x151] sm:$0xff] }
 0x7b2   :  { %14836 = vmatmul.mubr.msk.bf16.gmra.mrb[36].mxu1 %vm5534_vm2, %v19378_v12  ;;  %v8345_v12 = vld [vmem:[#allocation3 + $0x11] sm:$0xff] }
 0x7b3   :  { %14839 = vmatprep.mubr.msk.bf16.mxu1 %vm5534_vm2, %v19384_v24  ;;  %v8346_v24 = vld [vmem:[#allocation3 + $0x19] sm:$0xff] }
 0x7ba   :  { %14840 = vmatmul.mubr.msk.bf16.gmra.mrb[40].mxu1 %vm5534_vm2, %v19386_v40  ;;  %v8409_v40 = vpack.c.bf16 %v8346_v24, %v8345_v12  ;;  %v8370_v12 = vld [vmem:[#allocation3 + $0xd9] sm:$0xff] }
 0x7bb   :  { %14843 = vmatprep.mubr.msk.bf16.mxu1 %vm5534_vm2, %v19392_v17  ;;  %v8347_v17 = vld [vmem:[#allocation3 + $0x21] sm:$0xff] }
 0x7c2   :  { %14844 = vmatmul.mubr.msk.bf16.gmra.mrb[44].mxu1 %vm5534_vm2, %v19394_v48  ;;  %v8348_v48 = vld [vmem:[#allocation3 + $0x29] sm:$0xff] }
 0x7c3   :  { %14847 = vmatprep.mubr.msk.bf16.mxu1 %vm5534_vm2, %v19400_v38  ;;  %v8349_v38 = vld [vmem:[#allocation3 + $0x31] sm:$0xff] }
 0x7ca   :  { %14848 = vmatmul.mubr.msk.bf16.gmra.mrb[48].mxu1 %vm5534_vm2, %v19402_v42  ;;  %v8350_v42 = vld [vmem:[#allocation3 + $0x39] sm:$0xff] }
 0x7cb   :  { %14851 = vmatprep.mubr.msk.bf16.mxu1 %vm5534_vm2, %v19408_v29  ;;  %v19699_v29 = vpack.c.bf16 %v8348_v48, %v8347_v17  ;;  %v8371_v17 = vld [vmem:[#allocation3 + $0xe1] sm:$0xff]  ;;  %v8372_v48 = vld [vmem:[#allocation3 + $0xe9] sm:$0xff] }
 0x7d2   :  { %14852 = vmatmul.mubr.msk.bf16.gmra.mrb[52].mxu1 %vm5534_vm2, %v19410_v15  ;;  %v9090_v15 = vsel %vm6564_vm3, %v13243_v33, 0  ;;  %v8367_v33 = vld [vmem:[#allocation3 + $0xc1] sm:$0xff] }
 0x7d3   :  { %14855 = vmatprep.mubr.msk.bf16.mxu1 %vm5534_vm2, %v19416_v22  ;;  %v19702_v22 = vpack.c.bf16 %v8350_v42, %v8349_v38  ;;  %v19747_v24 = vpack.c.bf16 %v8368_v2, %v8367_v33  ;;  %v8373_v38 = vld [vmem:[#allocation3 + $0xf1] sm:$0xff]  ;;  %v8374_v42 = vld [vmem:[#allocation3 + $0xf9] sm:$0xff]  ;;  %v19779_v2 = vpack.c.bf16 %v8384_v18, %v8383_v46  ;;  %v8396_v46 = vld [vmem:[#allocation3 + $0x1a9] sm:$0xff] }
 0x7d4   :  { %v8386_v33 = vld [vmem:[#allocation3 + $0x159] sm:$0xff]  ;;  %v8397_v18 = vld [vmem:[#allocation3 + $0x1b1] sm:$0xff] }
 0x7da   :  { %14856 = vmatmul.mubr.msk.bf16.gmra.mrb[56].mxu1 %vm5534_vm2, %v19418_v50  ;;  %v19707_v50 = vld [vmem:[%s21711_s5 + $0x18] sm:$0xf] }
 0x7db   :  { %14859 = vmatprep.mubr.msk.bf16.mxu1 %vm5534_vm2, %v19424_v5  ;;  %v8351_v5 = vld [vmem:[#allocation3 + $0x41] sm:$0xff] }
 0x7e2   :  { %14860 = vmatmul.mubr.msk.bf16.gmra.mrb[60].mxu1 %vm5534_vm2, %v19426_v51  ;;  %v8352_v51 = vld [vmem:[#allocation3 + $0x49] sm:$0xff] }
 0x7e3   :  { %14863 = vmatprep.mubr.msk.bf16.mxu1 %vm5534_vm2, %v19432_v37  ;;  %v8353_v37 = vld [vmem:[#allocation3 + $0x51] sm:$0xff] }
 0x7ea   :  { %14864 = vmatmul.mubr.msk.bf16.gmra.mrb[64].mxu1 %vm5534_vm2, %v19434_v20  ;;  %v8354_v20 = vld [vmem:[#allocation3 + $0x59] sm:$0xff] }
 0x7eb   :  { %14867 = vmatprep.mubr.msk.bf16.mxu1 %vm5534_vm2, %v19440_v8  ;;  %v19715_v8 = vpack.c.bf16 %v8352_v51, %v8351_v5  ;;  %v19757_v5 = vpack.c.bf16 %v8374_v42, %v8373_v38  ;;  %v8375_v51 = vld [vmem:[#allocation3 + $0x101] sm:$0xff]  ;;  %v8390_v38 = vld [vmem:[#allocation3 + $0x179] sm:$0xff] }
 0x7f2   :  { %14868 = vmatmul.mubr.msk.bf16.gmra.mrb[68].mxu1 %vm5534_vm2, %v19442_v52  ;;  %v19717_v52 = vpack.c.bf16 %v8354_v20, %v8353_v37  ;;  %v8376_v37 = vld [vmem:[#allocation3 + $0x109] sm:$0xff]  ;;  %v8377_v20 = vld [vmem:[#allocation3 + $0x111] sm:$0xff] }
 0x7f3   :  { %14871 = vmatprep.mubr.msk.bf16.mxu1 %vm5534_vm2, %v19448_v14  ;;  %v8355_v14 = vld [vmem:[#allocation3 + $0x61] sm:$0xff] }
 0x7fa   :  { %14872 = vmatmul.mubr.msk.bf16.gmra.mrb[72].mxu1 %vm5534_vm2, %v19450_v53  ;;  %v8356_v53 = vld [vmem:[#allocation3 + $0x69] sm:$0xff] }
 0x7fb   :  { %14875 = vmatprep.mubr.msk.bf16.mxu1 %vm5534_vm2, %v19456_v28  ;;  %v8357_v28 = vld [vmem:[#allocation3 + $0x71] sm:$0xff] }
 0x802   :  { %14876 = vmatmul.mubr.msk.bf16.gmra.mrb[76].mxu1 %vm5534_vm2, %v19458_v3  ;;  %v8358_v3 = vld [vmem:[#allocation3 + $0x79] sm:$0xff] }
 0x803   :  { %14879 = vmatprep.mubr.msk.bf16.mxu1 %vm5534_vm2, %v19464_v19  ;;  %v19723_v19 = vpack.c.bf16 %v8356_v53, %v8355_v14  ;;  %v8378_v14 = vld [vmem:[#allocation3 + $0x119] sm:$0xff]  ;;  %v19763_v53 = vpack.c.bf16 %v8376_v37, %v8375_v51  ;;  %v8391_v37 = vld [vmem:[#allocation3 + $0x181] sm:$0xff] }
 0x80a   :  { %14880 = vmatmul.mubr.msk.bf16.gmra.mrb[80].mxu1 %vm5534_vm2, %v19466_v21  ;;  %v19725_v21 = vpack.c.bf16 %v8358_v3, %v8357_v28  ;;  %v19765_v28 = vpack.c.bf16 %v8378_v14, %v8377_v20  ;;  %v8379_v3 = vld [vmem:[#allocation3 + $0x121] sm:$0xff]  ;;  %v8392_v20 = vld [vmem:[#allocation3 + $0x189] sm:$0xff]  ;;  %v8393_v14 = vld [vmem:[#allocation3 + $0x191] sm:$0xff] }
 0x80b   :  { %14883 = vmatprep.mubr.msk.bf16.mxu1 %vm5534_vm2, %v19472_v0  ;;  %v8359_v0 = vld [vmem:[#allocation3 + $0x81] sm:$0xff] }
 0x812   :  { %14884 = vmatmul.mubr.msk.bf16.gmra.mrb[84].mxu1 %vm5534_vm2, %v19474_v39  ;;  %v8360_v39 = vld [vmem:[#allocation3 + $0x89] sm:$0xff] }
 0x813   :  { %14887 = vmatprep.mubr.msk.bf16.mxu1 %vm5534_vm2, %v19480_v49  ;;  %v8361_v49 = vld [vmem:[#allocation3 + $0x91] sm:$0xff] }
 0x81a   :  { %14888 = vmatmul.mubr.msk.bf16.gmra.mrb[88].mxu1 %vm5534_vm2, %v19482_v45  ;;  %v8362_v45 = vld [vmem:[#allocation3 + $0x99] sm:$0xff] }
 0x81b   :  { %14891 = vmatprep.mubr.msk.bf16.mxu1 %vm5534_vm2, %v19488_v58  ;;  %v19731_v58 = vpack.c.bf16 %v8360_v39, %v8359_v0  ;;  %v19733_v35 = vpack.c.bf16 %v8362_v45, %v8361_v49  ;;  %v8380_v0 = vld [vmem:[#allocation3 + $0x129] sm:$0xff]  ;;  %v8381_v39 = vld [vmem:[#allocation3 + $0x131] sm:$0xff]  ;;  %v8382_v49 = vld [vmem:[#allocation3 + $0x139] sm:$0xff] }
 0x81c   :  { %v19771_v45 = vpack.c.bf16 %v8380_v0, %v8379_v3  ;;  %v19773_v36 = vpack.c.bf16 %v8382_v49, %v8381_v39  ;;  %v8394_v3 = vld [vmem:[#allocation3 + $0x199] sm:$0xff]  ;;  %v19795_v0 = vpack.c.bf16 %v8392_v20, %v8391_v37  ;;  %v8395_v49 = vld [vmem:[#allocation3 + $0x1a1] sm:$0xff] }
 0x81d   :  { %v19797_v39 = vpack.c.bf16 %v8394_v3, %v8393_v14  ;;  %v8402_v37 = vld [vmem:[#allocation3 + $0x1d9] sm:$0xff]  ;;  %v8403_v3 = vld [vmem:[#allocation3 + $0x1e1] sm:$0xff] }
 0x822   :  { %14892 = vmatmul.mubr.msk.bf16.gmra.mrb[92].mxu1 %vm5534_vm2, %v19694_v60 }
 0x823   :  { %14897 = vmatprep.mubr.msk.bf16.mxu1 %vm5534_vm2, %v8409_v40  ;;  %v19749_v40 = vpack.c.bf16 %v8370_v12, %v8369_v43  ;;  %v19781_v43 = vpack.c.bf16 %v8386_v33, %v8385_v47  ;;  %v8387_v12 = vld [vmem:[#allocation3 + $0x161] sm:$0xff]  ;;  %v8398_v47 = vld [vmem:[#allocation3 + $0x1b9] sm:$0xff]  ;;  %v19803_v33 = vpack.c.bf16 %v8396_v46, %v8395_v49  ;;  %v8404_v49 = vld [vmem:[#allocation3 + $0x1e9] sm:$0xff] }
 0x824   :  { %v8405_v46 = vld [vmem:[#allocation3 + $0x1f1] sm:$0xff] }
 0x82a   :  { %14898 = vmatmul.mubr.msk.bf16.vlgmr.msra.gmra.mrb[32].mxu1 %vm5534_vm2, %v19699_v29 }
 0x82b   :  { %14962 = vmatpush3.bf16.msra.mxu1 %v9090_v15  ;;  %14901 = vmatprep.mubr.msk.bf16.mxu1 %vm5534_vm2, %v19702_v22  ;;  %v19755_v15 = vpack.c.bf16 %v8372_v48, %v8371_v17  ;;  %v8388_v17 = vld [vmem:[#allocation3 + $0x169] sm:$0xff]  ;;  %v8389_v48 = vld [vmem:[#allocation3 + $0x171] sm:$0xff] }
 0x82c   :  { %16333 = vmatprep.subr.msk.bf16.mxu1 %vm6564_vm3, %v19707_v50  ;;  %v19787_v42 = vpack.c.bf16 %v8388_v17, %v8387_v12  ;;  %v19789_v51 = vpack.c.bf16 %v8390_v38, %v8389_v48  ;;  %v19805_v12 = vpack.c.bf16 %v8398_v47, %v8397_v18  ;;  %v8399_v17 = vld [vmem:[#allocation3 + $0x1c1] sm:$0xff]  ;;  %v8400_v48 = vld [vmem:[#allocation3 + $0x1c9] sm:$0xff]  ;;  %v8401_v38 = vld [vmem:[#allocation3 + $0x1d1] sm:$0xff]  ;;  %v19819_v47 = vpack.c.bf16 %v8404_v49, %v8403_v3 }
 0x82d   :  { %v19811_v20 = vpack.c.bf16 %v8400_v48, %v8399_v17  ;;  %v19813_v14 = vpack.c.bf16 %v8402_v37, %v8401_v38  ;;  %v8406_v18 = vld [vmem:[#allocation3 + $0x1f9] sm:$0xff]  ;;  %v8407_v17 = vld [vmem:[#allocation3 + $0x201] sm:$0xff]  ;;  %v8408_v48 = vld [vmem:[#allocation3 + $0x209] sm:$0xff]  ;;  %v9640_v37 = vsel %vm6564_vm3, %v19707_v50, 0 }
 0x82e   :  { %22236 = vst [vmem:[#allocation33_spill] sm:$0xff] %v19805_v12  ;;  %v19827_v38 = vpack.c.bf16 %v8408_v48, %v8407_v17  ;;  %v13309_v3 = vld [vmem:[%s21711_s5 + $0x1c] sm:$0xf]  ;;  %v9458_v17 = vld [vmem:[#allocation3 + $0x88] sm:$0xff] }
 0x82f   :  { %v9455_v49 = vld [vmem:[#allocation3 + $0x70] sm:$0xff] }
 0x832   :  { %14902 = vmatmul.mubr.msk.bf16.gmra.mrb[36].mxu1 %vm5534_vm2, %v19715_v8 }
 0x833   :  { %14905 = vmatprep.mubr.msk.bf16.mxu1 %vm5534_vm2, %v19717_v52 }
 0x83a   :  { %14906 = vmatmul.mubr.msk.bf16.gmra.mrb[40].mxu1 %vm5534_vm2, %v19723_v19 }
 0x83b   :  { %14909 = vmatprep.mubr.msk.bf16.mxu1 %vm5534_vm2, %v19725_v21 }
 0x842   :  { %14910 = vmatmul.mubr.msk.bf16.gmra.mrb[44].mxu1 %vm5534_vm2, %v19731_v58 }
 0x843   :  { %14913 = vmatprep.mubr.msk.bf16.mxu1 %vm5534_vm2, %v19733_v35 }
 0x84a   :  { %14914 = vmatmul.mubr.msk.bf16.gmra.mrb[48].mxu1 %vm5534_vm2, %v19739_v54 }
 0x84b   :  { %14917 = vmatprep.mubr.msk.bf16.mxu1 %vm5534_vm2, %v19741_v63 }
 0x852   :  { %14918 = vmatmul.mubr.msk.bf16.gmra.mrb[52].mxu1 %vm5534_vm2, %v19747_v24 }
 0x853   :  { %14921 = vmatprep.mubr.msk.bf16.mxu1 %vm5534_vm2, %v19749_v40 }
 0x85a   :  { %14922 = vmatmul.mubr.msk.bf16.gmra.mrb[56].mxu1 %vm5534_vm2, %v19755_v15 }
 0x85b   :  { %14925 = vmatprep.mubr.msk.bf16.mxu1 %vm5534_vm2, %v19757_v5 }
 0x862   :  { %14926 = vmatmul.mubr.msk.bf16.gmra.mrb[60].mxu1 %vm5534_vm2, %v19763_v53 }
 0x863   :  { %14929 = vmatprep.mubr.msk.bf16.mxu1 %vm5534_vm2, %v19765_v28 }
 0x86a   :  { %14930 = vmatmul.mubr.msk.bf16.gmra.mrb[64].mxu1 %vm5534_vm2, %v19771_v45 }
 0x86b   :  { %14933 = vmatprep.mubr.msk.bf16.mxu1 %vm5534_vm2, %v19773_v36 }
 0x872   :  { %14934 = vmatmul.mubr.msk.bf16.gmra.mrb[68].mxu1 %vm5534_vm2, %v19779_v2 }
 0x873   :  { %14937 = vmatprep.mubr.msk.bf16.mxu1 %vm5534_vm2, %v19781_v43 }
 0x87a   :  { %14938 = vmatmul.mubr.msk.bf16.gmra.mrb[72].mxu1 %vm5534_vm2, %v19787_v42 }
 0x87b   :  { %14941 = vmatprep.mubr.msk.bf16.mxu1 %vm5534_vm2, %v19789_v51 }
 0x882   :  { %14942 = vmatmul.mubr.msk.bf16.gmra.mrb[76].mxu1 %vm5534_vm2, %v19795_v0 }
 0x883   :  { %14945 = vmatprep.mubr.msk.bf16.mxu1 %vm5534_vm2, %v19797_v39 }
 0x88a   :  { %14946 = vmatmul.mubr.msk.bf16.gmra.mrb[80].mxu1 %vm5534_vm2, %v19803_v33 }
 0x88b   :  { %14949 = vmatprep.mubr.msk.bf16.mxu1 %vm5534_vm2, %v19805_v12  ;;  %v19821_v12 = vpack.c.bf16 %v8406_v18, %v8405_v46  ;;  %v9456_v46 = vld [vmem:[#allocation3 + $0x78] sm:$0xff]  ;;  %v9457_v18 = vld [vmem:[#allocation3 + $0x80] sm:$0xff] }
 0x88c   :  { %v9514_v48 = vpack.c.bf16 %v9456_v46, %v9455_v49  ;;  %v9476_v49 = vld [vmem:[#allocation3 + $0x118] sm:$0xff]  ;;  %v9477_v46 = vld [vmem:[#allocation3 + $0x120] sm:$0xff] }
 0x892   :  { %14950 = vmatmul.mubr.msk.bf16.gmra.mrb[84].mxu1 %vm5534_vm2, %v19811_v20 }
 0x893   :  { %14953 = vmatprep.mubr.msk.bf16.mxu1 %vm5534_vm2, %v19813_v14 }
 0x89a   :  { %14954 = vmatmul.mubr.msk.bf16.gmra.mrb[88].mxu1 %vm5534_vm2, %v19819_v47 }
 0x89b   :  { %14957 = vmatprep.mubr.msk.bf16.mxu1 %vm5534_vm2, %v19821_v12 }
 0x8a2   :  { %14958 = vmatmul.mubr.msk.bf16.gmra.mrb[92].mxu1 %vm5534_vm2, %v19827_v38 }
 0x8a3   :  { %14963 = vmatprep.mubr.msk.bf16.mxu1 %vm5534_vm2, %v19493_v41  ;;  %v22237_v41 = vld [vmem:[#allocation30_spill] sm:$0xff] }
 0x8aa   :  { %14964 = vmatmul.mubr.msk.bf16.vlgmr.msra.gmra.mrb[32].mxu1 %vm5534_vm2, %v19497_v27  ;;  %v22238_v27 = vld [vmem:[#allocation64_spill] sm:$0xff] }
 0x8ab   :  { %15028 = vmatpush3.bf16.msra.mxu1 %v9640_v37  ;;  %14967 = vmatprep.mubr.msk.bf16.mxu1 %vm5534_vm2, %v19510_v6  ;;  %v22239_v6 = vld [vmem:[#allocation31_spill] sm:$0xff]  ;;  %v9515_v37 = vpack.c.bf16 %v9458_v17, %v9457_v18 }
 0x8ac   :  { %16334 = vmatprep.subr.msk.bf16.mxu1 %vm6564_vm3, %v13309_v3  ;;  %v9478_v18 = vld [vmem:[#allocation3 + $0x128] sm:$0xff] }
 0x8b2   :  { %14968 = vmatmul.mubr.msk.bf16.gmra.mrb[36].mxu1 %vm5534_vm2, %v19512_v11  ;;  %v22240_v11 = vld [vmem:[#allocation67_spill] sm:$0xff] }
 0x8b3   :  { %14971 = vmatprep.mubr.msk.bf16.mxu1 %vm5534_vm2, %v19518_v62  ;;  %v22241_v62 = vld [vmem:[#allocation32_spill] sm:$0xff] }
 0x8ba   :  { %14972 = vmatmul.mubr.msk.bf16.gmra.mrb[40].mxu1 %vm5534_vm2, %v19520_v34  ;;  %v22242_v34 = vld [vmem:[#allocation71_spill] sm:$0xff] }
 0x8bb   :  { %14975 = vmatprep.mubr.msk.bf16.mxu1 %vm5534_vm2, %v19526_v4  ;;  %v8957_v4 = vld [vmem:[#allocation3 + $0x202] sm:$0xff] }
 0x8c2   :  { %14976 = vmatmul.mubr.msk.bf16.gmra.mrb[44].mxu1 %vm5534_vm2, %v19528_v30  ;;  %v8958_v30 = vld [vmem:[#allocation3 + $0x20a] sm:$0xff] }
 0x8c3   :  { %14979 = vmatprep.mubr.msk.bf16.mxu1 %vm5534_vm2, %v19534_v32  ;;  %v19899_v32 = vpack.c.bf16 %v8958_v30, %v8957_v4  ;;  %v9464_v4 = vld [vmem:[#allocation3 + $0xb8] sm:$0xff]  ;;  %v9465_v30 = vld [vmem:[#allocation3 + $0xc0] sm:$0xff] }
 0x8ca   :  { %14980 = vmatmul.mubr.msk.bf16.gmra.mrb[48].mxu1 %vm5534_vm2, %v19536_v7  ;;  %v9445_v7 = vld [vmem:[#allocation3 + $0x20] sm:$0xff] }
 0x8cb   :  { %14983 = vmatprep.mubr.msk.bf16.mxu1 %vm5534_vm2, %v19542_v1  ;;  %v9446_v1 = vld [vmem:[#allocation3 + $0x28] sm:$0xff] }
 0x8d2   :  { %14984 = vmatmul.mubr.msk.bf16.gmra.mrb[52].mxu1 %vm5534_vm2, %v19544_v59  ;;  %v9509_v59 = vpack.c.bf16 %v9446_v1, %v9445_v7  ;;  %v9466_v7 = vld [vmem:[#allocation3 + $0xc8] sm:$0xff] }
 0x8d3   :  { %14987 = vmatprep.mubr.msk.bf16.mxu1 %vm5534_vm2, %v19550_v9  ;;  %v9447_v9 = vld [vmem:[#allocation3 + $0x30] sm:$0xff] }
 0x8da   :  { %14988 = vmatmul.mubr.msk.bf16.gmra.mrb[56].mxu1 %vm5534_vm2, %v19552_v10  ;;  %v9448_v10 = vld [vmem:[#allocation3 + $0x38] sm:$0xff] }
 0x8db   :  { %14991 = vmatprep.mubr.msk.bf16.mxu1 %vm5534_vm2, %v19558_v31  ;;  %v9449_v31 = vld [vmem:[#allocation3 + $0x40] sm:$0xff] }
 0x8e2   :  { %14992 = vmatmul.mubr.msk.bf16.gmra.mrb[60].mxu1 %vm5534_vm2, %v19560_v44  ;;  %v9450_v44 = vld [vmem:[#allocation3 + $0x48] sm:$0xff] }
 0x8e3   :  { %14995 = vmatprep.mubr.msk.bf16.mxu1 %vm5534_vm2, %v19566_v16  ;;  %v9510_v16 = vpack.c.bf16 %v9448_v10, %v9447_v9  ;;  %v9467_v9 = vld [vmem:[#allocation3 + $0xd0] sm:$0xff]  ;;  %v9468_v10 = vld [vmem:[#allocation3 + $0xd8] sm:$0xff] }
 0x8ea   :  { %14996 = vmatmul.mubr.msk.bf16.gmra.mrb[64].mxu1 %vm5534_vm2, %v19568_v57  ;;  %v10190_v57 = vsel %vm6564_vm3, %v13309_v3, 0  ;;  %v9459_v3 = vld [vmem:[#allocation3 + $0x90] sm:$0xff] }
 0x8eb   :  { %14999 = vmatprep.mubr.msk.bf16.mxu1 %vm5534_vm2, %v19574_v56  ;;  %v9511_v56 = vpack.c.bf16 %v9450_v44, %v9449_v31  ;;  %v9469_v31 = vld [vmem:[#allocation3 + $0xe0] sm:$0xff]  ;;  %v9470_v44 = vld [vmem:[#allocation3 + $0xe8] sm:$0xff] }
 0x8f2   :  { %15000 = vmatmul.mubr.msk.bf16.gmra.mrb[68].mxu1 %vm5534_vm2, %v19576_v23  ;;  %v19908_v23 = vld [vmem:[%s21711_s5 + $0x20] sm:$0xf] }
 0x8f3   :  { %15003 = vmatprep.mubr.msk.bf16.mxu1 %vm5534_vm2, %v22237_v41  ;;  %v9460_v41 = vld [vmem:[#allocation3 + $0x98] sm:$0xff] }
 0x8fa   :  { %15004 = vmatmul.mubr.msk.bf16.gmra.mrb[72].mxu1 %vm5534_vm2, %v22238_v27  ;;  %v9461_v27 = vld [vmem:[#allocation3 + $0xa0] sm:$0xff] }
 0x8fb   :  { %15007 = vmatprep.mubr.msk.bf16.mxu1 %vm5534_vm2, %v22239_v6  ;;  %v9462_v6 = vld [vmem:[#allocation3 + $0xa8] sm:$0xff] }
 0x902   :  { %15008 = vmatmul.mubr.msk.bf16.gmra.mrb[76].mxu1 %vm5534_vm2, %v22240_v11  ;;  %v9516_v11 = vpack.c.bf16 %v9460_v41, %v9459_v3  ;;  %v9480_v3 = vld [vmem:[#allocation3 + $0x138] sm:$0xff]  ;;  %v9481_v41 = vld [vmem:[#allocation3 + $0x140] sm:$0xff] }
 0x903   :  { %15011 = vmatprep.mubr.msk.bf16.mxu1 %vm5534_vm2, %v22241_v62  ;;  %v9517_v62 = vpack.c.bf16 %v9462_v6, %v9461_v27  ;;  %v9482_v27 = vld [vmem:[#allocation3 + $0x148] sm:$0xff] }
 0x90a   :  { %15012 = vmatmul.mubr.msk.bf16.gmra.mrb[80].mxu1 %vm5534_vm2, %v22242_v34  ;;  %v9463_v34 = vld [vmem:[#allocation3 + $0xb0] sm:$0xff] }
 0x90b   :  { %15015 = vmatprep.mubr.msk.bf16.mxu1 %vm5534_vm2, %v19606_v13  ;;  %v9453_v13 = vld [vmem:[#allocation3 + $0x60] sm:$0xff]  ;;  %v9518_v1 = vpack.c.bf16 %v9464_v4, %v9463_v34  ;;  %v9484_v34 = vld [vmem:[#allocation3 + $0x158] sm:$0xff] }
 0x90c   :  { %v9485_v4 = vld [vmem:[#allocation3 + $0x160] sm:$0xff] }
 0x912   :  { %15016 = vmatmul.mubr.msk.bf16.gmra.mrb[84].mxu1 %vm5534_vm2, %v19608_v61  ;;  %v9454_v61 = vld [vmem:[#allocation3 + $0x68] sm:$0xff] }
 0x913   :  { %15019 = vmatprep.mubr.msk.bf16.mxu1 %vm5534_vm2, %v19614_v25  ;;  %v9451_v25 = vld [vmem:[#allocation3 + $0x50] sm:$0xff]  ;;  %v9513_v50 = vpack.c.bf16 %v9454_v61, %v9453_v13  ;;  %v9474_v13 = vld [vmem:[#allocation3 + $0x108] sm:$0xff] }
 0x91a   :  { %15020 = vmatmul.mubr.msk.bf16.gmra.mrb[88].mxu1 %vm5534_vm2, %v19616_v26  ;;  %v9452_v26 = vld [vmem:[#allocation3 + $0x58] sm:$0xff] }
 0x91b   :  { %15023 = vmatprep.mubr.msk.bf16.mxu1 %vm5534_vm2, %v19622_v55  ;;  %v9512_v55 = vpack.c.bf16 %v9452_v26, %v9451_v25  ;;  %v9472_v25 = vld [vmem:[#allocation3 + $0xf8] sm:$0xff]  ;;  %v9473_v26 = vld [vmem:[#allocation3 + $0x100] sm:$0xff] }
 0x922   :  { %15024 = vmatmul.mubr.msk.bf16.gmra.mrb[92].mxu1 %vm5534_vm2, %v19899_v32 }
 0x923   :  { %15029 = vmatprep.mubr.msk.bf16.mxu1 %vm5534_vm2, %v9509_v59  ;;  %v9519_v59 = vpack.c.bf16 %v9466_v7, %v9465_v30  ;;  %v9486_v30 = vld [vmem:[#allocation3 + $0x168] sm:$0xff] }
 0x92a   :  { %15030 = vmatmul.mubr.msk.bf16.vlgmr.msra.gmra.mrb[32].mxu1 %vm5534_vm2, %v9510_v16  ;;  %v9520_v16 = vpack.c.bf16 %v9468_v10, %v9467_v9  ;;  %v9488_v9 = vld [vmem:[#allocation3 + $0x178] sm:$0xff]  ;;  %v9489_v10 = vld [vmem:[#allocation3 + $0x180] sm:$0xff] }
 0x92b   :  { %15094 = vmatpush3.bf16.msra.mxu1 %v10190_v57  ;;  %15033 = vmatprep.mubr.msk.bf16.mxu1 %vm5534_vm2, %v9511_v56  ;;  %v9521_v57 = vpack.c.bf16 %v9470_v44, %v9469_v31  ;;  %v9471_v56 = vld [vmem:[#allocation3 + $0xf0] sm:$0xff]  ;;  %v9490_v31 = vld [vmem:[#allocation3 + $0x188] sm:$0xff] }
 0x92c   :  { %16335 = vmatprep.subr.msk.bf16.mxu1 %vm6564_vm3, %v19908_v23  ;;  %v9522_v61 = vpack.c.bf16 %v9472_v25, %v9471_v56  ;;  %v9492_v56 = vld [vmem:[#allocation3 + $0x198] sm:$0xff]  ;;  %v9493_v25 = vld [vmem:[#allocation3 + $0x1a0] sm:$0xff] }
 0x932   :  { %15034 = vmatmul.mubr.msk.bf16.gmra.mrb[36].mxu1 %vm5534_vm2, %v9512_v55  ;;  %v9523_v55 = vpack.c.bf16 %v9474_v13, %v9473_v26  ;;  %v9494_v26 = vld [vmem:[#allocation3 + $0x1a8] sm:$0xff] }
 0x933   :  { %15037 = vmatprep.mubr.msk.bf16.mxu1 %vm5534_vm2, %v9513_v50  ;;  %v9475_v50 = vld [vmem:[#allocation3 + $0x110] sm:$0xff] }
 0x934   :  { %v9524_v17 = vpack.c.bf16 %v9476_v49, %v9475_v50  ;;  %v9496_v50 = vld [vmem:[#allocation3 + $0x1b8] sm:$0xff]  ;;  %v9497_v49 = vld [vmem:[#allocation3 + $0x1c0] sm:$0xff] }
 0x93a   :  { %15038 = vmatmul.mubr.msk.bf16.gmra.mrb[40].mxu1 %vm5534_vm2, %v9514_v48  ;;  %v9525_v48 = vpack.c.bf16 %v9478_v18, %v9477_v46  ;;  %v9498_v46 = vld [vmem:[#allocation3 + $0x1c8] sm:$0xff] }
 0x93b   :  { %15041 = vmatprep.mubr.msk.bf16.mxu1 %vm5534_vm2, %v9515_v37  ;;  %v9479_v37 = vld [vmem:[#allocation3 + $0x130] sm:$0xff] }
 0x93c   :  { %v9526_v6 = vpack.c.bf16 %v9480_v3, %v9479_v37  ;;  %v9500_v37 = vld [vmem:[#allocation3 + $0x1d8] sm:$0xff]  ;;  %v9501_v3 = vld [vmem:[#allocation3 + $0x1e0] sm:$0xff] }
 0x942   :  { %15042 = vmatmul.mubr.msk.bf16.gmra.mrb[44].mxu1 %vm5534_vm2, %v9516_v11  ;;  %v9527_v11 = vpack.c.bf16 %v9482_v27, %v9481_v41  ;;  %v9502_v41 = vld [vmem:[#allocation3 + $0x1e8] sm:$0xff] }
 0x943   :  { %15045 = vmatprep.mubr.msk.bf16.mxu1 %vm5534_vm2, %v9517_v62  ;;  %v9483_v62 = vld [vmem:[#allocation3 + $0x150] sm:$0xff] }
 0x944   :  { %v9528_v7 = vpack.c.bf16 %v9484_v34, %v9483_v62  ;;  %v9504_v62 = vld [vmem:[#allocation3 + $0x1f8] sm:$0xff] }
 0x94a   :  { %15046 = vmatmul.mubr.msk.bf16.gmra.mrb[48].mxu1 %vm5534_vm2, %v9518_v1  ;;  %v9529_v1 = vpack.c.bf16 %v9486_v30, %v9485_v4  ;;  %v9507_v4 = vld [vmem:[#allocation3 + $0x210] sm:$0xff]  ;;  %v9508_v30 = vld [vmem:[#allocation3 + $0x218] sm:$0xff] }
 0x94b   :  { %15049 = vmatprep.mubr.msk.bf16.mxu1 %vm5534_vm2, %v9519_v59  ;;  %v9487_v59 = vld [vmem:[#allocation3 + $0x170] sm:$0xff] }
 0x94c   :  { %v9530_v44 = vpack.c.bf16 %v9488_v9, %v9487_v59  ;;  %v10564_v59 = vld [vmem:[#allocation3 + $0xba] sm:$0xff]  ;;  %v10565_v9 = vld [vmem:[#allocation3 + $0xc2] sm:$0xff] }
 0x952   :  { %15050 = vmatmul.mubr.msk.bf16.gmra.mrb[52].mxu1 %vm5534_vm2, %v9520_v16  ;;  %v9531_v16 = vpack.c.bf16 %v9490_v31, %v9489_v10  ;;  %v10566_v10 = vld [vmem:[#allocation3 + $0xca] sm:$0xff] }
 0x953   :  { %15053 = vmatprep.mubr.msk.bf16.mxu1 %vm5534_vm2, %v9521_v57  ;;  %v9491_v57 = vld [vmem:[#allocation3 + $0x190] sm:$0xff] }
 0x954   :  { %v9532_v13 = vpack.c.bf16 %v9492_v56, %v9491_v57  ;;  %v10568_v57 = vld [vmem:[#allocation3 + $0xda] sm:$0xff]  ;;  %v10569_v56 = vld [vmem:[#allocation3 + $0xe2] sm:$0xff] }
 0x95a   :  { %15054 = vmatmul.mubr.msk.bf16.gmra.mrb[56].mxu1 %vm5534_vm2, %v9522_v61  ;;  %v9533_v61 = vpack.c.bf16 %v9494_v26, %v9493_v25  ;;  %v10570_v25 = vld [vmem:[#allocation3 + $0xea] sm:$0xff] }
 0x95b   :  { %15057 = vmatprep.mubr.msk.bf16.mxu1 %vm5534_vm2, %v9523_v55  ;;  %v9495_v55 = vld [vmem:[#allocation3 + $0x1b0] sm:$0xff] }
 0x95c   :  { %v9534_v18 = vpack.c.bf16 %v9496_v50, %v9495_v55  ;;  %v10572_v55 = vld [vmem:[#allocation3 + $0xfa] sm:$0xff]  ;;  %v10573_v50 = vld [vmem:[#allocation3 + $0x102] sm:$0xff] }
 0x962   :  { %15058 = vmatmul.mubr.msk.bf16.gmra.mrb[60].mxu1 %vm5534_vm2, %v9524_v17  ;;  %v9535_v17 = vpack.c.bf16 %v9498_v46, %v9497_v49  ;;  %v10574_v49 = vld [vmem:[#allocation3 + $0x10a] sm:$0xff] }
 0x963   :  { %15061 = vmatprep.mubr.msk.bf16.mxu1 %vm5534_vm2, %v9525_v48  ;;  %v9499_v48 = vld [vmem:[#allocation3 + $0x1d0] sm:$0xff] }
 0x964   :  { %v9536_v27 = vpack.c.bf16 %v9500_v37, %v9499_v48  ;;  %v10576_v48 = vld [vmem:[#allocation3 + $0x11a] sm:$0xff]  ;;  %v10577_v37 = vld [vmem:[#allocation3 + $0x122] sm:$0xff] }
 0x96a   :  { %15062 = vmatmul.mubr.msk.bf16.gmra.mrb[64].mxu1 %vm5534_vm2, %v9526_v6  ;;  %v9537_v6 = vpack.c.bf16 %v9502_v41, %v9501_v3  ;;  %v10578_v3 = vld [vmem:[#allocation3 + $0x12a] sm:$0xff] }
 0x96b   :  { %15065 = vmatprep.mubr.msk.bf16.mxu1 %vm5534_vm2, %v9527_v11  ;;  %v9503_v11 = vld [vmem:[#allocation3 + $0x1f0] sm:$0xff] }
 0x96c   :  { %v9538_v34 = vpack.c.bf16 %v9504_v62, %v9503_v11  ;;  %v10580_v11 = vld [vmem:[#allocation3 + $0x13a] sm:$0xff]  ;;  %v10581_v62 = vld [vmem:[#allocation3 + $0x142] sm:$0xff] }
 0x972   :  { %15066 = vmatmul.mubr.msk.bf16.gmra.mrb[68].mxu1 %vm5534_vm2, %v9528_v7  ;;  %v9540_v7 = vpack.c.bf16 %v9508_v30, %v9507_v4 }
 0x973   :  { %15069 = vmatprep.mubr.msk.bf16.mxu1 %vm5534_vm2, %v9529_v1  ;;  %v10740_v1 = vsel %vm6564_vm3, %v19908_v23, 0  ;;  %v10563_v23 = vld [vmem:[#allocation3 + $0xb2] sm:$0xff] }
 0x974   :  { %v10618_v31 = vpack.c.bf16 %v10564_v59, %v10563_v23  ;;  %v10607_v23 = vld [vmem:[#allocation3 + $0x212] sm:$0xff]  ;;  %v10608_v59 = vld [vmem:[#allocation3 + $0x21a] sm:$0xff] }
 0x97a   :  { %15070 = vmatmul.mubr.msk.bf16.gmra.mrb[72].mxu1 %vm5534_vm2, %v9530_v44  ;;  %v10619_v44 = vpack.c.bf16 %v10566_v10, %v10565_v9  ;;  %v10640_v9 = vpack.c.bf16 %v10608_v59, %v10607_v23  ;;  %v20042_v10 = vpop.permute.xlu0 %11232 }
 0x97b   :  { %15073 = vmatprep.mubr.msk.bf16.mxu1 %vm5534_vm2, %v9531_v16  ;;  %v10567_v16 = vld [vmem:[#allocation3 + $0xd2] sm:$0xff] }
 0x97c   :  { %v10620_v26 = vpack.c.bf16 %v10568_v57, %v10567_v16 }
 0x982   :  { %15074 = vmatmul.mubr.msk.bf16.gmra.mrb[76].mxu1 %vm5534_vm2, %v9532_v13  ;;  %v10621_v13 = vpack.c.bf16 %v10570_v25, %v10569_v56 }
 0x983   :  { %15077 = vmatprep.mubr.msk.bf16.mxu1 %vm5534_vm2, %v9533_v61  ;;  %v10571_v61 = vld [vmem:[#allocation3 + $0xf2] sm:$0xff] }
 0x984   :  { %v10622_v46 = vpack.c.bf16 %v10572_v55, %v10571_v61 }
 0x98a   :  { %15078 = vmatmul.mubr.msk.bf16.gmra.mrb[80].mxu1 %vm5534_vm2, %v9534_v18  ;;  %v10623_v18 = vpack.c.bf16 %v10574_v49, %v10573_v50 }
 0x98b   :  { %15081 = vmatprep.mubr.msk.bf16.mxu1 %vm5534_vm2, %v9535_v17  ;;  %v10575_v17 = vld [vmem:[#allocation3 + $0x112] sm:$0xff] }
 0x98c   :  { %v10624_v41 = vpack.c.bf16 %v10576_v48, %v10575_v17 }
 0x992   :  { %15082 = vmatmul.mubr.msk.bf16.gmra.mrb[84].mxu1 %vm5534_vm2, %v9536_v27  ;;  %v10625_v27 = vpack.c.bf16 %v10578_v3, %v10577_v37 }
 0x993   :  { %15085 = vmatprep.mubr.msk.bf16.mxu1 %vm5534_vm2, %v9537_v6  ;;  %v10579_v6 = vld [vmem:[#allocation3 + $0x132] sm:$0xff] }
 0x994   :  { %v10626_v4 = vpack.c.bf16 %v10580_v11, %v10579_v6 }
 0x99a   :  { %15086 = vmatmul.mubr.msk.bf16.gmra.mrb[88].mxu1 %vm5534_vm2, %v9538_v34  ;;  %v10582_v34 = vld [vmem:[#allocation3 + $0x14a] sm:$0xff] }
 0x99b   :  { %15089 = vmatprep.mubr.msk.bf16.mxu1 %vm5534_vm2, %v19694_v60  ;;  %v22243_v60 = vld [vmem:[#allocation33_spill] sm:$0xff]  ;;  %v10627_v30 = vpack.c.bf16 %v10582_v34, %v10581_v62 }
 0x9a2   :  { %15090 = vmatmul.mubr.msk.bf16.gmra.mrb[92].mxu1 %vm5534_vm2, %v9540_v7  ;;  %v10583_v7 = vld [vmem:[#allocation3 + $0x152] sm:$0xff] }
 0x9a3   :  { %15095 = vmatprep.mubr.msk.bf16.mxu1 %vm5534_vm2, %v19699_v29  ;;  %v10057_v29 = vld [vmem:[#allocation3 + $0x211] sm:$0xff] }
 0x9aa   :  { %15096 = vmatmul.mubr.msk.bf16.vlgmr.msra.gmra.mrb[32].mxu1 %vm5534_vm2, %v19702_v22  ;;  %v10058_v22 = vld [vmem:[#allocation3 + $0x219] sm:$0xff] }
 0x9ab   :  { %15160 = vmatpush3.bf16.msra.mxu1 %v10740_v1  ;;  %15099 = vmatprep.mubr.msk.bf16.mxu1 %vm5534_vm2, %v19715_v8  ;;  %v10090_v8 = vpack.c.bf16 %v10058_v22, %v10057_v29  ;;  %v10584_v1 = vld [vmem:[#allocation3 + $0x15a] sm:$0xff]  ;;  %v10586_v29 = vld [vmem:[#allocation3 + $0x16a] sm:$0xff] }
 0x9ac   :  { %v10628_v22 = vpack.c.bf16 %v10584_v1, %v10583_v7 }
 0x9b2   :  { %15100 = vmatmul.mubr.msk.bf16.gmra.mrb[36].mxu1 %vm5534_vm2, %v19717_v52  ;;  %v10545_v52 = vld [vmem:[#allocation3 + $0x22] sm:$0xff] }
 0x9b3   :  { %15103 = vmatprep.mubr.msk.bf16.mxu1 %vm5534_vm2, %v19723_v19  ;;  %v10546_v19 = vld [vmem:[#allocation3 + $0x2a] sm:$0xff] }
 0x9ba   :  { %15104 = vmatmul.mubr.msk.bf16.gmra.mrb[40].mxu1 %vm5534_vm2, %v19725_v21  ;;  %v10609_v21 = vpack.c.bf16 %v10546_v19, %v10545_v52  ;;  %v10587_v52 = vld [vmem:[#allocation3 + $0x172] sm:$0xff]  ;;  %v10588_v19 = vld [vmem:[#allocation3 + $0x17a] sm:$0xff] }
 0x9bb   :  { %15107 = vmatprep.mubr.msk.bf16.mxu1 %vm5534_vm2, %v19731_v58  ;;  %v10547_v58 = vld [vmem:[#allocation3 + $0x32] sm:$0xff] }
 0x9c2   :  { %15108 = vmatmul.mubr.msk.bf16.gmra.mrb[44].mxu1 %vm5534_vm2, %v19733_v35  ;;  %v10548_v35 = vld [vmem:[#allocation3 + $0x3a] sm:$0xff] }
 0x9c3   :  { %15111 = vmatprep.mubr.msk.bf16.mxu1 %vm5534_vm2, %v19739_v54  ;;  %v10549_v54 = vld [vmem:[#allocation3 + $0x42] sm:$0xff] }
 0x9ca   :  { %15112 = vmatmul.mubr.msk.bf16.gmra.mrb[48].mxu1 %vm5534_vm2, %v19741_v63  ;;  %v10550_v63 = vld [vmem:[#allocation3 + $0x4a] sm:$0xff] }
 0x9cb   :  { %15115 = vmatprep.mubr.msk.bf16.mxu1 %vm5534_vm2, %v19747_v24  ;;  %v10610_v24 = vpack.c.bf16 %v10548_v35, %v10547_v58  ;;  %v10590_v58 = vld [vmem:[#allocation3 + $0x18a] sm:$0xff]  ;;  %v10630_v35 = vpack.c.bf16 %v10588_v19, %v10587_v52 }
 0x9d2   :  { %15116 = vmatmul.mubr.msk.bf16.gmra.mrb[52].mxu1 %vm5534_vm2, %v19749_v40  ;;  %v10611_v40 = vpack.c.bf16 %v10550_v63, %v10549_v54  ;;  %v10591_v63 = vld [vmem:[#allocation3 + $0x192] sm:$0xff] }
 0x9d3   :  { %15119 = vmatprep.mubr.msk.bf16.mxu1 %vm5534_vm2, %v19755_v15  ;;  %v10551_v15 = vld [vmem:[#allocation3 + $0x52] sm:$0xff] }
 0x9da   :  { %15120 = vmatmul.mubr.msk.bf16.gmra.mrb[56].mxu1 %vm5534_vm2, %v19757_v5  ;;  %v10552_v5 = vld [vmem:[#allocation3 + $0x5a] sm:$0xff] }
 0x9db   :  { %15123 = vmatprep.mubr.msk.bf16.mxu1 %vm5534_vm2, %v19763_v53  ;;  %v10553_v53 = vld [vmem:[#allocation3 + $0x62] sm:$0xff] }
 0x9e2   :  { %15124 = vmatmul.mubr.msk.bf16.gmra.mrb[60].mxu1 %vm5534_vm2, %v19765_v28  ;;  %v10554_v28 = vld [vmem:[#allocation3 + $0x6a] sm:$0xff] }
 0x9e3   :  { %15127 = vmatprep.mubr.msk.bf16.mxu1 %vm5534_vm2, %v19771_v45  ;;  %v10612_v45 = vpack.c.bf16 %v10552_v5, %v10551_v15  ;;  %v10594_v15 = vld [vmem:[#allocation3 + $0x1aa] sm:$0xff] }
 0x9ea   :  { %15128 = vmatmul.mubr.msk.bf16.gmra.mrb[64].mxu1 %vm5534_vm2, %v19773_v36  ;;  %v10613_v36 = vpack.c.bf16 %v10554_v28, %v10553_v53  ;;  %v10595_v28 = vld [vmem:[#allocation3 + $0x1b2] sm:$0xff] }
 0x9eb   :  { %15131 = vmatprep.mubr.msk.bf16.mxu1 %vm5534_vm2, %v19779_v2  ;;  %v10555_v2 = vld [vmem:[#allocation3 + $0x72] sm:$0xff] }
 0x9f2   :  { %15132 = vmatmul.mubr.msk.bf16.gmra.mrb[68].mxu1 %vm5534_vm2, %v19781_v43  ;;  %v10556_v43 = vld [vmem:[#allocation3 + $0x7a] sm:$0xff] }
 0x9f3   :  { %15135 = vmatprep.mubr.msk.bf16.mxu1 %vm5534_vm2, %v19787_v42  ;;  %v10557_v42 = vld [vmem:[#allocation3 + $0x82] sm:$0xff] }
 0x9fa   :  { %15136 = vmatmul.mubr.msk.bf16.gmra.mrb[72].mxu1 %vm5534_vm2, %v19789_v51  ;;  %v10558_v51 = vld [vmem:[#allocation3 + $0x8a] sm:$0xff] }
 0x9fb   :  { %15139 = vmatprep.mubr.msk.bf16.mxu1 %vm5534_vm2, %v19795_v0  ;;  %v10614_v0 = vpack.c.bf16 %v10556_v43, %v10555_v2  ;;  %v10598_v2 = vld [vmem:[#allocation3 + $0x1ca] sm:$0xff] }
 0xa02   :  { %15140 = vmatmul.mubr.msk.bf16.gmra.mrb[76].mxu1 %vm5534_vm2, %v19797_v39  ;;  %v10615_v39 = vpack.c.bf16 %v10558_v51, %v10557_v42  ;;  %v10599_v51 = vld [vmem:[#allocation3 + $0x1d2] sm:$0xff] }
 0xa03   :  { %15143 = vmatprep.mubr.msk.bf16.mxu1 %vm5534_vm2, %v19803_v33  ;;  %v10559_v33 = vld [vmem:[#allocation3 + $0x92] sm:$0xff] }
 0xa0a   :  { %15144 = vmatmul.mubr.msk.bf16.gmra.mrb[80].mxu1 %vm5534_vm2, %v22243_v60  ;;  %v10585_v60 = vld [vmem:[#allocation3 + $0x162] sm:$0xff] }
 0xa0b   :  { %15147 = vmatprep.mubr.msk.bf16.mxu1 %vm5534_vm2, %v19811_v20  ;;  %v10561_v20 = vld [vmem:[#allocation3 + $0xa2] sm:$0xff] }
 0xa12   :  { %15148 = vmatmul.mubr.msk.bf16.gmra.mrb[84].mxu1 %vm5534_vm2, %v19813_v14  ;;  %v10562_v14 = vld [vmem:[#allocation3 + $0xaa] sm:$0xff] }
 0xa13   :  { %15151 = vmatprep.mubr.msk.bf16.mxu1 %vm5534_vm2, %v19819_v47 }
 0xa1a   :  { %15152 = vmatmul.mubr.msk.bf16.gmra.mrb[88].mxu1 %vm5534_vm2, %v19821_v12  ;;  %v10560_v12 = vld [vmem:[#allocation3 + $0x9a] sm:$0xff] }
 0xa1b   :  { %15155 = vmatprep.mubr.msk.bf16.mxu1 %vm5534_vm2, %v19827_v38  ;;  %v10616_v47 = vpack.c.bf16 %v10560_v12, %v10559_v33  ;;  %v10617_v38 = vpack.c.bf16 %v10562_v14, %v10561_v20  ;;  %v10602_v33 = vld [vmem:[#allocation3 + $0x1ea] sm:$0xff]  ;;  %v10603_v14 = vld [vmem:[#allocation3 + $0x1f2] sm:$0xff] }
 0xa22   :  { %15156 = vmatmul.mubr.msk.bf16.gmra.mrb[92].mxu1 %vm5534_vm2, %v10090_v8  ;;  %v10629_v8 = vpack.c.bf16 %v10586_v29, %v10585_v60 }
 0xa23   :  { %15161 = vmatprep.mubr.msk.bf16.mxu1 %vm5534_vm2, %v10609_v21  ;;  %v10589_v21 = vld [vmem:[#allocation3 + $0x182] sm:$0xff] }
 0xa24   :  { %v10631_v54 = vpack.c.bf16 %v10590_v58, %v10589_v21 }
 0xa2a   :  { %15162 = vmatmul.mubr.msk.bf16.vlgmr.msra.gmra.mrb[32].mxu1 %vm5534_vm2, %v10610_v24  ;;  %v10592_v24 = vld [vmem:[#allocation3 + $0x19a] sm:$0xff] }
 0xa2b   :  { %15165 = vmatprep.mubr.msk.bf16.mxu1 %vm5534_vm2, %v10611_v40  ;;  %v10593_v40 = vld [vmem:[#allocation3 + $0x1a2] sm:$0xff]  ;;  %v10632_v5 = vpack.c.bf16 %v10592_v24, %v10591_v63 }
 0xa2c   :  { %v10633_v53 = vpack.c.bf16 %v10594_v15, %v10593_v40 }
 0xa32   :  { %15166 = vmatmul.mubr.msk.bf16.gmra.mrb[36].mxu1 %vm5534_vm2, %v10612_v45  ;;  %v10596_v45 = vld [vmem:[#allocation3 + $0x1ba] sm:$0xff] }
 0xa33   :  { %15169 = vmatprep.mubr.msk.bf16.mxu1 %vm5534_vm2, %v10613_v36  ;;  %v10597_v36 = vld [vmem:[#allocation3 + $0x1c2] sm:$0xff]  ;;  %v10634_v43 = vpack.c.bf16 %v10596_v45, %v10595_v28 }
 0xa34   :  { %v10635_v42 = vpack.c.bf16 %v10598_v2, %v10597_v36 }
 0xa3a   :  { %15170 = vmatmul.mubr.msk.bf16.gmra.mrb[40].mxu1 %vm5534_vm2, %v10614_v0  ;;  %v10600_v0 = vld [vmem:[#allocation3 + $0x1da] sm:$0xff] }
 0xa3b   :  { %15173 = vmatprep.mubr.msk.bf16.mxu1 %vm5534_vm2, %v10615_v39  ;;  %v10601_v39 = vld [vmem:[#allocation3 + $0x1e2] sm:$0xff]  ;;  %v10636_v12 = vpack.c.bf16 %v10600_v0, %v10599_v51 }
 0xa3c   :  { %v10637_v20 = vpack.c.bf16 %v10602_v33, %v10601_v39 }
 0xa42   :  { %15174 = vmatmul.mubr.msk.bf16.gmra.mrb[44].mxu1 %vm5534_vm2, %v10616_v47  ;;  %v10604_v47 = vld [vmem:[#allocation3 + $0x1fa] sm:$0xff] }
 0xa43   :  { %15177 = vmatprep.mubr.msk.bf16.mxu1 %vm5534_vm2, %v10617_v38  ;;  %v10638_v38 = vpack.c.bf16 %v10604_v47, %v10603_v14 }
 0xa4a   :  { %15178 = vmatmul.mubr.msk.bf16.gmra.mrb[48].mxu1 %vm5534_vm2, %v10618_v31  ;;  %v20044_v31 = vpop.permute.xlu1 %11237 }
 0xa4b   :  { %15181 = vmatprep.mubr.msk.bf16.mxu1 %vm5534_vm2, %v10619_v44  ;;  %v20046_v44 = vpop.permute.xlu0 %11242 }
 0xa4e   :  { %v20048_v16 = vpop.permute.xlu1 %11247 }
 0xa4f   :  { %v20050_v57 = vpop.permute.xlu0 %11252 }
 0xa52   :  { %15182 = vmatmul.mubr.msk.bf16.gmra.mrb[52].mxu1 %vm5534_vm2, %v10620_v26  ;;  %v20052_v56 = vpop.permute.xlu1 %11257 }
 0xa53   :  { %15185 = vmatprep.mubr.msk.bf16.mxu1 %vm5534_vm2, %v10621_v13  ;;  %v20054_v25 = vpop.permute.xlu0 %11262 }
 0xa57   :  { %v20058_v26 = vpop.permute.xlu0 %11272 }
 0xa5a   :  { %15186 = vmatmul.mubr.msk.bf16.gmra.mrb[56].mxu1 %vm5534_vm2, %v10622_v46 }
 0xa5b   :  { %15189 = vmatprep.mubr.msk.bf16.mxu1 %vm5534_vm2, %v10623_v18  ;;  %v20062_v61 = vpop.permute.xlu0 %11282 }
 0xa5f   :  { %v20066_v50 = vpop.permute.xlu0 %11292 }
 0xa62   :  { %15190 = vmatmul.mubr.msk.bf16.gmra.mrb[60].mxu1 %vm5534_vm2, %v10624_v41 }
 0xa63   :  { %15193 = vmatprep.mubr.msk.bf16.mxu1 %vm5534_vm2, %v10625_v27  ;;  %v20070_v46 = vpop.permute.xlu0 %11302  ;;  %v20087_v27 = vld [vmem:[%s21712_s6] ss:$0 sm:$0xff] }
 0xa64   :  { %22245 = vst [vmem:[#allocation70_spill] sm:$0xff] %v20070_v46 }
 0xa67   :  { %v20074_v17 = vpop.permute.xlu0 %11312 }
 0xa68   :  { %22247 = vst [vmem:[#allocation36_spill] sm:$0xff] %v20074_v17 }
 0xa6a   :  { %15194 = vmatmul.mubr.msk.bf16.gmra.mrb[64].mxu1 %vm5534_vm2, %v10626_v4 }
 0xa6b   :  { %15197 = vmatprep.mubr.msk.bf16.mxu1 %vm5534_vm2, %v10627_v30  ;;  %v20078_v37 = vpop.permute.xlu0 %11322 }
 0xa6c   :  { %22249 = vst [vmem:[#allocation75_spill] sm:$0xff] %v20078_v37 }
 0xa6f   :  { %v20082_v41 = vpop.permute.xlu0 %11332 }
 0xa70   :  { %22251 = vst [vmem:[#allocation60_spill] sm:$0xff] %v20082_v41 }
 0xa72   :  { %15198 = vmatmul.mubr.msk.bf16.gmra.mrb[68].mxu1 %vm5534_vm2, %v10628_v22 }
 0xa73   :  { %15201 = vmatprep.mubr.msk.bf16.mxu1 %vm5534_vm2, %v10629_v8  ;;  %v20105_v22 = vpop.permute.xlu0 %11342 }
 0xa74   :  { %22253 = vst [vmem:[#allocation63_spill] sm:$0xff] %v20105_v22 }
 0xa77   :  { %v20124_v28 = vpop.permute.xlu0 %11352 }
 0xa78   :  { %22255 = vst [vmem:[#allocation69_spill] sm:$0xff] %v20124_v28 }
 0xa7a   :  { %15202 = vmatmul.mubr.msk.bf16.gmra.mrb[72].mxu1 %vm5534_vm2, %v10630_v35 }
 0xa7b   :  { %15205 = vmatprep.mubr.msk.bf16.mxu1 %vm5534_vm2, %v10631_v54  ;;  %v20145_v59 = vpop.permute.xlu0 %11362 }
 0xa7c   :  { %22257 = vst [vmem:[#allocation72_spill] sm:$0xff] %v20145_v59 }
 0xa82   :  { %15206 = vmatmul.mubr.msk.bf16.gmra.mrb[76].mxu1 %vm5534_vm2, %v10632_v5 }
 0xa83   :  { %15209 = vmatprep.mubr.msk.bf16.mxu1 %vm5534_vm2, %v10633_v53 }
 0xa8a   :  { %15210 = vmatmul.mubr.msk.bf16.gmra.mrb[80].mxu1 %vm5534_vm2, %v10634_v43 }
 0xa8b   :  { %15213 = vmatprep.mubr.msk.bf16.mxu1 %vm5534_vm2, %v10635_v42 }
 0xa92   :  { %15214 = vmatmul.mubr.msk.bf16.gmra.mrb[84].mxu1 %vm5534_vm2, %v10636_v12 }
 0xa93   :  { %15217 = vmatprep.mubr.msk.bf16.mxu1 %vm5534_vm2, %v10637_v20 }
 0xa9a   :  { %15218 = vmatmul.mubr.msk.bf16.gmra.mrb[88].mxu1 %vm5534_vm2, %v10638_v38 }
 0xa9b   :  { %15221 = vmatprep.mubr.msk.bf16.mxu1 %vm5534_vm2, %v19899_v32  ;;  %v20056_v32 = vpop.permute.xlu1 %11267 }
 0xa9f   :  { %v20060_v13 = vpop.permute.xlu1 %11277 }
 0xaa2   :  { %15222 = vmatmul.mubr.msk.bf16.gmra.mrb[92].mxu1 %vm5534_vm2, %v10640_v9 }
 0xaa3   :  { %v20064_v55 = vpop.permute.xlu1 %11287 }
 0xaa7   :  { %v20068_v49 = vpop.permute.xlu1 %11297 }
 0xaa8   :  { %22244 = vst [vmem:[#allocation34_spill] sm:$0xff] %v20068_v49 }
 0xaab   :  { %v20072_v18 = vpop.permute.xlu1 %11307 }
 0xaac   :  { %22246 = vst [vmem:[#allocation35_spill] sm:$0xff] %v20072_v18 }
 0xaaf   :  { %v20076_v48 = vpop.permute.xlu1 %11317 }
 0xab0   :  { %22248 = vst [vmem:[#allocation55_spill] sm:$0xff] %v20076_v48 }
 0xab3   :  { %v20080_v3 = vpop.permute.xlu1 %11327 }
 0xab4   :  { %22250 = vst [vmem:[#allocation59_spill] sm:$0xff] %v20080_v3 }
 0xab7   :  { %v20089_v11 = vpop.permute.xlu1 %11337 }
 0xab8   :  { %22252 = vst [vmem:[#allocation62_spill] sm:$0xff] %v20089_v11 }
 0xabb   :  { %v20111_v19 = vpop.permute.xlu1 %11347 }
 0xabc   :  { %22254 = vst [vmem:[#allocation66_spill] sm:$0xff] %v20111_v19 }
 0xabf   :  { %v20135_v0 = vpop.permute.xlu1 %11357 }
 0xac0   :  { %22256 = vst [vmem:[#allocation81_spill] sm:$0xff] %v20135_v0 }
 0xafd   :  { %v15163_v6 = vpop.f32.mrb[32].mxu1 }
 0xafe   :  { %v10776_v62 = vpop.f32.mrb[33].mxu1  ;;  %v20092_v34 = vadd.f32 %v15163_v6, %v20087_v27 }
 0xaff   :  { %v20095_v4 = vadd.f32 %v20087_v27, %v10776_v62  ;;  %v15164_v30 = vpop.f32.mrb[34].mxu1 }
 0xb00   :  { %v10779_v7 = vpop.f32.mrb[35].mxu1  ;;  %v20100_v60 = vadd.f32 %v15164_v30, %v20087_v27  ;;  %v11552_v8 = vmul.f32 %v20046_v44, %v20092_v34 }
 0xb01   :  { %v11550_v1 = vmul.f32 %v20042_v10, %v20095_v4  ;;  %v20103_v29 = vadd.f32 %v20087_v27, %v10779_v7 }
 0xb02   :  { %v11553_v58 = vmul.f32 %v20048_v16, %v20100_v60  ;;  %v11617_v40 = vsel %vm5534_vm2, %v11552_v8, 0.0  ;;  %v20154_v8 = vpop.permute.xlu1 %11367 }
 0xb03   :  { %v11551_v52 = vmul.f32 %v20044_v31, %v20103_v29  ;;  %v11614_v21 = vsel %vm5534_vm2, %v11550_v1, 0.0  ;;  %22258 = vst [vmem:[#allocation83_spill] sm:$0xff] %v20154_v8 }
 0xb04   :  { %v11619_v2 = vsel %vm5534_vm2, %v11553_v58, 0.0 }
 0xb05   :  { %v11615_v35 = vsel %vm5534_vm2, %v11551_v52, 0.0  ;;  %v15167_v54 = vpop.f32.mrb[36].mxu1 }
 0xb06   :  { %v11616_v63 = vadd.f32 %v11615_v35, %v11614_v21  ;;  %v10792_v24 = vpop.f32.mrb[37].mxu1  ;;  %v20119_v15 = vadd.f32 %v15167_v54, %v20087_v27 }
 0xb07   :  { %v20122_v5 = vadd.f32 %v20087_v27, %v10792_v24  ;;  %v15168_v53 = vpop.f32.mrb[38].mxu1 }
 0xb08   :  { %v11618_v45 = vadd.f32 %v11617_v40, %v11616_v63  ;;  %v10795_v36 = vpop.f32.mrb[39].mxu1  ;;  %v20130_v42 = vadd.f32 %v15168_v53, %v20087_v27  ;;  %v11556_v33 = vmul.f32 %v20054_v25, %v20119_v15 }
 0xb09   :  { %v11554_v43 = vmul.f32 %v20050_v57, %v20122_v5  ;;  %v20133_v51 = vadd.f32 %v20087_v27, %v10795_v36  ;;  %v20170_v36 = vpop.permute.xlu0 %11372 }
 0xb0a   :  { %v11620_v39 = vadd.f32 %v11619_v2, %v11618_v45  ;;  %v11557_v47 = vmul.f32 %v20056_v32, %v20130_v42  ;;  %v11625_v62 = vsel %vm5534_vm2, %v11556_v33, 0.0  ;;  %22259 = vst [vmem:[#allocation73_spill] sm:$0xff] %v20170_v36 }
 0xb0b   :  { %v11621_v12 = vsel %vm5534_vm2, %v11554_v43, 0.0  ;;  %v11555_v20 = vmul.f32 %v20052_v56, %v20133_v51 }
 0xb0c   :  { %v11622_v14 = vadd.f32 %v11621_v12, %v11620_v39  ;;  %v11627_v58 = vsel %vm5534_vm2, %v11557_v47, 0.0  ;;  %v20175_v12 = vpop.permute.xlu1 %11377 }
 0xb0d   :  { %v11623_v38 = vsel %vm5534_vm2, %v11555_v20, 0.0  ;;  %v15171_v23 = vpop.f32.mrb[40].mxu1  ;;  %22260 = vst [vmem:[#allocation87_spill] sm:$0xff] %v20175_v12 }
 0xb0e   :  { %v11624_v9 = vadd.f32 %v11623_v38, %v11622_v14  ;;  %v10808_v6 = vpop.f32.mrb[41].mxu1  ;;  %v20149_v30 = vadd.f32 %v15171_v23, %v20087_v27 }
 0xb0f   :  { %v20152_v7 = vadd.f32 %v20087_v27, %v10808_v6  ;;  %v15172_v1 = vpop.f32.mrb[42].mxu1 }
 0xb10   :  { %v11626_v52 = vadd.f32 %v11625_v62, %v11624_v9  ;;  %v10811_v21 = vpop.f32.mrb[43].mxu1  ;;  %v20160_v54 = vadd.f32 %v15172_v1, %v20087_v27  ;;  %v11560_v40 = vmul.f32 %v20062_v61, %v20149_v30 }
 0xb11   :  { %v11558_v35 = vmul.f32 %v20058_v26, %v20152_v7  ;;  %v20163_v63 = vadd.f32 %v20087_v27, %v10811_v21 }
 0xb12   :  { %v11628_v24 = vadd.f32 %v11627_v58, %v11626_v52  ;;  %v11561_v43 = vmul.f32 %v20064_v55, %v20160_v54  ;;  %v11633_v47 = vsel %vm5534_vm2, %v11560_v40, 0.0 }
 0xb13   :  { %v11629_v53 = vsel %vm5534_vm2, %v11558_v35, 0.0  ;;  %v11559_v45 = vmul.f32 %v20060_v13, %v20163_v63  ;;  %v20193_v35 = vpop.permute.xlu0 %11382 }
 0xb14   :  { %v11630_v2 = vadd.f32 %v11629_v53, %v11628_v24  ;;  %v11635_v1 = vsel %vm5534_vm2, %v11561_v43, 0.0  ;;  %22262 = vst [vmem:[#allocation90_spill] sm:$0xff] %v20193_v35 }
 0xb15   :  { %v11631_v39 = vsel %vm5534_vm2, %v11559_v45, 0.0  ;;  %v15175_v33 = vpop.f32.mrb[44].mxu1 }
 0xb16   :  { %v11632_v20 = vadd.f32 %v11631_v39, %v11630_v2  ;;  %v10824_v14 = vpop.f32.mrb[45].mxu1  ;;  %v20179_v38 = vadd.f32 %v15175_v33, %v20087_v27  ;;  %v20200_v2 = vpop.permute.xlu1 %11387 }
 0xb17   :  { %v20182_v23 = vadd.f32 %v20087_v27, %v10824_v14  ;;  %v15176_v9 = vpop.f32.mrb[46].mxu1  ;;  %22263 = vst [vmem:[#allocation76_spill] sm:$0xff] %v20200_v2 }
 0xb18   :  { %v11634_v6 = vadd.f32 %v11633_v47, %v11632_v20  ;;  %v10827_v62 = vpop.f32.mrb[47].mxu1  ;;  %v20188_v21 = vadd.f32 %v15176_v9, %v20087_v27  ;;  %v11564_v40 = vmul.f32 %v20070_v46, %v20179_v38 }
 0xb19   :  { %v11562_v52 = vmul.f32 %v20066_v50, %v20182_v23  ;;  %v20191_v58 = vadd.f32 %v20087_v27, %v10827_v62 }
 0xb1a   :  { %22261 = vst [vmem:[#allocation74_spill] sm:$0xff] %v20188_v21  ;;  %v11636_v24 = vadd.f32 %v11635_v1, %v11634_v6  ;;  %v11565_v39 = vmul.f32 %v20072_v18, %v20188_v21  ;;  %v11641_v9 = vsel %vm5534_vm2, %v11564_v40, 0.0 }
 0xb1b   :  { %v11637_v53 = vsel %vm5534_vm2, %v11562_v52, 0.0  ;;  %v11563_v45 = vmul.f32 %v20068_v49, %v20191_v58  ;;  %v20212_v52 = vpop.permute.xlu0 %11392 }
 0xb1c   :  { %v11638_v43 = vadd.f32 %v11637_v53, %v11636_v24  ;;  %22266 = vst [vmem:[#allocation89_spill] sm:$0xff] %v20212_v52  ;;  %v11643_v18 = vsel %vm5534_vm2, %v11565_v39, 0.0 }
 0xb1d   :  { %v11639_v33 = vsel %vm5534_vm2, %v11563_v45, 0.0  ;;  %v15179_v20 = vpop.f32.mrb[48].mxu1 }
 0xb1e   :  { %v11640_v14 = vadd.f32 %v11639_v33, %v11638_v43  ;;  %v10840_v47 = vpop.f32.mrb[49].mxu1  ;;  %v20207_v6 = vadd.f32 %v15179_v20, %v20087_v27  ;;  %v20223_v33 = vpop.permute.xlu1 %11397 }
 0xb1f   :  { %v20210_v62 = vadd.f32 %v20087_v27, %v10840_v47  ;;  %v15180_v1 = vpop.f32.mrb[50].mxu1  ;;  %22269 = vst [vmem:[#allocation80_spill] sm:$0xff] %v20223_v33 }
 0xb20   :  { %22264 = vst [vmem:[#allocation86_spill] sm:$0xff] %v20207_v6  ;;  %v11642_v24 = vadd.f32 %v11641_v9, %v11640_v14  ;;  %v10843_v53 = vpop.f32.mrb[51].mxu1  ;;  %v20218_v43 = vadd.f32 %v15180_v1, %v20087_v27  ;;  %v11568_v47 = vmul.f32 %v20078_v37, %v20207_v6 }
 0xb21   :  { %22265 = vst [vmem:[#allocation77_spill] sm:$0xff] %v20210_v62  ;;  %v11566_v45 = vmul.f32 %v20074_v17, %v20210_v62  ;;  %v20221_v40 = vadd.f32 %v20087_v27, %v10843_v53  ;;  %v20233_v53 = vpop.permute.xlu0 %11402 }
 0xb22   :  { %22267 = vst [vmem:[#allocation78_spill] sm:$0xff] %v20218_v43  ;;  %v11644_v20 = vadd.f32 %v11643_v18, %v11642_v24  ;;  %v11569_v17 = vmul.f32 %v20080_v3, %v20218_v43  ;;  %22270 = vst [vmem:[#allocation82_spill] sm:$0xff] %v20233_v53  ;;  %v11649_v18 = vsel %vm5534_vm2, %v11568_v47, 0.0 }
 0xb23   :  { %22268 = vst [vmem:[#allocation79_spill] sm:$0xff] %v20221_v40  ;;  %v11645_v14 = vsel %vm5534_vm2, %v11566_v45, 0.0  ;;  %v11567_v39 = vmul.f32 %v20076_v48, %v20221_v40 }
 0xb24   :  { %v11646_v9 = vadd.f32 %v11645_v14, %v11644_v20  ;;  %v20242_v20 = vpop.permute.xlu1 %11407 }
 0xb25   :  { %v11647_v1 = vsel %vm5534_vm2, %v11567_v39, 0.0  ;;  %v15183_v46 = vpop.f32.mrb[52].mxu1  ;;  %22273 = vst [vmem:[#allocation88_spill] sm:$0xff] %v20242_v20  ;;  %v11651_v39 = vsel %vm5534_vm2, %v11569_v17, 0.0 }
 0xb26   :  { %v11648_v62 = vadd.f32 %v11647_v1, %v11646_v9  ;;  %v10856_v49 = vpop.f32.mrb[53].mxu1  ;;  %v20237_v24 = vadd.f32 %v15183_v46, %v20087_v27 }
 0xb27   :  { %v20240_v45 = vadd.f32 %v20087_v27, %v10856_v49  ;;  %v15184_v37 = vpop.f32.mrb[54].mxu1 }
 0xb28   :  { %22271 = vst [vmem:[#allocation84_spill] sm:$0xff] %v20237_v24  ;;  %v11650_v14 = vadd.f32 %v11649_v18, %v11648_v62  ;;  %v10859_v3 = vpop.f32.mrb[55].mxu1  ;;  %v20248_v9 = vadd.f32 %v15184_v37, %v20087_v27  ;;  %v11572_v49 = vmul.f32 %v20105_v22, %v20237_v24  ;;  %v20258_v18 = vpop.permute.xlu0 %11412 }
 0xb29   :  { %22272 = vst [vmem:[#allocation85_spill] sm:$0xff] %v20240_v45  ;;  %v11570_v48 = vmul.f32 %v20082_v41, %v20240_v45  ;;  %v20251_v47 = vadd.f32 %v20087_v27, %v10859_v3  ;;  %22276 = vst [vmem:[#allocation93_spill] sm:$0xff] %v20258_v18  ;;  %v20263_v3 = vpop.permute.xlu1 %11417 }
 0xb2a   :  { %22274 = vst [vmem:[#allocation91_spill] sm:$0xff] %v20248_v9  ;;  %v11652_v46 = vadd.f32 %v11651_v39, %v11650_v14  ;;  %v11573_v41 = vmul.f32 %v20111_v19, %v20248_v9  ;;  %22277 = vst [vmem:[#allocation94_spill] sm:$0xff] %v20263_v3  ;;  %v11657_v22 = vsel %vm5534_vm2, %v11572_v49, 0.0 }
 0xb2b   :  { %22275 = vst [vmem:[#allocation92_spill] sm:$0xff] %v20251_v47  ;;  %v11653_v1 = vsel %vm5534_vm2, %v11570_v48, 0.0  ;;  %v11571_v62 = vmul.f32 %v20089_v11, %v20251_v47 }
 0xb2c   :  { %v11654_v17 = vadd.f32 %v11653_v1, %v11652_v46  ;;  %v11659_v19 = vsel %vm5534_vm2, %v11573_v41, 0.0  ;;  %v20281_v49 = vpop.permute.xlu0 %11422 }
 0xb2d   :  { %v11655_v37 = vsel %vm5534_vm2, %v11571_v62, 0.0  ;;  %v15187_v45 = vpop.f32.mrb[56].mxu1  ;;  %22282 = vst [vmem:[#allocation41_spill] sm:$0xff] %v20281_v49 }
 0xb2e   :  { %v11656_v14 = vadd.f32 %v11655_v37, %v11654_v17  ;;  %v10872_v39 = vpop.f32.mrb[57].mxu1  ;;  %v20267_v48 = vadd.f32 %v15187_v45, %v20087_v27 }
 0xb2f   :  { %v20270_v11 = vadd.f32 %v20087_v27, %v10872_v39  ;;  %v15188_v24 = vpop.f32.mrb[58].mxu1 }
 0xb30   :  { %22278 = vst [vmem:[#allocation37_spill] sm:$0xff] %v20267_v48  ;;  %v11658_v46 = vadd.f32 %v11657_v22, %v11656_v14  ;;  %v10875_v1 = vpop.f32.mrb[59].mxu1  ;;  %v20276_v9 = vadd.f32 %v15188_v24, %v20087_v27  ;;  %v11576_v37 = vmul.f32 %v20145_v59, %v20267_v48  ;;  %v20288_v14 = vpop.permute.xlu1 %11427 }
 0xb31   :  { %22279 = vst [vmem:[#allocation38_spill] sm:$0xff] %v20270_v11  ;;  %v11574_v62 = vmul.f32 %v20124_v28, %v20270_v11  ;;  %v20279_v17 = vadd.f32 %v20087_v27, %v10875_v1  ;;  %22283 = vst [vmem:[#allocation42_spill] sm:$0xff] %v20288_v14 }
 0xb32   :  { %22280 = vst [vmem:[#allocation39_spill] sm:$0xff] %v20276_v9  ;;  %v11660_v45 = vadd.f32 %v11659_v19, %v11658_v46  ;;  %v11577_v24 = vmul.f32 %v20154_v8, %v20276_v9  ;;  %v11665_v19 = vsel %vm5534_vm2, %v11576_v37, 0.0 }
 0xb33   :  { %22281 = vst [vmem:[#allocation40_spill] sm:$0xff] %v20279_v17  ;;  %v11661_v22 = vsel %vm5534_vm2, %v11574_v62, 0.0  ;;  %v11575_v41 = vmul.f32 %v20135_v0, %v20279_v17  ;;  %v20300_v0 = vpop.permute.xlu0 %11432 }
 0xb34   :  { %v11662_v39 = vadd.f32 %v11661_v22, %v11660_v45  ;;  %22286 = vst [vmem:[#allocation45_spill] sm:$0xff] %v20300_v0  ;;  %v11667_v8 = vsel %vm5534_vm2, %v11577_v24, 0.0 }
 0xb35   :  { %v11663_v1 = vsel %vm5534_vm2, %v11575_v41, 0.0  ;;  %v15191_v28 = vpop.f32.mrb[60].mxu1 }
 0xb36   :  { %v11664_v11 = vadd.f32 %v11663_v1, %v11662_v39  ;;  %v10888_v47 = vpop.f32.mrb[61].mxu1  ;;  %v20295_v46 = vadd.f32 %v15191_v28, %v20087_v27  ;;  %v20311_v28 = vpop.permute.xlu1 %11437 }
 0xb37   :  { %v20298_v62 = vadd.f32 %v20087_v27, %v10888_v47  ;;  %v15192_v59 = vpop.f32.mrb[62].mxu1  ;;  %22289 = vst [vmem:[#allocation48_spill] sm:$0xff] %v20311_v28 }
 0xb38   :  { %22284 = vst [vmem:[#allocation43_spill] sm:$0xff] %v20295_v46  ;;  %v11666_v45 = vadd.f32 %v11665_v19, %v11664_v11  ;;  %v10891_v22 = vpop.f32.mrb[63].mxu1  ;;  %v20306_v39 = vadd.f32 %v15192_v59, %v20087_v27  ;;  %v11580_v1 = vmul.f32 %v20193_v35, %v20295_v46 }
 0xb39   :  { %22285 = vst [vmem:[#allocation44_spill] sm:$0xff] %v20298_v62  ;;  %v11578_v41 = vmul.f32 %v20170_v36, %v20298_v62  ;;  %v20309_v37 = vadd.f32 %v20087_v27, %v10891_v22  ;;  %v20321_v22 = vpop.permute.xlu0 %11442 }
 0xb3a   :  { %22287 = vst [vmem:[#allocation46_spill] sm:$0xff] %v20306_v39  ;;  %v11668_v47 = vadd.f32 %v11667_v8, %v11666_v45  ;;  %v11581_v36 = vmul.f32 %v20200_v2, %v20306_v39  ;;  %22290 = vst [vmem:[#allocation50_spill] sm:$0xff] %v20321_v22  ;;  %v11673_v8 = vsel %vm5534_vm2, %v11580_v1, 0.0 }
 0xb3b   :  { %22288 = vst [vmem:[#allocation47_spill] sm:$0xff] %v20309_v37  ;;  %v11669_v11 = vsel %vm5534_vm2, %v11578_v41, 0.0  ;;  %v11579_v24 = vmul.f32 %v20175_v12, %v20309_v37 }
 0xb3c   :  { %v11670_v19 = vadd.f32 %v11669_v11, %v11668_v47  ;;  %v20330_v47 = vpop.permute.xlu1 %11447 }
 0xb3d   :  { %v11671_v59 = vsel %vm5534_vm2, %v11579_v24, 0.0  ;;  %v15195_v62 = vpop.f32.mrb[64].mxu1  ;;  %22293 = vst [vmem:[#allocation7_spill] sm:$0xff] %v20330_v47  ;;  %v11675_v24 = vsel %vm5534_vm2, %v11581_v36, 0.0 }
 0xb3e   :  { %v11672_v9 = vadd.f32 %v11671_v59, %v11670_v19  ;;  %v10904_v48 = vpop.f32.mrb[65].mxu1  ;;  %v20325_v45 = vadd.f32 %v15195_v62, %v20087_v27 }
 0xb3f   :  { %v20328_v41 = vadd.f32 %v20087_v27, %v10904_v48  ;;  %v15196_v35 = vpop.f32.mrb[66].mxu1 }
 0xb40   :  { %22291 = vst [vmem:[#allocation51_spill] sm:$0xff] %v20325_v45  ;;  %v11674_v11 = vadd.f32 %v11673_v8, %v11672_v9  ;;  %v10907_v2 = vpop.f32.mrb[67].mxu1  ;;  %v20336_v19 = vadd.f32 %v15196_v35, %v20087_v27  ;;  %v11584_v48 = vmul.f32 %v20233_v53, %v20325_v45  ;;  %v20346_v8 = vpop.permute.xlu0 %11452 }
 0xb41   :  { %22292 = vst [vmem:[#allocation49_spill] sm:$0xff] %v20328_v41  ;;  %v11582_v12 = vmul.f32 %v20212_v52, %v20328_v41  ;;  %v20339_v1 = vadd.f32 %v20087_v27, %v10907_v2  ;;  %22296 = vst [vmem:[#allocation8_spill] sm:$0xff] %v20346_v8  ;;  %v20351_v2 = vpop.permute.xlu1 %11457 }
 0xb42   :  { %22294 = vst [vmem:[#allocation9_spill] sm:$0xff] %v20336_v19  ;;  %v11676_v62 = vadd.f32 %v11675_v24, %v11674_v11  ;;  %v11585_v52 = vmul.f32 %v20242_v20, %v20336_v19  ;;  %22297 = vst [vmem:[#allocation10_spill] sm:$0xff] %v20351_v2  ;;  %v11681_v53 = vsel %vm5534_vm2, %v11584_v48, 0.0 }
 0xb43   :  { %22295 = vst [vmem:[#allocation52_spill] sm:$0xff] %v20339_v1  ;;  %v11677_v59 = vsel %vm5534_vm2, %v11582_v12, 0.0  ;;  %v11583_v9 = vmul.f32 %v20223_v33, %v20339_v1 }
 0xb44   :  { %v11678_v36 = vadd.f32 %v11677_v59, %v11676_v62  ;;  %v11683_v20 = vsel %vm5534_vm2, %v11585_v52, 0.0  ;;  %v20369_v48 = vpop.permute.xlu0 %11462 }
 0xb45   :  { %v11679_v35 = vsel %vm5534_vm2, %v11583_v9, 0.0  ;;  %v15199_v41 = vpop.f32.mrb[68].mxu1  ;;  %22302 = vst [vmem:[#allocation15_spill] sm:$0xff] %v20369_v48 }
 0xb46   :  { %v11680_v11 = vadd.f32 %v11679_v35, %v11678_v36  ;;  %v10920_v24 = vpop.f32.mrb[69].mxu1  ;;  %v20355_v12 = vadd.f32 %v15199_v41, %v20087_v27 }
 0xb47   :  { %v20358_v33 = vadd.f32 %v20087_v27, %v10920_v24  ;;  %v15200_v45 = vpop.f32.mrb[70].mxu1 }
 0xb48   :  { %22298 = vst [vmem:[#allocation11_spill] sm:$0xff] %v20355_v12  ;;  %v11682_v62 = vadd.f32 %v11681_v53, %v11680_v11  ;;  %v10923_v59 = vpop.f32.mrb[71].mxu1  ;;  %v20364_v19 = vadd.f32 %v15200_v45, %v20087_v27  ;;  %v11588_v35 = vmul.f32 %v20281_v49, %v20355_v12  ;;  %v20376_v11 = vpop.permute.xlu1 %11467 }
 0xb49   :  { %22299 = vst [vmem:[#allocation12_spill] sm:$0xff] %v20358_v33  ;;  %v11586_v9 = vmul.f32 %v20258_v18, %v20358_v33  ;;  %v20367_v36 = vadd.f32 %v20087_v27, %v10923_v59  ;;  %22303 = vst [vmem:[#allocation16_spill] sm:$0xff] %v20376_v11 }
 0xb4a   :  { %22300 = vst [vmem:[#allocation13_spill] sm:$0xff] %v20364_v19  ;;  %v11684_v41 = vadd.f32 %v11683_v20, %v11682_v62  ;;  %v11589_v45 = vmul.f32 %v20288_v14, %v20364_v19  ;;  %v11689_v20 = vsel %vm5534_vm2, %v11588_v35, 0.0 }
 0xb4b   :  { %22301 = vst [vmem:[#allocation14_spill] sm:$0xff] %v20367_v36  ;;  %v11685_v53 = vsel %vm5534_vm2, %v11586_v9, 0.0  ;;  %v11587_v52 = vmul.f32 %v20263_v3, %v20367_v36  ;;  %v20388_v3 = vpop.permute.xlu0 %11472 }
 0xb4c   :  { %v11686_v24 = vadd.f32 %v11685_v53, %v11684_v41  ;;  %22306 = vst [vmem:[#allocation53_spill] sm:$0xff] %v20388_v3  ;;  %v11691_v14 = vsel %vm5534_vm2, %v11589_v45, 0.0 }
 0xb4d   :  { %v11687_v59 = vsel %vm5534_vm2, %v11587_v52, 0.0  ;;  %v15203_v18 = vpop.f32.mrb[72].mxu1 }
 0xb4e   :  { %v11688_v33 = vadd.f32 %v11687_v59, %v11686_v24  ;;  %v10936_v1 = vpop.f32.mrb[73].mxu1  ;;  %v20383_v62 = vadd.f32 %v15203_v18, %v20087_v27  ;;  %v20399_v18 = vpop.permute.xlu1 %11477 }
 0xb4f   :  { %v20386_v9 = vadd.f32 %v20087_v27, %v10936_v1  ;;  %v15204_v49 = vpop.f32.mrb[74].mxu1  ;;  %22309 = vst [vmem:[#allocation21_spill] sm:$0xff] %v20399_v18 }
 0xb50   :  { %22304 = vst [vmem:[#allocation17_spill] sm:$0xff] %v20383_v62  ;;  %v11690_v41 = vadd.f32 %v11689_v20, %v11688_v33  ;;  %v10939_v53 = vpop.f32.mrb[75].mxu1  ;;  %v20394_v24 = vadd.f32 %v15204_v49, %v20087_v27  ;;  %v11592_v59 = vmul.f32 %v20321_v22, %v20383_v62 }
 0xb51   :  { %22305 = vst [vmem:[#allocation18_spill] sm:$0xff] %v20386_v9  ;;  %v11590_v52 = vmul.f32 %v20300_v0, %v20386_v9  ;;  %v20397_v35 = vadd.f32 %v20087_v27, %v10939_v53  ;;  %v20409_v53 = vpop.permute.xlu0 %11482 }
 0xb52   :  { %22307 = vst [vmem:[#allocation20_spill] sm:$0xff] %v20394_v24  ;;  %v11692_v1 = vadd.f32 %v11691_v14, %v11690_v41  ;;  %v11593_v0 = vmul.f32 %v20330_v47, %v20394_v24  ;;  %22310 = vst [vmem:[#allocation22_spill] sm:$0xff] %v20409_v53  ;;  %v11697_v14 = vsel %vm5534_vm2, %v11592_v59, 0.0 }
 0xb53   :  { %22308 = vst [vmem:[#allocation57_spill] sm:$0xff] %v20397_v35  ;;  %v11693_v33 = vsel %vm5534_vm2, %v11590_v52, 0.0  ;;  %v11591_v45 = vmul.f32 %v20311_v28, %v20397_v35 }
 0xb54   :  { %v11694_v20 = vadd.f32 %v11693_v33, %v11692_v1  ;;  %v20418_v1 = vpop.permute.xlu1 %11487 }
 0xb55   :  { %v11695_v49 = vsel %vm5534_vm2, %v11591_v45, 0.0  ;;  %v15207_v9 = vpop.f32.mrb[76].mxu1  ;;  %22313 = vst [vmem:[#allocation58_spill] sm:$0xff] %v20418_v1  ;;  %v11699_v45 = vsel %vm5534_vm2, %v11593_v0, 0.0 }
 0xb56   :  { %v11696_v19 = vadd.f32 %v11695_v49, %v11694_v20  ;;  %v10952_v12 = vpop.f32.mrb[77].mxu1  ;;  %v20413_v41 = vadd.f32 %v15207_v9, %v20087_v27 }
 0xb57   :  { %v20416_v52 = vadd.f32 %v20087_v27, %v10952_v12  ;;  %v15208_v22 = vpop.f32.mrb[78].mxu1 }
 0xb58   :  { %22311 = vst [vmem:[#allocation56_spill] sm:$0xff] %v20413_v41  ;;  %v11698_v33 = vadd.f32 %v11697_v14, %v11696_v19  ;;  %v10955_v47 = vpop.f32.mrb[79].mxu1  ;;  %v20424_v20 = vadd.f32 %v15208_v22, %v20087_v27  ;;  %v11596_v12 = vmul.f32 %v20369_v48, %v20413_v41  ;;  %v20434_v14 = vpop.permute.xlu0 %11492 }
 0xb59   :  { %22312 = vst [vmem:[#allocation23_spill] sm:$0xff] %v20416_v52  ;;  %v11594_v28 = vmul.f32 %v20346_v8, %v20416_v52  ;;  %v20427_v59 = vadd.f32 %v20087_v27, %v10955_v47  ;;  %22316 = vst [vmem:[#allocation25_spill] sm:$0xff] %v20434_v14  ;;  %v20439_v47 = vpop.permute.xlu1 %11497 }
 0xb5a   :  { %22314 = vst [vmem:[#allocation24_spill] sm:$0xff] %v20424_v20  ;;  %v11700_v9 = vadd.f32 %v11699_v45, %v11698_v33  ;;  %v11597_v8 = vmul.f32 %v20376_v11, %v20424_v20  ;;  %22317 = vst [vmem:[#allocation26_spill] sm:$0xff] %v20439_v47  ;;  %v11705_v48 = vsel %vm5534_vm2, %v11596_v12, 0.0 }
 0xb5b   :  { %22315 = vst [vmem:[#allocation61_spill] sm:$0xff] %v20427_v59  ;;  %v11701_v49 = vsel %vm5534_vm2, %v11594_v28, 0.0  ;;  %v11595_v19 = vmul.f32 %v20351_v2, %v20427_v59 }
 0xb5c   :  { %v11702_v0 = vadd.f32 %v11701_v49, %v11700_v9  ;;  %v11707_v11 = vsel %vm5534_vm2, %v11597_v8, 0.0  ;;  %v20457_v12 = vpop.permute.xlu0 %11502 }
 0xb5d   :  { %v11703_v22 = vsel %vm5534_vm2, %v11595_v19, 0.0  ;;  %v15211_v52 = vpop.f32.mrb[80].mxu1  ;;  %22318 = vst [vmem:[#allocation27_spill] sm:$0xff] %v20457_v12 }
 0xb5e   :  { %v11704_v33 = vadd.f32 %v11703_v22, %v11702_v0  ;;  %v10968_v45 = vpop.f32.mrb[81].mxu1  ;;  %v20443_v28 = vadd.f32 %v15211_v52, %v20087_v27 }
 0xb5f   :  { %v20446_v2 = vadd.f32 %v20087_v27, %v10968_v45  ;;  %v15212_v41 = vpop.f32.mrb[82].mxu1 }
 0xb60   :  { %v11706_v9 = vadd.f32 %v11705_v48, %v11704_v33  ;;  %v10971_v49 = vpop.f32.mrb[83].mxu1  ;;  %v20452_v20 = vadd.f32 %v15212_v41, %v20087_v27  ;;  %v11600_v22 = vmul.f32 %v20409_v53, %v20443_v28  ;;  %v20464_v33 = vpop.permute.xlu1 %11507 }
 0xb61   :  { %v11598_v19 = vmul.f32 %v20388_v3, %v20446_v2  ;;  %v20455_v0 = vadd.f32 %v20087_v27, %v10971_v49  ;;  %22319 = vst [vmem:[#allocation28_spill] sm:$0xff] %v20464_v33 }
 0xb62   :  { %v11708_v52 = vadd.f32 %v11707_v11, %v11706_v9  ;;  %v11601_v41 = vmul.f32 %v20418_v1, %v20452_v20  ;;  %v11713_v11 = vsel %vm5534_vm2, %v11600_v22, 0.0 }
 0xb63   :  { %v11709_v48 = vsel %vm5534_vm2, %v11598_v19, 0.0  ;;  %v11599_v8 = vmul.f32 %v20399_v18, %v20455_v0  ;;  %v20476_v18 = vpop.permute.xlu0 %11512 }
 0xb64   :  { %v11710_v45 = vadd.f32 %v11709_v48, %v11708_v52  ;;  %22320 = vst [vmem:[#allocation65_spill] sm:$0xff] %v20476_v18  ;;  %v11715_v1 = vsel %vm5534_vm2, %v11601_v41, 0.0 }
 0xb65   :  { %v11711_v49 = vsel %vm5534_vm2, %v11599_v8, 0.0  ;;  %v15215_v3 = vpop.f32.mrb[84].mxu1 }
 0xb66   :  { %v11712_v59 = vadd.f32 %v11711_v49, %v11710_v45  ;;  %v10984_v24 = vpop.f32.mrb[85].mxu1  ;;  %v20471_v9 = vadd.f32 %v15215_v3, %v20087_v27  ;;  %v20487_v3 = vpop.permute.xlu1 %11517 }
 0xb67   :  { %v20474_v19 = vadd.f32 %v20087_v27, %v10984_v24  ;;  %v15216_v53 = vpop.f32.mrb[86].mxu1  ;;  %22321 = vst [vmem:[#allocation29_spill] sm:$0xff] %v20487_v3 }
 0xb68   :  { %v11714_v52 = vadd.f32 %v11713_v11, %v11712_v59  ;;  %v10987_v48 = vpop.f32.mrb[87].mxu1  ;;  %v20482_v45 = vadd.f32 %v15216_v53, %v20087_v27  ;;  %v11604_v49 = vmul.f32 %v20457_v12, %v20471_v9 }
 0xb69   :  { %v11602_v8 = vmul.f32 %v20434_v14, %v20474_v19  ;;  %v20485_v22 = vadd.f32 %v20087_v27, %v10987_v48  ;;  %v20497_v48 = vpop.permute.xlu0 %11522 }
 0xb6a   :  { %v11716_v24 = vadd.f32 %v11715_v1, %v11714_v52  ;;  %v11605_v14 = vmul.f32 %v20464_v33, %v20482_v45  ;;  %22322 = vst [vmem:[#allocation68_spill] sm:$0xff] %v20497_v48  ;;  %v11721_v1 = vsel %vm5534_vm2, %v11604_v49, 0.0 }
 0xb6b   :  { %v11717_v59 = vsel %vm5534_vm2, %v11602_v8, 0.0  ;;  %v11603_v41 = vmul.f32 %v20439_v47, %v20485_v22  ;;  %v20504_v47 = vpop.permute.xlu1 %11527 }
 0xb6c   :  { %v11718_v11 = vadd.f32 %v11717_v59, %v11716_v24  ;;  %22323 = vst [vmem:[#allocation19_spill] sm:$0xff] %v20504_v47  ;;  %v11723_v33 = vsel %vm5534_vm2, %v11605_v14, 0.0 }
 0xb6d   :  { %v11719_v53 = vsel %vm5534_vm2, %v11603_v41, 0.0  ;;  %v15219_v62 = vpop.f32.mrb[88].mxu1  ;;  %v20514_v46 = vpop.permute.xlu0 %11532 }
 0xb6e   :  { %v11720_v35 = vadd.f32 %v11719_v53, %v11718_v11  ;;  %v11000_v36 = vpop.f32.mrb[89].mxu1  ;;  %v20501_v52 = vadd.f32 %v15219_v62, %v20087_v27  ;;  %22324 = vst [vmem:[#allocation30_spill] sm:$0xff] %v20514_v46 }
 0xb6f   :  { %v11158_v8 = vadd.f32 %v20087_v27, %v11000_v36  ;;  %v15220_v12 = vpop.f32.mrb[90].mxu1  ;;  %v20518_v37 = vpop.permute.xlu1 %11537 }
 0xb70   :  { %v11722_v24 = vadd.f32 %v11721_v1, %v11720_v35  ;;  %v11003_v59 = vpop.f32.mrb[91].mxu1  ;;  %v11161_v39 = vadd.f32 %v15220_v12, %v20087_v27  ;;  %v11608_v62 = vmul.f32 %v20497_v48, %v20501_v52  ;;  %22325 = vst [vmem:[#allocation64_spill] sm:$0xff] %v20518_v37 }
 0xb71   :  { %v11606_v41 = vmul.f32 %v20476_v18, %v11158_v8  ;;  %v11159_v11 = vadd.f32 %v20087_v27, %v11003_v59  ;;  %v20527_v43 = vpop.permute.xlu0 %11542 }
 0xb72   :  { %v11724_v53 = vadd.f32 %v11723_v33, %v11722_v24  ;;  %v11609_v1 = vmul.f32 %v20504_v47, %v11161_v39  ;;  %v11729_v33 = vsel %vm5534_vm2, %v11608_v62, 0.0  ;;  %22326 = vst [vmem:[#allocation31_spill] sm:$0xff] %v20527_v43 }
 0xb73   :  { %v11725_v49 = vsel %vm5534_vm2, %v11606_v41, 0.0  ;;  %v11607_v36 = vmul.f32 %v20487_v3, %v11159_v11 }
 0xb74   :  { %v11726_v35 = vadd.f32 %v11725_v49, %v11724_v53  ;;  %v11731_v53 = vsel %vm5534_vm2, %v11609_v1, 0.0 }
 0xb75   :  { %v11727_v14 = vsel %vm5534_vm2, %v11607_v36, 0.0  ;;  %v15223_v18 = vpop.f32.mrb[92].mxu1 }
 0xb76   :  { %v11728_v12 = vadd.f32 %v11727_v14, %v11726_v35  ;;  %v11016_v59 = vpop.f32.mrb[93].mxu1  ;;  %v11164_v24 = vadd.f32 %v15223_v18, %v20087_v27 }
 0xb77   :  { %v11162_v41 = vadd.f32 %v20087_v27, %v11016_v59  ;;  %v15224_v48 = vpop.f32.mrb[94].mxu1  ;;  %v20532_v59 = vpop.permute.xlu1 %11547 }
 0xb78   :  { %v11730_v3 = vadd.f32 %v11729_v33, %v11728_v12  ;;  %v11019_v17 = vpop.f32.mrb[95].mxu1  ;;  %v11165_v36 = vadd.f32 %v15224_v48, %v20087_v27  ;;  %v11612_v62 = vmul.f32 %v20527_v43, %v11164_v24 }
 0xb79   :  { %v11610_v49 = vmul.f32 %v20514_v46, %v11162_v41  ;;  %v11163_v47 = vadd.f32 %v20087_v27, %v11019_v17 }
 0xb7a   :  { %v11732_v35 = vadd.f32 %v11731_v53, %v11730_v3  ;;  %v11613_v1 = vmul.f32 %v20532_v59, %v11165_v36  ;;  %v11737_v48 = vsel %vm5534_vm2, %v11612_v62, 0.0 }
 0xb7b   :  { %v11733_v18 = vsel %vm5534_vm2, %v11610_v49, 0.0  ;;  %v11611_v14 = vmul.f32 %v20518_v37, %v11163_v47 }
 0xb7c   :  { %v11734_v12 = vadd.f32 %v11733_v18, %v11732_v35  ;;  %v11739_v17 = vsel %vm5534_vm2, %v11613_v1, 0.0 }
 0xb7d   :  { %v11735_v33 = vsel %vm5534_vm2, %v11611_v14, 0.0 }
 0xb7e   :  { %v11736_v46 = vadd.f32 %v11735_v33, %v11734_v12 }
 0xb80   :  { %v11738_v27 = vadd.f32 %v11737_v48, %v11736_v46 }
 0xb82   :  { %v11740_v3 = vadd.f32 %v11739_v17, %v11738_v27 }
 0xb84   :  { %v11741_v53 = vrot.slane %v11740_v3, 4 }
 0xb86   :  { %v11742_v43 = vadd.f32 %v11741_v53, %v11740_v3 }
 0xb88   :  { %v11743_v6 = vrot.slane %v11742_v43, 2 }
 0xb8a   :  { %v11744_v49 = vadd.f32 %v11743_v6, %v11742_v43 }
 0xb8c   :  { %v11745_v40 = vrot.slane %v11744_v49, 1 }
 0xb8e   :  { %v11746_v37 = vadd.f32 %v11745_v40, %v11744_v49 }
 0xb90   :  { %v20538_v21 = vmul.f32 0.0034722222, %v11746_v37 }
 0xb92   :  { %v20542_v35 = vsub.f32 %v20446_v2, %v20538_v21  ;;  %v20546_v18 = vsub.f32 %v20455_v0, %v20538_v21  ;;  %v20550_v46 = vsub.f32 %v20443_v28, %v20538_v21  ;;  %v20554_v62 = vsub.f32 %v20452_v20, %v20538_v21 }
 0xb93   :  { %v20558_v6 = vsub.f32 %v20474_v19, %v20538_v21  ;;  %v20562_v43 = vsub.f32 %v20485_v22, %v20538_v21  ;;  %v20566_v40 = vsub.f32 %v20471_v9, %v20538_v21  ;;  %v20570_v37 = vsub.f32 %v20482_v45, %v20538_v21 }
 0xb94   :  { %v20573_v2 = vsub.f32 %v11158_v8, %v20538_v21  ;;  %v20576_v20 = vsub.f32 %v11159_v11, %v20538_v21  ;;  %v20580_v28 = vsub.f32 %v20501_v52, %v20538_v21  ;;  %v20583_v0 = vsub.f32 %v11161_v39, %v20538_v21 }
 0xb95   :  { %v20586_v9 = vsub.f32 %v11162_v41, %v20538_v21  ;;  %v20589_v19 = vsub.f32 %v11163_v47, %v20538_v21  ;;  %v20592_v45 = vsub.f32 %v11164_v24, %v20538_v21  ;;  %v20595_v22 = vsub.f32 %v11165_v36, %v20538_v21 }
 0xb96   :  { %v20599_v8 = vsub.f32 %v20095_v4, %v20538_v21  ;;  %v20603_v39 = vsub.f32 %v20103_v29, %v20538_v21  ;;  %v20607_v52 = vsub.f32 %v20092_v34, %v20538_v21  ;;  %v20611_v47 = vsub.f32 %v20100_v60, %v20538_v21 }
 0xb97   :  { %v20619_v4 = vsub.f32 %v20122_v5, %v20538_v21  ;;  %v20625_v34 = vsub.f32 %v20133_v51, %v20538_v21 }
 0xb98   :  { %v11812_v11 = vmul.f32 %v20599_v8, %v20042_v10  ;;  %v11813_v24 = vmul.f32 %v20603_v39, %v20044_v31  ;;  %v11814_v29 = vmul.f32 %v20607_v52, %v20046_v44  ;;  %v11815_v60 = vmul.f32 %v20611_v47, %v20048_v16 }
 0xb99   :  { %v20631_v10 = vsub.f32 %v20119_v15, %v20538_v21  ;;  %v11816_v31 = vmul.f32 %v20619_v4, %v20050_v57  ;;  %v20637_v44 = vsub.f32 %v20130_v42, %v20538_v21  ;;  %v11817_v51 = vmul.f32 %v20625_v34, %v20052_v56 }
 0xb9a   :  { %v11876_v41 = vmul.f32 %v11812_v11, %v11812_v11  ;;  %v11877_v36 = vmul.f32 %v11813_v24, %v11813_v24  ;;  %v11878_v5 = vmul.f32 %v11814_v29, %v11814_v29  ;;  %v11879_v14 = vmul.f32 %v11815_v60, %v11815_v60 }
 0xb9b   :  { %v20645_v15 = vsub.f32 %v20152_v7, %v20538_v21  ;;  %v11818_v57 = vmul.f32 %v20631_v10, %v20054_v25  ;;  %v11880_v33 = vmul.f32 %v11816_v31, %v11816_v31  ;;  %v20652_v56 = vsub.f32 %v20163_v63, %v20538_v21 }
 0xb9c   :  { %v11940_v16 = vsel %vm5534_vm2, %v11876_v41, 0.0  ;;  %v11941_v12 = vsel %vm5534_vm2, %v11877_v36, 0.0  ;;  %v11943_v42 = vsel %vm5534_vm2, %v11878_v5, 0.0  ;;  %v11819_v27 = vmul.f32 %v20637_v44, %v20056_v32 }
 0xb9d   :  { %v11942_v1 = vadd.f32 %v11941_v12, %v11940_v16  ;;  %v11881_v17 = vmul.f32 %v11817_v51, %v11817_v51  ;;  %v11945_v3 = vsel %vm5534_vm2, %v11879_v14, 0.0  ;;  %v20659_v7 = vsub.f32 %v20149_v30, %v20538_v21 }
 0xb9e   :  { %v11820_v25 = vmul.f32 %v20645_v15, %v20058_v26  ;;  %v11882_v49 = vmul.f32 %v11818_v57, %v11818_v57  ;;  %v11947_v11 = vsel %vm5534_vm2, %v11880_v33, 0.0  ;;  %v20666_v63 = vsub.f32 %v20160_v54, %v20538_v21 }
 0xb9f   :  { %v11944_v48 = vadd.f32 %v11943_v42, %v11942_v1  ;;  %v11821_v32 = vmul.f32 %v20652_v56, %v20060_v13  ;;  %v11883_v29 = vmul.f32 %v11819_v27, %v11819_v27  ;;  %v11949_v60 = vsel %vm5534_vm2, %v11881_v17, 0.0 }
 0xba0   :  { %v20673_v30 = vsub.f32 %v20182_v23, %v20538_v21  ;;  %v11822_v26 = vmul.f32 %v20659_v7, %v20062_v61  ;;  %v11884_v36 = vmul.f32 %v11820_v25, %v11820_v25  ;;  %v11951_v31 = vsel %vm5534_vm2, %v11882_v49, 0.0 }
 0xba1   :  { %v11946_v53 = vadd.f32 %v11945_v3, %v11944_v48  ;;  %v20680_v54 = vsub.f32 %v20191_v58, %v20538_v21  ;;  %v11823_v13 = vmul.f32 %v20666_v63, %v20064_v55  ;;  %v11885_v51 = vmul.f32 %v11821_v32, %v11821_v32  ;;  %v22330_v58 = vld [vmem:[#allocation74_spill] sm:$0xff] }
 0xba2   :  { %22327 = vst [vmem:[#allocation67_spill] sm:$0xff] %v20673_v30  ;;  %v11953_v14 = vsel %vm5534_vm2, %v11883_v29, 0.0  ;;  %v20687_v23 = vsub.f32 %v20179_v38, %v20538_v21  ;;  %v11824_v61 = vmul.f32 %v20673_v30, %v20066_v50  ;;  %v11886_v12 = vmul.f32 %v11822_v26, %v11822_v26  ;;  %v22332_v55 = vld [vmem:[#allocation34_spill] sm:$0xff]  ;;  %v22333_v38 = vld [vmem:[#allocation77_spill] sm:$0xff]  ;;  %v22338_v29 = vld [vmem:[#allocation35_spill] sm:$0xff] }
 0xba3   :  { %v11948_v24 = vadd.f32 %v11947_v11, %v11946_v53  ;;  %22328 = vst [vmem:[#allocation32_spill] sm:$0xff] %v20680_v54  ;;  %v11955_v1 = vsel %vm5534_vm2, %v11884_v36, 0.0  ;;  %v20694_v33 = vsub.f32 %v22330_v58, %v20538_v21  ;;  %v11825_v42 = vmul.f32 %v20680_v54, %v22332_v55  ;;  %v22335_v50 = vld [vmem:[#allocation70_spill] sm:$0xff] }
 0xba4   :  { %22329 = vst [vmem:[#allocation71_spill] sm:$0xff] %v20687_v23  ;;  %v11887_v48 = vmul.f32 %v11823_v13, %v11823_v13  ;;  %v11957_v27 = vsel %vm5534_vm2, %v11885_v51, 0.0  ;;  %v20701_v3 = vsub.f32 %v22333_v38, %v20538_v21  ;;  %v11826_v53 = vmul.f32 %v20687_v23, %v22335_v50  ;;  %v22341_v13 = vld [vmem:[#allocation36_spill] sm:$0xff]  ;;  %v22347_v38 = vld [vmem:[#allocation75_spill] sm:$0xff] }
 0xba5   :  { %v11950_v41 = vadd.f32 %v11949_v60, %v11948_v24  ;;  %22331 = vst [vmem:[#allocation33_spill] sm:$0xff] %v20694_v33  ;;  %v11888_v25 = vmul.f32 %v11824_v61, %v11824_v61  ;;  %v11959_v49 = vsel %vm5534_vm2, %v11886_v12, 0.0  ;;  %v22336_v24 = vld [vmem:[#allocation79_spill] sm:$0xff]  ;;  %v11827_v60 = vmul.f32 %v20694_v33, %v22338_v29  ;;  %v22342_v12 = vld [vmem:[#allocation78_spill] sm:$0xff] }
 0xba6   :  { %22334 = vst [vmem:[#allocation74_spill] sm:$0xff] %v20701_v3  ;;  %v20708_v32 = vsub.f32 %v22336_v24, %v20538_v21  ;;  %v11961_v26 = vsel %vm5534_vm2, %v11887_v48, 0.0  ;;  %v11828_v51 = vmul.f32 %v20701_v3, %v22341_v13  ;;  %v22350_v29 = vld [vmem:[#allocation59_spill] sm:$0xff] }
 0xba7   :  { %v11952_v5 = vadd.f32 %v11951_v31, %v11950_v41  ;;  %v11889_v41 = vmul.f32 %v11825_v42, %v11825_v42  ;;  %v22339_v31 = vld [vmem:[#allocation86_spill] sm:$0xff]  ;;  %v11891_v55 = vmul.f32 %v11827_v60, %v11827_v60 }
 0xba8   :  { %22337 = vst [vmem:[#allocation34_spill] sm:$0xff] %v20708_v32 }
 0xba9   :  { %v11954_v16 = vadd.f32 %v11953_v14, %v11952_v5  ;;  %v20715_v5 = vsub.f32 %v22339_v31, %v20538_v21  ;;  %v11890_v14 = vmul.f32 %v11826_v53, %v11826_v53  ;;  %v11965_v42 = vsel %vm5534_vm2, %v11889_v41, 0.0  ;;  %v22351_v31 = vld [vmem:[#allocation84_spill] sm:$0xff] }
 0xbaa   :  { %v11892_v53 = vmul.f32 %v11828_v51, %v11828_v51  ;;  %v20743_v13 = vsub.f32 %v22351_v31, %v20538_v21 }
 0xbab   :  { %v11956_v57 = vadd.f32 %v11955_v1, %v11954_v16  ;;  %22340 = vst [vmem:[#allocation77_spill] sm:$0xff] %v20715_v5  ;;  %v11963_v16 = vsel %vm5534_vm2, %v11888_v25, 0.0  ;;  %v20722_v1 = vsub.f32 %v22342_v12, %v20538_v21  ;;  %v11830_v50 = vmul.f32 %v20715_v5, %v22347_v38 }
 0xbac   :  { %v11967_v25 = vsel %vm5534_vm2, %v11890_v14, 0.0  ;;  %22352 = vst [vmem:[#allocation86_spill] sm:$0xff] %v20743_v13 }
 0xbad   :  { %v11958_v17 = vadd.f32 %v11957_v27, %v11956_v57  ;;  %22343 = vst [vmem:[#allocation70_spill] sm:$0xff] %v20722_v1  ;;  %v22344_v57 = vld [vmem:[#allocation55_spill] sm:$0xff]  ;;  %v22345_v27 = vld [vmem:[#allocation85_spill] sm:$0xff]  ;;  %v11831_v60 = vmul.f32 %v20722_v1, %v22350_v29  ;;  %v11894_v14 = vmul.f32 %v11830_v50, %v11830_v50 }
 0xbae   :  { %v11829_v58 = vmul.f32 %v20708_v32, %v22344_v57  ;;  %v22354_v57 = vld [vmem:[#allocation91_spill] sm:$0xff] }
 0xbaf   :  { %v11960_v11 = vadd.f32 %v11959_v49, %v11958_v17  ;;  %v20729_v17 = vsub.f32 %v22345_v27, %v20538_v21  ;;  %v11975_v29 = vsel %vm5534_vm2, %v11894_v14, 0.0 }
 0xbb0   :  { %v11893_v41 = vmul.f32 %v11829_v58, %v11829_v58 }
 0xbb1   :  { %v11962_v36 = vadd.f32 %v11961_v26, %v11960_v11  ;;  %22346 = vst [vmem:[#allocation79_spill] sm:$0xff] %v20729_v17  ;;  %v22348_v11 = vld [vmem:[#allocation92_spill] sm:$0xff]  ;;  %v11969_v26 = vsel %vm5534_vm2, %v11891_v55, 0.0  ;;  %v11895_v55 = vmul.f32 %v11831_v60, %v11831_v60 }
 0xbb2   :  { %v20736_v24 = vsub.f32 %v22348_v11, %v20538_v21  ;;  %v11973_v27 = vsel %vm5534_vm2, %v11893_v41, 0.0  ;;  %v22359_v11 = vld [vmem:[#allocation63_spill] sm:$0xff] }
 0xbb3   :  { %v11964_v61 = vadd.f32 %v11963_v16, %v11962_v36  ;;  %v22353_v16 = vld [vmem:[#allocation60_spill] sm:$0xff]  ;;  %v11834_v50 = vmul.f32 %v20743_v13, %v22359_v11  ;;  %v22366_v11 = vld [vmem:[#allocation39_spill] sm:$0xff] }
 0xbb4   :  { %22349 = vst [vmem:[#allocation35_spill] sm:$0xff] %v20736_v24  ;;  %v11832_v51 = vmul.f32 %v20729_v17, %v22353_v16  ;;  %v22362_v16 = vld [vmem:[#allocation66_spill] sm:$0xff] }
 0xbb5   :  { %v11966_v48 = vadd.f32 %v11965_v42, %v11964_v61  ;;  %v11971_v61 = vsel %vm5534_vm2, %v11892_v53, 0.0  ;;  %v20750_v42 = vsub.f32 %v22354_v57, %v20538_v21  ;;  %v22363_v57 = vld [vmem:[#allocation37_spill] sm:$0xff]  ;;  %v11898_v14 = vmul.f32 %v11834_v50, %v11834_v50 }
 0xbb6   :  { %v11896_v53 = vmul.f32 %v11832_v51, %v11832_v51 }
 0xbb7   :  { %v11968_v49 = vadd.f32 %v11967_v25, %v11966_v48  ;;  %22355 = vst [vmem:[#allocation36_spill] sm:$0xff] %v20750_v42  ;;  %v22356_v48 = vld [vmem:[#allocation62_spill] sm:$0xff]  ;;  %v11835_v60 = vmul.f32 %v20750_v42, %v22362_v16 }
 0xbb8   :  { %v11833_v58 = vmul.f32 %v20736_v24, %v22356_v48  ;;  %v22357_v25 = vld [vmem:[#allocation38_spill] sm:$0xff]  ;;  %v20771_v48 = vsub.f32 %v22363_v57, %v20538_v21 }
 0xbb9   :  { %v11970_v36 = vadd.f32 %v11969_v26, %v11968_v49  ;;  %v20757_v49 = vsub.f32 %v22357_v25, %v20538_v21 }
 0xbba   :  { %v11897_v41 = vmul.f32 %v11833_v58, %v11833_v58  ;;  %22364 = vst [vmem:[#allocation85_spill] sm:$0xff] %v20771_v48 }
 0xbbb   :  { %v11972_v12 = vadd.f32 %v11971_v61, %v11970_v36  ;;  %22358 = vst [vmem:[#allocation78_spill] sm:$0xff] %v20757_v49  ;;  %v22360_v36 = vld [vmem:[#allocation40_spill] sm:$0xff]  ;;  %v11977_v61 = vsel %vm5534_vm2, %v11895_v55, 0.0  ;;  %v11899_v55 = vmul.f32 %v11835_v60, %v11835_v60 }
 0xbbc   :  { %v20764_v31 = vsub.f32 %v22360_v36, %v20538_v21  ;;  %v22368_v36 = vld [vmem:[#allocation81_spill] sm:$0xff] }
 0xbbd   :  { %v11974_v38 = vadd.f32 %v11973_v27, %v11972_v12  ;;  %v22365_v27 = vld [vmem:[#allocation69_spill] sm:$0xff] }
 0xbbe   :  { %22361 = vst [vmem:[#allocation55_spill] sm:$0xff] %v20764_v31  ;;  %v11836_v51 = vmul.f32 %v20757_v49, %v22365_v27  ;;  %v11837_v58 = vmul.f32 %v20764_v31, %v22368_v36  ;;  %v22371_v27 = vld [vmem:[#allocation72_spill] sm:$0xff]  ;;  %v22374_v36 = vld [vmem:[#allocation83_spill] sm:$0xff] }
 0xbbf   :  { %v11976_v26 = vadd.f32 %v11975_v29, %v11974_v38  ;;  %v11979_v38 = vsel %vm5534_vm2, %v11896_v53, 0.0  ;;  %v20778_v29 = vsub.f32 %v22366_v11, %v20538_v21  ;;  %v11838_v50 = vmul.f32 %v20771_v48, %v22371_v27  ;;  %v22372_v11 = vld [vmem:[#allocation47_spill] sm:$0xff]  ;;  %v22377_v27 = vld [vmem:[#allocation73_spill] sm:$0xff] }
 0xbc0   :  { %v11900_v53 = vmul.f32 %v11836_v51, %v11836_v51  ;;  %v20792_v49 = vsub.f32 %v22372_v11, %v20538_v21  ;;  %v22378_v11 = vld [vmem:[#allocation46_spill] sm:$0xff] }
 0xbc1   :  { %v11978_v12 = vadd.f32 %v11977_v61, %v11976_v26  ;;  %22367 = vst [vmem:[#allocation75_spill] sm:$0xff] %v20778_v29  ;;  %v11981_v26 = vsel %vm5534_vm2, %v11897_v41, 0.0  ;;  %v22369_v61 = vld [vmem:[#allocation44_spill] sm:$0xff]  ;;  %v11839_v60 = vmul.f32 %v20778_v29, %v22374_v36  ;;  %v11901_v41 = vmul.f32 %v11837_v58, %v11837_v58  ;;  %v22380_v36 = vld [vmem:[#allocation87_spill] sm:$0xff] }
 0xbc2   :  { %v20785_v57 = vsub.f32 %v22369_v61, %v20538_v21  ;;  %22373 = vst [vmem:[#allocation59_spill] sm:$0xff] %v20792_v49  ;;  %v22375_v61 = vld [vmem:[#allocation43_spill] sm:$0xff]  ;;  %v20806_v48 = vsub.f32 %v22378_v11, %v20538_v21  ;;  %v11841_v58 = vmul.f32 %v20792_v49, %v22380_v36  ;;  %v22384_v11 = vld [vmem:[#allocation52_spill] sm:$0xff] }
 0xbc3   :  { %v11980_v25 = vadd.f32 %v11979_v38, %v11978_v12  ;;  %v11983_v12 = vsel %vm5534_vm2, %v11898_v14, 0.0  ;;  %v20799_v31 = vsub.f32 %v22375_v61, %v20538_v21  ;;  %v11902_v14 = vmul.f32 %v11838_v50, %v11838_v50  ;;  %v22381_v61 = vld [vmem:[#allocation49_spill] sm:$0xff]  ;;  %v22386_v36 = vld [vmem:[#allocation76_spill] sm:$0xff] }
 0xbc4   :  { %22370 = vst [vmem:[#allocation92_spill] sm:$0xff] %v20785_v57  ;;  %v11840_v51 = vmul.f32 %v20785_v57, %v22377_v27  ;;  %22379 = vst [vmem:[#allocation60_spill] sm:$0xff] %v20806_v48  ;;  %v20813_v29 = vsub.f32 %v22381_v61, %v20538_v21  ;;  %v22383_v27 = vld [vmem:[#allocation90_spill] sm:$0xff]  ;;  %v20820_v57 = vsub.f32 %v22384_v11, %v20538_v21  ;;  %v22387_v61 = vld [vmem:[#allocation51_spill] sm:$0xff] }
 0xbc5   :  { %v11982_v16 = vadd.f32 %v11981_v26, %v11980_v25  ;;  %v11985_v25 = vsel %vm5534_vm2, %v11899_v55, 0.0  ;;  %22376 = vst [vmem:[#allocation84_spill] sm:$0xff] %v20799_v31  ;;  %v11903_v55 = vmul.f32 %v11839_v60, %v11839_v60  ;;  %v11842_v50 = vmul.f32 %v20799_v31, %v22383_v27  ;;  %v22388_v27 = vld [vmem:[#allocation89_spill] sm:$0xff] }
 0xbc6   :  { %22382 = vst [vmem:[#allocation91_spill] sm:$0xff] %v20813_v29  ;;  %22385 = vst [vmem:[#allocation62_spill] sm:$0xff] %v20820_v57  ;;  %v11843_v60 = vmul.f32 %v20806_v48, %v22386_v36  ;;  %v20827_v49 = vsub.f32 %v22387_v61, %v20538_v21  ;;  %v22389_v11 = vld [vmem:[#allocation9_spill] sm:$0xff]  ;;  %v22390_v36 = vld [vmem:[#allocation80_spill] sm:$0xff] }
 0xbc7   :  { %v11984_v38 = vadd.f32 %v11983_v12, %v11982_v16  ;;  %v11987_v16 = vsel %vm5534_vm2, %v11900_v53, 0.0  ;;  %v11904_v53 = vmul.f32 %v11840_v51, %v11840_v51  ;;  %v11844_v51 = vmul.f32 %v20813_v29, %v22388_v27  ;;  %v22391_v61 = vld [vmem:[#allocation12_spill] sm:$0xff]  ;;  %v22392_v27 = vld [vmem:[#allocation82_spill] sm:$0xff] }
 0xbc8   :  { %v20834_v31 = vsub.f32 %v22389_v11, %v20538_v21  ;;  %v20841_v48 = vsub.f32 %v22391_v61, %v20538_v21  ;;  %v22393_v11 = vld [vmem:[#allocation14_spill] sm:$0xff]  ;;  %v22395_v61 = vld [vmem:[#allocation11_spill] sm:$0xff] }
 0xbc9   :  { %v11986_v26 = vadd.f32 %v11985_v25, %v11984_v38  ;;  %v11989_v38 = vsel %vm5534_vm2, %v11901_v41, 0.0  ;;  %v11905_v41 = vmul.f32 %v11841_v58, %v11841_v58  ;;  %v11845_v58 = vmul.f32 %v20820_v57, %v22390_v36  ;;  %v22394_v36 = vld [vmem:[#allocation88_spill] sm:$0xff] }
 0xbca   :  { %v20848_v29 = vsub.f32 %v22393_v11, %v20538_v21  ;;  %v20855_v57 = vsub.f32 %v22395_v61, %v20538_v21  ;;  %v22397_v11 = vld [vmem:[#allocation13_spill] sm:$0xff]  ;;  %v22399_v61 = vld [vmem:[#allocation18_spill] sm:$0xff] }
 0xbcb   :  { %v11988_v12 = vadd.f32 %v11987_v16, %v11986_v26  ;;  %v11991_v26 = vsel %vm5534_vm2, %v11902_v14, 0.0  ;;  %v11906_v14 = vmul.f32 %v11842_v50, %v11842_v50  ;;  %v11846_v50 = vmul.f32 %v20827_v49, %v22392_v27  ;;  %v22396_v27 = vld [vmem:[#allocation93_spill] sm:$0xff] }
 0xbcc   :  { %v20862_v42 = vsub.f32 %v22397_v11, %v20538_v21  ;;  %v20869_v13 = vsub.f32 %v22399_v61, %v20538_v21  ;;  %v22401_v11 = vld [vmem:[#allocation57_spill] sm:$0xff] }
 0xbcd   :  { %v11990_v25 = vadd.f32 %v11989_v38, %v11988_v12  ;;  %v11993_v12 = vsel %vm5534_vm2, %v11903_v55, 0.0  ;;  %v11907_v55 = vmul.f32 %v11843_v60, %v11843_v60  ;;  %v11847_v60 = vmul.f32 %v20834_v31, %v22394_v36  ;;  %v22398_v36 = vld [vmem:[#allocation94_spill] sm:$0xff]  ;;  %v22403_v61 = vld [vmem:[#allocation17_spill] sm:$0xff] }
 0xbce   :  { %v20876_v24 = vsub.f32 %v22401_v11, %v20538_v21  ;;  %v20883_v17 = vsub.f32 %v22403_v61, %v20538_v21  ;;  %v22405_v11 = vld [vmem:[#allocation20_spill] sm:$0xff]  ;;  %v22407_v61 = vld [vmem:[#allocation23_spill] sm:$0xff] }
 0xbcf   :  { %v11992_v16 = vadd.f32 %v11991_v26, %v11990_v25  ;;  %v11995_v25 = vsel %vm5534_vm2, %v11904_v53, 0.0  ;;  %v11908_v53 = vmul.f32 %v11844_v51, %v11844_v51  ;;  %v11848_v51 = vmul.f32 %v20841_v48, %v22396_v27  ;;  %v22400_v27 = vld [vmem:[#allocation41_spill] sm:$0xff] }
 0xbd0   :  { %v20890_v1 = vsub.f32 %v22405_v11, %v20538_v21  ;;  %v20897_v5 = vsub.f32 %v22407_v61, %v20538_v21  ;;  %v22409_v11 = vld [vmem:[#allocation61_spill] sm:$0xff]  ;;  %v22411_v61 = vld [vmem:[#allocation56_spill] sm:$0xff] }
 0xbd1   :  { %v11994_v38 = vadd.f32 %v11993_v12, %v11992_v16  ;;  %v11997_v16 = vsel %vm5534_vm2, %v11905_v41, 0.0  ;;  %v11909_v41 = vmul.f32 %v11845_v58, %v11845_v58  ;;  %v11849_v58 = vmul.f32 %v20848_v29, %v22398_v36  ;;  %v22402_v36 = vld [vmem:[#allocation42_spill] sm:$0xff] }
 0xbd2   :  { %v20904_v32 = vsub.f32 %v22409_v11, %v20538_v21  ;;  %v20911_v3 = vsub.f32 %v22411_v61, %v20538_v21 }
 0xbd3   :  { %v11996_v26 = vadd.f32 %v11995_v25, %v11994_v38  ;;  %v11999_v38 = vsel %vm5534_vm2, %v11906_v14, 0.0  ;;  %v11910_v14 = vmul.f32 %v11846_v50, %v11846_v50  ;;  %v11850_v50 = vmul.f32 %v20855_v57, %v22400_v27  ;;  %v22404_v27 = vld [vmem:[#allocation45_spill] sm:$0xff] }
 0xbd5   :  { %v11998_v12 = vadd.f32 %v11997_v16, %v11996_v26  ;;  %v12001_v26 = vsel %vm5534_vm2, %v11907_v55, 0.0  ;;  %v11911_v55 = vmul.f32 %v11847_v60, %v11847_v60  ;;  %v11851_v60 = vmul.f32 %v20862_v42, %v22402_v36  ;;  %v22406_v36 = vld [vmem:[#allocation48_spill] sm:$0xff] }
 0xbd7   :  { %v12000_v25 = vadd.f32 %v11999_v38, %v11998_v12  ;;  %v12003_v12 = vsel %vm5534_vm2, %v11908_v53, 0.0  ;;  %v11912_v53 = vmul.f32 %v11848_v51, %v11848_v51  ;;  %v11852_v51 = vmul.f32 %v20869_v13, %v22404_v27  ;;  %v22408_v27 = vld [vmem:[#allocation50_spill] sm:$0xff] }
 0xbd9   :  { %v12002_v16 = vadd.f32 %v12001_v26, %v12000_v25  ;;  %v12005_v25 = vsel %vm5534_vm2, %v11909_v41, 0.0  ;;  %v11913_v41 = vmul.f32 %v11849_v58, %v11849_v58  ;;  %v11853_v58 = vmul.f32 %v20876_v24, %v22406_v36  ;;  %v22410_v36 = vld [vmem:[#allocation7_spill] sm:$0xff] }
 0xbdb   :  { %v12004_v38 = vadd.f32 %v12003_v12, %v12002_v16  ;;  %v12007_v16 = vsel %vm5534_vm2, %v11910_v14, 0.0  ;;  %v11914_v14 = vmul.f32 %v11850_v50, %v11850_v50  ;;  %v11854_v50 = vmul.f32 %v20883_v17, %v22408_v27  ;;  %v22412_v27 = vld [vmem:[#allocation8_spill] sm:$0xff] }
 0xbdd   :  { %v12006_v26 = vadd.f32 %v12005_v25, %v12004_v38  ;;  %v12009_v38 = vsel %vm5534_vm2, %v11911_v55, 0.0  ;;  %v11915_v55 = vmul.f32 %v11851_v60, %v11851_v60  ;;  %v11855_v60 = vmul.f32 %v20890_v1, %v22410_v36  ;;  %v22414_v36 = vld [vmem:[#allocation10_spill] sm:$0xff] }
 0xbdf   :  { %v12008_v12 = vadd.f32 %v12007_v16, %v12006_v26  ;;  %v12011_v26 = vsel %vm5534_vm2, %v11912_v53, 0.0  ;;  %v11916_v53 = vmul.f32 %v11852_v51, %v11852_v51  ;;  %v11856_v51 = vmul.f32 %v20897_v5, %v22412_v27  ;;  %v22415_v27 = vld [vmem:[#allocation15_spill] sm:$0xff] }
 0xbe0   :  { %v11919_v61 = vmul.f32 %v11855_v60, %v11855_v60  ;;  %v11858_v33 = vmul.f32 %v20911_v3, %v22415_v27 }
 0xbe1   :  { %v12010_v25 = vadd.f32 %v12009_v38, %v12008_v12  ;;  %v12013_v12 = vsel %vm5534_vm2, %v11913_v41, 0.0  ;;  %v11917_v41 = vmul.f32 %v11853_v58, %v11853_v58 }
 0xbe3   :  { %v12012_v16 = vadd.f32 %v12011_v26, %v12010_v25  ;;  %v12015_v25 = vsel %vm5534_vm2, %v11914_v14, 0.0  ;;  %v11918_v14 = vmul.f32 %v11854_v50, %v11854_v50  ;;  %v12021_v50 = vsel %vm5534_vm2, %v11917_v41, 0.0 }
 0xbe4   :  { %v11922_v41 = vmul.f32 %v11858_v33, %v11858_v33 }
 0xbe5   :  { %v12014_v38 = vadd.f32 %v12013_v12, %v12012_v16  ;;  %v12017_v16 = vsel %vm5534_vm2, %v11915_v55, 0.0  ;;  %v22413_v55 = vld [vmem:[#allocation24_spill] sm:$0xff] }
 0xbe7   :  { %v12016_v26 = vadd.f32 %v12015_v25, %v12014_v38  ;;  %v12019_v38 = vsel %vm5534_vm2, %v11916_v53, 0.0  ;;  %v12315_v25 = vld [vmem:[%s21715_s9] sm:$0xf] }
 0xbe8   :  { %16336 = vmatprep.subr.msk.bf16.mxu0 %vm6564_vm3, %v12315_v25  ;;  %v12420_v58 = vsel %vm6564_vm3, %v12315_v25, 0  ;;  %v22416_v25 = vld [vmem:[#allocation16_spill] sm:$0xff] }
 0xbe9   :  { %v12018_v12 = vadd.f32 %v12017_v16, %v12016_v26  ;;  %v20923_v26 = vsub.f32 %v22413_v55, %v20538_v21  ;;  %v11857_v16 = vmul.f32 %v20904_v32, %v22414_v36  ;;  %15226 = vmatpush3.bf16.msra.mxu0 %v12420_v58  ;;  %v12025_v55 = vsel %vm5534_vm2, %v11919_v61, 0.0  ;;  %v22417_v36 = vld [vmem:[#allocation53_spill] sm:$0xff] }
 0xbea   :  { %v11860_v60 = vmul.f32 %v20542_v35, %v22417_v36 }
 0xbeb   :  { %v12020_v11 = vadd.f32 %v12019_v38, %v12018_v12  ;;  %v11920_v12 = vmul.f32 %v11856_v51, %v11856_v51  ;;  %v12023_v38 = vsel %vm5534_vm2, %v11918_v14, 0.0  ;;  %v11859_v54 = vmul.f32 %v20923_v26, %v22416_v25 }
 0xbec   :  { %v11921_v21 = vmul.f32 %v11857_v16, %v11857_v16  ;;  %v11924_v25 = vmul.f32 %v11860_v60, %v11860_v60 }
 0xbed   :  { %v12022_v53 = vadd.f32 %v12021_v50, %v12020_v11  ;;  %v12027_v11 = vsel %vm5534_vm2, %v11920_v12, 0.0  ;;  %v22418_v50 = vld [vmem:[#allocation21_spill] sm:$0xff]  ;;  %v11923_v27 = vmul.f32 %v11859_v54, %v11859_v54 }
 0xbee   :  { %v11861_v51 = vmul.f32 %v20546_v18, %v22418_v50  ;;  %v12029_v14 = vsel %vm5534_vm2, %v11921_v21, 0.0  ;;  %v12035_v21 = vsel %vm5534_vm2, %v11924_v25, 0.0 }
 0xbef   :  { %v12024_v23 = vadd.f32 %v12023_v38, %v12022_v53  ;;  %v22419_v38 = vld [vmem:[#allocation22_spill] sm:$0xff] }
 0xbf0   :  { %v11862_v16 = vmul.f32 %v20550_v46, %v22419_v38  ;;  %v11925_v36 = vmul.f32 %v11861_v51, %v11861_v51 }
 0xbf1   :  { %v12026_v30 = vadd.f32 %v12025_v55, %v12024_v23  ;;  %v12031_v23 = vsel %vm5534_vm2, %v11922_v41, 0.0  ;;  %v22420_v55 = vld [vmem:[#allocation58_spill] sm:$0xff] }
 0xbf2   :  { %v11863_v33 = vmul.f32 %v20554_v62, %v22420_v55  ;;  %v11926_v50 = vmul.f32 %v11862_v16, %v11862_v16  ;;  %v12037_v41 = vsel %vm5534_vm2, %v11925_v36, 0.0 }
 0xbf3   :  { %v12028_v58 = vadd.f32 %v12027_v11, %v12026_v30  ;;  %v12033_v30 = vsel %vm5534_vm2, %v11923_v27, 0.0  ;;  %v22421_v11 = vld [vmem:[#allocation25_spill] sm:$0xff] }
 0xbf4   :  { %v11864_v54 = vmul.f32 %v20558_v6, %v22421_v11  ;;  %v11927_v38 = vmul.f32 %v11863_v33, %v11863_v33  ;;  %v12039_v27 = vsel %vm5534_vm2, %v11926_v50, 0.0 }
 0xbf5   :  { %v12030_v53 = vadd.f32 %v12029_v14, %v12028_v58  ;;  %v22422_v14 = vld [vmem:[#allocation26_spill] sm:$0xff] }
 0xbf6   :  { %v11865_v60 = vmul.f32 %v20562_v43, %v22422_v14  ;;  %v11928_v55 = vmul.f32 %v11864_v54, %v11864_v54  ;;  %v12041_v25 = vsel %vm5534_vm2, %v11927_v38, 0.0 }
 0xbf7   :  { %v12032_v61 = vadd.f32 %v12031_v23, %v12030_v53  ;;  %v22423_v23 = vld [vmem:[#allocation27_spill] sm:$0xff] }
 0xbf8   :  { %v11866_v51 = vmul.f32 %v20566_v40, %v22423_v23  ;;  %v11929_v11 = vmul.f32 %v11865_v60, %v11865_v60  ;;  %v12043_v36 = vsel %vm5534_vm2, %v11928_v55, 0.0 }
 0xbf9   :  { %v12034_v12 = vadd.f32 %v12033_v30, %v12032_v61  ;;  %v22424_v30 = vld [vmem:[#allocation28_spill] sm:$0xff] }
 0xbfa   :  { %v11867_v16 = vmul.f32 %v20570_v37, %v22424_v30  ;;  %v11930_v14 = vmul.f32 %v11866_v51, %v11866_v51  ;;  %v12045_v50 = vsel %vm5534_vm2, %v11929_v11, 0.0 }
 0xbfb   :  { %v12036_v58 = vadd.f32 %v12035_v21, %v12034_v12  ;;  %v22425_v21 = vld [vmem:[#allocation65_spill] sm:$0xff] }
 0xbfc   :  { %v11868_v33 = vmul.f32 %v20573_v2, %v22425_v21  ;;  %v11931_v23 = vmul.f32 %v11867_v16, %v11867_v16  ;;  %v12047_v38 = vsel %vm5534_vm2, %v11930_v14, 0.0 }
 0xbfd   :  { %v12038_v53 = vadd.f32 %v12037_v41, %v12036_v58  ;;  %v22426_v41 = vld [vmem:[#allocation29_spill] sm:$0xff] }
 0xbfe   :  { %v11869_v54 = vmul.f32 %v20576_v20, %v22426_v41  ;;  %v11932_v30 = vmul.f32 %v11868_v33, %v11868_v33  ;;  %v12049_v55 = vsel %vm5534_vm2, %v11931_v23, 0.0 }
 0xbff   :  { %v12040_v61 = vadd.f32 %v12039_v27, %v12038_v53  ;;  %v22427_v27 = vld [vmem:[#allocation68_spill] sm:$0xff] }
 0xc00   :  { %v11870_v60 = vmul.f32 %v20580_v28, %v22427_v27  ;;  %v11933_v21 = vmul.f32 %v11869_v54, %v11869_v54  ;;  %v12051_v11 = vsel %vm5534_vm2, %v11932_v30, 0.0 }
 0xc01   :  { %v12042_v12 = vadd.f32 %v12041_v25, %v12040_v61  ;;  %v22428_v25 = vld [vmem:[#allocation19_spill] sm:$0xff] }
 0xc02   :  { %v11871_v51 = vmul.f32 %v20583_v0, %v22428_v25  ;;  %v11934_v41 = vmul.f32 %v11870_v60, %v11870_v60  ;;  %v12053_v14 = vsel %vm5534_vm2, %v11933_v21, 0.0  ;;  %v11875_v60 = vmul.f32 %v20595_v22, %v20532_v59 }
 0xc03   :  { %v12044_v58 = vadd.f32 %v12043_v36, %v12042_v12  ;;  %v22429_v36 = vld [vmem:[#allocation30_spill] sm:$0xff] }
 0xc04   :  { %v11872_v16 = vmul.f32 %v20586_v9, %v22429_v36  ;;  %v11935_v27 = vmul.f32 %v11871_v51, %v11871_v51  ;;  %v12055_v23 = vsel %vm5534_vm2, %v11934_v41, 0.0  ;;  %v11939_v21 = vmul.f32 %v11875_v60, %v11875_v60 }
 0xc05   :  { %v12046_v53 = vadd.f32 %v12045_v50, %v12044_v58  ;;  %v22430_v50 = vld [vmem:[#allocation64_spill] sm:$0xff] }
 0xc06   :  { %v11873_v33 = vmul.f32 %v20589_v19, %v22430_v50  ;;  %v11936_v25 = vmul.f32 %v11872_v16, %v11872_v16  ;;  %v12057_v30 = vsel %vm5534_vm2, %v11935_v27, 0.0  ;;  %v12065_v41 = vsel %vm5534_vm2, %v11939_v21, 0.0 }
 0xc07   :  { %v12048_v61 = vadd.f32 %v12047_v38, %v12046_v53  ;;  %v22431_v38 = vld [vmem:[#allocation31_spill] sm:$0xff] }
 0xc08   :  { %v11874_v54 = vmul.f32 %v20592_v45, %v22431_v38  ;;  %v12059_v51 = vsel %vm5534_vm2, %v11936_v25, 0.0  ;;  %v12074_v25 = vld [vmem:[%s21713_s7] sm:$0x1] }
 0xc09   :  { %v12050_v12 = vadd.f32 %v12049_v55, %v12048_v61  ;;  %v11937_v55 = vmul.f32 %v11873_v33, %v11873_v33 }
 0xc0a   :  { %v11938_v36 = vmul.f32 %v11874_v54, %v11874_v54 }
 0xc0b   :  { %v12052_v58 = vadd.f32 %v12051_v11, %v12050_v12 }
 0xc0c   :  { %v12063_v16 = vsel %vm5534_vm2, %v11938_v36, 0.0 }
 0xc0d   :  { %v12054_v53 = vadd.f32 %v12053_v14, %v12052_v58  ;;  %v12061_v58 = vsel %vm5534_vm2, %v11937_v55, 0.0 }
 0xc0f   :  { %v12056_v61 = vadd.f32 %v12055_v23, %v12054_v53 }
 0xc11   :  { %v12058_v12 = vadd.f32 %v12057_v30, %v12056_v61 }
 0xc13   :  { %v12060_v11 = vadd.f32 %v12059_v51, %v12058_v12  ;;  %v22432_v12 = vld [vmem:[#allocation54_spill] sm:$0xff] }
 0xc14   :  { %v22433_v36 = vsub.s32 0, %v22432_v12 }
 0xc15   :  { %v12062_v50 = vadd.f32 %v12061_v58, %v12060_v11  ;;  %v20996_v11 = vld [vmem:[%s21714_s8] ss:$0 sm:$0xff] }
 0xc17   :  { %v12064_v14 = vadd.f32 %v12063_v16, %v12062_v50 }
 0xc19   :  { %v12066_v53 = vadd.f32 %v12065_v41, %v12064_v14 }
 0xc1b   :  { %v12067_v38 = vrot.slane %v12066_v53, 4 }
 0xc1d   :  { %v12068_v59 = vadd.f32 %v12067_v38, %v12066_v53 }
 0xc1f   :  { %v12069_v33 = vrot.slane %v12068_v59, 2 }
 0xc21   :  { %v12070_v23 = vadd.f32 %v12069_v33, %v12068_v59 }
 0xc23   :  { %v12071_v27 = vrot.slane %v12070_v23, 1 }
 0xc25   :  { %v12072_v61 = vadd.f32 %v12071_v27, %v12070_v23 }
 0xc27   :  { %v12073_v54 = vmul.f32 0.0034722222, %v12072_v61 }
 0xc29   :  { %v12075_v30 = vadd.f32 1e-05, %v12073_v54 }
 0xc2b   :  { %16346 = vrsqrt.f32 %v12075_v30 }
 0xc35   :  { %v16347_v60 = vpop.eup %16346 }
 0xc36   :  { %v12077_v55 = vmul.f32 %v16347_v60, %v12074_v25 }
 0xc38   :  { %v20991_v51 = vrot.slane %v12077_v55, %v22433_v36 }
 0xc3a   :  { %v12145_v21 = vmul.f32 %v20991_v51, %v20589_v19  ;;  %v12118_v50 = vmul.f32 %v20991_v51, %v20827_v49  ;;  %v12119_v16 = vmul.f32 %v20991_v51, %v20834_v31  ;;  %v12120_v14 = vmul.f32 %v20991_v51, %v20841_v48 }
 0xc3b   :  { %v12121_v41 = vmul.f32 %v20991_v51, %v20848_v29  ;;  %v12122_v53 = vmul.f32 %v20991_v51, %v20855_v57  ;;  %v12123_v19 = vmul.f32 %v20991_v51, %v20862_v42  ;;  %v12124_v38 = vmul.f32 %v20991_v51, %v20869_v13 }
 0xc3c   :  { %v21001_v58 = vadd.f32 %v20996_v11, %v12145_v21  ;;  %v12125_v49 = vmul.f32 %v20991_v51, %v20876_v24  ;;  %v12126_v31 = vmul.f32 %v20991_v51, %v20883_v17  ;;  %v12127_v48 = vmul.f32 %v20991_v51, %v20890_v1 }
 0xc3d   :  { %v12128_v29 = vmul.f32 %v20991_v51, %v20897_v5  ;;  %v12129_v57 = vmul.f32 %v20991_v51, %v20904_v32  ;;  %v12130_v42 = vmul.f32 %v20991_v51, %v20911_v3  ;;  %v12131_v13 = vmul.f32 %v20991_v51, %v20923_v26 }
 0xc3e   :  { %v12132_v24 = vmul.f32 %v20991_v51, %v20542_v35  ;;  %v12133_v17 = vmul.f32 %v20991_v51, %v20546_v18  ;;  %v12134_v1 = vmul.f32 %v20991_v51, %v20550_v46  ;;  %v12135_v5 = vmul.f32 %v20991_v51, %v20554_v62 }
 0xc3f   :  { %v12136_v32 = vmul.f32 %v20991_v51, %v20558_v6  ;;  %v12137_v3 = vmul.f32 %v20991_v51, %v20562_v43  ;;  %v12138_v26 = vmul.f32 %v20991_v51, %v20566_v40  ;;  %v12139_v35 = vmul.f32 %v20991_v51, %v20570_v37 }
 0xc40   :  { %v12140_v18 = vmul.f32 %v20991_v51, %v20573_v2  ;;  %v12141_v46 = vmul.f32 %v20991_v51, %v20576_v20  ;;  %v12142_v62 = vmul.f32 %v20991_v51, %v20580_v28  ;;  %v12143_v6 = vmul.f32 %v20991_v51, %v20583_v0 }
 0xc41   :  { %v12144_v43 = vmul.f32 %v20991_v51, %v20586_v9  ;;  %v12146_v40 = vmul.f32 %v20991_v51, %v20592_v45  ;;  %v12147_v37 = vmul.f32 %v20991_v51, %v20595_v22  ;;  %v21062_v2 = vadd.f32 %v20996_v11, %v12118_v50 }
 0xc42   :  { %v21065_v20 = vadd.f32 %v20996_v11, %v12119_v16  ;;  %v21068_v28 = vadd.f32 %v20996_v11, %v12120_v14  ;;  %v21071_v0 = vadd.f32 %v20996_v11, %v12121_v41  ;;  %v21074_v9 = vadd.f32 %v20996_v11, %v12122_v53 }
 0xc43   :  { %v21077_v45 = vadd.f32 %v20996_v11, %v12123_v19  ;;  %v21080_v22 = vadd.f32 %v20996_v11, %v12124_v38  ;;  %v21083_v59 = vadd.f32 %v20996_v11, %v12125_v49  ;;  %v21086_v33 = vadd.f32 %v20996_v11, %v12126_v31 }
 0xc44   :  { %v21089_v23 = vadd.f32 %v20996_v11, %v12127_v48  ;;  %v21092_v27 = vadd.f32 %v20996_v11, %v12128_v29  ;;  %v21095_v61 = vadd.f32 %v20996_v11, %v12129_v57  ;;  %v21098_v54 = vadd.f32 %v20996_v11, %v12130_v42 }
 0xc45   :  { %v21101_v30 = vadd.f32 %v20996_v11, %v12131_v13  ;;  %v21104_v25 = vadd.f32 %v20996_v11, %v12132_v24  ;;  %v21107_v60 = vadd.f32 %v20996_v11, %v12133_v17  ;;  %v21110_v55 = vadd.f32 %v20996_v11, %v12134_v1 }
 0xc46   :  { %v21113_v12 = vadd.f32 %v20996_v11, %v12135_v5  ;;  %v21116_v36 = vadd.f32 %v20996_v11, %v12136_v32  ;;  %v21119_v21 = vadd.f32 %v20996_v11, %v12137_v3  ;;  %v21122_v50 = vadd.f32 %v20996_v11, %v12138_v26  ;;  %v22434_v26 = vld [vmem:[#allocation67_spill] sm:$0xff] }
 0xc47   :  { %v21125_v16 = vadd.f32 %v20996_v11, %v12139_v35  ;;  %v21128_v14 = vadd.f32 %v20996_v11, %v12140_v18  ;;  %v21131_v41 = vadd.f32 %v20996_v11, %v12141_v46  ;;  %v21134_v53 = vadd.f32 %v20996_v11, %v12142_v62  ;;  %v22435_v46 = vld [vmem:[#allocation32_spill] sm:$0xff] }
 0xc48   :  { %v21137_v19 = vadd.f32 %v20996_v11, %v12143_v6  ;;  %v21140_v38 = vadd.f32 %v20996_v11, %v12144_v43  ;;  %v21143_v49 = vadd.f32 %v20996_v11, %v12146_v40  ;;  %v21146_v31 = vadd.f32 %v20996_v11, %v12147_v37 }
 0xc49   :  { %v12084_v48 = vmul.f32 %v20991_v51, %v20599_v8  ;;  %v12085_v29 = vmul.f32 %v20991_v51, %v20603_v39  ;;  %v12086_v57 = vmul.f32 %v20991_v51, %v20607_v52  ;;  %v12087_v42 = vmul.f32 %v20991_v51, %v20611_v47 }
 0xc4a   :  { %v12088_v13 = vmul.f32 %v20991_v51, %v20619_v4  ;;  %v12089_v24 = vmul.f32 %v20991_v51, %v20625_v34  ;;  %v12090_v17 = vmul.f32 %v20991_v51, %v20631_v10  ;;  %v12091_v8 = vmul.f32 %v20991_v51, %v20637_v44 }
 0xc4b   :  { %v12092_v39 = vmul.f32 %v20991_v51, %v20645_v15  ;;  %v12093_v52 = vmul.f32 %v20991_v51, %v20652_v56  ;;  %v12155_v47 = vadd.f32 %v20996_v11, %v12084_v48  ;;  %v12156_v1 = vadd.f32 %v20996_v11, %v12085_v29 }
 0xc4c   :  { %v12157_v4 = vadd.f32 %v20996_v11, %v12086_v57  ;;  %v12158_v34 = vadd.f32 %v20996_v11, %v12087_v42  ;;  %v12159_v5 = vadd.f32 %v20996_v11, %v12088_v13  ;;  %v12160_v10 = vadd.f32 %v20996_v11, %v12089_v24 }
 0xc4d   :  { %v21175_v44 = vadd.f32 %v20996_v11, %v12090_v17  ;;  %v21178_v15 = vadd.f32 %v20996_v11, %v12091_v8  ;;  %v21181_v56 = vadd.f32 %v20996_v11, %v12092_v39  ;;  %v21185_v32 = vmul.f32 %v20991_v51, %v20659_v7 }
 0xc4e   :  { %v21189_v3 = vmul.f32 %v20991_v51, %v20666_v63  ;;  %v21193_v35 = vmul.f32 %v20991_v51, %v22434_v26  ;;  %v12280_v18 = vmax.f32 %v21001_v58, 0.0  ;;  %v21198_v62 = vmul.f32 %v20991_v51, %v22435_v46 }
 0xc4f   :  { %v21201_v6 = vadd.f32 %v20996_v11, %v12093_v52  ;;  %v12219_v43 = vmax.f32 %v12155_v47, 0.0  ;;  %v12220_v7 = vmax.f32 %v12156_v1, 0.0  ;;  %v12221_v40 = vmax.f32 %v12157_v4, 0.0 }
 0xc50   :  { %v12222_v37 = vmax.f32 %v12158_v34, 0.0  ;;  %v12223_v48 = vmax.f32 %v12159_v5, 0.0  ;;  %v12224_v63 = vmax.f32 %v12160_v10, 0.0  ;;  %v12225_v29 = vmax.f32 %v21175_v44, 0.0 }
 0xc51   :  { %v12226_v57 = vmax.f32 %v21178_v15, 0.0  ;;  %v12227_v42 = vmax.f32 %v21181_v56, 0.0  ;;  %v12253_v58 = vmax.f32 %v21062_v2, 0.0  ;;  %v12254_v13 = vmax.f32 %v21065_v20, 0.0 }
 0xc52   :  { %v12255_v24 = vmax.f32 %v21068_v28, 0.0  ;;  %v12256_v17 = vmax.f32 %v21071_v0, 0.0  ;;  %v12257_v8 = vmax.f32 %v21074_v9, 0.0  ;;  %v12258_v39 = vmax.f32 %v21077_v45, 0.0 }
 0xc53   :  { %v12259_v52 = vmax.f32 %v21080_v22, 0.0  ;;  %v12260_v47 = vmax.f32 %v21083_v59, 0.0  ;;  %v12261_v1 = vmax.f32 %v21086_v33, 0.0  ;;  %v12262_v4 = vmax.f32 %v21089_v23, 0.0 }
 0xc54   :  { %v12263_v2 = vmax.f32 %v21092_v27, 0.0  ;;  %v12264_v20 = vmax.f32 %v21095_v61, 0.0  ;;  %v12265_v28 = vmax.f32 %v21098_v54, 0.0  ;;  %v12266_v0 = vmax.f32 %v21101_v30, 0.0 }
 0xc55   :  { %v12267_v9 = vmax.f32 %v21104_v25, 0.0  ;;  %v12268_v45 = vmax.f32 %v21107_v60, 0.0  ;;  %v12269_v22 = vmax.f32 %v21110_v55, 0.0  ;;  %v12270_v59 = vmax.f32 %v21113_v12, 0.0 }
 0xc56   :  { %v12284_v34 = vpack.c.bf16 %v12222_v37, %v12221_v40  ;;  %v12283_v33 = vpack.c.bf16 %v12220_v7, %v12219_v43  ;;  %v12271_v23 = vmax.f32 %v21116_v36, 0.0  ;;  %v12272_v27 = vmax.f32 %v21119_v21, 0.0 }
 0xc57   :  { %v12273_v61 = vmax.f32 %v21122_v50, 0.0  ;;  %v12274_v54 = vmax.f32 %v21125_v16, 0.0  ;;  %v12275_v30 = vmax.f32 %v21128_v14, 0.0  ;;  %v12276_v25 = vmax.f32 %v21131_v41, 0.0 }
 0xc58   :  { %v12277_v60 = vmax.f32 %v21134_v53, 0.0  ;;  %15227 = vmatprep.mubr.msk.bf16.mxu0 %vm5534_vm2, %v12283_v33  ;;  %v12285_v55 = vpack.c.bf16 %v12224_v63, %v12223_v48  ;;  %v12278_v12 = vmax.f32 %v21137_v19, 0.0  ;;  %v12279_v5 = vmax.f32 %v21140_v38, 0.0 }
 0xc59   :  { %v12281_v36 = vmax.f32 %v21143_v49, 0.0  ;;  %v12282_v21 = vmax.f32 %v21146_v31, 0.0  ;;  %15228 = vmatmul.mubr.msk.bf16.vlgmr.msra.gmra.mrb[64].mxu0 %vm5534_vm2, %v12284_v34  ;;  %v12228_v50 = vmax.f32 %v21201_v6, 0.0  ;;  %v21239_v16 = vpack.c.bf16 %v12254_v13, %v12253_v58  ;;  %v22437_v13 = vld [vmem:[#allocation33_spill] sm:$0xff]  ;;  %v22443_v34 = vld [vmem:[#allocation35_spill] sm:$0xff] }
 0xc5a   :  { %15231 = vmatprep.mubr.msk.bf16.mxu0 %vm5534_vm2, %v12285_v55  ;;  %v21241_v14 = vpack.c.bf16 %v12256_v17, %v12255_v24  ;;  %v21243_v41 = vpack.c.bf16 %v12258_v39, %v12257_v8  ;;  %v21245_v53 = vpack.c.bf16 %v12260_v47, %v12259_v52  ;;  %v21247_v19 = vpack.c.bf16 %v12262_v4, %v12261_v1 }
 0xc5b   :  { %v21249_v38 = vpack.c.bf16 %v12264_v20, %v12263_v2  ;;  %v21251_v49 = vpack.c.bf16 %v12266_v0, %v12265_v28  ;;  %v21253_v31 = vpack.c.bf16 %v12268_v45, %v12267_v9  ;;  %v21255_v10 = vpack.c.bf16 %v12270_v59, %v12269_v22  ;;  %v22440_v2 = vld [vmem:[#allocation77_spill] sm:$0xff]  ;;  %v22441_v28 = vld [vmem:[#allocation70_spill] sm:$0xff]  ;;  %v22442_v22 = vld [vmem:[#allocation79_spill] sm:$0xff] }
 0xc5c   :  { %v21257_v44 = vpack.c.bf16 %v12272_v27, %v12271_v23  ;;  %v21259_v15 = vpack.c.bf16 %v12274_v54, %v12273_v61  ;;  %v21261_v56 = vpack.c.bf16 %v12276_v25, %v12275_v30  ;;  %v21263_v26 = vpack.c.bf16 %v12278_v12, %v12277_v60  ;;  %v22444_v12 = vld [vmem:[#allocation86_spill] sm:$0xff] }
 0xc5d   :  { %v21265_v46 = vpack.c.bf16 %v12280_v18, %v12279_v5  ;;  %v21267_v6 = vpack.c.bf16 %v12282_v21, %v12281_v36  ;;  %v12165_v43 = vadd.f32 %v20996_v11, %v21185_v32  ;;  %v12166_v7 = vadd.f32 %v20996_v11, %v21189_v3  ;;  %v22436_v18 = vld [vmem:[#allocation71_spill] sm:$0xff]  ;;  %v22445_v36 = vld [vmem:[#allocation36_spill] sm:$0xff] }
 0xc5e   :  { %v12286_v40 = vpack.c.bf16 %v12226_v57, %v12225_v29  ;;  %v12167_v37 = vadd.f32 %v20996_v11, %v21193_v35  ;;  %v12168_v48 = vadd.f32 %v20996_v11, %v21198_v62  ;;  %v12287_v63 = vpack.c.bf16 %v12228_v50, %v12227_v42  ;;  %v22438_v29 = vld [vmem:[#allocation74_spill] sm:$0xff] }
 0xc5f   :  { %v12098_v58 = vmul.f32 %v20991_v51, %v22436_v18  ;;  %v12099_v32 = vmul.f32 %v20991_v51, %v22437_v13  ;;  %v12229_v24 = vmax.f32 %v12165_v43, 0.0  ;;  %v12230_v3 = vmax.f32 %v12166_v7, 0.0  ;;  %v22439_v35 = vld [vmem:[#allocation34_spill] sm:$0xff] }
 0xc60   :  { %v12100_v57 = vmul.f32 %v20991_v51, %v22438_v29  ;;  %v12101_v17 = vmul.f32 %v20991_v51, %v22439_v35  ;;  %v12231_v62 = vmax.f32 %v12167_v37, 0.0  ;;  %v12232_v42 = vmax.f32 %v12168_v48, 0.0  ;;  %v22446_v7 = vld [vmem:[#allocation78_spill] sm:$0xff]  ;;  %v22447_v37 = vld [vmem:[#allocation55_spill] sm:$0xff] }
 0xc61   :  { %15232 = vmatmul.mubr.msk.bf16.gmra.mrb[68].mxu0 %vm5534_vm2, %v12286_v40  ;;  %v12169_v8 = vadd.f32 %v20996_v11, %v12098_v58  ;;  %v12170_v39 = vadd.f32 %v20996_v11, %v12099_v32  ;;  %v12288_v52 = vpack.c.bf16 %v12230_v3, %v12229_v24  ;;  %v12102_v20 = vmul.f32 %v20991_v51, %v22440_v2 }
 0xc62   :  { %15235 = vmatprep.mubr.msk.bf16.mxu0 %vm5534_vm2, %v12287_v63  ;;  %v12171_v47 = vadd.f32 %v20996_v11, %v12100_v57  ;;  %v12172_v1 = vadd.f32 %v20996_v11, %v12101_v17  ;;  %v12289_v4 = vpack.c.bf16 %v12232_v42, %v12231_v62  ;;  %v12103_v0 = vmul.f32 %v20991_v51, %v22441_v28  ;;  %v22448_v57 = vld [vmem:[#allocation85_spill] sm:$0xff]  ;;  %v22449_v17 = vld [vmem:[#allocation75_spill] sm:$0xff] }
 0xc63   :  { %v12233_v9 = vmax.f32 %v12169_v8, 0.0  ;;  %v12234_v45 = vmax.f32 %v12170_v39, 0.0  ;;  %v12104_v59 = vmul.f32 %v20991_v51, %v22442_v22  ;;  %v12105_v33 = vmul.f32 %v20991_v51, %v22443_v34  ;;  %v22450_v39 = vld [vmem:[#allocation92_spill] sm:$0xff] }
 0xc64   :  { %v12235_v23 = vmax.f32 %v12171_v47, 0.0  ;;  %v12236_v27 = vmax.f32 %v12172_v1, 0.0  ;;  %v12173_v61 = vadd.f32 %v20996_v11, %v12102_v20  ;;  %v12174_v54 = vadd.f32 %v20996_v11, %v12103_v0  ;;  %v22451_v47 = vld [vmem:[#allocation59_spill] sm:$0xff] }
 0xc65   :  { %v12290_v30 = vpack.c.bf16 %v12234_v45, %v12233_v9  ;;  %v12175_v25 = vadd.f32 %v20996_v11, %v12104_v59  ;;  %v12176_v60 = vadd.f32 %v20996_v11, %v12105_v33  ;;  %v12106_v5 = vmul.f32 %v20991_v51, %v22444_v12  ;;  %v22452_v59 = vld [vmem:[#allocation84_spill] sm:$0xff] }
 0xc66   :  { %v12291_v55 = vpack.c.bf16 %v12236_v27, %v12235_v23  ;;  %v12107_v21 = vmul.f32 %v20991_v51, %v22445_v36  ;;  %v12237_v50 = vmax.f32 %v12173_v61, 0.0  ;;  %v12238_v43 = vmax.f32 %v12174_v54, 0.0  ;;  %v22453_v33 = vld [vmem:[#allocation60_spill] sm:$0xff]  ;;  %v22454_v54 = vld [vmem:[#allocation91_spill] sm:$0xff] }
 0xc67   :  { %v12108_v40 = vmul.f32 %v20991_v51, %v22446_v7  ;;  %v12109_v48 = vmul.f32 %v20991_v51, %v22447_v37  ;;  %v12239_v63 = vmax.f32 %v12175_v25, 0.0  ;;  %v12240_v18 = vmax.f32 %v12176_v60, 0.0  ;;  %v22455_v25 = vld [vmem:[#allocation62_spill] sm:$0xff] }
 0xc68   :  { %v12177_v58 = vadd.f32 %v20996_v11, %v12106_v5  ;;  %v12178_v13 = vadd.f32 %v20996_v11, %v12107_v21  ;;  %v12292_v32 = vpack.c.bf16 %v12238_v43, %v12237_v50  ;;  %v12110_v35 = vmul.f32 %v20991_v51, %v22448_v57 }
 0xc69   :  { %15236 = vmatmul.mubr.msk.bf16.gmra.mrb[72].mxu0 %vm5534_vm2, %v12288_v52  ;;  %v12179_v24 = vadd.f32 %v20996_v11, %v12108_v40  ;;  %v12180_v3 = vadd.f32 %v20996_v11, %v12109_v48  ;;  %v12293_v29 = vpack.c.bf16 %v12240_v18, %v12239_v63  ;;  %v12111_v62 = vmul.f32 %v20991_v51, %v22449_v17 }
 0xc6a   :  { %15239 = vmatprep.mubr.msk.bf16.mxu0 %vm5534_vm2, %v12289_v4  ;;  %v12241_v42 = vmax.f32 %v12177_v58, 0.0  ;;  %v12242_v8 = vmax.f32 %v12178_v13, 0.0  ;;  %v12112_v52 = vmul.f32 %v20991_v51, %v22450_v39  ;;  %v12113_v1 = vmul.f32 %v20991_v51, %v22451_v47 }
 0xc6b   :  { %v12243_v4 = vmax.f32 %v12179_v24, 0.0  ;;  %v12244_v2 = vmax.f32 %v12180_v3, 0.0  ;;  %v12181_v20 = vadd.f32 %v20996_v11, %v12110_v35  ;;  %v12182_v28 = vadd.f32 %v20996_v11, %v12111_v62 }
 0xc6c   :  { %v12294_v0 = vpack.c.bf16 %v12242_v8, %v12241_v42  ;;  %v12183_v9 = vadd.f32 %v20996_v11, %v12112_v52  ;;  %v12184_v45 = vadd.f32 %v20996_v11, %v12113_v1  ;;  %v12114_v34 = vmul.f32 %v20991_v51, %v22452_v59 }
 0xc6d   :  { %v12295_v22 = vpack.c.bf16 %v12244_v2, %v12243_v4  ;;  %v12115_v23 = vmul.f32 %v20991_v51, %v22453_v33  ;;  %v12245_v27 = vmax.f32 %v12181_v20, 0.0  ;;  %v12246_v61 = vmax.f32 %v12182_v28, 0.0 }
 0xc6e   :  { %v12117_v60 = vmul.f32 %v20991_v51, %v22455_v25  ;;  %v12248_v12 = vmax.f32 %v12184_v45, 0.0  ;;  %v12185_v5 = vadd.f32 %v20996_v11, %v12114_v34 }
 0xc6f   :  { %v12186_v36 = vadd.f32 %v20996_v11, %v12115_v23  ;;  %v12296_v21 = vpack.c.bf16 %v12246_v61, %v12245_v27 }
 0xc70   :  { %v12188_v43 = vadd.f32 %v20996_v11, %v12117_v60  ;;  %v12249_v40 = vmax.f32 %v12185_v5, 0.0 }
 0xc71   :  { %15240 = vmatmul.mubr.msk.bf16.gmra.mrb[76].mxu0 %vm5534_vm2, %v12290_v30  ;;  %v12116_v30 = vmul.f32 %v20991_v51, %v22454_v54  ;;  %v12250_v37 = vmax.f32 %v12186_v36, 0.0 }
 0xc72   :  { %15243 = vmatprep.mubr.msk.bf16.mxu0 %vm5534_vm2, %v12291_v55  ;;  %v12247_v55 = vmax.f32 %v12183_v9, 0.0  ;;  %v12252_v51 = vmax.f32 %v12188_v43, 0.0 }
 0xc73   :  { %v12187_v50 = vadd.f32 %v20996_v11, %v12116_v30  ;;  %v12298_v63 = vpack.c.bf16 %v12250_v37, %v12249_v40  ;;  %v21384_v11 = vld [vmem:[%s21716_s10] ss:$0 sm:$0xff] }
 0xc74   :  { %v12297_v7 = vpack.c.bf16 %v12248_v12, %v12247_v55 }
 0xc75   :  { %v12251_v48 = vmax.f32 %v12187_v50, 0.0 }
 0xc77   :  { %v12299_v18 = vpack.c.bf16 %v12252_v51, %v12251_v48 }
 0xc79   :  { %15244 = vmatmul.mubr.msk.bf16.gmra.mrb[80].mxu0 %vm5534_vm2, %v12292_v32 }
 0xc7a   :  { %15247 = vmatprep.mubr.msk.bf16.mxu0 %vm5534_vm2, %v12293_v29 }
 0xc81   :  { %15248 = vmatmul.mubr.msk.bf16.gmra.mrb[84].mxu0 %vm5534_vm2, %v12294_v0 }
 0xc82   :  { %15251 = vmatprep.mubr.msk.bf16.mxu0 %vm5534_vm2, %v12295_v22 }
 0xc89   :  { %15252 = vmatmul.mubr.msk.bf16.gmra.mrb[88].mxu0 %vm5534_vm2, %v12296_v21 }
 0xc8a   :  { %15255 = vmatprep.mubr.msk.bf16.mxu0 %vm5534_vm2, %v12297_v7 }
 0xc91   :  { %15256 = vmatmul.mubr.msk.bf16.gmra.mrb[92].mxu0 %vm5534_vm2, %v12298_v63 }
 0xc92   :  { %15259 = vmatprep.mubr.msk.bf16.mxu0 %vm5534_vm2, %v12299_v18 }
 0xc99   :  { %15260 = vmatmul.mubr.msk.bf16.gmra.mrb[96].mxu0 %vm5534_vm2, %v21239_v16 }
 0xc9a   :  { %15263 = vmatprep.mubr.msk.bf16.mxu0 %vm5534_vm2, %v21241_v14 }
 0xca1   :  { %15264 = vmatmul.mubr.msk.bf16.gmra.mrb[100].mxu0 %vm5534_vm2, %v21243_v41 }
 0xca2   :  { %15267 = vmatprep.mubr.msk.bf16.mxu0 %vm5534_vm2, %v21245_v53 }
 0xca9   :  { %15268 = vmatmul.mubr.msk.bf16.gmra.mrb[104].mxu0 %vm5534_vm2, %v21247_v19 }
 0xcaa   :  { %15271 = vmatprep.mubr.msk.bf16.mxu0 %vm5534_vm2, %v21249_v38 }
 0xcb1   :  { %15272 = vmatmul.mubr.msk.bf16.gmra.mrb[108].mxu0 %vm5534_vm2, %v21251_v49 }
 0xcb2   :  { %15275 = vmatprep.mubr.msk.bf16.mxu0 %vm5534_vm2, %v21253_v31 }
 0xcb9   :  { %15276 = vmatmul.mubr.msk.bf16.gmra.mrb[112].mxu0 %vm5534_vm2, %v21255_v10 }
 0xcba   :  { %15279 = vmatprep.mubr.msk.bf16.mxu0 %vm5534_vm2, %v21257_v44 }
 0xcc1   :  { %15280 = vmatmul.mubr.msk.bf16.gmra.mrb[116].mxu0 %vm5534_vm2, %v21259_v15 }
 0xcc2   :  { %15283 = vmatprep.mubr.msk.bf16.mxu0 %vm5534_vm2, %v21261_v56 }
 0xcc9   :  { %15284 = vmatmul.mubr.msk.bf16.gmra.mrb[120].mxu0 %vm5534_vm2, %v21263_v26 }
 0xcca   :  { %15287 = vmatprep.mubr.msk.bf16.mxu0 %vm5534_vm2, %v21265_v46 }
 0xcd1   :  { %15288 = vmatmul.mubr.msk.bf16.gmra.mrb[124].mxu0 %vm5534_vm2, %v21267_v6 }
 0xd2c   :  { %v15229_v16 = vpop.f32.mrb[64].mxu0 }
 0xd2d   :  { %v12465_v14 = vadd.f32 %v15229_v16, %v21384_v11  ;;  %v12456_v41 = vpop.f32.mrb[65].mxu0 }
 0xd2e   :  { %v12457_v53 = vadd.f32 %v21384_v11, %v12456_v41  ;;  %v15230_v19 = vpop.f32.mrb[66].mxu0 }
 0xd2f   :  { %12714 = vst.msk [vmem:[%s21719_s13 + $0x10] sm:$0xff] %vm12711_vm4, %v12465_v14  ;;  %v12468_v38 = vadd.f32 %v15230_v19, %v21384_v11  ;;  %v12459_v49 = vpop.f32.mrb[67].mxu0 }
 0xd30   :  { %12712 = vst.msk [vmem:[%s21719_s13] sm:$0xff] %vm12711_vm4, %v12457_v53  ;;  %v12460_v31 = vadd.f32 %v21384_v11, %v12459_v49 }
 0xd31   :  { %12715 = vst.msk [vmem:[%s21719_s13 + $0x18] sm:$0xff] %vm12711_vm4, %v12468_v38 }
 0xd32   :  { %12713 = vst.msk [vmem:[%s21719_s13 + $0x8] sm:$0xff] %vm12711_vm4, %v12460_v31 }
 0xd34   :  { %v15233_v10 = vpop.f32.mrb[68].mxu0 }
 0xd35   :  { %v12481_v44 = vadd.f32 %v15233_v10, %v21384_v11  ;;  %v12472_v15 = vpop.f32.mrb[69].mxu0 }
 0xd36   :  { %v12473_v56 = vadd.f32 %v21384_v11, %v12472_v15  ;;  %v15234_v26 = vpop.f32.mrb[70].mxu0 }
 0xd37   :  { %12718 = vst.msk [vmem:[%s21719_s13 + $0x30] sm:$0xff] %vm12711_vm4, %v12481_v44  ;;  %v12484_v46 = vadd.f32 %v15234_v26, %v21384_v11  ;;  %v12475_v6 = vpop.f32.mrb[71].mxu0 }
 0xd38   :  { %12716 = vst.msk [vmem:[%s21719_s13 + $0x20] sm:$0xff] %vm12711_vm4, %v12473_v56  ;;  %v12476_v58 = vadd.f32 %v21384_v11, %v12475_v6 }
 0xd39   :  { %12719 = vst.msk [vmem:[%s21719_s13 + $0x38] sm:$0xff] %vm12711_vm4, %v12484_v46 }
 0xd3a   :  { %12717 = vst.msk [vmem:[%s21719_s13 + $0x28] sm:$0xff] %vm12711_vm4, %v12476_v58 }
 0xd3c   :  { %v15237_v13 = vpop.f32.mrb[72].mxu0 }
 0xd3d   :  { %v12497_v32 = vadd.f32 %v15237_v13, %v21384_v11  ;;  %v12488_v24 = vpop.f32.mrb[73].mxu0 }
 0xd3e   :  { %v12489_v3 = vadd.f32 %v21384_v11, %v12488_v24  ;;  %v15238_v29 = vpop.f32.mrb[74].mxu0 }
 0xd3f   :  { %12722 = vst.msk [vmem:[%s21719_s13 + $0x50] sm:$0xff] %vm12711_vm4, %v12497_v32  ;;  %v12500_v57 = vadd.f32 %v15238_v29, %v21384_v11  ;;  %v12491_v35 = vpop.f32.mrb[75].mxu0 }
 0xd40   :  { %12720 = vst.msk [vmem:[%s21719_s13 + $0x40] sm:$0xff] %vm12711_vm4, %v12489_v3  ;;  %v12492_v17 = vadd.f32 %v21384_v11, %v12491_v35 }
 0xd41   :  { %12723 = vst.msk [vmem:[%s21719_s13 + $0x58] sm:$0xff] %vm12711_vm4, %v12500_v57 }
 0xd42   :  { %12721 = vst.msk [vmem:[%s21719_s13 + $0x48] sm:$0xff] %vm12711_vm4, %v12492_v17 }
 0xd44   :  { %v15241_v62 = vpop.f32.mrb[76].mxu0 }
 0xd45   :  { %v12513_v42 = vadd.f32 %v15241_v62, %v21384_v11  ;;  %v12504_v8 = vpop.f32.mrb[77].mxu0 }
 0xd46   :  { %v12505_v39 = vadd.f32 %v21384_v11, %v12504_v8  ;;  %v15242_v52 = vpop.f32.mrb[78].mxu0 }
 0xd47   :  { %12726 = vst.msk [vmem:[%s21719_s13 + $0x70] sm:$0xff] %vm12711_vm4, %v12513_v42  ;;  %v12516_v47 = vadd.f32 %v15242_v52, %v21384_v11  ;;  %v12507_v1 = vpop.f32.mrb[79].mxu0 }
 0xd48   :  { %12724 = vst.msk [vmem:[%s21719_s13 + $0x60] sm:$0xff] %vm12711_vm4, %v12505_v39  ;;  %v12508_v4 = vadd.f32 %v21384_v11, %v12507_v1 }
 0xd49   :  { %12727 = vst.msk [vmem:[%s21719_s13 + $0x78] sm:$0xff] %vm12711_vm4, %v12516_v47 }
 0xd4a   :  { %12725 = vst.msk [vmem:[%s21719_s13 + $0x68] sm:$0xff] %vm12711_vm4, %v12508_v4 }
 0xd4c   :  { %v15245_v2 = vpop.f32.mrb[80].mxu0 }
 0xd4d   :  { %v12529_v20 = vadd.f32 %v15245_v2, %v21384_v11  ;;  %v12520_v28 = vpop.f32.mrb[81].mxu0 }
 0xd4e   :  { %v12521_v0 = vadd.f32 %v21384_v11, %v12520_v28  ;;  %v15246_v9 = vpop.f32.mrb[82].mxu0 }
 0xd4f   :  { %12730 = vst.msk [vmem:[%s21719_s13 + $0x90] sm:$0xff] %vm12711_vm4, %v12529_v20  ;;  %v12532_v45 = vadd.f32 %v15246_v9, %v21384_v11  ;;  %v12523_v22 = vpop.f32.mrb[83].mxu0 }
 0xd50   :  { %12728 = vst.msk [vmem:[%s21719_s13 + $0x80] sm:$0xff] %vm12711_vm4, %v12521_v0  ;;  %v12524_v59 = vadd.f32 %v21384_v11, %v12523_v22 }
 0xd51   :  { %12731 = vst.msk [vmem:[%s21719_s13 + $0x98] sm:$0xff] %vm12711_vm4, %v12532_v45 }
 0xd52   :  { %12729 = vst.msk [vmem:[%s21719_s13 + $0x88] sm:$0xff] %vm12711_vm4, %v12524_v59 }
 0xd54   :  { %v15249_v34 = vpop.f32.mrb[84].mxu0 }
 0xd55   :  { %v12545_v33 = vadd.f32 %v15249_v34, %v21384_v11  ;;  %v12536_v23 = vpop.f32.mrb[85].mxu0 }
 0xd56   :  { %v12537_v27 = vadd.f32 %v21384_v11, %v12536_v23  ;;  %v15250_v61 = vpop.f32.mrb[86].mxu0 }
 0xd57   :  { %12734 = vst.msk [vmem:[%s21719_s13 + $0xb0] sm:$0xff] %vm12711_vm4, %v12545_v33  ;;  %v12548_v54 = vadd.f32 %v15250_v61, %v21384_v11  ;;  %v12539_v30 = vpop.f32.mrb[87].mxu0 }
 0xd58   :  { %12732 = vst.msk [vmem:[%s21719_s13 + $0xa0] sm:$0xff] %vm12711_vm4, %v12537_v27  ;;  %v12540_v25 = vadd.f32 %v21384_v11, %v12539_v30 }
 0xd59   :  { %12735 = vst.msk [vmem:[%s21719_s13 + $0xb8] sm:$0xff] %vm12711_vm4, %v12548_v54 }
 0xd5a   :  { %12733 = vst.msk [vmem:[%s21719_s13 + $0xa8] sm:$0xff] %vm12711_vm4, %v12540_v25 }
 0xd5c   :  { %v15253_v60 = vpop.f32.mrb[88].mxu0 }
 0xd5d   :  { %v12561_v55 = vadd.f32 %v15253_v60, %v21384_v11  ;;  %v12552_v12 = vpop.f32.mrb[89].mxu0 }
 0xd5e   :  { %v12553_v5 = vadd.f32 %v21384_v11, %v12552_v12  ;;  %v15254_v36 = vpop.f32.mrb[90].mxu0 }
 0xd5f   :  { %12738 = vst.msk [vmem:[%s21719_s13 + $0xd0] sm:$0xff] %vm12711_vm4, %v12561_v55  ;;  %v12564_v21 = vadd.f32 %v15254_v36, %v21384_v11  ;;  %v12555_v50 = vpop.f32.mrb[91].mxu0 }
 0xd60   :  { %12736 = vst.msk [vmem:[%s21719_s13 + $0xc0] sm:$0xff] %vm12711_vm4, %v12553_v5  ;;  %v12556_v43 = vadd.f32 %v21384_v11, %v12555_v50 }
 0xd61   :  { %12739 = vst.msk [vmem:[%s21719_s13 + $0xd8] sm:$0xff] %vm12711_vm4, %v12564_v21 }
 0xd62   :  { %12737 = vst.msk [vmem:[%s21719_s13 + $0xc8] sm:$0xff] %vm12711_vm4, %v12556_v43 }
 0xd64   :  { %v15257_v7 = vpop.f32.mrb[92].mxu0 }
 0xd65   :  { %v12577_v40 = vadd.f32 %v15257_v7, %v21384_v11  ;;  %v12568_v37 = vpop.f32.mrb[93].mxu0 }
 0xd66   :  { %v12569_v48 = vadd.f32 %v21384_v11, %v12568_v37  ;;  %v15258_v51 = vpop.f32.mrb[94].mxu0 }
 0xd67   :  { %12742 = vst.msk [vmem:[%s21719_s13 + $0xf0] sm:$0xff] %vm12711_vm4, %v12577_v40  ;;  %v12580_v63 = vadd.f32 %v15258_v51, %v21384_v11  ;;  %v12571_v18 = vpop.f32.mrb[95].mxu0 }
 0xd68   :  { %12740 = vst.msk [vmem:[%s21719_s13 + $0xe0] sm:$0xff] %vm12711_vm4, %v12569_v48  ;;  %v12572_v16 = vadd.f32 %v21384_v11, %v12571_v18 }
 0xd69   :  { %12743 = vst.msk [vmem:[%s21719_s13 + $0xf8] sm:$0xff] %vm12711_vm4, %v12580_v63 }
 0xd6a   :  { %12741 = vst.msk [vmem:[%s21719_s13 + $0xe8] sm:$0xff] %vm12711_vm4, %v12572_v16 }
 0xd6c   :  { %v15261_v14 = vpop.f32.mrb[96].mxu0 }
 0xd6d   :  { %v12593_v41 = vadd.f32 %v15261_v14, %v21384_v11  ;;  %v12584_v53 = vpop.f32.mrb[97].mxu0 }
 0xd6e   :  { %v12585_v19 = vadd.f32 %v21384_v11, %v12584_v53  ;;  %v15262_v38 = vpop.f32.mrb[98].mxu0 }
 0xd6f   :  { %12746 = vst.msk [vmem:[%s21719_s13 + $0x110] sm:$0xff] %vm12711_vm4, %v12593_v41  ;;  %v12596_v49 = vadd.f32 %v15262_v38, %v21384_v11  ;;  %v12587_v31 = vpop.f32.mrb[99].mxu0 }
 0xd70   :  { %12744 = vst.msk [vmem:[%s21719_s13 + $0x100] sm:$0xff] %vm12711_vm4, %v12585_v19  ;;  %v12588_v10 = vadd.f32 %v21384_v11, %v12587_v31 }
 0xd71   :  { %12747 = vst.msk [vmem:[%s21719_s13 + $0x118] sm:$0xff] %vm12711_vm4, %v12596_v49 }
 0xd72   :  { %12745 = vst.msk [vmem:[%s21719_s13 + $0x108] sm:$0xff] %vm12711_vm4, %v12588_v10 }
 0xd74   :  { %v15265_v44 = vpop.f32.mrb[100].mxu0 }
 0xd75   :  { %v12609_v15 = vadd.f32 %v15265_v44, %v21384_v11  ;;  %v12600_v56 = vpop.f32.mrb[101].mxu0 }
 0xd76   :  { %v12601_v26 = vadd.f32 %v21384_v11, %v12600_v56  ;;  %v15266_v46 = vpop.f32.mrb[102].mxu0 }
 0xd77   :  { %12750 = vst.msk [vmem:[%s21719_s13 + $0x130] sm:$0xff] %vm12711_vm4, %v12609_v15  ;;  %v12612_v6 = vadd.f32 %v15266_v46, %v21384_v11  ;;  %v12603_v58 = vpop.f32.mrb[103].mxu0 }
 0xd78   :  { %12748 = vst.msk [vmem:[%s21719_s13 + $0x120] sm:$0xff] %vm12711_vm4, %v12601_v26  ;;  %v12604_v13 = vadd.f32 %v21384_v11, %v12603_v58 }
 0xd79   :  { %12751 = vst.msk [vmem:[%s21719_s13 + $0x138] sm:$0xff] %vm12711_vm4, %v12612_v6 }
 0xd7a   :  { %12749 = vst.msk [vmem:[%s21719_s13 + $0x128] sm:$0xff] %vm12711_vm4, %v12604_v13 }
 0xd7c   :  { %v15269_v32 = vpop.f32.mrb[104].mxu0 }
 0xd7d   :  { %v12625_v24 = vadd.f32 %v15269_v32, %v21384_v11  ;;  %v12616_v3 = vpop.f32.mrb[105].mxu0 }
 0xd7e   :  { %v12617_v29 = vadd.f32 %v21384_v11, %v12616_v3  ;;  %v15270_v57 = vpop.f32.mrb[106].mxu0 }
 0xd7f   :  { %12754 = vst.msk [vmem:[%s21719_s13 + $0x150] sm:$0xff] %vm12711_vm4, %v12625_v24  ;;  %v12628_v35 = vadd.f32 %v15270_v57, %v21384_v11  ;;  %v12619_v17 = vpop.f32.mrb[107].mxu0 }
 0xd80   :  { %12752 = vst.msk [vmem:[%s21719_s13 + $0x140] sm:$0xff] %vm12711_vm4, %v12617_v29  ;;  %v12620_v62 = vadd.f32 %v21384_v11, %v12619_v17 }
 0xd81   :  { %12755 = vst.msk [vmem:[%s21719_s13 + $0x158] sm:$0xff] %vm12711_vm4, %v12628_v35 }
 0xd82   :  { %12753 = vst.msk [vmem:[%s21719_s13 + $0x148] sm:$0xff] %vm12711_vm4, %v12620_v62 }
 0xd84   :  { %v15273_v42 = vpop.f32.mrb[108].mxu0 }
 0xd85   :  { %v12641_v8 = vadd.f32 %v15273_v42, %v21384_v11  ;;  %v12632_v39 = vpop.f32.mrb[109].mxu0 }
 0xd86   :  { %v12633_v52 = vadd.f32 %v21384_v11, %v12632_v39  ;;  %v15274_v47 = vpop.f32.mrb[110].mxu0 }
 0xd87   :  { %12758 = vst.msk [vmem:[%s21719_s13 + $0x170] sm:$0xff] %vm12711_vm4, %v12641_v8  ;;  %v12644_v1 = vadd.f32 %v15274_v47, %v21384_v11  ;;  %v12635_v4 = vpop.f32.mrb[111].mxu0 }
 0xd88   :  { %12756 = vst.msk [vmem:[%s21719_s13 + $0x160] sm:$0xff] %vm12711_vm4, %v12633_v52  ;;  %v12636_v2 = vadd.f32 %v21384_v11, %v12635_v4 }
 0xd89   :  { %12759 = vst.msk [vmem:[%s21719_s13 + $0x178] sm:$0xff] %vm12711_vm4, %v12644_v1 }
 0xd8a   :  { %12757 = vst.msk [vmem:[%s21719_s13 + $0x168] sm:$0xff] %vm12711_vm4, %v12636_v2 }
 0xd8c   :  { %v15277_v20 = vpop.f32.mrb[112].mxu0 }
 0xd8d   :  { %v12657_v28 = vadd.f32 %v15277_v20, %v21384_v11  ;;  %v12648_v0 = vpop.f32.mrb[113].mxu0 }
 0xd8e   :  { %v12649_v9 = vadd.f32 %v21384_v11, %v12648_v0  ;;  %v15278_v45 = vpop.f32.mrb[114].mxu0 }
 0xd8f   :  { %12762 = vst.msk [vmem:[%s21719_s13 + $0x190] sm:$0xff] %vm12711_vm4, %v12657_v28  ;;  %v12660_v22 = vadd.f32 %v15278_v45, %v21384_v11  ;;  %v12651_v59 = vpop.f32.mrb[115].mxu0 }
 0xd90   :  { %12760 = vst.msk [vmem:[%s21719_s13 + $0x180] sm:$0xff] %vm12711_vm4, %v12649_v9  ;;  %v12652_v34 = vadd.f32 %v21384_v11, %v12651_v59 }
 0xd91   :  { %12763 = vst.msk [vmem:[%s21719_s13 + $0x198] sm:$0xff] %vm12711_vm4, %v12660_v22 }
 0xd92   :  { %12761 = vst.msk [vmem:[%s21719_s13 + $0x188] sm:$0xff] %vm12711_vm4, %v12652_v34 }
 0xd94   :  { %v15281_v33 = vpop.f32.mrb[116].mxu0 }
 0xd95   :  { %v12673_v23 = vadd.f32 %v15281_v33, %v21384_v11  ;;  %v12664_v27 = vpop.f32.mrb[117].mxu0 }
 0xd96   :  { %v12665_v61 = vadd.f32 %v21384_v11, %v12664_v27  ;;  %v15282_v54 = vpop.f32.mrb[118].mxu0 }
 0xd97   :  { %12766 = vst.msk [vmem:[%s21719_s13 + $0x1b0] sm:$0xff] %vm12711_vm4, %v12673_v23  ;;  %v12676_v30 = vadd.f32 %v15282_v54, %v21384_v11  ;;  %v12667_v25 = vpop.f32.mrb[119].mxu0 }
 0xd98   :  { %12764 = vst.msk [vmem:[%s21719_s13 + $0x1a0] sm:$0xff] %vm12711_vm4, %v12665_v61  ;;  %v12668_v60 = vadd.f32 %v21384_v11, %v12667_v25 }
 0xd99   :  { %12767 = vst.msk [vmem:[%s21719_s13 + $0x1b8] sm:$0xff] %vm12711_vm4, %v12676_v30 }
 0xd9a   :  { %12765 = vst.msk [vmem:[%s21719_s13 + $0x1a8] sm:$0xff] %vm12711_vm4, %v12668_v60 }
 0xd9c   :  { %v15285_v55 = vpop.f32.mrb[120].mxu0 }
 0xd9d   :  { %v12689_v12 = vadd.f32 %v15285_v55, %v21384_v11  ;;  %v12680_v5 = vpop.f32.mrb[121].mxu0 }
 0xd9e   :  { %v12681_v36 = vadd.f32 %v21384_v11, %v12680_v5  ;;  %v15286_v21 = vpop.f32.mrb[122].mxu0 }
 0xd9f   :  { %12770 = vst.msk [vmem:[%s21719_s13 + $0x1d0] sm:$0xff] %vm12711_vm4, %v12689_v12  ;;  %v12692_v50 = vadd.f32 %v15286_v21, %v21384_v11  ;;  %v12683_v43 = vpop.f32.mrb[123].mxu0 }
 0xda0   :  { %12768 = vst.msk [vmem:[%s21719_s13 + $0x1c0] sm:$0xff] %vm12711_vm4, %v12681_v36  ;;  %v12684_v7 = vadd.f32 %v21384_v11, %v12683_v43 }
 0xda1   :  { %12771 = vst.msk [vmem:[%s21719_s13 + $0x1d8] sm:$0xff] %vm12711_vm4, %v12692_v50 }
 0xda2   :  { %12769 = vst.msk [vmem:[%s21719_s13 + $0x1c8] sm:$0xff] %vm12711_vm4, %v12684_v7 }
 0xda4   :  { %v15289_v40 = vpop.f32.mrb[124].mxu0 }
 0xda5   :  { %v12705_v37 = vadd.f32 %v15289_v40, %v21384_v11  ;;  %v12696_v48 = vpop.f32.mrb[125].mxu0 }
 0xda6   :  { %v12697_v51 = vadd.f32 %v21384_v11, %v12696_v48  ;;  %v15290_v63 = vpop.f32.mrb[126].mxu0 }
 0xda7   :  { %12774 = vst.msk [vmem:[%s21719_s13 + $0x1f0] sm:$0xff] %vm12711_vm4, %v12705_v37  ;;  %v12708_v18 = vadd.f32 %v15290_v63, %v21384_v11  ;;  %v12699_v16 = vpop.f32.mrb[127].mxu0 }
 0xda8   :  { %12772 = vst.msk [vmem:[%s21719_s13 + $0x1e0] sm:$0xff] %vm12711_vm4, %v12697_v51  ;;  %v12700_v14 = vadd.f32 %v21384_v11, %v12699_v16 }
 0xda9   :  { %12775 = vst.msk [vmem:[%s21719_s13 + $0x1f8] sm:$0xff] %vm12711_vm4, %v12708_v18 }
 0xdaa   :  { %12773 = vst.msk [vmem:[%s21719_s13 + $0x1e8] sm:$0xff] %vm12711_vm4, %v12700_v14 }
 0xdab   :  { %12780 = vsyncpa [#allocation5], 1 }

</bundles_post_ra>
